<compile_context>
chip_gen: v6e
topology: v6e:2x2x1
jax: 0.10.0
libtpu: 0.0.40
codegen_flags: <defaults>
</compile_context>

<pallas_src>
from functools import partial

import jax
import jax.numpy as jnp
from jax.experimental import pallas as pl
from jax.experimental.pallas import tpu as pltpu

# ---------------- model hyper-parameters (synthetic, small) -----------------
IMG = 16              # input spatial size
STRIDE = 2            # backbone output stride (conv2 has stride 2)
ANCHOR_SIZES = (4.0, 8.0, 16.0)
A = len(ANCHOR_SIZES) # anchors per location
TOPK_PROPOSALS = 8    # proposals kept per image (pre-NMS top-k)
POOL = 4              # ROIAlign output resolution (POOL x POOL)
C1 = 16               # backbone conv1 out channels (logical)
BACKBONE_OUT = 32     # backbone.out_channels (logical)
NUM_CLASSES = 5       # roi box predictor classes (incl. background)
BBOX_CLAMP = 4.0
LANE = 128            # lane-dense padding width
VMEM_LIMIT = 32 * 1024 * 1024   # explicit, safe on v5e/v6e/v7x

# derived static geometry (padded / over-wide sizes, all 8-aligned)
HP1 = IMG + 2                 # 18  padded H/W for the 3x3 convs on 16x16
ROWS1 = IMG * HP1             # 288 over-wide rows (16 out rows x padded width)
L1 = 328                      # flattened padded length + wrap tail (8-aligned)
HF = IMG // STRIDE            # 8   feature map H/W
HP3 = HF + 2                  # 10  padded H/W for the RPN 3x3 conv
ROWS3 = HF * HP3              # 80  over-wide rows
L3 = 104                      # flattened padded length + wrap tail (8-aligned)
STARTS_18 = tuple(di * HP1 + dj for di in range(3) for dj in range(3))
STARTS_10 = tuple(di * HP3 + dj for di in range(3) for dj in range(3))


# ====================== Pallas kernels (hot path) ============================
def _backbone_rpn_kernel(x_ref, pad_in_ref, w1_ref, b1_ref,
                         pad_f1_ref, sel_s2_ref, w2_ref, b2_ref,
                         pad_f2_ref, sel_v_ref, wr_ref, br_ref, wh_ref, bh_ref,
                         feat_ref, rpn_ref):
    """Fused per-image backbone (conv1+conv2) + RPN head, all in VMEM.

    Padding / stride-2 subsample / valid-column selection are 0/1 matmuls;
    every conv is one tap-stacked matmul; accumulation in f32.
    """
    f32 = jnp.float32
    bf16 = jnp.bfloat16

    # ---- conv1: 3x3 s1 p1, Cin=3 -> C1, ReLU (single K=27 matmul) ----------
    x = x_ref[0].astype(bf16)                                        # (256, 3)
    xp = jnp.dot(pad_in_ref[...], x, preferred_element_type=f32)     # (L1, 3)
    xp = xp.astype(bf16)                                             # cast once
    p1 = jnp.concatenate([xp[s:s + ROWS1, :] for s in STARTS_18], axis=-1)
    f1 = jnp.dot(p1, w1_ref[...], preferred_element_type=f32) + b1_ref[...]
    f1 = jnp.maximum(f1, 0.0)                                        # (288, C1)

    # ---- conv2: 3x3 s2 p1, C1 -> 128(pad), ReLU; stride-2 folded into SEL --
    f1p = jnp.dot(pad_f1_ref[...], f1.astype(bf16),
                  preferred_element_type=f32).astype(bf16)           # (L1, C1)
    p2 = jnp.concatenate([f1p[s:s + ROWS1, :] for s in STARTS_18], axis=-1)
    p2s = jnp.dot(sel_s2_ref[...], p2,
                  preferred_element_type=f32).astype(bf16)           # (64, 144)
    feat = jnp.dot(p2s, w2_ref[...], preferred_element_type=f32) + b2_ref[...]
    feat = jnp.maximum(feat, 0.0)                                    # (64, 128)
    feat_ref[0] = feat.astype(bf16)            # lane-dense bf16 store (128 wide)

    # ---- fused RPN head: 3x3 conv + ReLU + concatenated 1x1 cls/box heads --
    fp = jnp.dot(pad_f2_ref[...], feat.astype(bf16),
                 preferred_element_type=f32).astype(bf16)            # (L3, 128)
    p3 = jnp.concatenate([fp[s:s + ROWS3, :] for s in STARTS_10], axis=-1)
    t = jnp.dot(p3, wr_ref[...], preferred_element_type=f32) + br_ref[...]
    t = jnp.maximum(t, 0.0)                                          # (80, 32)
    t = jnp.dot(sel_v_ref[...], t.astype(bf16),
                preferred_element_type=f32)                          # (64, 32)
    head = jnp.dot(t.astype(bf16), wh_ref[...],
                   preferred_element_type=f32) + bh_ref[...]         # (64, 128)
    rpn_ref[0] = head.astype(rpn_ref.dtype)    # lane-dense store (128 wide)


def _roi_box_head_kernel(feat_ref, w2d_ref, w1_ref, b1_ref, w2_ref, b2_ref,
                         wp_ref, bp_ref, o_ref, *, n_rois):
    """Fused ROIAlign (interpolation matmul) + fc1 + fc2 + [cls|box] predictor."""
    f32 = jnp.float32
    bf16 = jnp.bfloat16
    # bilinear pooling for every (bin, roi) pair in ONE matmul, K = N*Hf*Wf
    pooled = jnp.dot(w2d_ref[...], feat_ref[...],
                     preferred_element_type=f32).astype(bf16)   # (PP*R, 128)
    # flatten (bin-major) along the contraction axis: 128-aligned lane concat
    stacked = jnp.concatenate(
        [pooled[s * n_rois:(s + 1) * n_rois, :] for s in range(POOL * POOL)],
        axis=-1)                                                # (R, 2048)
    h = jnp.dot(stacked, w1_ref[...], preferred_element_type=f32) + b1_ref[...]
    h = jnp.maximum(h, 0.0)
    h = jnp.dot(h.astype(bf16), w2_ref[...],
                preferred_element_type=f32) + b2_ref[...]
    h = jnp.maximum(h, 0.0)
    out = jnp.dot(h.astype(bf16), wp_ref[...],
                  preferred_element_type=f32) + bp_ref[...]
    o_ref[...] = out


# ============================ kernel wrappers ================================
def backbone_rpn_pallas(pp, x_flat):
    """x_flat: (N, IMG*IMG, 3) f32 -> (features bf16 (N,64,128), rpn f32 (N,64,128))."""
    n = x_flat.shape[0]
    weights = (pp["pad_in"], pp["w1"], pp["b1"],
               pp["pad_f1"], pp["sel_s2"], pp["w2"], pp["b2"],
               pp["pad_f2"], pp["sel_v"], pp["wr"], pp["br"], pp["wh"], pp["bh"])

    def _bcast(a):
        return pl.BlockSpec(a.shape, lambda i: (0,) * a.ndim)

    macs = (L1 * IMG * IMG * 3 + ROWS1 * 27 * C1 + L1 * ROWS1 * C1 +
            HF * HF * ROWS1 * 9 * C1 + HF * HF * 9 * C1 * LANE +
            L3 * HF * HF * LANE + ROWS3 * 9 * LANE * BACKBONE_OUT +
            HF * HF * ROWS3 * BACKBONE_OUT + HF * HF * BACKBONE_OUT * LANE)
    bytes_io = (int(x_flat.size) * 4 +
                sum(int(w.size) * int(w.dtype.itemsize) for w in weights) +
                n * HF * HF * LANE * (2 + 4))

    feat, rpn = pl.pallas_call(
        _backbone_rpn_kernel,
        out_shape=(jax.ShapeDtypeStruct((n, HF * HF, LANE), jnp.bfloat16),
                   jax.ShapeDtypeStruct((n, HF * HF, LANE), jnp.float32)),
        grid=(n,),
        in_specs=[pl.BlockSpec((1, IMG * IMG, 3), lambda i: (i, 0, 0))] +
                 [_bcast(w) for w in weights],
        out_specs=[pl.BlockSpec((1, HF * HF, LANE), lambda i: (i, 0, 0)),
                   pl.BlockSpec((1, HF * HF, LANE), lambda i: (i, 0, 0))],
        compiler_params=pltpu.CompilerParams(
            dimension_semantics=("parallel",), vmem_limit_bytes=VMEM_LIMIT),
        cost_estimate=pl.CostEstimate(flops=int(2 * n * macs),
                                      transcendentals=0,
                                      bytes_accessed=int(bytes_io)),
    )(x_flat, *weights)
    return feat, rpn


def roi_box_head_pallas(pp, feat2d, w2d):
    """feat2d: (N*Hf*Wf, 128) bf16, w2d: (POOL*POOL*R, N*Hf*Wf) bf16."""
    r = w2d.shape[0] // (POOL * POOL)
    macs = (w2d.shape[0] * w2d.shape[1] * LANE +
            r * POOL * POOL * LANE * LANE + 2 * r * LANE * LANE)
    bytes_io = (int(feat2d.size) * 2 + int(w2d.size) * 2 +
                (POOL * POOL * LANE + 2 * LANE) * LANE * 2 + r * LANE * 4)
    out = pl.pallas_call(
        partial(_roi_box_head_kernel, n_rois=r),
        out_shape=jax.ShapeDtypeStruct((r, LANE), jnp.float32),
        compiler_params=pltpu.CompilerParams(vmem_limit_bytes=VMEM_LIMIT),
        cost_estimate=pl.CostEstimate(flops=int(2 * macs), transcendentals=0,
                                      bytes_accessed=int(bytes_io)),
    )(feat2d, w2d, pp["fc1_w"], pp["fc1_b"], pp["fc2_w"], pp["fc2_b"],
      pp["pred_w"], pp["pred_b"])
    cls_logits = out[:, :NUM_CLASSES]
    box_regr = out[:, NUM_CLASSES:NUM_CLASSES + NUM_CLASSES * 4]
    return cls_logits, box_regr


# ============================ box utilities (glue) ===========================
def make_anchors(hf, wf):
    ys, xs = jnp.meshgrid(jnp.arange(hf, dtype=jnp.float32),
                          jnp.arange(wf, dtype=jnp.float32), indexing="ij")
    cx = (xs + 0.5) * STRIDE
    cy = (ys + 0.5) * STRIDE
    half = jnp.asarray(ANCHOR_SIZES, dtype=jnp.float32) / 2.0
    x1 = cx[..., None] - half
    y1 = cy[..., None] - half
    x2 = cx[..., None] + half
    y2 = cy[..., None] + half
    return jnp.stack([x1, y1, x2, y2], axis=-1).reshape(-1, 4)


def decode_boxes(ref_boxes, deltas):
    wa = ref_boxes[..., 2] - ref_boxes[..., 0]
    ha = ref_boxes[..., 3] - ref_boxes[..., 1]
    cxa = ref_boxes[..., 0] + 0.5 * wa
    cya = ref_boxes[..., 1] + 0.5 * ha
    dx, dy, dw, dh = (deltas[..., i] for i in range(4))
    pcx = dx * wa + cxa
    pcy = dy * ha + cya
    pw = jnp.exp(jnp.clip(dw, -BBOX_CLAMP, BBOX_CLAMP)) * wa
    ph = jnp.exp(jnp.clip(dh, -BBOX_CLAMP, BBOX_CLAMP)) * ha
    return jnp.stack([pcx - 0.5 * pw, pcy - 0.5 * ph,
                      pcx + 0.5 * pw, pcy + 0.5 * ph], axis=-1)


def clip_boxes(boxes, img_h, img_w):
    x1 = jnp.clip(boxes[..., 0], 0.0, img_w - 1.0)
    y1 = jnp.clip(boxes[..., 1], 0.0, img_h - 1.0)
    x2 = jnp.clip(boxes[..., 2], 0.0, img_w - 1.0)
    y2 = jnp.clip(boxes[..., 3], 0.0, img_h - 1.0)
    return jnp.stack([x1, y1, x2, y2], axis=-1)


# ================================ RPN ========================================
def generate_proposals(logits, deltas, img_h, img_w):
    # logits: (N, Hf, Wf, A), deltas: (N, Hf, Wf, 4A)
    n, hf, wf, _ = logits.shape
    anchors = make_anchors(hf, wf)
    scores = logits.reshape(n, hf * wf * A)
    deltas = deltas.reshape(n, hf, wf, A, 4).reshape(n, hf * wf * A, 4)
    boxes = decode_boxes(anchors[None, :, :], deltas)
    boxes = clip_boxes(boxes, img_h, img_w)
    # TODO(synk): top-k selection / NMS are sorting ops with no clean Pallas
    #             equivalent; done with jax.lax.top_k in plain JAX.
    top_scores, idx = jax.lax.top_k(scores, TOPK_PROPOSALS)
    proposals = jnp.take_along_axis(boxes, idx[..., None], axis=1)
    return proposals, jax.nn.sigmoid(top_scores)


# ============================ ROI heads ======================================
def build_interp_matrix(rois, batch_idx, n_images, hf, wf, pool, scale):
    """Bilinear ROIAlign as a (POOL*POOL*R, N*Hf*Wf) 0/weight matrix (no gather).

    TODO(synk): single sample per bin, no aligned=True half-pixel offset, so it
                is not bit-compatible with torchvision ROIAlign.
    """
    x1 = rois[:, 0] * scale
    y1 = rois[:, 1] * scale
    x2 = rois[:, 2] * scale
    y2 = rois[:, 3] * scale
    bw = jnp.maximum(x2 - x1, 1.0)
    bh = jnp.maximum(y2 - y1, 1.0)
    g = (jnp.arange(pool, dtype=jnp.float32) + 0.5) / pool
    sx = x1[:, None] + g[None, :] * bw[:, None]          # (R, P)
    sy = y1[:, None] + g[None, :] * bh[:, None]          # (R, P)

    def axis_weights(s, size):
        s0 = jnp.floor(s)
        f = jnp.clip(s - s0, 0.0, 1.0)
        i0 = jnp.clip(s0, 0, size - 1).astype(jnp.int32)
        i1 = jnp.clip(s0 + 1, 0, size - 1).astype(jnp.int32)
        return (jax.nn.one_hot(i0, size) * (1.0 - f)[..., None] +
                jax.nn.one_hot(i1, size) * f[..., None])          # (R, P, size)

    wy = axis_weights(sy, hf)
    wx = axis_weights(sx, wf)
    bsel = jax.nn.one_hot(batch_idx, n_images)                    # (R, N)
    w6 = (bsel[:, None, None, :, None, None] *
          wy[:, :, None, None, :, None] *
          wx[:, None, :, None, None, :])                          # (R,P,P,N,H,W)
    r = rois.shape[0]
    w2d = jnp.transpose(w6, (1, 2, 0, 3, 4, 5)).reshape(
        pool * pool * r, n_images * hf * wf)
    return w2d.astype(jnp.bfloat16)


def roi_heads(pp, features, proposals, img_h, img_w):
    n, k, _ = proposals.shape
    r = n * k
    rois = proposals.reshape(r, 4)
    batch_idx = jnp.repeat(jnp.arange(n, dtype=jnp.int32), k)
    w2d = build_interp_matrix(rois, batch_idx, n, HF, HF, POOL, 1.0 / STRIDE)
    feat2d = features.reshape(n * HF * HF, LANE)        # free reshape (no copy)

    cls_logits, box_regr = roi_box_head_pallas(pp, feat2d, w2d)

    probs = jax.nn.softmax(cls_logits, axis=-1)
    labels = jnp.argmax(probs[:, 1:], axis=-1) + 1
    scores = jnp.take_along_axis(probs, labels[:, None], axis=1)[:, 0]
    regr = box_regr.reshape(r, NUM_CLASSES, 4)
    sel = jnp.take_along_axis(regr, labels[:, None, None], axis=1)[:, 0]
    det_boxes = clip_boxes(decode_boxes(rois, sel), img_h, img_w)

    return {
        "boxes": det_boxes.reshape(n, k, 4),
        "scores": scores.reshape(n, k),
        "labels": labels.reshape(n, k),
    }


# ========================== GeneralizedRCNN forward ==========================
def generalized_rcnn_forward(pp, images_nchw):
    """Inference forward: images -> backbone -> rpn -> roi_heads -> result."""
    n, _, img_h, img_w = images_nchw.shape
    # TODO(synk): NCHW->NHWC transpose is the only remaining host-side layout op.
    x = jnp.transpose(images_nchw, (0, 2, 3, 1)).reshape(n, IMG * IMG, 3)

    features, rpn_out = backbone_rpn_pallas(pp, x)       # fused backbone + RPN
    rpn_map = rpn_out.reshape(n, HF, HF, LANE)
    obj_logits = rpn_map[..., :A]
    box_deltas = rpn_map[..., A:5 * A]
    proposals, _ = generate_proposals(obj_logits, box_deltas, img_h, img_w)

    return roi_heads(pp, features, proposals, img_h, img_w)


# =============================== parameters ==================================
def init_params(key):
    ks = jax.random.split(key, 9)

    def w(k, shape):
        return 0.05 * jax.random.normal(k, shape, dtype=jnp.float32)

    def b(shape):
        return jnp.zeros(shape, dtype=jnp.float32)

    return {
        # backbone
        "bb_w1": w(ks[0], (3, 3, 3, C1)), "bb_b1": b((C1,)),
        "bb_w2": w(ks[1], (3, 3, C1, BACKBONE_OUT)), "bb_b2": b((BACKBONE_OUT,)),
        # rpn
        "rpn_w": w(ks[2], (3, 3, BACKBONE_OUT, BACKBONE_OUT)),
        "rpn_b": b((BACKBONE_OUT,)),
        "rpn_cls_w": w(ks[3], (1, 1, BACKBONE_OUT, A)), "rpn_cls_b": b((A,)),
        "rpn_box_w": w(ks[4], (1, 1, BACKBONE_OUT, 4 * A)),
        "rpn_box_b": b((4 * A,)),
        # roi box head + predictor
        "fc1_w": w(ks[5], (POOL * POOL * BACKBONE_OUT, 64)), "fc1_b": b((64,)),
        "fc2_w": w(ks[6], (64, 64)), "fc2_b": b((64,)),
        "cls_w": w(ks[7], (64, NUM_CLASSES)), "cls_b": b((NUM_CLASSES,)),
        "box_w": w(ks[8], (64, NUM_CLASSES * 4)), "box_b": b((NUM_CLASSES * 4,)),
    }


def prepare_params(params):
    """Hoisted weight prep: tap-stack / lane-pad / bf16-cast weights and build
    the constant 0/1 padding & stride/valid selection matrices (done once)."""
    bf16 = jnp.bfloat16
    f32 = jnp.float32

    def scatter(rows, cols, ridx, cidx):
        m = jnp.zeros((rows, cols), f32).at[ridx, cidx].set(1.0)
        return m.astype(bf16)

    y, xg = jnp.meshgrid(jnp.arange(IMG), jnp.arange(IMG), indexing="ij")
    y, xg = y.reshape(-1), xg.reshape(-1)
    pad_in = scatter(L1, IMG * IMG, (y + 1) * HP1 + (xg + 1), y * IMG + xg)
    pad_f1 = scatter(L1, ROWS1, (y + 1) * HP1 + (xg + 1), y * HP1 + xg)
    oy, ox = jnp.meshgrid(jnp.arange(HF), jnp.arange(HF), indexing="ij")
    oy, ox = oy.reshape(-1), ox.reshape(-1)
    sel_s2 = scatter(HF * HF, ROWS1, oy * HF + ox, (2 * oy) * HP1 + 2 * ox)
    pad_f2 = scatter(L3, HF * HF, (oy + 1) * HP3 + (ox + 1), oy * HF + ox)
    sel_v = scatter(HF * HF, ROWS3, oy * HF + ox, oy * HP3 + ox)

    w1 = params["bb_w1"].reshape(9 * 3, C1).astype(bf16)
    b1 = params["bb_b1"].reshape(1, C1).astype(f32)
    w2 = jnp.pad(params["bb_w2"].reshape(9 * C1, BACKBONE_OUT),
                 ((0, 0), (0, LANE - BACKBONE_OUT))).astype(bf16)
    b2 = jnp.pad(params["bb_b2"],
                 (0, LANE - BACKBONE_OUT)).reshape(1, LANE).astype(f32)
    wr = jnp.pad(params["rpn_w"],
                 ((0, 0), (0, 0), (0, LANE - BACKBONE_OUT), (0, 0)))
    wr = wr.reshape(9 * LANE, BACKBONE_OUT).astype(bf16)
    br = params["rpn_b"].reshape(1, BACKBONE_OUT).astype(f32)
    wh = jnp.concatenate([params["rpn_cls_w"][0, 0],
                          params["rpn_box_w"][0, 0]], axis=1)
    n_head = wh.shape[1]
    wh = jnp.pad(wh, ((0, 0), (0, LANE - n_head))).astype(bf16)
    bh = jnp.pad(jnp.concatenate([params["rpn_cls_b"], params["rpn_box_b"]]),
                 (0, LANE - n_head)).reshape(1, LANE).astype(f32)

    fc1 = params["fc1_w"].reshape(POOL * POOL, BACKBONE_OUT, 64)
    fc1 = jnp.pad(fc1, ((0, 0), (0, LANE - BACKBONE_OUT), (0, LANE - 64)))
    fc1 = fc1.reshape(POOL * POOL * LANE, LANE).astype(bf16)
    fb1 = jnp.pad(params["fc1_b"], (0, LANE - 64)).reshape(1, LANE).astype(f32)
    fc2 = jnp.pad(params["fc2_w"],
                  ((0, LANE - 64), (0, LANE - 64))).astype(bf16)
    fb2 = jnp.pad(params["fc2_b"], (0, LANE - 64)).reshape(1, LANE).astype(f32)
    pred_w = jnp.concatenate([params["cls_w"], params["box_w"]], axis=1)
    n_pred = pred_w.shape[1]
    pred_w = jnp.pad(pred_w, ((0, LANE - 64), (0, LANE - n_pred))).astype(bf16)
    pred_b = jnp.pad(jnp.concatenate([params["cls_b"], params["box_b"]]),
                     (0, LANE - n_pred)).reshape(1, LANE).astype(f32)

    return {
        "pad_in": pad_in, "pad_f1": pad_f1, "sel_s2": sel_s2,
        "pad_f2": pad_f2, "sel_v": sel_v,
        "w1": w1, "b1": b1, "w2": w2, "b2": b2,
        "wr": wr, "br": br, "wh": wh, "bh": bh,
        "fc1_w": fc1, "fc1_b": fb1, "fc2_w": fc2, "fc2_b": fb2,
        "pred_w": pred_w, "pred_b": pred_b,
    }


# ================================== main =====================================
if __name__ == "__main__":
    key = jax.random.PRNGKey(0)
    k_img, k_par = jax.random.split(key)
    images = jax.random.normal(k_img, (2, 3, IMG, IMG), dtype=jnp.float32)  # NCHW
    params = init_params(k_par)
    prepped = prepare_params(params)   # weight prep hoisted out of the forward

    result = jax.jit(generalized_rcnn_forward)(prepped, images)
    jax.tree_util.tree_map(lambda a: a.block_until_ready(), result)

    assert result["boxes"].shape == (2, TOPK_PROPOSALS, 4)
    assert result["scores"].shape == (2, TOPK_PROPOSALS)
    assert result["labels"].shape == (2, TOPK_PROPOSALS)
    print("KERNEL_OK")
</pallas_src>

<mosaic_0001>
module attributes {stable_mosaic.version = 11 : i64} {
  func.func @_backbone_rpn_kernel(%arg0: i32, %arg1: memref<1x256x3xf32, #tpu.memory_space<vmem>>, %arg2: memref<328x256xbf16, #tpu.memory_space<vmem>>, %arg3: memref<27x16xbf16, #tpu.memory_space<vmem>>, %arg4: memref<1x16xf32, #tpu.memory_space<vmem>>, %arg5: memref<328x288xbf16, #tpu.memory_space<vmem>>, %arg6: memref<64x288xbf16, #tpu.memory_space<vmem>>, %arg7: memref<144x128xbf16, #tpu.memory_space<vmem>>, %arg8: memref<1x128xf32, #tpu.memory_space<vmem>>, %arg9: memref<104x64xbf16, #tpu.memory_space<vmem>>, %arg10: memref<64x80xbf16, #tpu.memory_space<vmem>>, %arg11: memref<1152x32xbf16, #tpu.memory_space<vmem>>, %arg12: memref<1x32xf32, #tpu.memory_space<vmem>>, %arg13: memref<32x128xbf16, #tpu.memory_space<vmem>>, %arg14: memref<1x128xf32, #tpu.memory_space<vmem>>, %arg15: memref<1x64x128xbf16, #tpu.memory_space<vmem>>, %arg16: memref<1x64x128xf32, #tpu.memory_space<vmem>>) attributes {dimension_semantics = [#tpu.dimension_semantics<parallel>], iteration_bounds = array<i64: 2>, scalar_prefetch = 0 : i64, scratch_operands = 0 : i64, tpu.core_type = #tpu.core_type<tc>, window_params = [{transform_indices = @transform_0, window_bounds = array<i64: 1, 256, 3>}, {pipeline_mode = #tpu.pipeline_mode<synchronous>, transform_indices = @transform_1, window_bounds = array<i64: 328, 256>}, {pipeline_mode = #tpu.pipeline_mode<synchronous>, transform_indices = @transform_2, window_bounds = array<i64: 27, 16>}, {pipeline_mode = #tpu.pipeline_mode<synchronous>, transform_indices = @transform_3, window_bounds = array<i64: 1, 16>}, {pipeline_mode = #tpu.pipeline_mode<synchronous>, transform_indices = @transform_4, window_bounds = array<i64: 328, 288>}, {pipeline_mode = #tpu.pipeline_mode<synchronous>, transform_indices = @transform_5, window_bounds = array<i64: 64, 288>}, {pipeline_mode = #tpu.pipeline_mode<synchronous>, transform_indices = @transform_6, window_bounds = array<i64: 144, 128>}, {pipeline_mode = #tpu.pipeline_mode<synchronous>, transform_indices = @transform_7, window_bounds = array<i64: 1, 128>}, {pipeline_mode = #tpu.pipeline_mode<synchronous>, transform_indices = @transform_8, window_bounds = array<i64: 104, 64>}, {pipeline_mode = #tpu.pipeline_mode<synchronous>, transform_indices = @transform_9, window_bounds = array<i64: 64, 80>}, {pipeline_mode = #tpu.pipeline_mode<synchronous>, transform_indices = @transform_10, window_bounds = array<i64: 1152, 32>}, {pipeline_mode = #tpu.pipeline_mode<synchronous>, transform_indices = @transform_11, window_bounds = array<i64: 1, 32>}, {pipeline_mode = #tpu.pipeline_mode<synchronous>, transform_indices = @transform_12, window_bounds = array<i64: 32, 128>}, {pipeline_mode = #tpu.pipeline_mode<synchronous>, transform_indices = @transform_13, window_bounds = array<i64: 1, 128>}, {transform_indices = @transform_14, window_bounds = array<i64: 1, 64, 128>}, {transform_indices = @transform_15, window_bounds = array<i64: 1, 64, 128>}]} {
    %c0 = arith.constant 0 : index
    %c0_0 = arith.constant 0 : index
    %c0_1 = arith.constant 0 : index
    %0 = vector.load %arg1[%c0, %c0_0, %c0_1] : memref<1x256x3xf32, #tpu.memory_space<vmem>>, vector<1x256x3xf32>
    %1 = vector.shape_cast %0 : vector<1x256x3xf32> to vector<256x3xf32>
    %2 = arith.truncf %1 : vector<256x3xf32> to vector<256x3xbf16>
    %c0_2 = arith.constant 0 : index
    %c0_3 = arith.constant 0 : index
    %3 = vector.load %arg2[%c0_2, %c0_3] : memref<328x256xbf16, #tpu.memory_space<vmem>>, vector<328x256xbf16>
    %cst = arith.constant dense<0.000000e+00> : vector<328x3xf32>
    %4 = tpu.matmul %3, %2, %cst {dimension_numbers = #tpu.dot_dimension_numbers<[1], [0], [0], [1], [0, 0, 1, 1], [], []>} : vector<328x256xbf16>, vector<256x3xbf16>, vector<328x3xf32> -> vector<328x3xf32>
    %5 = arith.truncf %4 : vector<328x3xf32> to vector<328x3xbf16>
    %6 = vector.extract_strided_slice %5 {offsets = [0, 0], sizes = [288, 3], strides = [1, 1]} : vector<328x3xbf16> to vector<288x3xbf16>
    %7 = vector.extract_strided_slice %5 {offsets = [1, 0], sizes = [288, 3], strides = [1, 1]} : vector<328x3xbf16> to vector<288x3xbf16>
    %8 = vector.extract_strided_slice %5 {offsets = [2, 0], sizes = [288, 3], strides = [1, 1]} : vector<328x3xbf16> to vector<288x3xbf16>
    %9 = vector.extract_strided_slice %5 {offsets = [18, 0], sizes = [288, 3], strides = [1, 1]} : vector<328x3xbf16> to vector<288x3xbf16>
    %10 = vector.extract_strided_slice %5 {offsets = [19, 0], sizes = [288, 3], strides = [1, 1]} : vector<328x3xbf16> to vector<288x3xbf16>
    %11 = vector.extract_strided_slice %5 {offsets = [20, 0], sizes = [288, 3], strides = [1, 1]} : vector<328x3xbf16> to vector<288x3xbf16>
    %12 = vector.extract_strided_slice %5 {offsets = [36, 0], sizes = [288, 3], strides = [1, 1]} : vector<328x3xbf16> to vector<288x3xbf16>
    %13 = vector.extract_strided_slice %5 {offsets = [37, 0], sizes = [288, 3], strides = [1, 1]} : vector<328x3xbf16> to vector<288x3xbf16>
    %14 = vector.extract_strided_slice %5 {offsets = [38, 0], sizes = [288, 3], strides = [1, 1]} : vector<328x3xbf16> to vector<288x3xbf16>
    %15 = tpu.concatenate %6, %7, %8, %9, %10, %11, %12, %13, %14 in 1 : vector<288x3xbf16>, vector<288x3xbf16>, vector<288x3xbf16>, vector<288x3xbf16>, vector<288x3xbf16>, vector<288x3xbf16>, vector<288x3xbf16>, vector<288x3xbf16>, vector<288x3xbf16> -> vector<288x27xbf16>
    %c0_4 = arith.constant 0 : index
    %c0_5 = arith.constant 0 : index
    %16 = vector.load %arg3[%c0_4, %c0_5] : memref<27x16xbf16, #tpu.memory_space<vmem>>, vector<27x16xbf16>
    %cst_6 = arith.constant dense<0.000000e+00> : vector<288x16xf32>
    %17 = tpu.matmul %15, %16, %cst_6 {dimension_numbers = #tpu.dot_dimension_numbers<[1], [0], [0], [1], [0, 0, 1, 1], [], []>} : vector<288x27xbf16>, vector<27x16xbf16>, vector<288x16xf32> -> vector<288x16xf32>
    %c0_7 = arith.constant 0 : index
    %c0_8 = arith.constant 0 : index
    %18 = vector.load %arg4[%c0_7, %c0_8] : memref<1x16xf32, #tpu.memory_space<vmem>>, vector<1x16xf32>
    %19 = vector.broadcast %18 : vector<1x16xf32> to vector<288x16xf32>
    %20 = arith.addf %17, %19 : vector<288x16xf32>
    %cst_9 = arith.constant 0.000000e+00 : f32
    %21 = vector.broadcast %cst_9 : f32 to vector<288x16xf32>
    %22 = arith.maximumf %20, %21 : vector<288x16xf32>
    %c0_10 = arith.constant 0 : index
    %c0_11 = arith.constant 0 : index
    %23 = vector.load %arg5[%c0_10, %c0_11] : memref<328x288xbf16, #tpu.memory_space<vmem>>, vector<328x288xbf16>
    %24 = arith.truncf %22 : vector<288x16xf32> to vector<288x16xbf16>
    %cst_12 = arith.constant dense<0.000000e+00> : vector<328x16xf32>
    %25 = tpu.matmul %23, %24, %cst_12 {dimension_numbers = #tpu.dot_dimension_numbers<[1], [0], [0], [1], [0, 0, 1, 1], [], []>} : vector<328x288xbf16>, vector<288x16xbf16>, vector<328x16xf32> -> vector<328x16xf32>
    %26 = arith.truncf %25 : vector<328x16xf32> to vector<328x16xbf16>
    %27 = vector.extract_strided_slice %26 {offsets = [0, 0], sizes = [288, 16], strides = [1, 1]} : vector<328x16xbf16> to vector<288x16xbf16>
    %28 = vector.extract_strided_slice %26 {offsets = [1, 0], sizes = [288, 16], strides = [1, 1]} : vector<328x16xbf16> to vector<288x16xbf16>
    %29 = vector.extract_strided_slice %26 {offsets = [2, 0], sizes = [288, 16], strides = [1, 1]} : vector<328x16xbf16> to vector<288x16xbf16>
    %30 = vector.extract_strided_slice %26 {offsets = [18, 0], sizes = [288, 16], strides = [1, 1]} : vector<328x16xbf16> to vector<288x16xbf16>
    %31 = vector.extract_strided_slice %26 {offsets = [19, 0], sizes = [288, 16], strides = [1, 1]} : vector<328x16xbf16> to vector<288x16xbf16>
    %32 = vector.extract_strided_slice %26 {offsets = [20, 0], sizes = [288, 16], strides = [1, 1]} : vector<328x16xbf16> to vector<288x16xbf16>
    %33 = vector.extract_strided_slice %26 {offsets = [36, 0], sizes = [288, 16], strides = [1, 1]} : vector<328x16xbf16> to vector<288x16xbf16>
    %34 = vector.extract_strided_slice %26 {offsets = [37, 0], sizes = [288, 16], strides = [1, 1]} : vector<328x16xbf16> to vector<288x16xbf16>
    %35 = vector.extract_strided_slice %26 {offsets = [38, 0], sizes = [288, 16], strides = [1, 1]} : vector<328x16xbf16> to vector<288x16xbf16>
    %36 = tpu.concatenate %27, %28, %29, %30, %31, %32, %33, %34, %35 in 1 : vector<288x16xbf16>, vector<288x16xbf16>, vector<288x16xbf16>, vector<288x16xbf16>, vector<288x16xbf16>, vector<288x16xbf16>, vector<288x16xbf16>, vector<288x16xbf16>, vector<288x16xbf16> -> vector<288x144xbf16>
    %c0_13 = arith.constant 0 : index
    %c0_14 = arith.constant 0 : index
    %37 = vector.load %arg6[%c0_13, %c0_14] : memref<64x288xbf16, #tpu.memory_space<vmem>>, vector<64x288xbf16>
    %cst_15 = arith.constant dense<0.000000e+00> : vector<64x144xf32>
    %38 = tpu.matmul %37, %36, %cst_15 {dimension_numbers = #tpu.dot_dimension_numbers<[1], [0], [0], [1], [0, 0, 1, 1], [], []>} : vector<64x288xbf16>, vector<288x144xbf16>, vector<64x144xf32> -> vector<64x144xf32>
    %39 = arith.truncf %38 : vector<64x144xf32> to vector<64x144xbf16>
    %c0_16 = arith.constant 0 : index
    %c0_17 = arith.constant 0 : index
    %40 = vector.load %arg7[%c0_16, %c0_17] : memref<144x128xbf16, #tpu.memory_space<vmem>>, vector<144x128xbf16>
    %cst_18 = arith.constant dense<0.000000e+00> : vector<64x128xf32>
    %41 = tpu.matmul %39, %40, %cst_18 {dimension_numbers = #tpu.dot_dimension_numbers<[1], [0], [0], [1], [0, 0, 1, 1], [], []>} : vector<64x144xbf16>, vector<144x128xbf16>, vector<64x128xf32> -> vector<64x128xf32>
    %c0_19 = arith.constant 0 : index
    %c0_20 = arith.constant 0 : index
    %42 = vector.load %arg8[%c0_19, %c0_20] : memref<1x128xf32, #tpu.memory_space<vmem>>, vector<1x128xf32>
    %43 = vector.broadcast %42 : vector<1x128xf32> to vector<64x128xf32>
    %44 = arith.addf %41, %43 : vector<64x128xf32>
    %cst_21 = arith.constant 0.000000e+00 : f32
    %45 = vector.broadcast %cst_21 : f32 to vector<64x128xf32>
    %46 = arith.maximumf %44, %45 : vector<64x128xf32>
    %47 = arith.truncf %46 : vector<64x128xf32> to vector<64x128xbf16>
    %c0_22 = arith.constant 0 : index
    %c0_23 = arith.constant 0 : index
    %c0_24 = arith.constant 0 : index
    %48 = vector.load %arg15[%c0_22, %c0_23, %c0_24] : memref<1x64x128xbf16, #tpu.memory_space<vmem>>, vector<1x64x128xbf16>
    %49 = vector.shape_cast %48 : vector<1x64x128xbf16> to vector<64x128xbf16>
    %50 = vector.shape_cast %47 : vector<64x128xbf16> to vector<1x64x128xbf16>
    tpu.vector_store %arg15[%c0_22, %c0_23, %c0_24], %50 {strides = array<i32>} : memref<1x64x128xbf16, #tpu.memory_space<vmem>>, vector<1x64x128xbf16>,
    %c0_25 = arith.constant 0 : index
    %c0_26 = arith.constant 0 : index
    %51 = vector.load %arg9[%c0_25, %c0_26] : memref<104x64xbf16, #tpu.memory_space<vmem>>, vector<104x64xbf16>
    %52 = arith.truncf %46 : vector<64x128xf32> to vector<64x128xbf16>
    %cst_27 = arith.constant dense<0.000000e+00> : vector<104x128xf32>
    %53 = tpu.matmul %51, %52, %cst_27 {dimension_numbers = #tpu.dot_dimension_numbers<[1], [0], [0], [1], [0, 0, 1, 1], [], []>} : vector<104x64xbf16>, vector<64x128xbf16>, vector<104x128xf32> -> vector<104x128xf32>
    %54 = arith.truncf %53 : vector<104x128xf32> to vector<104x128xbf16>
    %55 = vector.extract_strided_slice %54 {offsets = [0, 0], sizes = [80, 128], strides = [1, 1]} : vector<104x128xbf16> to vector<80x128xbf16>
    %56 = vector.extract_strided_slice %54 {offsets = [1, 0], sizes = [80, 128], strides = [1, 1]} : vector<104x128xbf16> to vector<80x128xbf16>
    %57 = vector.extract_strided_slice %54 {offsets = [2, 0], sizes = [80, 128], strides = [1, 1]} : vector<104x128xbf16> to vector<80x128xbf16>
    %58 = vector.extract_strided_slice %54 {offsets = [10, 0], sizes = [80, 128], strides = [1, 1]} : vector<104x128xbf16> to vector<80x128xbf16>
    %59 = vector.extract_strided_slice %54 {offsets = [11, 0], sizes = [80, 128], strides = [1, 1]} : vector<104x128xbf16> to vector<80x128xbf16>
    %60 = vector.extract_strided_slice %54 {offsets = [12, 0], sizes = [80, 128], strides = [1, 1]} : vector<104x128xbf16> to vector<80x128xbf16>
    %61 = vector.extract_strided_slice %54 {offsets = [20, 0], sizes = [80, 128], strides = [1, 1]} : vector<104x128xbf16> to vector<80x128xbf16>
    %62 = vector.extract_strided_slice %54 {offsets = [21, 0], sizes = [80, 128], strides = [1, 1]} : vector<104x128xbf16> to vector<80x128xbf16>
    %63 = vector.extract_strided_slice %54 {offsets = [22, 0], sizes = [80, 128], strides = [1, 1]} : vector<104x128xbf16> to vector<80x128xbf16>
    %64 = tpu.concatenate %55, %56, %57, %58, %59, %60, %61, %62, %63 in 1 : vector<80x128xbf16>, vector<80x128xbf16>, vector<80x128xbf16>, vector<80x128xbf16>, vector<80x128xbf16>, vector<80x128xbf16>, vector<80x128xbf16>, vector<80x128xbf16>, vector<80x128xbf16> -> vector<80x1152xbf16>
    %c0_28 = arith.constant 0 : index
    %c0_29 = arith.constant 0 : index
    %65 = vector.load %arg11[%c0_28, %c0_29] : memref<1152x32xbf16, #tpu.memory_space<vmem>>, vector<1152x32xbf16>
    %cst_30 = arith.constant dense<0.000000e+00> : vector<80x32xf32>
    %66 = tpu.matmul %64, %65, %cst_30 {dimension_numbers = #tpu.dot_dimension_numbers<[1], [0], [0], [1], [0, 0, 1, 1], [], []>} : vector<80x1152xbf16>, vector<1152x32xbf16>, vector<80x32xf32> -> vector<80x32xf32>
    %c0_31 = arith.constant 0 : index
    %c0_32 = arith.constant 0 : index
    %67 = vector.load %arg12[%c0_31, %c0_32] : memref<1x32xf32, #tpu.memory_space<vmem>>, vector<1x32xf32>
    %68 = vector.broadcast %67 : vector<1x32xf32> to vector<80x32xf32>
    %69 = arith.addf %66, %68 : vector<80x32xf32>
    %cst_33 = arith.constant 0.000000e+00 : f32
    %70 = vector.broadcast %cst_33 : f32 to vector<80x32xf32>
    %71 = arith.maximumf %69, %70 : vector<80x32xf32>
    %c0_34 = arith.constant 0 : index
    %c0_35 = arith.constant 0 : index
    %72 = vector.load %arg10[%c0_34, %c0_35] : memref<64x80xbf16, #tpu.memory_space<vmem>>, vector<64x80xbf16>
    %73 = arith.truncf %71 : vector<80x32xf32> to vector<80x32xbf16>
    %cst_36 = arith.constant dense<0.000000e+00> : vector<64x32xf32>
    %74 = tpu.matmul %72, %73, %cst_36 {dimension_numbers = #tpu.dot_dimension_numbers<[1], [0], [0], [1], [0, 0, 1, 1], [], []>} : vector<64x80xbf16>, vector<80x32xbf16>, vector<64x32xf32> -> vector<64x32xf32>
    %75 = arith.truncf %74 : vector<64x32xf32> to vector<64x32xbf16>
    %c0_37 = arith.constant 0 : index
    %c0_38 = arith.constant 0 : index
    %76 = vector.load %arg13[%c0_37, %c0_38] : memref<32x128xbf16, #tpu.memory_space<vmem>>, vector<32x128xbf16>
    %cst_39 = arith.constant dense<0.000000e+00> : vector<64x128xf32>
    %77 = tpu.matmul %75, %76, %cst_39 {dimension_numbers = #tpu.dot_dimension_numbers<[1], [0], [0], [1], [0, 0, 1, 1], [], []>} : vector<64x32xbf16>, vector<32x128xbf16>, vector<64x128xf32> -> vector<64x128xf32>
    %c0_40 = arith.constant 0 : index
    %c0_41 = arith.constant 0 : index
    %78 = vector.load %arg14[%c0_40, %c0_41] : memref<1x128xf32, #tpu.memory_space<vmem>>, vector<1x128xf32>
    %79 = vector.broadcast %78 : vector<1x128xf32> to vector<64x128xf32>
    %80 = arith.addf %77, %79 : vector<64x128xf32>
    %c0_42 = arith.constant 0 : index
    %c0_43 = arith.constant 0 : index
    %c0_44 = arith.constant 0 : index
    %81 = vector.load %arg16[%c0_42, %c0_43, %c0_44] : memref<1x64x128xf32, #tpu.memory_space<vmem>>, vector<1x64x128xf32>
    %82 = vector.shape_cast %81 : vector<1x64x128xf32> to vector<64x128xf32>
    %83 = vector.shape_cast %80 : vector<64x128xf32> to vector<1x64x128xf32>
    tpu.vector_store %arg16[%c0_42, %c0_43, %c0_44], %83 {strides = array<i32>} : memref<1x64x128xf32, #tpu.memory_space<vmem>>, vector<1x64x128xf32>,
    return
  }
  func.func @transform_0(%arg0: i32) -> (i32, i32, i32) {
    %c0_i32 = arith.constant 0 : i32
    %c0_i32_0 = arith.constant 0 : i32
    %c0_i32_1 = arith.constant 0 : i32
    return %arg0, %c0_i32, %c0_i32_0 : i32, i32, i32
  }
  func.func @transform_1(%arg0: i32) -> (i32, i32) {
    %c0_i32 = arith.constant 0 : i32
    %c0_i32_0 = arith.constant 0 : i32
    %c0_i32_1 = arith.constant 0 : i32
    return %c0_i32, %c0_i32_0 : i32, i32
  }
  func.func @transform_2(%arg0: i32) -> (i32, i32) {
    %c0_i32 = arith.constant 0 : i32
    %c0_i32_0 = arith.constant 0 : i32
    %c0_i32_1 = arith.constant 0 : i32
    return %c0_i32, %c0_i32_0 : i32, i32
  }
  func.func @transform_3(%arg0: i32) -> (i32, i32) {
    %c0_i32 = arith.constant 0 : i32
    %c0_i32_0 = arith.constant 0 : i32
    %c0_i32_1 = arith.constant 0 : i32
    return %c0_i32, %c0_i32_0 : i32, i32
  }
  func.func @transform_4(%arg0: i32) -> (i32, i32) {
    %c0_i32 = arith.constant 0 : i32
    %c0_i32_0 = arith.constant 0 : i32
    %c0_i32_1 = arith.constant 0 : i32
    return %c0_i32, %c0_i32_0 : i32, i32
  }
  func.func @transform_5(%arg0: i32) -> (i32, i32) {
    %c0_i32 = arith.constant 0 : i32
    %c0_i32_0 = arith.constant 0 : i32
    %c0_i32_1 = arith.constant 0 : i32
    return %c0_i32, %c0_i32_0 : i32, i32
  }
  func.func @transform_6(%arg0: i32) -> (i32, i32) {
    %c0_i32 = arith.constant 0 : i32
    %c0_i32_0 = arith.constant 0 : i32
    %c0_i32_1 = arith.constant 0 : i32
    return %c0_i32, %c0_i32_0 : i32, i32
  }
  func.func @transform_7(%arg0: i32) -> (i32, i32) {
    %c0_i32 = arith.constant 0 : i32
    %c0_i32_0 = arith.constant 0 : i32
    %c0_i32_1 = arith.constant 0 : i32
    return %c0_i32, %c0_i32_0 : i32, i32
  }
  func.func @transform_8(%arg0: i32) -> (i32, i32) {
    %c0_i32 = arith.constant 0 : i32
    %c0_i32_0 = arith.constant 0 : i32
    %c0_i32_1 = arith.constant 0 : i32
    return %c0_i32, %c0_i32_0 : i32, i32
  }
  func.func @transform_9(%arg0: i32) -> (i32, i32) {
    %c0_i32 = arith.constant 0 : i32
    %c0_i32_0 = arith.constant 0 : i32
    %c0_i32_1 = arith.constant 0 : i32
    return %c0_i32, %c0_i32_0 : i32, i32
  }
  func.func @transform_10(%arg0: i32) -> (i32, i32) {
    %c0_i32 = arith.constant 0 : i32
    %c0_i32_0 = arith.constant 0 : i32
    %c0_i32_1 = arith.constant 0 : i32
    return %c0_i32, %c0_i32_0 : i32, i32
  }
  func.func @transform_11(%arg0: i32) -> (i32, i32) {
    %c0_i32 = arith.constant 0 : i32
    %c0_i32_0 = arith.constant 0 : i32
    %c0_i32_1 = arith.constant 0 : i32
    return %c0_i32, %c0_i32_0 : i32, i32
  }
  func.func @transform_12(%arg0: i32) -> (i32, i32) {
    %c0_i32 = arith.constant 0 : i32
    %c0_i32_0 = arith.constant 0 : i32
    %c0_i32_1 = arith.constant 0 : i32
    return %c0_i32, %c0_i32_0 : i32, i32
  }
  func.func @transform_13(%arg0: i32) -> (i32, i32) {
    %c0_i32 = arith.constant 0 : i32
    %c0_i32_0 = arith.constant 0 : i32
    %c0_i32_1 = arith.constant 0 : i32
    return %c0_i32, %c0_i32_0 : i32, i32
  }
  func.func @transform_14(%arg0: i32) -> (i32, i32, i32) {
    %c0_i32 = arith.constant 0 : i32
    %c0_i32_0 = arith.constant 0 : i32
    %c0_i32_1 = arith.constant 0 : i32
    return %arg0, %c0_i32, %c0_i32_0 : i32, i32, i32
  }
  func.func @transform_15(%arg0: i32) -> (i32, i32, i32) {
    %c0_i32 = arith.constant 0 : i32
    %c0_i32_0 = arith.constant 0 : i32
    %c0_i32_1 = arith.constant 0 : i32
    return %arg0, %c0_i32, %c0_i32_0 : i32, i32, i32
  }
}

module attributes {stable_mosaic.version = 11 : i64} {
  func.func @_roi_box_head_kernel(%arg0: memref<128x128xbf16, #tpu.memory_space<vmem>>, %arg1: memref<256x128xbf16, #tpu.memory_space<vmem>>, %arg2: memref<2048x128xbf16, #tpu.memory_space<vmem>>, %arg3: memref<1x128xf32, #tpu.memory_space<vmem>>, %arg4: memref<128x128xbf16, #tpu.memory_space<vmem>>, %arg5: memref<1x128xf32, #tpu.memory_space<vmem>>, %arg6: memref<128x128xbf16, #tpu.memory_space<vmem>>, %arg7: memref<1x128xf32, #tpu.memory_space<vmem>>, %arg8: memref<16x128xf32, #tpu.memory_space<vmem>>) attributes {dimension_semantics = [], scalar_prefetch = 0 : i64, scratch_operands = 0 : i64, tpu.core_type = #tpu.core_type<tc>} {
    %c0 = arith.constant 0 : index
    %c0_0 = arith.constant 0 : index
    %0 = vector.load %arg1[%c0, %c0_0] : memref<256x128xbf16, #tpu.memory_space<vmem>>, vector<256x128xbf16>
    %c0_1 = arith.constant 0 : index
    %c0_2 = arith.constant 0 : index
    %1 = vector.load %arg0[%c0_1, %c0_2] : memref<128x128xbf16, #tpu.memory_space<vmem>>, vector<128x128xbf16>
    %cst = arith.constant dense<0.000000e+00> : vector<256x128xf32>
    %2 = tpu.matmul %0, %1, %cst {dimension_numbers = #tpu.dot_dimension_numbers<[1], [0], [0], [1], [0, 0, 1, 1], [], []>} : vector<256x128xbf16>, vector<128x128xbf16>, vector<256x128xf32> -> vector<256x128xf32>
    %3 = arith.truncf %2 : vector<256x128xf32> to vector<256x128xbf16>
    %4 = vector.extract_strided_slice %3 {offsets = [0, 0], sizes = [16, 128], strides = [1, 1]} : vector<256x128xbf16> to vector<16x128xbf16>
    %5 = vector.extract_strided_slice %3 {offsets = [16, 0], sizes = [16, 128], strides = [1, 1]} : vector<256x128xbf16> to vector<16x128xbf16>
    %6 = vector.extract_strided_slice %3 {offsets = [32, 0], sizes = [16, 128], strides = [1, 1]} : vector<256x128xbf16> to vector<16x128xbf16>
    %7 = vector.extract_strided_slice %3 {offsets = [48, 0], sizes = [16, 128], strides = [1, 1]} : vector<256x128xbf16> to vector<16x128xbf16>
    %8 = vector.extract_strided_slice %3 {offsets = [64, 0], sizes = [16, 128], strides = [1, 1]} : vector<256x128xbf16> to vector<16x128xbf16>
    %9 = vector.extract_strided_slice %3 {offsets = [80, 0], sizes = [16, 128], strides = [1, 1]} : vector<256x128xbf16> to vector<16x128xbf16>
    %10 = vector.extract_strided_slice %3 {offsets = [96, 0], sizes = [16, 128], strides = [1, 1]} : vector<256x128xbf16> to vector<16x128xbf16>
    %11 = vector.extract_strided_slice %3 {offsets = [112, 0], sizes = [16, 128], strides = [1, 1]} : vector<256x128xbf16> to vector<16x128xbf16>
    %12 = vector.extract_strided_slice %3 {offsets = [128, 0], sizes = [16, 128], strides = [1, 1]} : vector<256x128xbf16> to vector<16x128xbf16>
    %13 = vector.extract_strided_slice %3 {offsets = [144, 0], sizes = [16, 128], strides = [1, 1]} : vector<256x128xbf16> to vector<16x128xbf16>
    %14 = vector.extract_strided_slice %3 {offsets = [160, 0], sizes = [16, 128], strides = [1, 1]} : vector<256x128xbf16> to vector<16x128xbf16>
    %15 = vector.extract_strided_slice %3 {offsets = [176, 0], sizes = [16, 128], strides = [1, 1]} : vector<256x128xbf16> to vector<16x128xbf16>
    %16 = vector.extract_strided_slice %3 {offsets = [192, 0], sizes = [16, 128], strides = [1, 1]} : vector<256x128xbf16> to vector<16x128xbf16>
    %17 = vector.extract_strided_slice %3 {offsets = [208, 0], sizes = [16, 128], strides = [1, 1]} : vector<256x128xbf16> to vector<16x128xbf16>
    %18 = vector.extract_strided_slice %3 {offsets = [224, 0], sizes = [16, 128], strides = [1, 1]} : vector<256x128xbf16> to vector<16x128xbf16>
    %19 = vector.extract_strided_slice %3 {offsets = [240, 0], sizes = [16, 128], strides = [1, 1]} : vector<256x128xbf16> to vector<16x128xbf16>
    %20 = tpu.concatenate %4, %5, %6, %7, %8, %9, %10, %11, %12, %13, %14, %15, %16, %17, %18, %19 in 1 : vector<16x128xbf16>, vector<16x128xbf16>, vector<16x128xbf16>, vector<16x128xbf16>, vector<16x128xbf16>, vector<16x128xbf16>, vector<16x128xbf16>, vector<16x128xbf16>, vector<16x128xbf16>, vector<16x128xbf16>, vector<16x128xbf16>, vector<16x128xbf16>, vector<16x128xbf16>, vector<16x128xbf16>, vector<16x128xbf16>, vector<16x128xbf16> -> vector<16x2048xbf16>
    %c0_3 = arith.constant 0 : index
    %c0_4 = arith.constant 0 : index
    %21 = vector.load %arg2[%c0_3, %c0_4] : memref<2048x128xbf16, #tpu.memory_space<vmem>>, vector<2048x128xbf16>
    %cst_5 = arith.constant dense<0.000000e+00> : vector<16x128xf32>
    %22 = tpu.matmul %20, %21, %cst_5 {dimension_numbers = #tpu.dot_dimension_numbers<[1], [0], [0], [1], [0, 0, 1, 1], [], []>} : vector<16x2048xbf16>, vector<2048x128xbf16>, vector<16x128xf32> -> vector<16x128xf32>
    %c0_6 = arith.constant 0 : index
    %c0_7 = arith.constant 0 : index
    %23 = vector.load %arg3[%c0_6, %c0_7] : memref<1x128xf32, #tpu.memory_space<vmem>>, vector<1x128xf32>
    %24 = vector.broadcast %23 : vector<1x128xf32> to vector<16x128xf32>
    %25 = arith.addf %22, %24 : vector<16x128xf32>
    %cst_8 = arith.constant 0.000000e+00 : f32
    %26 = vector.broadcast %cst_8 : f32 to vector<16x128xf32>
    %27 = arith.maximumf %25, %26 : vector<16x128xf32>
    %28 = arith.truncf %27 : vector<16x128xf32> to vector<16x128xbf16>
    %c0_9 = arith.constant 0 : index
    %c0_10 = arith.constant 0 : index
    %29 = vector.load %arg4[%c0_9, %c0_10] : memref<128x128xbf16, #tpu.memory_space<vmem>>, vector<128x128xbf16>
    %cst_11 = arith.constant dense<0.000000e+00> : vector<16x128xf32>
    %30 = tpu.matmul %28, %29, %cst_11 {dimension_numbers = #tpu.dot_dimension_numbers<[1], [0], [0], [1], [0, 0, 1, 1], [], []>} : vector<16x128xbf16>, vector<128x128xbf16>, vector<16x128xf32> -> vector<16x128xf32>
    %c0_12 = arith.constant 0 : index
    %c0_13 = arith.constant 0 : index
    %31 = vector.load %arg5[%c0_12, %c0_13] : memref<1x128xf32, #tpu.memory_space<vmem>>, vector<1x128xf32>
    %32 = vector.broadcast %31 : vector<1x128xf32> to vector<16x128xf32>
    %33 = arith.addf %30, %32 : vector<16x128xf32>
    %cst_14 = arith.constant 0.000000e+00 : f32
    %34 = vector.broadcast %cst_14 : f32 to vector<16x128xf32>
    %35 = arith.maximumf %33, %34 : vector<16x128xf32>
    %36 = arith.truncf %35 : vector<16x128xf32> to vector<16x128xbf16>
    %c0_15 = arith.constant 0 : index
    %c0_16 = arith.constant 0 : index
    %37 = vector.load %arg6[%c0_15, %c0_16] : memref<128x128xbf16, #tpu.memory_space<vmem>>, vector<128x128xbf16>
    %cst_17 = arith.constant dense<0.000000e+00> : vector<16x128xf32>
    %38 = tpu.matmul %36, %37, %cst_17 {dimension_numbers = #tpu.dot_dimension_numbers<[1], [0], [0], [1], [0, 0, 1, 1], [], []>} : vector<16x128xbf16>, vector<128x128xbf16>, vector<16x128xf32> -> vector<16x128xf32>
    %c0_18 = arith.constant 0 : index
    %c0_19 = arith.constant 0 : index
    %39 = vector.load %arg7[%c0_18, %c0_19] : memref<1x128xf32, #tpu.memory_space<vmem>>, vector<1x128xf32>
    %40 = vector.broadcast %39 : vector<1x128xf32> to vector<16x128xf32>
    %41 = arith.addf %38, %40 : vector<16x128xf32>
    %c0_20 = arith.constant 0 : index
    %c0_21 = arith.constant 0 : index
    %42 = vector.load %arg8[%c0_20, %c0_21] : memref<16x128xf32, #tpu.memory_space<vmem>>, vector<16x128xf32>
    tpu.vector_store %arg8[%c0_20, %c0_21], %41 {strides = array<i32>} : memref<16x128xf32, #tpu.memory_space<vmem>>, vector<16x128xf32>,
    return
  }
}

</mosaic_0001>

<bundles_post_ra>
// kernel: generalized_rcnn_forward.2
= control target key start
LH: loop header
LB: loop body
LE: loop exit
PB: predicated region body
PF: predicated region fallthrough
CT: control target
= control target key end

     0   :  { %s7527_s18 = smov 0   ;;  %s10718_s0 = inlined_call_operand.vmem [shape: f32[2,256,3], index: 0, kind: input, shape index: {}]   ;;  %s10719_s1 = inlined_call_operand.vmem [shape: bf16[328,256], index: 1, kind: input, shape index: {}]   ;;  %s10720_s2 = inlined_call_operand.vmem [shape: bf16[27,16], index: 2, kind: input, shape index: {}]   ;;  %s10721_s3 = inlined_call_operand.vmem [shape: f32[1,16], index: 3, kind: input, shape index: {}]   ;;  %s10722_s4 = inlined_call_operand.vmem [shape: bf16[328,288], index: 4, kind: input, shape index: {}]   ;;  %s10723_s5 = inlined_call_operand.vmem [shape: bf16[64,288], index: 5, kind: input, shape index: {}]   ;;  %s10724_s6 = inlined_call_operand.vmem [shape: bf16[144,128], index: 6, kind: input, shape index: {}]   ;;  %s10725_s7 = inlined_call_operand.vmem [shape: f32[1,128], index: 7, kind: input, shape index: {}]   ;;  %s10726_s8 = inlined_call_operand.vmem [shape: bf16[104,64], index: 8, kind: input, shape index: {}]   ;;  %s10727_s9 = inlined_call_operand.vmem [shape: bf16[64,80], index: 9, kind: input, shape index: {}]   ;;  %s10728_s10 = inlined_call_operand.vmem [shape: bf16[1152,32], index: 10, kind: input, shape index: {}]   ;;  %s10729_s11 = inlined_call_operand.vmem [shape: f32[1,32], index: 11, kind: input, shape index: {}]   ;;  %s10730_s12 = inlined_call_operand.vmem [shape: bf16[32,128], index: 12, kind: input, shape index: {}]   ;;  %s10731_s13 = inlined_call_operand.vmem [shape: f32[1,128], index: 13, kind: input, shape index: {}]   ;;  %s10732_s14 = inlined_call_operand.vmem [shape: bf16[2,64,128], index: 14, kind: output, shape index: {0}]   ;;  %s10733_s15 = inlined_call_operand.vmem [shape: f32[2,64,128], index: 15, kind: output, shape index: {1}]  }
   0x1 LB: > { %s6306_s19 = sadd.s32 4294967295, %s7426_s18   ;;  %p6310_p0 = scmp.ge.s32.totalorder %s7426_s18, 1  ;;  %s7426_s18 = sphi %s7527_s18, %s26_s18  }
   0x2   : > { %p440_p1 = scmp.lt.s32.totalorder %s7426_s18, 3 }
   0x4   : > { %p441_p2 = pnand %p6310_p0, %p440_p1 }
   0x6   : > { %444 = sbr.rel (%p441_p2) target bundleno = 2909 (0xb5d), region = 76 }
   0xb   : > { %p493_p3 = scmp.lt.s32.totalorder %s6306_s19, 1  ;;  %v10734_v0 = vmov 0   ;;  %v7165_v1 = vld [vmem:[%s10719_s1 + $0x4] ss:$8 sps:$4 sm:$0xff]   ;;  %v7163_v50 = vld [vmem:[%s10719_s1] ss:$8 sps:$4 sm:$0xff]  }
   0xc   : > { %805 = vmatprep.subr.bf16.mxu0 %v10734_v0  ;;  %837 = vmatprep.mubr.bf16.mxu0 %v7165_v1  ;;  %v7166_v51 = vld [vmem:[%s10719_s1 + $0x14] ss:$8 sps:$4 sm:$0xff]   ;;  %v7168_v52 = vld [vmem:[%s10719_s1 + $0x10] ss:$8 sps:$4 sm:$0xff]   ;;  %v7169_v53 = vld [vmem:[%s10719_s1 + $0x24] ss:$8 sps:$4 sm:$0xff]  }
   0xd   : > { %s10879_s19 = smov (!%p493_p3, %s6306_s19), 1  ;;  %v7171_v54 = vld [vmem:[%s10719_s1 + $0x20] ss:$8 sps:$4 sm:$0xff]   ;;  %v7172_v55 = vld [vmem:[%s10719_s1 + $0x34] ss:$8 sps:$4 sm:$0xff]   ;;  %vm1230_vm0 = vcmask 1046528  }
   0xe   : > { %s6606_s22 = sshll.u32 %s10879_s19, 8  ;;  %v7174_v56 = vld [vmem:[%s10719_s1 + $0x30] ss:$8 sps:$4 sm:$0xff]   ;;  %v7175_v57 = vld [vmem:[%s10719_s1 + $0x44] ss:$8 sps:$4 sm:$0xff]   ;;  %s7429_s28 = smov 6  }
   0xf   : > { %s7545_s25 = scalar_lea.vmem %s10718_s0, %s6606_s22  ;;  %v7177_v58 = vld [vmem:[%s10719_s1 + $0x40] ss:$8 sps:$4 sm:$0xff]   ;;  %v7178_v59 = vld [vmem:[%s10719_s1 + $0x54] ss:$8 sps:$4 sm:$0xff]   ;;  %v7180_v60 = vld [vmem:[%s10719_s1 + $0x50] ss:$8 sps:$4 sm:$0xff]  }
  0x10   : > { %v523_v2 = vld [vmem:[%s7545_s25 + $0x70] sm:$0xff]  ;;  %v524_v3 = vld [vmem:[%s7545_s25 + $0x78] sm:$0xff]  ;;  %v521_v4 = vld [vmem:[%s7545_s25 + $0x60] sm:$0xff]  ;;  %vm1026_vm1 = vsmask.f32 7424  ;;  %s7430_s29 = smov 3  }
  0x11   : > { %v548_v5 = vpack.c.bf16 %v524_v3, %v523_v2  ;;  %v522_v6 = vld [vmem:[%s7545_s25 + $0x68] sm:$0xff]  ;;  %v519_v8 = vld [vmem:[%s7545_s25 + $0x50] sm:$0xff]  ;;  %v520_v9 = vld [vmem:[%s7545_s25 + $0x58] sm:$0xff]  ;;  %s7431_s30 = smov 9   ;;  %vm1462_vm2 = vcmask 1045504   ;;  %s7432_s16 = smov 15  }
  0x12   : > { %v547_v7 = vpack.c.bf16 %v522_v6, %v521_v4  ;;  %v546_v10 = vpack.c.bf16 %v520_v9, %v519_v8  ;;  %v517_v11 = vld [vmem:[%s7545_s25 + $0x40] sm:$0xff]  ;;  %v518_v12 = vld [vmem:[%s7545_s25 + $0x48] sm:$0xff]  ;;  %v515_v14 = vld [vmem:[%s7545_s25 + $0x30] sm:$0xff]  ;;  %vm1343_vm3 = vsmask.f32 6400  ;;  %s7433_s17 = smov 12  }
  0x13   : > { %806 = vmatpush1.bf16.msra.mxu0 %v548_v5  ;;  %v545_v13 = vpack.c.bf16 %v518_v12, %v517_v11  ;;  %v516_v15 = vld [vmem:[%s7545_s25 + $0x38] sm:$0xff]  ;;  %v513_v17 = vld [vmem:[%s7545_s25 + $0x20] sm:$0xff]  ;;  %v514_v18 = vld [vmem:[%s7545_s25 + $0x28] sm:$0xff]  ;;  %s7434_s22 = smov 18   ;;  %vm1692_vm4 = vcmask 1044480   ;;  %s7436_s23 = smov 24  }
  0x14   : > { %807 = vmatprep.subr.bf16.mxu0 %v10734_v0  ;;  %v544_v16 = vpack.c.bf16 %v516_v15, %v515_v14  ;;  %v543_v19 = vpack.c.bf16 %v514_v18, %v513_v17  ;;  %v511_v20 = vld [vmem:[%s7545_s25 + $0x10] sm:$0xff]  ;;  %v512_v21 = vld [vmem:[%s7545_s25 + $0x18] sm:$0xff]  ;;  %v509_v22 = vld [vmem:[%s7545_s25] sm:$0xff]  ;;  %vm1575_vm5 = vsmask.f32 5376  ;;  %s7437_s26 = smov 21  }
  0x15   : > { %v510_v23 = vld [vmem:[%s7545_s25 + $0x8] sm:$0xff]  ;;  %v542_v24 = vpack.c.bf16 %v512_v21, %v511_v20  ;;  %v539_v25 = vld [vmem:[%s7545_s25 + $0xf0] sm:$0xff]  ;;  %v540_v27 = vld [vmem:[%s7545_s25 + $0xf8] sm:$0xff]  ;;  %vm1766_vm6 = vcmask 23552   ;;  %vm1803_vm7 = vcmask 48128   ;;  %vm1840_vm8 = vcmask 72704  }
  0x16   : > { %v541_v26 = vpack.c.bf16 %v510_v23, %v509_v22  ;;  %v537_v28 = vld [vmem:[%s7545_s25 + $0xe0] sm:$0xff]  ;;  %v538_v29 = vld [vmem:[%s7545_s25 + $0xe8] sm:$0xff]  ;;  %v556_v30 = vpack.c.bf16 %v540_v27, %v539_v25  ;;  %v535_v31 = vld [vmem:[%s7545_s25 + $0xd0] sm:$0xff]  ;;  %vm1877_vm9 = vcmask 97280   ;;  %vm1914_vm10 = vcmask 121856   ;;  %s7441_s24 = smov 16  }
  0x17   : > { %808 = vmatpush1.bf16.msra.mxu0 %v547_v7  ;;  %v555_v32 = vpack.c.bf16 %v538_v29, %v537_v28  ;;  %v536_v33 = vld [vmem:[%s7545_s25 + $0xd8] sm:$0xff]  ;;  %v533_v34 = vld [vmem:[%s7545_s25 + $0xc0] sm:$0xff]  ;;  %v534_v35 = vld [vmem:[%s7545_s25 + $0xc8] sm:$0xff]  ;;  %vm1951_vm11 = vcmask 146432   ;;  %vm1988_vm12 = vcmask 171008   ;;  %vm2025_vm13 = vcmask 195584  }
  0x18   : > { %809 = vmatprep.subr.bf16.mxu0 %v10734_v0  ;;  %v554_v36 = vpack.c.bf16 %v536_v33, %v535_v31  ;;  %v531_v37 = vld [vmem:[%s7545_s25 + $0xb0] sm:$0xff]  ;;  %v553_v38 = vpack.c.bf16 %v534_v35, %v533_v34  ;;  %v532_v39 = vld [vmem:[%s7545_s25 + $0xb8] sm:$0xff]  ;;  %v529_v40 = vld [vmem:[%s7545_s25 + $0xa0] sm:$0xff]  ;;  %vm2084_vm14 = vcmask 220160   ;;  %vm7439_vm15 = vmmov 0   ;;  %s7444_s27 = smov 64  }
  0x19   : > { %v530_v41 = vld [vmem:[%s7545_s25 + $0xa8] sm:$0xff]  ;;  %v552_v42 = vpack.c.bf16 %v532_v39, %v531_v37  ;;  %v527_v43 = vld [vmem:[%s7545_s25 + $0x90] sm:$0xff]  ;;  %v528_v44 = vld [vmem:[%s7545_s25 + $0x98] sm:$0xff]  ;;  %s6607_s21 = sshll.u32 %s10879_s19, 5 }
  0x1a   : > { %v551_v45 = vpack.c.bf16 %v530_v41, %v529_v40  ;;  %v525_v46 = vld [vmem:[%s7545_s25 + $0x80] sm:$0xff]  ;;  %v526_v47 = vld [vmem:[%s7545_s25 + $0x88] sm:$0xff]  ;;  %v550_v48 = vpack.c.bf16 %v528_v44, %v527_v43  ;;  %v7184_v63 = vld [vmem:[%s10719_s1 + $0x74] ss:$8 sps:$4 sm:$0xff]   ;;  %s7442_s25 = smov 48  }
  0x1b   : > { %810 = vmatpush1.bf16.msra.mxu0 %v546_v10  ;;  %v549_v49 = vpack.c.bf16 %v526_v47, %v525_v46  ;;  %v7181_v61 = vld [vmem:[%s10719_s1 + $0x64] ss:$8 sps:$4 sm:$0xff]   ;;  %v7183_v62 = vld [vmem:[%s10719_s1 + $0x60] ss:$8 sps:$4 sm:$0xff]   ;;  %v7186_v1 = vld [vmem:[%s10719_s1 + $0x70] ss:$8 sps:$4 sm:$0xff]  }
  0x1c   : > { %811 = vmatprep.subr.bf16.mxu0 %v10734_v0  ;;  %v7187_v2 = vld [vmem:[%s10719_s1 + $0x84] ss:$8 sps:$4 sm:$0xff]   ;;  %v7189_v3 = vld [vmem:[%s10719_s1 + $0x80] ss:$8 sps:$4 sm:$0xff]   ;;  %v7190_v4 = vld [vmem:[%s10719_s1 + $0x94] ss:$8 sps:$4 sm:$0xff]  }
  0x1d   : > { %v7192_v5 = vld [vmem:[%s10719_s1 + $0x90] ss:$8 sps:$4 sm:$0xff]   ;;  %v7193_v6 = vld [vmem:[%s10719_s1 + $0xa4] ss:$8 sps:$4 sm:$0xff]   ;;  %v7195_v7 = vld [vmem:[%s10719_s1 + $0xa0] ss:$8 sps:$4 sm:$0xff]  }
  0x1e   : > { %v7196_v8 = vld [vmem:[%s10719_s1 + $0xb4] ss:$8 sps:$4 sm:$0xff]   ;;  %v7198_v9 = vld [vmem:[%s10719_s1 + $0xb0] ss:$8 sps:$4 sm:$0xff]   ;;  %v7199_v10 = vld [vmem:[%s10719_s1 + $0xc4] ss:$8 sps:$4 sm:$0xff]  }
  0x1f   : > { %812 = vmatpush1.bf16.msra.mxu0 %v545_v13  ;;  %v7201_v11 = vld [vmem:[%s10719_s1 + $0xc0] ss:$8 sps:$4 sm:$0xff]   ;;  %v7202_v12 = vld [vmem:[%s10719_s1 + $0xd4] ss:$8 sps:$4 sm:$0xff]   ;;  %v7204_v13 = vld [vmem:[%s10719_s1 + $0xd0] ss:$8 sps:$4 sm:$0xff]  }
  0x20   : > { %813 = vmatprep.subr.bf16.mxu0 %v10734_v0  ;;  %v7205_v14 = vld [vmem:[%s10719_s1 + $0xe4] ss:$8 sps:$4 sm:$0xff]   ;;  %v7207_v15 = vld [vmem:[%s10719_s1 + $0xe0] ss:$8 sps:$4 sm:$0xff]   ;;  %v7210_v17 = vld [vmem:[%s10719_s1 + $0xf0] ss:$8 sps:$4 sm:$0xff]  }
  0x21   : > { %v7211_v18 = vld [vmem:[%s10719_s1 + $0x104] ss:$8 sps:$4 sm:$0xff]   ;;  %v7214_v20 = vld [vmem:[%s10719_s1 + $0x114] ss:$8 sps:$4 sm:$0xff]   ;;  %v7216_v21 = vld [vmem:[%s10719_s1 + $0x110] ss:$8 sps:$4 sm:$0xff]  }
  0x22   : > { %v7217_v22 = vld [vmem:[%s10719_s1 + $0x124] ss:$8 sps:$4 sm:$0xff]   ;;  %v7219_v23 = vld [vmem:[%s10719_s1 + $0x120] ss:$8 sps:$4 sm:$0xff]   ;;  %v7222_v25 = vld [vmem:[%s10719_s1 + $0x130] ss:$8 sps:$4 sm:$0xff]  }
  0x23   : > { %814 = vmatpush1.bf16.msra.mxu0 %v544_v16  ;;  %v7208_v16 = vld [vmem:[%s10719_s1 + $0xf4] ss:$8 sps:$4 sm:$0xff]  }
  0x24   : > { %815 = vmatprep.subr.bf16.mxu0 %v10734_v0 }
  0x27   : > { %816 = vmatpush1.bf16.msra.mxu0 %v543_v19  ;;  %v7213_v19 = vld [vmem:[%s10719_s1 + $0x100] ss:$8 sps:$4 sm:$0xff]  }
  0x28   : > { %817 = vmatprep.subr.bf16.mxu0 %v10734_v0 }
  0x2b   : > { %818 = vmatpush1.bf16.msra.mxu0 %v542_v24  ;;  %v7220_v24 = vld [vmem:[%s10719_s1 + $0x134] ss:$8 sps:$4 sm:$0xff]  }
  0x2c   : > { %819 = vmatprep.subr.bf16.mxu0 %v10734_v0 }
  0x2f   : > { %820 = vmatpush1.bf16.msra.mxu0 %v541_v26  ;;  %v597_v26 = vld [vmem:[%s10719_s1 + $0x140] sm:$0xff] }
  0x30   : > { %821 = vmatprep.subr.bf16.mxu0 %v10734_v0  ;;  %v6358_v27 = vcombine.high %v597_v26, %v597_v26  ;;  %v6357_v28 = vcombine.low %v597_v26, %v597_v26 }
  0x33   : > { %822 = vmatpush2.bf16.msra.mxu0 %v556_v30 }
  0x34   : > { %823 = vmatprep.subr.bf16.mxu0 %v10734_v0 }
  0x37   : > { %824 = vmatpush2.bf16.msra.mxu0 %v555_v32 }
  0x38   : > { %825 = vmatprep.subr.bf16.mxu0 %v10734_v0 }
  0x3b   : > { %826 = vmatpush2.bf16.msra.mxu0 %v554_v36 }
  0x3c   : > { %827 = vmatprep.subr.bf16.mxu0 %v10734_v0 }
  0x3f   : > { %828 = vmatpush2.bf16.msra.mxu0 %v553_v38 }
  0x40   : > { %829 = vmatprep.subr.bf16.mxu0 %v10734_v0 }
  0x43   : > { %830 = vmatpush2.bf16.msra.mxu0 %v552_v42 }
  0x44   : > { %831 = vmatprep.subr.bf16.mxu0 %v10734_v0 }
  0x47   : > { %832 = vmatpush2.bf16.msra.mxu0 %v551_v45 }
  0x48   : > { %833 = vmatprep.subr.bf16.mxu0 %v10734_v0 }
  0x4b   : > { %834 = vmatpush2.bf16.msra.mxu0 %v550_v48 }
  0x4c   : > { %835 = vmatprep.subr.bf16.mxu0 %v10734_v0 }
  0x4f   : > { %836 = vmatpush2.bf16.msra.mxu0 %v549_v49 }
  0x52   : > { %838 = vmatmul.mubr.bf16.vlgmr.msra.gmra.mxu0 %v7163_v50 }
  0x53   : > { %845 = vmatprep.mubr.bf16.mxu0 %v7166_v51 }
  0x5a   : > { %846 = vmatmul.mubr.bf16.gmra.mxu0 %v7168_v52 }
  0x5b   : > { %853 = vmatprep.mubr.bf16.mxu0 %v7169_v53 }
  0x62   : > { %854 = vmatmul.mubr.bf16.gmra.mxu0 %v7171_v54 }
  0x63   : > { %861 = vmatprep.mubr.bf16.mxu0 %v7172_v55 }
  0x6a   : > { %862 = vmatmul.mubr.bf16.gmra.mxu0 %v7174_v56 }
  0x6b   : > { %869 = vmatprep.mubr.bf16.mxu0 %v7175_v57 }
  0x72   : > { %870 = vmatmul.mubr.bf16.gmra.mxu0 %v7177_v58 }
  0x73   : > { %877 = vmatprep.mubr.bf16.mxu0 %v7178_v59 }
  0x7a   : > { %878 = vmatmul.mubr.bf16.gmra.mxu0 %v7180_v60 }
  0x7b   : > { %885 = vmatprep.mubr.bf16.mxu0 %v7181_v61 }
  0x82   : > { %886 = vmatmul.mubr.bf16.gmra.mxu0 %v7183_v62 }
  0x83   : > { %893 = vmatprep.mubr.bf16.mxu0 %v7184_v63 }
  0x8a   : > { %894 = vmatmul.mubr.bf16.gmra.mxu0 %v7186_v1 }
  0x8b   : > { %901 = vmatprep.mubr.bf16.mxu0 %v7187_v2 }
  0x92   : > { %902 = vmatmul.mubr.bf16.gmra.mxu0 %v7189_v3 }
  0x93   : > { %909 = vmatprep.mubr.bf16.mxu0 %v7190_v4 }
  0x9a   : > { %910 = vmatmul.mubr.bf16.gmra.mxu0 %v7192_v5 }
  0x9b   : > { %917 = vmatprep.mubr.bf16.mxu0 %v7193_v6 }
  0xa2   : > { %918 = vmatmul.mubr.bf16.gmra.mxu0 %v7195_v7 }
  0xa3   : > { %925 = vmatprep.mubr.bf16.mxu0 %v7196_v8 }
  0xaa   : > { %926 = vmatmul.mubr.bf16.gmra.mxu0 %v7198_v9 }
  0xab   : > { %933 = vmatprep.mubr.bf16.mxu0 %v7199_v10 }
  0xb2   : > { %934 = vmatmul.mubr.bf16.gmra.mxu0 %v7201_v11 }
  0xb3   : > { %941 = vmatprep.mubr.bf16.mxu0 %v7202_v12 }
  0xba   : > { %942 = vmatmul.mubr.bf16.gmra.mxu0 %v7204_v13 }
  0xbb   : > { %949 = vmatprep.mubr.bf16.mxu0 %v7205_v14 }
  0xc2   : > { %950 = vmatmul.mubr.bf16.gmra.mxu0 %v7207_v15 }
  0xc3   : > { %957 = vmatprep.mubr.bf16.mxu0 %v7208_v16 }
  0xca   : > { %958 = vmatmul.mubr.bf16.gmra.mxu0 %v7210_v17 }
  0xcb   : > { %965 = vmatprep.mubr.bf16.mxu0 %v7211_v18 }
  0xd2   : > { %966 = vmatmul.mubr.bf16.gmra.mxu0 %v7213_v19 }
  0xd3   : > { %973 = vmatprep.mubr.bf16.mxu0 %v7214_v20 }
  0xda   : > { %974 = vmatmul.mubr.bf16.gmra.mxu0 %v7216_v21 }
  0xdb   : > { %981 = vmatprep.mubr.bf16.mxu0 %v7217_v22 }
  0xe2   : > { %982 = vmatmul.mubr.bf16.gmra.mxu0 %v7219_v23 }
  0xe3   : > { %989 = vmatprep.mubr.bf16.mxu0 %v7220_v24 }
  0xea   : > { %990 = vmatmul.mubr.bf16.gmra.mxu0 %v7222_v25 }
  0xeb   : > { %997 = vmatprep.mubr.bf16.mxu0 %v6358_v27 }
  0xf2   : > { %998 = vmatmul.mubr.bf16.gmra.mxu0 %v6357_v28 }
 0x112   : > { %v839_v29 = vpop.f32.mrf.mxu0 }
 0x114   : > { %v841_v30 = vpop.f32.mrf.mxu0 }
 0x116   : > { %v842_v31 = vpop.f32.mrf.mxu0 }
 0x117   : > { %v7714_v32 = vpack.c.bf16 %v842_v31, %v839_v29 }
 0x118   : > { %v844_v33 = vpop.f32.mrf.mxu0 }
 0x119   : > { %v1030_v35 = vshll.u32 %v7714_v32, 16  ;;  %v1231_v41 = vrot.slane %v7714_v32, 1  ;;  %v1028_v43 = vshrl.u32 %v7714_v32, 16 }
 0x11a   : > { %v847_v34 = vpop.f32.mrf.mxu0 }
 0x11b   : > { %v1032_v39 = vrot.slane %v1030_v35, 1 }
 0x11c   : > { %v849_v36 = vpop.f32.mrf.mxu0 }
 0x11d   : > { %v1033_v47 = vor.u32 %v1032_v39, %v1028_v43 }
 0x11e   : > { %v850_v37 = vpop.f32.mrf.mxu0 }
 0x11f   : > { %v7717_v38 = vpack.c.bf16 %v850_v37, %v847_v34  ;;  %v7225_v34 = vld [vmem:[%s10720_s2 + $0x8] sm:$0x3f]   ;;  %v7435_v37 = vmov 65535  }
 0x120   : > { %v852_v40 = vpop.f32.mrf.mxu0  ;;  %v2123_v39 = vsel %vm1692_vm4, 4294967295, %v7435_v37 }
 0x121   : > { %v1232_v42 = vrot.slane %v7717_v38, 1  ;;  %v1035_v44 = vshll.u32 %v7717_v38, 16  ;;  %v1039_v61 = vshrl.u32 %v7717_v38, 16  ;;  %v1463_v62 = vrot.slane %v7717_v38, 2 }
 0x122   : > { %v855_v45 = vpop.f32.mrf.mxu0  ;;  %v2124_v43 = vsel %vm1462_vm2, %v2123_v39, 0 }
 0x123   : > { %v1233_v46 = vsel %vm1230_vm0, %v1231_v41, %v1232_v42  ;;  %v1037_v48 = vrot.slane %v1035_v44, 1  ;;  %v1344_v8 = vrot.slane %v1039_v61, 1  ;;  %v1345_v9 = vrot.slane %v1035_v44, 2 }
 0x124   : > { %1268 = vrot.lane.b32.xlu1 %v1233_v46, %s7429_s28  ;;  %v857_v49 = vpop.f32.mrf.mxu0 }
 0x125   : > { %v1038_v50 = vsel %vm1026_vm1, %v1033_v47, %v1037_v48  ;;  %v1041_v7 = vor.u32 %v1039_v61, %v1037_v48  ;;  %v1346_v19 = vor.u32 %v1345_v9, %v1344_v8  ;;  %v2126_v47 = vand.u32 %v7225_v34, %v2124_v43 }
 0x126   : > { %1175 = vrot.lane.b32.xlu0 %v1038_v50, %s7430_s29  ;;  %v858_v51 = vpop.f32.mrf.mxu0 }
 0x127   : > { %v7727_v52 = vpack.c.bf16 %v858_v51, %v855_v45  ;;  %v7226_v51 = vld [vmem:[%s10720_s2] sm:$0xff]   ;;  %6906 = vmatprep.subr.bf16.mxu1 %v2126_v47 }
 0x128   : > { %v860_v53 = vpop.f32.mrf.mxu0  ;;  %6907 = vmatpush3.bf16.msra.mxu1 %v2126_v47 }
 0x129   : > { %v1234_v54 = vrot.slane %v7727_v52, 1  ;;  %v7731_v56 = vshll.u32 %v7727_v52, 16  ;;  %v7734_v57 = vshrl.u32 %v7727_v52, 16  ;;  %v1464_v59 = vrot.slane %v7727_v52, 2  ;;  %6908 = vmatprep.subr.bf16.mxu1 %v7226_v51 }
 0x12a   : > { %v863_v55 = vpop.f32.mrf.mxu0  ;;  %v1693_v36 = vrot.slane %v7727_v52, 3 }
 0x12b   : > { %v1235_v58 = vsel %vm1230_vm0, %v1232_v42, %v1234_v54  ;;  %v1045_v1 = vrot.slane %v7731_v56, 1  ;;  %v1347_v2 = vrot.slane %v7734_v57, 1  ;;  %v1348_v3 = vrot.slane %v7731_v56, 2 }
 0x12c   : > { %1307 = vrot.lane.b32.xlu0 %v1235_v58, %s7431_s30  ;;  %1270 = vrot.lane.b32.xlu1 %v1235_v58, %s7429_s28  ;;  %v865_v60 = vpop.f32.mrf.mxu0  ;;  %v1465_v5 = vsel %vm1462_vm2, %v1463_v62, %v1464_v59  ;;  %v1576_v49 = vrot.slane %v7734_v57, 2  ;;  %v1577_v50 = vrot.slane %v7731_v56, 3 }
 0x12d   : > { %v1046_v12 = vsel %vm1026_vm1, %v1041_v7, %v1045_v1  ;;  %v1349_v13 = vor.u32 %v1348_v3, %v1347_v2  ;;  %v1049_v27 = vor.u32 %v7734_v57, %v1045_v1  ;;  %6909 = vmatpush3.bf16.msra.mxu1 %v7226_v51 }
 0x12e   : > { %v866_v63 = vpop.f32.mrf.mxu0  ;;  %2815 = vmatprep.subr.bf16.mxu1 %v10734_v0 }
 0x12f   : > { %v7745_v4 = vpack.c.bf16 %v866_v63, %v863_v55  ;;  %v1350_v21 = vsel %vm1343_vm3, %v1346_v19, %v1349_v13 }
 0x130   : > { %1500 = vrot.lane.b32.xlu0 %v1465_v5, %s7432_s16  ;;  %v868_v6 = vpop.f32.mrf.mxu0 }
 0x131   : > { %v1236_v10 = vrot.slane %v7745_v4, 1  ;;  %v1466_v15 = vrot.slane %v7745_v4, 2  ;;  %v7756_v16 = vshll.u32 %v7745_v4, 16  ;;  %v7759_v17 = vshrl.u32 %v7745_v4, 16 }
 0x132   : > { %v871_v11 = vpop.f32.mrf.mxu0  ;;  %v1694_v31 = vrot.slane %v7745_v4, 3 }
 0x133   : > { %v1237_v14 = vsel %vm1230_vm0, %v1234_v54, %v1236_v10  ;;  %v1467_v22 = vsel %vm1462_vm2, %v1464_v59, %v1466_v15  ;;  %v1053_v23 = vrot.slane %v7756_v16, 1  ;;  %v1351_v24 = vrot.slane %v7759_v17, 1 }
 0x134   : > { %1177 = vrot.lane.b32.xlu0 %v1046_v12, %s7430_s29  ;;  %1309 = vrot.lane.b32.xlu1 %v1237_v14, %s7431_s30  ;;  %v873_v18 = vpop.f32.mrf.mxu0  ;;  %v1352_v25 = vrot.slane %v7756_v16, 2  ;;  %v1579_v41 = vrot.slane %v7759_v17, 2  ;;  %v1580_v42 = vrot.slane %v7756_v16, 3  ;;  %v1695_v44 = vsel %vm1692_vm4, %v1693_v36, %v1694_v31 }
 0x135   : > { %v1054_v30 = vsel %vm1026_vm1, %v1049_v27, %v1053_v23  ;;  %v1578_v59 = vor.u32 %v1577_v50, %v1576_v49  ;;  %v1057_v7 = vor.u32 %v7759_v17, %v1053_v23 }
 0x136   : > { %v874_v20 = vpop.f32.mrf.mxu0  ;;  %v7777_v33 = vor.u32 %v1352_v25, %v1351_v24  ;;  %v1581_v54 = vor.u32 %v1580_v42, %v1579_v41 }
 0x137   : > { %v7771_v29 = vpack.c.bf16 %v874_v20, %v871_v11 }
 0x138   : > { %1426 = vrot.lane.b32.xlu0 %v1350_v21, %s7433_s17  ;;  %1502 = vrot.lane.b32.xlu1 %v1467_v22, %s7432_s16  ;;  %v876_v26 = vpop.f32.mrf.mxu0  ;;  %v1354_v45 = vsel %vm1343_vm3, %v1349_v13, %v7777_v33  ;;  %v1582_v61 = vsel %vm1575_vm5, %v1578_v59, %v1581_v54 }
 0x139   : > { %v1468_v46 = vrot.slane %v7771_v29, 2  ;;  %v1238_v58 = vrot.slane %v7771_v29, 1  ;;  %v1059_v57 = vshll.u32 %v7771_v29, 16  ;;  %v1063_v56 = vshrl.u32 %v7771_v29, 16 }
 0x13a   : > { %v879_v28 = vpop.f32.mrf.mxu0  ;;  %v1696_v63 = vrot.slane %v7771_v29, 3 }
 0x13b   : > { %v1469_v55 = vsel %vm1462_vm2, %v1466_v15, %v1468_v46  ;;  %v1239_v1 = vsel %vm1230_vm0, %v1236_v10, %v1238_v58  ;;  %v1061_v2 = vrot.slane %v1059_v57, 1  ;;  %v1583_v3 = vrot.slane %v1063_v56, 2 }
 0x13c   : > { %1539 = vrot.lane.b32.xlu0 %v1467_v22, %s7434_s22  ;;  %1179 = vrot.lane.b32.xlu1 %v1054_v30, %s7430_s29  ;;  %v881_v35 = vpop.f32.mrf.mxu0  ;;  %v1584_v5 = vrot.slane %v1059_v57, 3  ;;  %v1697_v10 = vsel %vm1692_vm4, %v1694_v31, %v1696_v63  ;;  %v1356_v15 = vrot.slane %v1059_v57, 2 }
 0x13d   : > { %v1062_v11 = vsel %vm1026_vm1, %v1057_v7, %v1061_v2  ;;  %v1065_v37 = vor.u32 %v1063_v56, %v1061_v2 }
 0x13e   : > { %v882_v40 = vpop.f32.mrf.mxu0  ;;  %v1585_v12 = vor.u32 %v1584_v5, %v1583_v3 }
 0x13f   : > { %v7823_v9 = vpack.c.bf16 %v882_v40, %v879_v28 }
 0x140   : > { %1730 = vrot.lane.b32.xlu0 %v1695_v44, %s7436_s23  ;;  %1428 = vrot.lane.b32.xlu1 %v1354_v45, %s7433_s17  ;;  %v884_v48 = vpop.f32.mrf.mxu0  ;;  %v1586_v16 = vsel %vm1575_vm5, %v1581_v54, %v1585_v12 }
 0x141   : > { %v1240_v17 = vrot.slane %v7823_v9, 1  ;;  %v1470_v23 = vrot.slane %v7823_v9, 2  ;;  %v1067_v24 = vshll.u32 %v7823_v9, 16  ;;  %v1071_v25 = vshrl.u32 %v7823_v9, 16 }
 0x142   : > { %v7800_v53 = vpop.f32.mrf.mxu0  ;;  %v1698_v41 = vrot.slane %v7823_v9, 3 }
 0x143   : > { %v1241_v22 = vsel %vm1230_vm0, %v1238_v58, %v1240_v17  ;;  %v1471_v30 = vsel %vm1462_vm2, %v1468_v46, %v1470_v23  ;;  %v1069_v31 = vrot.slane %v1067_v24, 1  ;;  %v1359_v34 = vrot.slane %v1071_v25, 1 }
 0x144   : > { %1272 = vrot.lane.b32.xlu0 %v1237_v14, %s7429_s28  ;;  %1541 = vrot.lane.b32.xlu1 %v1469_v55, %s7434_s22  ;;  %v889_v60 = vpop.f32.mrf.mxu0  ;;  %v1355_v14 = vrot.slane %v1063_v56, 1  ;;  %v1360_v35 = vrot.slane %v1067_v24, 2  ;;  %v1587_v44 = vrot.slane %v1071_v25, 2  ;;  %v1588_v45 = vrot.slane %v1067_v24, 3 }
 0x145   : > { %v1699_v47 = vsel %vm1692_vm4, %v1696_v63, %v1698_v41 }
 0x146   : > { %v890_v62 = vpop.f32.mrf.mxu0  ;;  %v1357_v20 = vor.u32 %v1356_v15, %v1355_v14  ;;  %v1361_v42 = vor.u32 %v1360_v35, %v1359_v34  ;;  %v1589_v51 = vor.u32 %v1588_v45, %v1587_v44 }
 0x147   : > { %v7855_v40 = vpack.c.bf16 %v890_v62, %v7800_v53 }
 0x148   : > { %1656 = vrot.lane.b32.xlu0 %v1582_v61, %s7437_s26  ;;  %1274 = vrot.lane.b32.xlu1 %v1239_v1, %s7429_s28  ;;  %v892_v6 = vpop.f32.mrf.mxu0  ;;  %v1358_v27 = vsel %vm1343_vm3, %v7777_v33, %v1357_v20  ;;  %v1070_v33 = vsel %vm1026_vm1, %v1065_v37, %v1069_v31  ;;  %v1362_v48 = vsel %vm1343_vm3, %v1357_v20, %v1361_v42 }
 0x149   : > { %v1472_v49 = vrot.slane %v7855_v40, 2  ;;  %v1075_v58 = vshll.u32 %v7855_v40, 16  ;;  %v1079_v57 = vshrl.u32 %v7855_v40, 16  ;;  %v1590_v59 = vsel %vm1575_vm5, %v1585_v12, %v1589_v51 }
 0x14a   : > { %v7821_v8 = vpop.f32.mrf.mxu0  ;;  %v1700_v60 = vrot.slane %v7855_v40, 3  ;;  %v1073_v61 = vor.u32 %v1071_v25, %v1069_v31 }
 0x14b   : > { %v1473_v54 = vsel %vm1462_vm2, %v1470_v23, %v1472_v49  ;;  %v1591_v2 = vrot.slane %v1079_v57, 2  ;;  %v1592_v3 = vrot.slane %v1075_v58, 3  ;;  %v1363_v14 = vrot.slane %v1079_v57, 1 }
 0x14c   : > { %1732 = vrot.lane.b32.xlu0 %v1697_v10, %s7436_s23  ;;  %1181 = vrot.lane.b32.xlu1 %v1062_v11, %s7430_s29  ;;  %v897_v13 = vpop.f32.mrf.mxu0  ;;  %v1701_v10 = vsel %vm1692_vm4, %v1698_v41, %v1700_v60  ;;  %v1364_v15 = vrot.slane %v1075_v58, 2 }
 0x14d   : > { %v1593_v12 = vor.u32 %v1592_v3, %v1591_v2 }
 0x14e   : > { %v7829_v18 = vpop.f32.mrf.mxu0 }
 0x14f   : > { %v7885_v7 = vpack.c.bf16 %v7829_v18, %v7821_v8  ;;  %v1365_v18 = vor.u32 %v1364_v15, %v1363_v14 }
 0x150   : > { %1311 = vrot.lane.b32.xlu0 %v1239_v1, %s7431_s30  ;;  %1658 = vrot.lane.b32.xlu1 %v1586_v16, %s7437_s26  ;;  %v900_v19 = vpop.f32.mrf.mxu0  ;;  %v1077_v1 = vrot.slane %v1075_v58, 1 }
 0x151   : > { %v1244_v19 = vrot.slane %v7885_v7, 1  ;;  %v1083_v25 = vshll.u32 %v7885_v7, 16 }
 0x152   : > { %v7835_v21 = vpop.f32.mrf.mxu0  ;;  %v1078_v11 = vsel %vm1026_vm1, %v1073_v61, %v1077_v1  ;;  %v1081_v34 = vor.u32 %v1079_v57, %v1077_v1 }
 0x154   : > { %1504 = vrot.lane.b32.xlu0 %v1469_v55, %s7432_s16  ;;  %1313 = vrot.lane.b32.xlu1 %v1241_v22, %s7431_s30  ;;  %v905_v26 = vpop.f32.mrf.mxu0  ;;  %v1242_v55 = vrot.slane %v7855_v40, 1 }
 0x155   : > { %v1087_v26 = vshrl.u32 %v7885_v7, 16 }
 0x156   : > { %v7845_v28 = vpop.f32.mrf.mxu0  ;;  %v1243_v63 = vsel %vm1230_vm0, %v1240_v17, %v1242_v55  ;;  %v1594_v17 = vsel %vm1575_vm5, %v1589_v51, %v1593_v12  ;;  %v1245_v24 = vsel %vm1230_vm0, %v1242_v55, %v1244_v19  ;;  %v1596_v51 = vrot.slane %v1083_v25, 3 }
 0x157   : > { %v1367_v37 = vrot.slane %v1087_v26, 1  ;;  %v7911_v45 = vpack.c.bf16 %v7845_v28, %v7835_v21 }
 0x158   : > { %1430 = vrot.lane.b32.xlu0 %v1358_v27, %s7433_s17  ;;  %1506 = vrot.lane.b32.xlu1 %v1471_v30, %s7432_s16  ;;  %v908_v36 = vpop.f32.mrf.mxu0 }
 0x159   : > { %v1085_v36 = vrot.slane %v1083_v25, 1  ;;  %v1476_v21 = vrot.slane %v7911_v45, 2  ;;  %v1091_v1 = vshll.u32 %v7911_v45, 16 }
 0x15a   : > { %v7852_v39 = vpop.f32.mrf.mxu0 }
 0x15b   : > { %v1600_v15 = vrot.slane %v1091_v1, 3 }
 0x15c   : > { %1543 = vrot.lane.b32.xlu0 %v1471_v30, %s7434_s22  ;;  %1183 = vrot.lane.b32.xlu1 %v1070_v33, %s7430_s29  ;;  %v913_v43 = vpop.f32.mrf.mxu0  ;;  %v1366_v30 = vsel %vm1343_vm3, %v1361_v42, %v1365_v18  ;;  %v1368_v33 = vrot.slane %v1083_v25, 2  ;;  %v1086_v42 = vsel %vm1026_vm1, %v1081_v34, %v1085_v36  ;;  %v1372_v25 = vrot.slane %v1091_v1, 2 }
 0x15e   : > { %v7861_v46 = vpop.f32.mrf.mxu0 }
 0x160   : > { %1734 = vrot.lane.b32.xlu0 %v1699_v47, %s7436_s23  ;;  %1432 = vrot.lane.b32.xlu1 %v1362_v48, %s7433_s17  ;;  %v916_v50 = vpop.f32.mrf.mxu0  ;;  %v1702_v47 = vrot.slane %v7885_v7, 3  ;;  %v1369_v48 = vor.u32 %v1368_v33, %v1367_v37 }
 0x161   : > { %v1595_v50 = vrot.slane %v1087_v26, 2 }
 0x162   : > { %v7868_v53 = vpop.f32.mrf.mxu0  ;;  %v1703_v55 = vsel %vm1692_vm4, %v1700_v60, %v1702_v47  ;;  %v1370_v58 = vsel %vm1343_vm3, %v1365_v18, %v1369_v48  ;;  %v1095_v60 = vshrl.u32 %v7911_v45, 16 }
 0x164   : > { %1276 = vrot.lane.b32.xlu0 %v1241_v22, %s7429_s28  ;;  %1545 = vrot.lane.b32.xlu1 %v1473_v54, %s7434_s22  ;;  %v921_v56 = vpop.f32.mrf.mxu0  ;;  %v1474_v22 = vrot.slane %v7885_v7, 2  ;;  %v1599_v14 = vrot.slane %v1095_v60, 2 }
 0x165   : > { %v1597_v56 = vor.u32 %v1596_v51, %v1595_v50 }
 0x166   : > { %v7878_v62 = vpop.f32.mrf.mxu0  ;;  %v1475_v31 = vsel %vm1462_vm2, %v1472_v49, %v1474_v22 }
 0x167   : > { %v1598_v3 = vsel %vm1575_vm5, %v1593_v12, %v1597_v56  ;;  %v7939_v12 = vpack.c.bf16 %v7861_v46, %v7852_v39 }
 0x168   : > { %1660 = vrot.lane.b32.xlu0 %v1590_v59, %s7437_s26  ;;  %1278 = vrot.lane.b32.xlu1 %v1243_v63, %s7429_s28  ;;  %v924_v5 = vpop.f32.mrf.mxu0  ;;  %v1246_v59 = vrot.slane %v7911_v45, 1 }
 0x169   : > { %10773 = vst [vmem:[#allocation2_spill] sm:$0xff] %v7939_v12  ;;  %v1248_v39 = vrot.slane %v7939_v12, 1  ;;  %v1478_v34 = vrot.slane %v7939_v12, 2  ;;  %v1099_v37 = vshll.u32 %v7939_v12, 16  ;;  %v1103_v33 = vshrl.u32 %v7939_v12, 16 }
 0x16a   : > { %v927_v6 = vpop.f32.mrf.mxu0  ;;  %v1247_v5 = vsel %vm1230_vm0, %v1244_v19, %v1246_v59 }
 0x16b   : > { %v1101_v50 = vrot.slane %v1099_v37, 1  ;;  %v1375_v51 = vrot.slane %v1103_v33, 1 }
 0x16c   : > { %1736 = vrot.lane.b32.xlu0 %v1701_v10, %s7436_s23  ;;  %1185 = vrot.lane.b32.xlu1 %v1078_v11, %s7430_s29  ;;  %v929_v13 = vpop.f32.mrf.mxu0  ;;  %v1089_v10 = vor.u32 %v1087_v26, %v1085_v36  ;;  %v1249_v36 = vsel %vm1230_vm0, %v1246_v59, %v1248_v39 }
 0x16d   : > { %v1093_v13 = vrot.slane %v1091_v1, 1 }
 0x16e   : > { %v930_v16 = vpop.f32.mrf.mxu0 }
 0x16f   : > { %v7893_v20 = vpack.c.bf16 %v930_v16, %v927_v6  ;;  %v1704_v6 = vrot.slane %v7911_v45, 3  ;;  %v1094_v18 = vsel %vm1026_vm1, %v1089_v10, %v1093_v13 }
 0x170   : > { %1315 = vrot.lane.b32.xlu0 %v1243_v63, %s7431_s30  ;;  %1662 = vrot.lane.b32.xlu1 %v1594_v17, %s7437_s26  ;;  %v932_v8 = vpop.f32.mrf.mxu0  ;;  %v1477_v63 = vsel %vm1462_vm2, %v1474_v22, %v1476_v21  ;;  %v7943_v22 = vor.u32 %v1600_v15, %v1599_v14 }
 0x171   : > { %v1705_v19 = vsel %vm1692_vm4, %v1702_v47, %v1704_v6  ;;  %v1097_v47 = vor.u32 %v1095_v60, %v1093_v13 }
 0x172   : > { %v935_v23 = vpop.f32.mrf.mxu0 }
 0x174   : > { %1508 = vrot.lane.b32.xlu0 %v1473_v54, %s7432_s16  ;;  %1317 = vrot.lane.b32.xlu1 %v1245_v24, %s7431_s30  ;;  %v937_v27 = vpop.f32.mrf.mxu0 }
 0x175   : > { %v1602_v27 = vsel %vm1575_vm5, %v1597_v56, %v7943_v22  ;;  %v1706_v56 = vrot.slane %v7939_v12, 3 }
 0x176   : > { %v938_v35 = vpop.f32.mrf.mxu0 }
 0x177   : > { %v7905_v41 = vpack.c.bf16 %v938_v35, %v935_v23 }
 0x178   : > { %1434 = vrot.lane.b32.xlu0 %v1366_v30, %s7433_s17  ;;  %1510 = vrot.lane.b32.xlu1 %v1475_v31, %s7432_s16  ;;  %v940_v43 = vpop.f32.mrf.mxu0 }
 0x17a   : > { %v943_v44 = vpop.f32.mrf.mxu0 }
 0x17c   : > { %1547 = vrot.lane.b32.xlu0 %v1475_v31, %s7434_s22  ;;  %1187 = vrot.lane.b32.xlu1 %v1086_v42, %s7430_s29  ;;  %v945_v49 = vpop.f32.mrf.mxu0  ;;  %v1479_v42 = vsel %vm1462_vm2, %v1476_v21, %v1478_v34  ;;  %v1102_v21 = vsel %vm1026_vm1, %v1097_v47, %v1101_v50 }
 0x17e   : > { %v946_v54 = vpop.f32.mrf.mxu0 }
 0x17f   : > { %v7920_v28 = vpack.c.bf16 %v946_v54, %v943_v44  ;;  %v1376_v54 = vrot.slane %v1099_v37, 2 }
 0x180   : > { %1738 = vrot.lane.b32.xlu0 %v1703_v55, %s7436_s23  ;;  %1436 = vrot.lane.b32.xlu1 %v1370_v58, %s7433_s17  ;;  %v948_v57 = vpop.f32.mrf.mxu0 }
 0x182   : > { %v951_v61 = vpop.f32.mrf.mxu0 }
 0x184   : > { %1280 = vrot.lane.b32.xlu0 %v1245_v24, %s7429_s28  ;;  %1549 = vrot.lane.b32.xlu1 %v1477_v63, %s7434_s22  ;;  %v953_v2 = vpop.f32.mrf.mxu0  ;;  %v1371_v24 = vrot.slane %v1095_v60, 1 }
 0x185   : > { %v1707_v2 = vsel %vm1692_vm4, %v1704_v6, %v1706_v56 }
 0x186   : > { %v954_v11 = vpop.f32.mrf.mxu0  ;;  %v1373_v31 = vor.u32 %v1372_v25, %v1371_v24 }
 0x187   : > { %v7933_v16 = vpack.c.bf16 %v954_v11, %v951_v61  ;;  %v7974_v61 = vor.u32 %v1376_v54, %v1375_v51 }
 0x188   : > { %1664 = vrot.lane.b32.xlu0 %v1598_v3, %s7437_s26  ;;  %1282 = vrot.lane.b32.xlu1 %v1247_v5, %s7429_s28  ;;  %v956_v17 = vpop.f32.mrf.mxu0  ;;  %v1374_v44 = vsel %vm1343_vm3, %v1369_v48, %v1373_v31  ;;  %v7971_v48 = vpack.c.bf16 %v7878_v62, %v7868_v53  ;;  %v1603_v62 = vrot.slane %v1103_v33, 2 }
 0x189   : > { %v1378_v3 = vsel %vm1343_vm3, %v1373_v31, %v7974_v61 }
 0x18a   : > { %v959_v8 = vpop.f32.mrf.mxu0  ;;  %v1480_v53 = vrot.slane %v7971_v48, 2  ;;  %v1107_v6 = vshll.u32 %v7971_v48, 16  ;;  %v1111_v17 = vshrl.u32 %v7971_v48, 16  ;;  %v10738_v24 = vrot.slane %v7971_v48, 3 }
 0x18c   : > { %1740 = vrot.lane.b32.xlu0 %v1705_v19, %s7436_s23  ;;  %1189 = vrot.lane.b32.xlu1 %v1094_v18, %s7430_s29  ;;  %v961_v23 = vpop.f32.mrf.mxu0  ;;  %v1250_v18 = vrot.slane %v7971_v48, 1  ;;  %v1608_v31 = vrot.slane %v1107_v6, 3 }
 0x18e   : > { %v962_v26 = vpop.f32.mrf.mxu0 }
 0x18f   : > { %v7950_v46 = vpack.c.bf16 %v962_v26, %v959_v8  ;;  %v7999_v8 = vsel %vm1462_vm2, %v1478_v34, %v1480_v53  ;;  %v1380_v34 = vrot.slane %v1107_v6, 2 }
 0x190   : > { %1319 = vrot.lane.b32.xlu0 %v1247_v5, %s7431_s30  ;;  %1666 = vrot.lane.b32.xlu1 %v1602_v27, %s7437_s26  ;;  %v964_v30 = vpop.f32.mrf.mxu0  ;;  %v1604_v5 = vrot.slane %v1099_v37, 3 }
 0x191   : > { %v1607_v30 = vrot.slane %v1111_v17, 2 }
 0x192   : > { %v967_v35 = vpop.f32.mrf.mxu0  ;;  %v1605_v19 = vor.u32 %v1604_v5, %v1603_v62 }
 0x194   : > { %1512 = vrot.lane.b32.xlu0 %v1477_v63, %s7432_s16  ;;  %1321 = vrot.lane.b32.xlu1 %v1249_v36, %s7431_s30  ;;  %v969_v43 = vpop.f32.mrf.mxu0  ;;  %v1606_v37 = vsel %vm1575_vm5, %v7943_v22, %v1605_v19  ;;  %v1709_v22 = vsel %vm1692_vm4, %v1706_v56, %v10738_v24 }
 0x195   : > { %v1105_v43 = vor.u32 %v1103_v33, %v1101_v50 }
 0x196   : > { %v970_v49 = vpop.f32.mrf.mxu0  ;;  %v7978_v1 = vpop.permute.xlu1 %1268 }
 0x197   : > { %v7964_v55 = vpack.c.bf16 %v970_v49, %v967_v35  ;;  %v1379_v35 = vrot.slane %v1111_v17, 1 }
 0x198   : > { %1438 = vrot.lane.b32.xlu0 %v1374_v44, %s7433_s17  ;;  %1514 = vrot.lane.b32.xlu1 %v1479_v42, %s7432_s16  ;;  %v972_v58 = vpop.f32.mrf.mxu0  ;;  %v1176_v57 = vpop.permute.xlu0 %1175  ;;  %v1109_v44 = vrot.slane %v1107_v6, 1 }
 0x199   : > { %v8022_v58 = vor.u32 %v1608_v31, %v1607_v30  ;;  %v8025_v33 = vor.u32 %v1380_v34, %v1379_v35  ;;  %v1768_v56 = vsel %vm1766_vm6, %v7714_v32, %v1176_v57 }
 0x19a   : > { %v975_v59 = vpop.f32.mrf.mxu0  ;;  %v1110_v50 = vsel %vm1026_vm1, %v1105_v43, %v1109_v44 }
 0x19b   : > { %v1610_v32 = vsel %vm1575_vm5, %v1605_v19, %v8022_v58  ;;  %v1382_v6 = vsel %vm1343_vm3, %v7974_v61, %v8025_v33 }
 0x19c   : > { %1551 = vrot.lane.b32.xlu0 %v1479_v42, %s7434_s22  ;;  %1191 = vrot.lane.b32.xlu1 %v1102_v21, %s7430_s29  ;;  %v977_v63 = vpop.f32.mrf.mxu0  ;;  %v8030_v21 = vshll.u32 %v7893_v20, 16 }
 0x19d   : > { %v8033_v63 = vshrl.u32 %v7893_v20, 16 }
 0x19e   : > { %v7980_v60 = vpop.permute.xlu0 %1307  ;;  %v978_v10 = vpop.f32.mrf.mxu0 }
 0x19f   : > { %v7988_v11 = vpack.c.bf16 %v978_v10, %v975_v59  ;;  %v7990_v14 = vpop.permute.xlu1 %1270  ;;  %v10737_v59 = vrot.slane %v7893_v20, 2 }
 0x1a0   : > { %1742 = vrot.lane.b32.xlu0 %v1707_v2, %s7436_s23  ;;  %1440 = vrot.lane.b32.xlu1 %v1378_v3, %s7433_s17  ;;  %v980_v13 = vpop.f32.mrf.mxu0  ;;  %v8039_v3 = vor.u32 %v1111_v17, %v1109_v44 }
 0x1a1   : > { %v8066_v19 = vsel %vm1462_vm2, %v1480_v53, %v10737_v59 }
 0x1a2   : > { %v7992_v15 = vpop.permute.xlu0 %1500  ;;  %v983_v23 = vpop.f32.mrf.mxu0 }
 0x1a4   : > { %1284 = vrot.lane.b32.xlu0 %v1249_v36, %s7429_s28  ;;  %1553 = vrot.lane.b32.xlu1 %v7999_v8, %s7434_s22  ;;  %v985_v25 = vpop.f32.mrf.mxu0  ;;  %v1251_v36 = vsel %vm1230_vm0, %v1248_v39, %v1250_v18  ;;  %v10736_v39 = vrot.slane %v7893_v20, 1 }
 0x1a6   : > { %v1178_v26 = vpop.permute.xlu0 %1177  ;;  %v8006_v27 = vpop.permute.xlu1 %1309  ;;  %v8051_v57 = vsel %vm1230_vm0, %v1250_v18, %v10736_v39 }
 0x1a7   : > { %v986_v42 = vpop.f32.mrf.mxu0  ;;  %v1770_v31 = vsel %vm1766_vm6, %v7717_v38, %v1178_v26 }
 0x1a8   : > { %1668 = vrot.lane.b32.xlu0 %v1606_v37, %s7437_s26  ;;  %1286 = vrot.lane.b32.xlu1 %v1251_v36, %s7429_s28  ;;  %v8015_v47 = vpack.c.bf16 %v986_v42, %v983_v23  ;;  %v1805_v23 = vsel %vm1803_vm7, %v1768_v56, %v7978_v1  ;;  %v1384_v1 = vrot.slane %v8030_v21, 2 }
 0x1a9   : > { %v988_v49 = vpop.f32.mrf.mxu0  ;;  %v1842_v61 = vsel %vm1840_vm8, %v1805_v23, %v7980_v60 }
 0x1aa   : > { %v1427_v51 = vpop.permute.xlu0 %1426  ;;  %v8017_v54 = vpop.permute.xlu1 %1502  ;;  %v1411_v5 = vshrl.u32 %v8015_v47, 16  ;;  %v8057_v17 = vshll.u32 %v8015_v47, 16  ;;  %v10740_v35 = vrot.slane %v8015_v47, 2  ;;  %v1724_v34 = vrot.slane %v8015_v47, 3 }
 0x1ab   : > { %v991_v2 = vpop.f32.mrf.mxu0  ;;  %v10739_v60 = vrot.slane %v8015_v47, 1 }
 0x1ac   : > { %1744 = vrot.lane.b32.xlu0 %v1709_v22, %s7436_s23  ;;  %1193 = vrot.lane.b32.xlu1 %v1110_v50, %s7430_s29  ;;  %v1639_v43 = vrot.slane %v1411_v5, 2  ;;  %v1640_v38 = vrot.slane %v8057_v17, 3  ;;  %v1413_v50 = vrot.slane %v1411_v5, 1 }
 0x1ad   : > { %v993_v62 = vpop.f32.mrf.mxu0 }
 0x1ae   : > { %v8042_v10 = vpop.permute.xlu0 %1539  ;;  %v8044_v13 = vpop.permute.xlu1 %1179 }
 0x1af   : > { %v994_v30 = vpop.f32.mrf.mxu0 }
 0x1b0   : > { %1323 = vrot.lane.b32.xlu0 %v1251_v36, %s7431_s30  ;;  %1670 = vrot.lane.b32.xlu1 %v1610_v32, %s7437_s26  ;;  %v1024_v53 = vpack.c.bf16 %v994_v30, %v991_v2  ;;  %v1414_v2 = vrot.slane %v8057_v17, 2  ;;  %v1879_v32 = vsel %vm1877_vm9, %v1842_v61, %v1427_v51 }
 0x1b1   : > { %v996_v37 = vpop.f32.mrf.mxu0 }
 0x1b2   : > { %v1731_v44 = vpop.permute.xlu0 %1730  ;;  %v1429_v42 = vpop.permute.xlu1 %1428  ;;  %v1305_v26 = vrot.slane %v1024_v53, 1  ;;  %v1498_v36 = vrot.slane %v1024_v53, 2  ;;  %v1418_v49 = vshrl.u32 %v1024_v53, 16  ;;  %v1421_v56 = vshll.u32 %v1024_v53, 16 }
 0x1b3   : > { %v999_v22 = vpop.f32.mrf.mxu0  ;;  %v1726_v62 = vrot.slane %v1024_v53, 3 }
 0x1b4   : > { %1516 = vrot.lane.b32.xlu0 %v7999_v8, %s7432_s16  ;;  %1325 = vrot.lane.b32.xlu1 %v8051_v57, %s7431_s30  ;;  %v1025_v23 = vpack.c.bf16 %v999_v22, %v999_v22  ;;  %v8090_v30 = vsel %vm1230_vm0, %v10739_v60, %v1305_v26  ;;  %v1420_v37 = vrot.slane %v1418_v49, 1  ;;  %v8095_v53 = vsel %vm1462_vm2, %v10740_v35, %v1498_v36 }
 0x1b5   : > { %v1001_v5 = vpop.f32.mrf.mxu0  ;;  %10774 = vst [vmem:[#allocation3_spill] sm:$0xff] %v8095_v53  ;;  %v1423_v51 = vrot.slane %v1421_v56, 2  ;;  %v1643_v61 = vrot.slane %v1418_v49, 2  ;;  %v1644_v0 = vrot.slane %v1421_v56, 3  ;;  %v8102_v26 = vsel %vm1692_vm4, %v1724_v34, %v1726_v62 }
 0x1b6   : > { %v8097_v8 = vpop.permute.xlu0 %1272  ;;  %v1542_v39 = vpop.permute.xlu1 %1541  ;;  %v1648_v59 = vshrl.u32 %v1025_v23, 16  ;;  %v1651_v22 = vshll.u32 %v1025_v23, 16  ;;  %v1537_v24 = vrot.slane %v1025_v23, 2  ;;  %v8104_v5 = vor.u32 %v1640_v38, %v1639_v43 }
 0x1b7   : > { %v8106_v60 = vor.u32 %v1414_v2, %v1413_v50  ;;  %v1002_v35 = vpop.f32.mrf.mxu0  ;;  %v1424_v25 = vor.u32 %v1423_v51, %v1420_v37  ;;  %v1645_v18 = vor.u32 %v1644_v0, %v1643_v61  ;;  %v1728_v53 = vrot.slane %v1025_v23, 3 }
 0x1b8   : > { %1442 = vrot.lane.b32.xlu0 %v1382_v6, %s7433_s17  ;;  %1518 = vrot.lane.b32.xlu1 %v8066_v19, %s7432_s16  ;;  %v1650_v49 = vrot.slane %v1648_v59, 2  ;;  %v1653_v56 = vrot.slane %v1651_v22, 3  ;;  %v8112_v12 = vsel %vm1462_vm2, %v1498_v36, %v1537_v24  ;;  %v1916_v43 = vsel %vm1914_vm10, %v1879_v32, %v7992_v15 }
 0x1b9   : > { %v1003_v38 = vpop.f32.mrf.mxu0  ;;  %v8118_v35 = vsel %vm1343_vm3, %v8106_v60, %v1424_v25  ;;  %v8122_v0 = vsel %vm1575_vm5, %v8104_v5, %v1645_v18  ;;  %v1807_v59 = vsel %vm1803_vm7, %v1770_v31, %v7990_v14  ;;  %v1953_v24 = vsel %vm1951_vm11, %v1916_v43, %v8042_v10 }
 0x1ba   : > { %v1657_v6 = vpop.permute.xlu0 %1656  ;;  %v8128_v36 = vpop.permute.xlu1 %1274  ;;  %v1654_v15 = vor.u32 %v1653_v56, %v1650_v49  ;;  %v8131_v50 = vsel %vm1692_vm4, %v1726_v62, %v1728_v53  ;;  %v10775_v2 = vrot.slane %v8030_v21, 1  ;;  %v1710_v23 = vrot.slane %v7893_v20, 3 }
 0x1bb   : > { %v1990_v25 = vsel %vm1988_vm12, %v1953_v24, %v1657_v6  ;;  %v10776_v14 = vrot.slane %v8033_v63, 1  ;;  %v1844_v37 = vsel %vm1840_vm8, %v1807_v59, %v8006_v27  ;;  %v1611_v51 = vrot.slane %v8033_v63, 2 }
 0x1bc   : > { %v1118_v32 = vsel %vm1026_vm1, %v8039_v3, %v10775_v2  ;;  %1555 = vrot.lane.b32.xlu0 %v8066_v19, %s7434_s22  ;;  %v2027_v10 = vsel %vm2025_vm13, %v1990_v25, %v1731_v44  ;;  %v8148_v62 = vsel %vm1575_vm5, %v1645_v18, %v1654_v15  ;;  %v1881_v3 = vsel %vm1877_vm9, %v1844_v37, %v1429_v42 }
 0x1bd   : > { %v8141_v31 = vor.u32 %v1384_v1, %v10776_v14  ;;  %1195 = vrot.lane.b32.xlu1 %v1118_v32, %s7430_s29  ;;  %6910 = vmatprep.mubr.msk.bf16.mxu1 %vm2084_vm14, %v2027_v10  ;;  %v1612_v19 = vrot.slane %v8030_v21, 3  ;;  %v10777_v61 = vrot.slane %v7971_v48, 3  ;;  %v1484_v27 = vrot.slane %v7905_v41, 2 }
 0x1be   : > { %v1733_v53 = vpop.permute.xlu0 %1732  ;;  %v8154_v1 = vpop.permute.xlu1 %1181  ;;  %v1918_v42 = vsel %vm1914_vm10, %v1881_v3, %v8017_v54  ;;  %v1254_v38 = vrot.slane %v7905_v41, 1  ;;  %v1123_v6 = vshll.u32 %v7905_v41, 16  ;;  %v1127_v15 = vshrl.u32 %v7905_v41, 16 }
 0x1bf   : > { %v1711_v44 = vsel %vm1692_vm4, %v10777_v61, %v1710_v23  ;;  %v1386_v18 = vsel %vm1343_vm3, %v8025_v33, %v8141_v31  ;;  %v1955_v22 = vsel %vm1951_vm11, %v1918_v42, %v1542_v39  ;;  %v1613_v43 = vor.u32 %v1612_v19, %v1611_v51 }
 0x1c0   : > { %1746 = vrot.lane.b32.xlu0 %v1711_v44, %s7436_s23  ;;  %v10778_v33 = vrot.slane %v7893_v20, 2  ;;  %v1712_v32 = vrot.slane %v7905_v41, 3  ;;  %v10779_v14 = vrot.slane %v8030_v21, 1  ;;  %v10780_v37 = vrot.slane %v7893_v20, 1 }
 0x1c1   : > { %1444 = vrot.lane.b32.xlu1 %v1386_v18, %s7433_s17  ;;  %v1614_v2 = vsel %vm1575_vm5, %v8022_v58, %v1613_v43  ;;  %v1125_v3 = vrot.slane %v1123_v6, 1  ;;  %v1615_v51 = vrot.slane %v1127_v15, 2  ;;  %v1387_v42 = vrot.slane %v1127_v15, 1 }
 0x1c2   : > { %v1312_v49 = vpop.permute.xlu0 %1311  ;;  %v1659_v56 = vpop.permute.xlu1 %1658  ;;  %v1485_v24 = vsel %vm1462_vm2, %v10778_v33, %v1484_v27  ;;  %v1121_v10 = vor.u32 %v8033_v63, %v10779_v14  ;;  %v1713_v58 = vsel %vm1692_vm4, %v1710_v23, %v1712_v32  ;;  %v1772_v14 = vsel %vm1766_vm6, %v7727_v52, %v8044_v13 }
 0x1c3   : > { %v1992_v59 = vsel %vm1988_vm12, %v1955_v22, %v1659_v56  ;;  %v1388_v22 = vrot.slane %v1123_v6, 2 }
 0x1c4   : > { %1288 = vrot.lane.b32.xlu0 %v8051_v57, %s7429_s28  ;;  %v2029_v54 = vsel %vm2025_vm13, %v1992_v59, %v1733_v53  ;;  %v1255_v57 = vsel %vm1230_vm0, %v10780_v37, %v1254_v38  ;;  %v1616_v53 = vrot.slane %v1123_v6, 3  ;;  %v1126_v21 = vsel %vm1026_vm1, %v1121_v10, %v1125_v3 }
 0x1c5   : > { %1557 = vrot.lane.b32.xlu1 %v1485_v24, %s7434_s22  ;;  %6911 = vmatmul.mubr.msk.bf16.vlgmr.msra.gmra.mxu1 %vm2084_vm14, %v2029_v54  ;;  %v1256_v59 = vrot.slane %v7920_v28, 1  ;;  %v1389_v54 = vor.u32 %v1388_v22, %v1387_v42  ;;  %v1135_v10 = vshrl.u32 %v7920_v28, 16  ;;  %v1809_v37 = vsel %vm1803_vm7, %v1772_v14, %v8097_v8 }
 0x1c6   : > { %v1505_v39 = vpop.permute.xlu0 %1504  ;;  %v1314_v25 = vpop.permute.xlu1 %1313  ;;  %v8199_v63 = vor.u32 %v1616_v53, %v1615_v51  ;;  %v1129_v53 = vor.u32 %v1127_v15, %v1125_v3  ;;  %v1714_v3 = vrot.slane %v7920_v28, 3 }
 0x1c7   : > { %v1257_v6 = vsel %vm1230_vm0, %v1254_v38, %v1256_v59  ;;  %v1390_v38 = vsel %vm1343_vm3, %v8141_v31, %v1389_v54  ;;  %v1391_v42 = vrot.slane %v1135_v10, 1 }
 0x1c8   : > { %1672 = vrot.lane.b32.xlu0 %v1614_v2, %s7437_s26  ;;  %v1618_v56 = vsel %vm1575_vm5, %v1613_v43, %v8199_v63  ;;  %v1486_v2 = vrot.slane %v7920_v28, 2  ;;  %v1131_v43 = vshll.u32 %v7920_v28, 16 }
 0x1c9   : > { %1290 = vrot.lane.b32.xlu1 %v1255_v57, %s7429_s28 }
 0x1ca   : > { %v1431_v19 = vpop.permute.xlu0 %1430  ;;  %v8193_v61 = vpop.permute.xlu1 %1506  ;;  %v1392_v8 = vrot.slane %v1131_v43, 2 }
 0x1cc   : > { %1748 = vrot.lane.b32.xlu0 %v1713_v58, %s7436_s23  ;;  %v1487_v58 = vsel %vm1462_vm2, %v1484_v27, %v1486_v2 }
 0x1cd   : > { %1197 = vrot.lane.b32.xlu1 %v1126_v21, %s7430_s29  ;;  %v1133_v21 = vrot.slane %v1131_v43, 1 }
 0x1ce   : > { %v1544_v44 = vpop.permute.xlu0 %1543  ;;  %v8203_v18 = vpop.permute.xlu1 %1183 }
 0x1cf   : > { %v1134_v15 = vsel %vm1026_vm1, %v1129_v53, %v1133_v21 }
 0x1d0   : > { %1327 = vrot.lane.b32.xlu0 %v1255_v57, %s7431_s30  ;;  %v1846_v57 = vsel %vm1840_vm8, %v1809_v37, %v1312_v49  ;;  %v1774_v49 = vsel %vm1766_vm6, %v7745_v4, %v8154_v1 }
 0x1d1   : > { %1674 = vrot.lane.b32.xlu1 %v1618_v56, %s7437_s26  ;;  %v1883_v51 = vsel %vm1877_vm9, %v1846_v57, %v1431_v19  ;;  %v8242_v56 = vor.u32 %v1392_v8, %v1391_v42  ;;  %v1811_v14 = vsel %vm1803_vm7, %v1774_v49, %v8128_v36  ;;  %v1619_v57 = vrot.slane %v1135_v10, 2 }
 0x1d2   : > { %v1735_v23 = vpop.permute.xlu0 %1734  ;;  %v1433_v33 = vpop.permute.xlu1 %1432  ;;  %v1848_v1 = vsel %vm1840_vm8, %v1811_v14, %v1314_v25  ;;  %v1715_v36 = vsel %vm1692_vm4, %v1712_v32, %v1714_v3  ;;  %v1258_v42 = vrot.slane %v7933_v16, 1  ;;  %v1139_v8 = vshll.u32 %v7933_v16, 16 }
 0x1d3   : > { %v1143_v49 = vshrl.u32 %v7933_v16, 16 }
 0x1d4   : > { %1520 = vrot.lane.b32.xlu0 %v1485_v24, %s7432_s16  ;;  %v1920_v24 = vsel %vm1914_vm10, %v1883_v51, %v1505_v39  ;;  %v1885_v39 = vsel %vm1877_vm9, %v1848_v1, %v1433_v33  ;;  %v1620_v51 = vrot.slane %v1131_v43, 3  ;;  %v1624_v14 = vrot.slane %v1139_v8, 3 }
 0x1d5   : > { %1329 = vrot.lane.b32.xlu1 %v1257_v6, %s7431_s30  ;;  %v1957_v19 = vsel %vm1951_vm11, %v1920_v24, %v1544_v44  ;;  %v1922_v25 = vsel %vm1914_vm10, %v1885_v39, %v8193_v61 }
 0x1d6   : > { %v8225_v52 = vpop.permute.xlu0 %1276  ;;  %v1546_v13 = vpop.permute.xlu1 %1545 }
 0x1d7   : > { %v1959_v33 = vsel %vm1951_vm11, %v1922_v25, %v1546_v13 }
 0x1d8   : > { %1446 = vrot.lane.b32.xlu0 %v1390_v38, %s7433_s17  ;;  %v1394_v38 = vsel %vm1343_vm3, %v1389_v54, %v8242_v56 }
 0x1d9   : > { %1522 = vrot.lane.b32.xlu1 %v1487_v58, %s7432_s16 }
 0x1da   : > { %v1661_v22 = vpop.permute.xlu0 %1660  ;;  %v8237_v31 = vpop.permute.xlu1 %1278 }
 0x1db   : > { %v1994_v27 = vsel %vm1988_vm12, %v1957_v19, %v1661_v22  ;;  %v1716_v22 = vrot.slane %v7933_v16, 3 }
 0x1dc   : > { %1559 = vrot.lane.b32.xlu0 %v1487_v58, %s7434_s22  ;;  %v2031_v4 = vsel %vm2025_vm13, %v1994_v27, %v1735_v23  ;;  %v1488_v23 = vrot.slane %v7933_v16, 2  ;;  %v1621_v58 = vor.u32 %v1620_v51, %v1619_v57  ;;  %v1259_v27 = vsel %vm1230_vm0, %v1256_v59, %v1258_v42 }
 0x1dd   : > { %1199 = vrot.lane.b32.xlu1 %v1134_v15, %s7430_s29  ;;  %6914 = vmatprep.mubr.msk.bf16.mxu1 %vm2084_vm14, %v2031_v4  ;;  %v1141_v15 = vrot.slane %v1139_v8, 1  ;;  %v1396_v57 = vrot.slane %v1139_v8, 2  ;;  %v1151_v8 = vshrl.u32 %v7950_v46, 16 }
 0x1de   : > { %v1737_v44 = vpop.permute.xlu0 %1736  ;;  %v8252_v37 = vpop.permute.xlu1 %1185  ;;  %v1489_v54 = vsel %vm1462_vm2, %v1486_v2, %v1488_v23  ;;  %v1622_v19 = vsel %vm1575_vm5, %v8199_v63, %v1621_v58  ;;  %v1137_v2 = vor.u32 %v1135_v10, %v1133_v21  ;;  %v1717_v63 = vsel %vm1692_vm4, %v1714_v3, %v1716_v22 }
 0x1e0   : > { %1750 = vrot.lane.b32.xlu0 %v1715_v36, %s7436_s23  ;;  %v1142_v10 = vsel %vm1026_vm1, %v1137_v2, %v1141_v15  ;;  %v1260_v36 = vrot.slane %v7950_v46, 1 }
 0x1e1   : > { %1448 = vrot.lane.b32.xlu1 %v1394_v38, %s7433_s17 }
 0x1e2   : > { %v1316_v53 = vpop.permute.xlu0 %1315  ;;  %v1663_v43 = vpop.permute.xlu1 %1662 }
 0x1e3   : > { %v1996_v32 = vsel %vm1988_vm12, %v1959_v33, %v1663_v43  ;;  %v1490_v33 = vrot.slane %v7950_v46, 2  ;;  %v1776_v43 = vsel %vm1766_vm6, %v7771_v29, %v8203_v18 }
 0x1e4   : > { %1292 = vrot.lane.b32.xlu0 %v1257_v6, %s7429_s28  ;;  %v2033_v61 = vsel %vm2025_vm13, %v1996_v32, %v1737_v44  ;;  %v1623_v6 = vrot.slane %v1143_v49, 2  ;;  %v1395_v44 = vrot.slane %v1143_v49, 1  ;;  %v1261_v32 = vsel %vm1230_vm0, %v1258_v42, %v1260_v36 }
 0x1e5   : > { %1561 = vrot.lane.b32.xlu1 %v1489_v54, %s7434_s22  ;;  %6915 = vmatmul.mubr.msk.bf16.gmra.mxu1 %vm2084_vm14, %v2033_v61  ;;  %v1813_v61 = vsel %vm1803_vm7, %v1776_v43, %v8225_v52  ;;  %v1627_v43 = vrot.slane %v1151_v8, 2 }
 0x1e6   : > { %v1509_v13 = vpop.permute.xlu0 %1508  ;;  %v1318_v24 = vpop.permute.xlu1 %1317  ;;  %v8288_v21 = vor.u32 %v1624_v14, %v1623_v6  ;;  %v1397_v25 = vor.u32 %v1396_v57, %v1395_v44  ;;  %v1491_v6 = vsel %vm1462_vm2, %v1488_v23, %v1490_v33 }
 0x1e8   : > { %1676 = vrot.lane.b32.xlu0 %v1622_v19, %s7437_s26  ;;  %v1626_v51 = vsel %vm1575_vm5, %v1621_v58, %v8288_v21  ;;  %v1147_v58 = vshll.u32 %v7950_v46, 16  ;;  %v1850_v19 = vsel %vm1840_vm8, %v1813_v61, %v1316_v53  ;;  %v1398_v42 = vsel %vm1343_vm3, %v8242_v56, %v1397_v25 }
 0x1e9   : > { %1294 = vrot.lane.b32.xlu1 %v1259_v27, %s7429_s28  ;;  %v1778_v53 = vsel %vm1766_vm6, %v7823_v9, %v8252_v37 }
 0x1ea   : > { %v1435_v4 = vpop.permute.xlu0 %1434  ;;  %v8282_v1 = vpop.permute.xlu1 %1510  ;;  %v1149_v14 = vrot.slane %v1147_v58, 1  ;;  %v1400_v52 = vrot.slane %v1147_v58, 2  ;;  %v1815_v57 = vsel %vm1803_vm7, %v1778_v53, %v8237_v31  ;;  %v1628_v61 = vrot.slane %v1147_v58, 3 }
 0x1eb   : > { %v1887_v2 = vsel %vm1877_vm9, %v1850_v19, %v1435_v4  ;;  %v1852_v37 = vsel %vm1840_vm8, %v1815_v57, %v1318_v24 }
 0x1ec   : > { %1752 = vrot.lane.b32.xlu0 %v1717_v63, %s7436_s23  ;;  %v1399_v63 = vrot.slane %v1151_v8, 1 }
 0x1ed   : > { %1201 = vrot.lane.b32.xlu1 %v1142_v10, %s7430_s29 }
 0x1ee   : > { %v1548_v59 = vpop.permute.xlu0 %1547  ;;  %v8292_v39 = vpop.permute.xlu1 %1187  ;;  %v8331_v44 = vor.u32 %v1400_v52, %v1399_v63  ;;  %v8361_v63 = vshrl.u32 %v7964_v55, 16 }
 0x1f0   : > { %1331 = vrot.lane.b32.xlu0 %v1259_v27, %s7431_s30  ;;  %v1145_v27 = vor.u32 %v1143_v49, %v1141_v15  ;;  %v1718_v15 = vrot.slane %v7950_v46, 3  ;;  %v1402_v19 = vsel %vm1343_vm3, %v1397_v25, %v8331_v44 }
 0x1f1   : > { %1678 = vrot.lane.b32.xlu1 %v1626_v51, %s7437_s26 }
 0x1f2   : > { %v1739_v3 = vpop.permute.xlu0 %1738  ;;  %v1437_v38 = vpop.permute.xlu1 %1436  ;;  %v1150_v49 = vsel %vm1026_vm1, %v1145_v27, %v1149_v14  ;;  %v1719_v31 = vsel %vm1692_vm4, %v1716_v22, %v1718_v15  ;;  %v1262_v27 = vrot.slane %v7964_v55, 1 }
 0x1f4   : > { %1524 = vrot.lane.b32.xlu0 %v1489_v54, %s7432_s16  ;;  %v1924_v54 = vsel %vm1914_vm10, %v1887_v2, %v1509_v13  ;;  %v1889_v13 = vsel %vm1877_vm9, %v1852_v37, %v1437_v38  ;;  %v1403_v37 = vrot.slane %v8361_v63, 1 }
 0x1f5   : > { %1333 = vrot.lane.b32.xlu1 %v1261_v32, %s7431_s30  ;;  %v1961_v4 = vsel %vm1951_vm11, %v1924_v54, %v1548_v59  ;;  %v1926_v24 = vsel %vm1914_vm10, %v1889_v13, %v8282_v1  ;;  %v1153_v54 = vor.u32 %v1151_v8, %v1149_v14 }
 0x1f6   : > { %v8314_v29 = vpop.permute.xlu0 %1280  ;;  %v1550_v18 = vpop.permute.xlu1 %1549 }
 0x1f7   : > { %v1963_v38 = vsel %vm1951_vm11, %v1926_v24, %v1550_v18 }
 0x1f8   : > { %1450 = vrot.lane.b32.xlu0 %v1398_v42, %s7433_s17  ;;  %v1629_v42 = vor.u32 %v1628_v61, %v1627_v43  ;;  %v1163_v43 = vshll.u32 %v7988_v11, 16  ;;  %v1167_v61 = vshrl.u32 %v7988_v11, 16 }
 0x1f9   : > { %1526 = vrot.lane.b32.xlu1 %v1491_v6, %s7432_s16 }
 0x1fa   : > { %v1665_v10 = vpop.permute.xlu0 %1664  ;;  %v8326_v56 = vpop.permute.xlu1 %1282  ;;  %v1630_v53 = vsel %vm1575_vm5, %v8288_v21, %v1629_v42 }
 0x1fb   : > { %v1998_v23 = vsel %vm1988_vm12, %v1961_v4, %v1665_v10  ;;  %v1263_v4 = vsel %vm1230_vm0, %v1260_v36, %v1262_v27  ;;  %v1631_v10 = vrot.slane %v8361_v63, 2 }
 0x1fc   : > { %1563 = vrot.lane.b32.xlu0 %v1491_v6, %s7434_s22  ;;  %v2035_v9 = vsel %vm2025_vm13, %v1998_v23, %v1739_v3  ;;  %v1492_v3 = vrot.slane %v7964_v55, 2  ;;  %v8358_v6 = vshll.u32 %v7964_v55, 16 }
 0x1fd   : > { %1203 = vrot.lane.b32.xlu1 %v1150_v49, %s7430_s29  ;;  %6918 = vmatprep.mubr.msk.bf16.mxu1 %vm2084_vm14, %v2035_v9 }
 0x1fe   : > { %v1741_v59 = vpop.permute.xlu0 %1740  ;;  %v8341_v51 = vpop.permute.xlu1 %1189  ;;  %v1493_v25 = vsel %vm1462_vm2, %v1490_v33, %v1492_v3  ;;  %v1720_v33 = vrot.slane %v7964_v55, 3  ;;  %v1632_v23 = vrot.slane %v8358_v6, 3  ;;  %v1404_v13 = vrot.slane %v8358_v6, 2 }
 0x200   : > { %1754 = vrot.lane.b32.xlu0 %v1719_v31, %s7436_s23  ;;  %v1721_v21 = vsel %vm1692_vm4, %v1718_v15, %v1720_v33  ;;  %v8382_v14 = vor.u32 %v1632_v23, %v1631_v10  ;;  %v1264_v15 = vrot.slane %v7988_v11, 1  ;;  %v1405_v24 = vor.u32 %v1404_v13, %v1403_v37 }
 0x201   : > { %1452 = vrot.lane.b32.xlu1 %v1402_v19, %s7433_s17 }
 0x202   : > { %v1320_v2 = vpop.permute.xlu0 %1319  ;;  %v1667_v58 = vpop.permute.xlu1 %1666 }
 0x203   : > { %v2000_v22 = vsel %vm1988_vm12, %v1963_v38, %v1667_v58  ;;  %v1494_v38 = vrot.slane %v7988_v11, 2  ;;  %v1780_v58 = vsel %vm1766_vm6, %v7855_v40, %v8292_v39 }
 0x204   : > { %1296 = vrot.lane.b32.xlu0 %v1261_v32, %s7429_s28  ;;  %v2037_v1 = vsel %vm2025_vm13, %v2000_v22, %v1741_v59  ;;  %v1157_v32 = vrot.slane %v8358_v6, 1  ;;  %v1634_v59 = vsel %vm1575_vm5, %v1629_v42, %v8382_v14  ;;  %v8404_v42 = vsel %vm1230_vm0, %v1262_v27, %v1264_v15 }
 0x205   : > { %1565 = vrot.lane.b32.xlu1 %v1493_v25, %s7434_s22  ;;  %6919 = vmatmul.mubr.msk.bf16.gmra.mxu1 %vm2084_vm14, %v2037_v1  ;;  %v1407_v22 = vrot.slane %v1167_v61, 1  ;;  %v1408_v6 = vrot.slane %v1163_v43, 2  ;;  %v1817_v1 = vsel %vm1803_vm7, %v1780_v58, %v8314_v29  ;;  %v1406_v27 = vsel %vm1343_vm3, %v8331_v44, %v1405_v24 }
 0x206   : > { %v1513_v18 = vpop.permute.xlu0 %1512  ;;  %v1322_v52 = vpop.permute.xlu1 %1321  ;;  %v1158_v8 = vsel %vm1026_vm1, %v1153_v54, %v1157_v32  ;;  %v1782_v29 = vsel %vm1766_vm6, %v7885_v7, %v8341_v51  ;;  %v1636_v58 = vrot.slane %v1163_v43, 3 }
 0x207   : > { %v8418_v10 = vor.u32 %v1408_v6, %v1407_v22  ;;  %v10781_v22 = vrot.slane %v8015_v47, 2 }
 0x208   : > { %1680 = vrot.lane.b32.xlu0 %v1630_v53, %s7437_s26  ;;  %v1854_v53 = vsel %vm1840_vm8, %v1817_v1, %v1320_v2 }
 0x209   : > { %1298 = vrot.lane.b32.xlu1 %v1263_v4, %s7429_s28 }
 0x20a   : > { %v1439_v49 = vpop.permute.xlu0 %1438  ;;  %v1515_v57 = vpop.permute.xlu1 %1514 }
 0x20b   : > { %v1891_v54 = vsel %vm1877_vm9, %v1854_v53, %v1439_v49  ;;  %v1173_v53 = vrot.slane %v8057_v17, 1 }
 0x20c   : > { %1756 = vrot.lane.b32.xlu0 %v1721_v21, %s7436_s23  ;;  %v1928_v2 = vsel %vm1914_vm10, %v1891_v54, %v1513_v18  ;;  %v1722_v21 = vrot.slane %v7988_v11, 3  ;;  %v1161_v18 = vor.u32 %v8361_v63, %v1157_v32 }
 0x20d   : > { %1205 = vrot.lane.b32.xlu1 %v1158_v8, %s7430_s29  ;;  %v1819_v8 = vsel %vm1803_vm7, %v1782_v29, %v8326_v56 }
 0x20e   : > { %v1552_v36 = vpop.permute.xlu0 %1551  ;;  %v8386_v9 = vpop.permute.xlu1 %1191  ;;  %v1856_v51 = vsel %vm1840_vm8, %v1819_v8, %v1322_v52  ;;  %v1723_v56 = vsel %vm1692_vm4, %v1720_v33, %v1722_v21  ;;  %v1725_v33 = vsel %vm1692_vm4, %v1722_v21, %v1724_v34  ;;  %v1416_v8 = vsel %vm1343_vm3, %v8418_v10, %v8106_v60 }
 0x210   : > { %1335 = vrot.lane.b32.xlu0 %v1263_v4, %s7431_s30  ;;  %v1495_v4 = vsel %vm1462_vm2, %v1492_v3, %v1494_v38  ;;  %v1410_v3 = vsel %vm1343_vm3, %v1405_v24, %v8418_v10  ;;  %v1635_v24 = vrot.slane %v1167_v61, 2 }
 0x211   : > { %1682 = vrot.lane.b32.xlu1 %v1634_v59, %s7437_s26  ;;  %v1165_v59 = vrot.slane %v1163_v43, 1 }
 0x212   : > { %v1743_v31 = vpop.permute.xlu0 %1742  ;;  %v1441_v19 = vpop.permute.xlu1 %1440  ;;  %v1637_v6 = vor.u32 %v1636_v58, %v1635_v24 }
 0x213   : > { %v1166_v43 = vsel %vm1026_vm1, %v1161_v18, %v1165_v59 }
 0x214   : > { %1528 = vrot.lane.b32.xlu0 %v1493_v25, %s7432_s16  ;;  %v1965_v25 = vsel %vm1951_vm11, %v1928_v2, %v1552_v36  ;;  %v1893_v36 = vsel %vm1877_vm9, %v1856_v51, %v1441_v19 }
 0x215   : > { %1337 = vrot.lane.b32.xlu1 %v8404_v42, %s7431_s30  ;;  %v1930_v63 = vsel %vm1914_vm10, %v1893_v36, %v1515_v57 }
 0x216   : > { %v8413_v40 = vpop.permute.xlu0 %1284  ;;  %v1554_v39 = vpop.permute.xlu1 %1553 }
 0x217   : > { %v1967_v52 = vsel %vm1951_vm11, %v1930_v63, %v1554_v39 }
 0x218   : > { %1454 = vrot.lane.b32.xlu0 %v1406_v27, %s7433_s17  ;;  %v1638_v27 = vsel %vm1575_vm5, %v8382_v14, %v1637_v6  ;;  %v10782_v14 = vrot.slane %v8015_v47, 1 }
 0x219   : > { %1530 = vrot.lane.b32.xlu1 %v1495_v4, %s7432_s16 }
 0x21a   : > { %v1669_v23 = vpop.permute.xlu0 %1668  ;;  %v8427_v49 = vpop.permute.xlu1 %1286 }
 0x21b   : > { %v2002_v44 = vsel %vm1988_vm12, %v1965_v25, %v1669_v23  ;;  %v1267_v25 = vsel %vm1230_vm0, %v1264_v15, %v10782_v14 }
 0x21c   : > { %1567 = vrot.lane.b32.xlu0 %v1495_v4, %s7434_s22  ;;  %v2039_v7 = vsel %vm2025_vm13, %v2002_v44, %v1743_v31  ;;  %v1497_v31 = vsel %vm1462_vm2, %v1494_v38, %v10781_v22  ;;  %v1169_v38 = vor.u32 %v1167_v61, %v1165_v59  ;;  %v1642_v61 = vsel %vm1575_vm5, %v1637_v6, %v8104_v5 }
 0x21d   : > { %1456 = vrot.lane.b32.xlu1 %v1410_v3, %s7433_s17  ;;  %6922 = vmatprep.mubr.msk.bf16.mxu1 %vm2084_vm14, %v2039_v7  ;;  %v1784_v5 = vsel %vm1766_vm6, %v7911_v45, %v8386_v9  ;;  %v10783_v45 = vld [vmem:[#allocation3_spill] sm:$0xff]  ;;  %v10784_v9 = vld [vmem:[#allocation2_spill] sm:$0xff] }
 0x21e   : > { %v1745_v37 = vpop.permute.xlu0 %1744  ;;  %v1194_v13 = vpop.permute.xlu1 %1193  ;;  %v1174_v4 = vsel %vm1026_vm1, %v1169_v38, %v1173_v53 }
 0x220   : > { %1758 = vrot.lane.b32.xlu0 %v1723_v56, %s7436_s23 }
 0x221   : > { %1569 = vrot.lane.b32.xlu1 %v1497_v31, %s7434_s22 }
 0x222   : > { %v1324_v32 = vpop.permute.xlu0 %1323  ;;  %v1671_v19 = vpop.permute.xlu1 %1670 }
 0x223   : > { %v2004_v1 = vsel %vm1988_vm12, %v1967_v52, %v1671_v19 }
 0x224   : > { %1207 = vrot.lane.b32.xlu0 %v1166_v43, %s7430_s29  ;;  %v2041_v57 = vsel %vm2025_vm13, %v2004_v1, %v1745_v37 }
 0x225   : > { %1760 = vrot.lane.b32.xlu1 %v1725_v33, %s7436_s23  ;;  %6923 = vmatmul.mubr.msk.bf16.gmra.mxu1 %vm2084_vm14, %v2041_v57 }
 0x226   : > { %v1517_v54 = vpop.permute.xlu0 %1516  ;;  %v1326_v39 = vpop.permute.xlu1 %1325 }
 0x228   : > { %1684 = vrot.lane.b32.xlu0 %v1638_v27, %s7437_s26 }
 0x229   : > { %1209 = vrot.lane.b32.xlu1 %v1174_v4, %s7430_s29  ;;  %s7446_s29 = smov 112  }
 0x22a   : > { %v1443_v17 = vpop.permute.xlu0 %1442  ;;  %v1519_v34 = vpop.permute.xlu1 %1518 }
 0x22c   : > { %1300 = vrot.lane.b32.xlu0 %v8404_v42, %s7429_s28  ;;  %v1821_v42 = vsel %vm1803_vm7, %v1784_v5, %v8413_v40  ;;  %v1786_v40 = vsel %vm1766_vm6, %v10784_v9, %v1194_v13 }
 0x22d   : > { %1686 = vrot.lane.b32.xlu1 %v1642_v61, %s7437_s26  ;;  %v1858_v47 = vsel %vm1840_vm8, %v1821_v42, %v1324_v32  ;;  %v1823_v37 = vsel %vm1803_vm7, %v1786_v40, %v8427_v49 }
 0x22e   : > { %v1556_v29 = vpop.permute.xlu0 %1555  ;;  %v1895_v15 = vsel %vm1877_vm9, %v1858_v47, %v1443_v17  ;;  %v1860_v10 = vsel %vm1840_vm8, %v1823_v37, %v1326_v39 }
 0x22f   : > { %v1196_v2 = vpop.permute.xlu1 %1195 }
 0x230   : > { %1339 = vrot.lane.b32.xlu0 %v1267_v25, %s7431_s30 }
 0x231   : > { %1302 = vrot.lane.b32.xlu1 %v1267_v25, %s7429_s28  ;;  %s7445_s28 = smov 96  }
 0x232   : > { %v1747_v23 = vpop.permute.xlu0 %1746 }
 0x233   : > { %v1445_v44 = vpop.permute.xlu1 %1444 }
 0x234   : > { %1532 = vrot.lane.b32.xlu0 %v1497_v31, %s7432_s16  ;;  %v1897_v13 = vsel %vm1877_vm9, %v1860_v10, %v1445_v44 }
 0x235   : > { %1341 = vrot.lane.b32.xlu1 %v8090_v30, %s7431_s30  ;;  %v1932_v30 = vsel %vm1914_vm10, %v1895_v15, %v1517_v54  ;;  %v1934_v49 = vsel %vm1914_vm10, %v1897_v13, %v1519_v34 }
 0x236   : > { %v1289_v3 = vpop.permute.xlu0 %1288  ;;  %v1969_v7 = vsel %vm1951_vm11, %v1932_v30, %v1556_v29 }
 0x237   : > { %v1558_v21 = vpop.permute.xlu1 %1557 }
 0x238   : > { %1458 = vrot.lane.b32.xlu0 %v1416_v8, %s7433_s17 }
 0x239   : > { %1534 = vrot.lane.b32.xlu1 %v10783_v45, %s7432_s16 }
 0x23a   : > { %v1673_v51 = vpop.permute.xlu0 %1672 }
 0x23b   : > { %v1291_v18 = vpop.permute.xlu1 %1290  ;;  %v2006_v36 = vsel %vm1988_vm12, %v1969_v7, %v1673_v51 }
 0x23c   : > { %1571 = vrot.lane.b32.xlu0 %v10783_v45, %s7434_s22  ;;  %v2043_v60 = vsel %vm2025_vm13, %v2006_v36, %v1747_v23 }
 0x23d   : > { %1460 = vrot.lane.b32.xlu1 %v8118_v35, %s7433_s17  ;;  %6926 = vmatprep.mubr.msk.bf16.mxu1 %vm2084_vm14, %v2043_v60  ;;  %v1971_v35 = vsel %vm1951_vm11, %v1934_v49, %v1558_v21 }
 0x23e   : > { %v1749_v59 = vpop.permute.xlu0 %1748 }
 0x23f   : > { %v1198_v24 = vpop.permute.xlu1 %1197 }
 0x240   : > { %1688 = vrot.lane.b32.xlu0 %v8122_v0, %s7437_s26 }
 0x241   : > { %1573 = vrot.lane.b32.xlu1 %v8112_v12, %s7434_s22 }
 0x242   : > { %v1328_v58 = vpop.permute.xlu0 %1327 }
 0x243   : > { %v1675_v56 = vpop.permute.xlu1 %1674 }
 0x244   : > { %v2008_v22 = vsel %vm1988_vm12, %v1971_v35, %v1675_v56  ;;  %1762 = vrot.lane.b32.xlu0 %v8102_v26, %s7436_s23  ;;  %v1788_v26 = vsel %vm1766_vm6, %v7971_v48, %v1196_v2 }
 0x245   : > { %1690 = vrot.lane.b32.xlu1 %v8148_v62, %s7437_s26  ;;  %v2045_v31 = vsel %vm2025_vm13, %v2008_v22, %v1749_v59  ;;  %v1825_v62 = vsel %vm1803_vm7, %v1788_v26, %v1289_v3  ;;  %s7443_s26 = smov 80  }
 0x246   : > { %6927 = vmatmul.mubr.msk.bf16.gmra.mxu1 %vm2084_vm14, %v2045_v31  ;;  %v1521_v0 = vpop.permute.xlu0 %1520  ;;  %v1862_v1 = vsel %vm1840_vm8, %v1825_v62, %v1328_v58 }
 0x247   : > { %v1330_v12 = vpop.permute.xlu1 %1329 }
 0x249   : > { %1764 = vrot.lane.b32.xlu1 %v8131_v50, %s7436_s23  ;;  %v1790_v50 = vsel %vm1766_vm6, %v7893_v20, %v1198_v24  ;;  %s7440_s23 = smov 32  }
 0x24a   : > { %v1447_v63 = vpop.permute.xlu0 %1446  ;;  %v1827_v48 = vsel %vm1803_vm7, %v1790_v50, %v1291_v18 }
 0x24b   : > { %v1523_v52 = vpop.permute.xlu1 %1522  ;;  %v1899_v33 = vsel %vm1877_vm9, %v1862_v1, %v1447_v63  ;;  %v1864_v34 = vsel %vm1840_vm8, %v1827_v48, %v1330_v12 }
 0x24c   : > { %v1936_v57 = vsel %vm1914_vm10, %v1899_v33, %v1521_v0 }
 0x24e   : > { %v1560_v32 = vpop.permute.xlu0 %1559 }
 0x24f   : > { %v1200_v19 = vpop.permute.xlu1 %1199  ;;  %v1973_v54 = vsel %vm1951_vm11, %v1936_v57, %v1560_v32 }
 0x250   : > { %v1792_v40 = vsel %vm1766_vm6, %v7905_v41, %v1200_v19 }
 0x252   : > { %v1751_v43 = vpop.permute.xlu0 %1750 }
 0x253   : > { %v1449_v6 = vpop.permute.xlu1 %1448 }
 0x254   : > { %v1901_v61 = vsel %vm1877_vm9, %v1864_v34, %v1449_v6 }
 0x255   : > { %v1938_v2 = vsel %vm1914_vm10, %v1901_v61, %v1523_v52 }
 0x256   : > { %v1293_v38 = vpop.permute.xlu0 %1292 }
 0x257   : > { %v1562_v53 = vpop.permute.xlu1 %1561  ;;  %v1829_v30 = vsel %vm1803_vm7, %v1792_v40, %v1293_v38 }
 0x258   : > { %v1975_v14 = vsel %vm1951_vm11, %v1938_v2, %v1562_v53 }
 0x25a   : > { %v1677_v39 = vpop.permute.xlu0 %1676 }
 0x25b   : > { %v1295_v27 = vpop.permute.xlu1 %1294  ;;  %v2010_v4 = vsel %vm1988_vm12, %v1973_v54, %v1677_v39 }
 0x25c   : > { %v2047_v17 = vsel %vm2025_vm13, %v2010_v4, %v1751_v43 }
 0x25d   : > { %6930 = vmatprep.mubr.msk.bf16.mxu1 %vm2084_vm14, %v2047_v17 }
 0x25e   : > { %v1753_v29 = vpop.permute.xlu0 %1752 }
 0x25f   : > { %v1202_v20 = vpop.permute.xlu1 %1201 }
 0x260   : > { %v1794_v37 = vsel %vm1766_vm6, %v7920_v28, %v1202_v20 }
 0x261   : > { %v1831_v41 = vsel %vm1803_vm7, %v1794_v37, %v1295_v27 }
 0x262   : > { %v1332_v25 = vpop.permute.xlu0 %1331 }
 0x263   : > { %v1679_v23 = vpop.permute.xlu1 %1678  ;;  %v1866_v7 = vsel %vm1840_vm8, %v1829_v30, %v1332_v25 }
 0x264   : > { %v2012_v44 = vsel %vm1988_vm12, %v1975_v14, %v1679_v23 }
 0x265   : > { %v2049_v5 = vsel %vm2025_vm13, %v2012_v44, %v1753_v29 }
 0x266   : > { %6931 = vmatmul.mubr.msk.bf16.gmra.mxu1 %vm2084_vm14, %v2049_v5  ;;  %v1525_v42 = vpop.permute.xlu0 %1524 }
 0x267   : > { %v1334_v47 = vpop.permute.xlu1 %1333 }
 0x268   : > { %v1868_v35 = vsel %vm1840_vm8, %v1831_v41, %v1334_v47 }
 0x26a   : > { %v1451_v15 = vpop.permute.xlu0 %1450 }
 0x26b   : > { %v1527_v3 = vpop.permute.xlu1 %1526  ;;  %v1903_v51 = vsel %vm1877_vm9, %v1866_v7, %v1451_v15 }
 0x26c   : > { %v1940_v60 = vsel %vm1914_vm10, %v1903_v51, %v1525_v42 }
 0x26e   : > { %v1564_v21 = vpop.permute.xlu0 %1563 }
 0x26f   : > { %v1204_v8 = vpop.permute.xlu1 %1203  ;;  %v1977_v10 = vsel %vm1951_vm11, %v1940_v60, %v1564_v21 }
 0x270   : > { %v1796_v38 = vsel %vm1766_vm6, %v7933_v16, %v1204_v8 }
 0x272   : > { %v1755_v45 = vpop.permute.xlu0 %1754 }
 0x273   : > { %v1453_v9 = vpop.permute.xlu1 %1452 }
 0x274   : > { %v1905_v58 = vsel %vm1877_vm9, %v1868_v35, %v1453_v9 }
 0x275   : > { %v1942_v22 = vsel %vm1914_vm10, %v1905_v58, %v1527_v3 }
 0x276   : > { %v1297_v18 = vpop.permute.xlu0 %1296 }
 0x277   : > { %v1566_v36 = vpop.permute.xlu1 %1565  ;;  %v1833_v53 = vsel %vm1803_vm7, %v1796_v38, %v1297_v18  ;;  %v8608_v38 = vld [vmem:[%s10721_s3] ss:$0 sm:$0xff] }
 0x278   : > { %v1979_v31 = vsel %vm1951_vm11, %v1942_v22, %v1566_v36 }
 0x27a   : > { %v1681_v13 = vpop.permute.xlu0 %1680 }
 0x27b   : > { %v1299_v59 = vpop.permute.xlu1 %1298  ;;  %v2014_v24 = vsel %vm1988_vm12, %v1977_v10, %v1681_v13 }
 0x27c   : > { %v2051_v49 = vsel %vm2025_vm13, %v2014_v24, %v1755_v45 }
 0x27d   : > { %6934 = vmatprep.mubr.msk.bf16.mxu1 %vm2084_vm14, %v2051_v49 }
 0x27e   : > { %v1757_v56 = vpop.permute.xlu0 %1756 }
 0x27f   : > { %v1206_v28 = vpop.permute.xlu1 %1205 }
 0x280   : > { %v1798_v50 = vsel %vm1766_vm6, %v7950_v46, %v1206_v28 }
 0x281   : > { %v1835_v4 = vsel %vm1803_vm7, %v1798_v50, %v1299_v59 }
 0x282   : > { %v1336_v0 = vpop.permute.xlu0 %1335 }
 0x283   : > { %v1683_v12 = vpop.permute.xlu1 %1682  ;;  %v1870_v57 = vsel %vm1840_vm8, %v1833_v53, %v1336_v0 }
 0x284   : > { %v2016_v63 = vsel %vm1988_vm12, %v1979_v31, %v1683_v12 }
 0x285   : > { %v2053_v52 = vsel %vm2025_vm13, %v2016_v63, %v1757_v56  ;;  %v6912_v22 = vpop.f32.mrf.mxu1 }
 0x286   : > { %6935 = vmatmul.mubr.msk.bf16.gmra.mxu1 %vm2084_vm14, %v2053_v52  ;;  %v1529_v32 = vpop.permute.xlu0 %1528 }
 0x287   : > { %v1338_v19 = vpop.permute.xlu1 %1337  ;;  %v2162_v0 = vpop.f32.mrf.mxu1 }
 0x288   : > { %v1872_v48 = vsel %vm1840_vm8, %v1835_v4, %v1338_v19 }
 0x289   : > { %v6913_v12 = vpop.f32.mrf.mxu1 }
 0x28a   : > { %v1455_v43 = vpop.permute.xlu0 %1454 }
 0x28b   : > { %v1531_v6 = vpop.permute.xlu1 %1530  ;;  %v1907_v54 = vsel %vm1877_vm9, %v1870_v57, %v1455_v43  ;;  %v2165_v63 = vpop.f32.mrf.mxu1 }
 0x28c   : > { %v1944_v17 = vsel %vm1914_vm10, %v1907_v54, %v1529_v32 }
 0x28e   : > { %v1568_v26 = vpop.permute.xlu0 %1567 }
 0x28f   : > { %v1457_v62 = vpop.permute.xlu1 %1456  ;;  %v1981_v34 = vsel %vm1951_vm11, %v1944_v17, %v1568_v26 }
 0x290   : > { %v1909_v16 = vsel %vm1877_vm9, %v1872_v48, %v1457_v62 }
 0x291   : > { %v1946_v2 = vsel %vm1914_vm10, %v1909_v16, %v1531_v6 }
 0x292   : > { %v1759_v1 = vpop.permute.xlu0 %1758 }
 0x293   : > { %v1570_v33 = vpop.permute.xlu1 %1569 }
 0x294   : > { %v1983_v14 = vsel %vm1951_vm11, %v1946_v2, %v1570_v33 }
 0x296   : > { %v1208_v39 = vpop.permute.xlu0 %1207 }
 0x297   : > { %v1761_v27 = vpop.permute.xlu1 %1760  ;;  %v1800_v45 = vsel %vm1766_vm6, %v7964_v55, %v1208_v39 }
 0x29a   : > { %v1685_v61 = vpop.permute.xlu0 %1684 }
 0x29b   : > { %v1210_v29 = vpop.permute.xlu1 %1209  ;;  %v2018_v46 = vsel %vm1988_vm12, %v1981_v34, %v1685_v61 }
 0x29c   : > { %v2055_v20 = vsel %vm2025_vm13, %v2018_v46, %v1759_v1  ;;  %v1802_v18 = vsel %vm1766_vm6, %v7988_v11, %v1210_v29  ;;  %vm2751_vm6 = vcmask 261120  }
 0x29d   : > { %6938 = vmatprep.mubr.msk.bf16.mxu1 %vm2084_vm14, %v2055_v20  ;;  %v10785_v20 = vmov 0  }
 0x29e   : > { %v1301_v25 = vpop.permute.xlu0 %1300 }
 0x29f   : > { %v1687_v23 = vpop.permute.xlu1 %1686  ;;  %v1837_v30 = vsel %vm1803_vm7, %v1800_v45, %v1301_v25 }
 0x2a0   : > { %v2020_v44 = vsel %vm1988_vm12, %v1983_v14, %v1687_v23 }
 0x2a1   : > { %v2057_v5 = vsel %vm2025_vm13, %v2020_v44, %v1761_v27 }
 0x2a2   : > { %6939 = vmatmul.mubr.msk.bf16.gmra.mxu1 %vm2084_vm14, %v2057_v5  ;;  %v1340_v42 = vpop.permute.xlu0 %1339 }
 0x2a3   : > { %v1303_v47 = vpop.permute.xlu1 %1302  ;;  %v1874_v7 = vsel %vm1840_vm8, %v1837_v30, %v1340_v42  ;;  %v2174_v30 = vadd.f32 %v6913_v12, %v8608_v38 }
 0x2a4   : > { %v1839_v60 = vsel %vm1803_vm7, %v1802_v18, %v1303_v47  ;;  %v2171_v18 = vadd.f32 %v6912_v22, %v8608_v38  ;;  %vm3952_vm7 = vcmask 130048  }
 0x2a5   : > { %v6916_v52 = vpop.f32.mrf.mxu1 }
 0x2a6   : > { %v1533_v15 = vpop.permute.xlu0 %1532 }
 0x2a7   : > { %v1342_v3 = vpop.permute.xlu1 %1341  ;;  %v2178_v32 = vpop.f32.mrf.mxu1 }
 0x2a8   : > { %v1876_v10 = vsel %vm1840_vm8, %v1839_v60, %v1342_v3  ;;  %v2166_v60 = vadd.f32 %v8608_v38, %v2165_v63  ;;  %vm4025_vm8 = vcmask 392192  }
 0x2a9   : > { %v6917_v19 = vpop.f32.mrf.mxu1 }
 0x2aa   : > { %v1459_v21 = vpop.permute.xlu0 %1458  ;;  %v2190_v5 = vadd.f32 %v6917_v19, %v8608_v38 }
 0x2ab   : > { %v1535_v8 = vpop.permute.xlu1 %1534  ;;  %v1911_v51 = vsel %vm1877_vm9, %v1874_v7, %v1459_v21  ;;  %v2181_v43 = vpop.f32.mrf.mxu1 }
 0x2ac   : > { %v1948_v13 = vsel %vm1914_vm10, %v1911_v51, %v1533_v15  ;;  %v2187_v15 = vadd.f32 %v6916_v52, %v8608_v38  ;;  %v2312_v21 = vmax.f32 %v2190_v5, 0.0 }
 0x2ae   : > { %v1572_v9 = vpop.permute.xlu0 %1571 }
 0x2af   : > { %v1461_v40 = vpop.permute.xlu1 %1460  ;;  %v1985_v55 = vsel %vm1951_vm11, %v1948_v13, %v1572_v9  ;;  %v2311_v9 = vmax.f32 %v2187_v15, 0.0  ;;  %v2307_v13 = vmax.f32 %v2171_v18, 0.0 }
 0x2b0   : > { %v1913_v59 = vsel %vm1877_vm9, %v1876_v10, %v1461_v40  ;;  %v2179_v40 = vadd.f32 %v8608_v38, %v2178_v32  ;;  %vm4062_vm9 = vcmask 523264  }
 0x2b1   : > { %v1950_v11 = vsel %vm1914_vm10, %v1913_v59, %v1535_v8  ;;  %v2182_v8 = vadd.f32 %v8608_v38, %v2181_v43  ;;  %v2426_v7 = vpack.c.bf16 %v2312_v21, %v2311_v9  ;;  %vm4099_vm10 = vcmask 654336  }
 0x2b2   : > { %v1689_v36 = vpop.permute.xlu0 %1688 }
 0x2b3   : > { %v1574_v37 = vpop.permute.xlu1 %1573  ;;  %v2022_v24 = vsel %vm1988_vm12, %v1985_v55, %v1689_v36  ;;  %v2310_v51 = vmax.f32 %v2182_v8, 0.0  ;;  %v2309_v36 = vmax.f32 %v2179_v40, 0.0  ;;  %v2163_v55 = vadd.f32 %v8608_v38, %v2162_v0 }
 0x2b4   : > { %v1987_v58 = vsel %vm1951_vm11, %v1950_v11, %v1574_v37  ;;  %v2308_v37 = vmax.f32 %v2174_v30, 0.0  ;;  %vm4136_vm11 = vcmask 785408  }
 0x2b5   : > { %v2425_v10 = vpack.c.bf16 %v2310_v51, %v2309_v36 }
 0x2b6   : > { %v1763_v41 = vpop.permute.xlu0 %1762  ;;  %v2424_v59 = vpack.c.bf16 %v2308_v37, %v2307_v13 }
 0x2b7   : > { %v1691_v49 = vpop.permute.xlu1 %1690  ;;  %v2059_v35 = vsel %vm2025_vm13, %v2022_v24, %v1763_v41  ;;  %v2306_v24 = vmax.f32 %v2166_v60, 0.0  ;;  %v10743_v41 = vmov 0.0  }
 0x2b8   : > { %6942 = vmatprep.mubr.msk.bf16.mxu1 %vm2084_vm14, %v2059_v35  ;;  %v2024_v56 = vsel %vm1988_vm12, %v1987_v58, %v1691_v49  ;;  %6946 = vmatprep.subr.bf16.mxu0 %v10743_v41  ;;  %v2305_v49 = vmax.f32 %v2163_v55, 0.0  ;;  %v7229_v35 = vld [vmem:[%s10722_s4 + $0x4] ss:$12 sps:$4 sm:$0xff]   ;;  %vm4173_vm12 = vcmask 916480  }
 0x2b9   : > { %6950 = vmatprep.mubr.msk.bf16.mxu0 %vm7439_vm15, %v10743_v41 }
 0x2ba   : > { %v2423_v11 = vpack.c.bf16 %v2306_v24, %v2305_v49 }
 0x2bb   : > { %v1765_v28 = vpop.permute.xlu1 %1764 }
 0x2bc   : > { %v2061_v31 = vsel %vm2025_vm13, %v2024_v56, %v1765_v28  ;;  %vm4955_vm13 = vcmask 1041408  }
 0x2bd   : > { %6943 = vmatmul.mubr.msk.bf16.gmra.mxu1 %vm2084_vm14, %v2061_v31 }
 0x2be   : > { %2847 = vmatprep.mubr.bf16.mxu1 %v7229_v35 }
 0x2c5   : > { %v6920_v6 = vpop.f32.mrf.mxu1 }
 0x2c6   : > { %v2203_v29 = vadd.f32 %v6920_v6, %v8608_v38 }
 0x2c7   : > { %v2194_v26 = vpop.f32.mrf.mxu1 }
 0x2c8   : > { %v2315_v23 = vmax.f32 %v2203_v29, 0.0  ;;  %v2195_v44 = vadd.f32 %v8608_v38, %v2194_v26 }
 0x2c9   : > { %v6921_v62 = vpop.f32.mrf.mxu1 }
 0x2ca   : > { %v2206_v34 = vadd.f32 %v6921_v62, %v8608_v38  ;;  %v2313_v3 = vmax.f32 %v2195_v44, 0.0 }
 0x2cb   : > { %v2197_v1 = vpop.f32.mrf.mxu1 }
 0x2cc   : > { %v2316_v2 = vmax.f32 %v2206_v34, 0.0  ;;  %v2198_v14 = vadd.f32 %v8608_v38, %v2197_v1 }
 0x2ce   : > { %v2428_v42 = vpack.c.bf16 %v2316_v2, %v2315_v23  ;;  %v2314_v47 = vmax.f32 %v2198_v14, 0.0 }
 0x2d0   : > { %v2427_v45 = vpack.c.bf16 %v2314_v47, %v2313_v3 }
 0x2e5   : > { %v6924_v33 = vpop.f32.mrf.mxu1 }
 0x2e6   : > { %v2219_v50 = vadd.f32 %v6924_v33, %v8608_v38 }
 0x2e7   : > { %v2210_v53 = vpop.f32.mrf.mxu1 }
 0x2e8   : > { %v2319_v27 = vmax.f32 %v2219_v50, 0.0  ;;  %v2211_v4 = vadd.f32 %v8608_v38, %v2210_v53 }
 0x2e9   : > { %v6925_v57 = vpop.f32.mrf.mxu1 }
 0x2ea   : > { %v2222_v54 = vadd.f32 %v6925_v57, %v8608_v38  ;;  %v2317_v46 = vmax.f32 %v2211_v4, 0.0 }
 0x2eb   : > { %v2213_v39 = vpop.f32.mrf.mxu1 }
 0x2ec   : > { %v2320_v48 = vmax.f32 %v2222_v54, 0.0  ;;  %v2214_v17 = vadd.f32 %v8608_v38, %v2213_v39 }
 0x2ee   : > { %v2430_v16 = vpack.c.bf16 %v2320_v48, %v2319_v27  ;;  %v2318_v61 = vmax.f32 %v2214_v17, 0.0 }
 0x2f0   : > { %2816 = vmatpush1.bf16.msra.mxu1 %v2430_v16  ;;  %v2429_v25 = vpack.c.bf16 %v2318_v61, %v2317_v46 }
 0x2f1   : > { %2817 = vmatprep.subr.bf16.mxu1 %v10785_v20 }
 0x2f4   : > { %2818 = vmatpush1.bf16.msra.mxu1 %v2429_v25 }
 0x2f5   : > { %2819 = vmatprep.subr.bf16.mxu1 %v10785_v20 }
 0x2f8   : > { %2820 = vmatpush1.bf16.msra.mxu1 %v2428_v42 }
 0x2f9   : > { %2821 = vmatprep.subr.bf16.mxu1 %v10785_v20 }
 0x2fc   : > { %2822 = vmatpush1.bf16.msra.mxu1 %v2427_v45 }
 0x2fd   : > { %2823 = vmatprep.subr.bf16.mxu1 %v10785_v20 }
 0x300   : > { %2824 = vmatpush1.bf16.msra.mxu1 %v2426_v7 }
 0x301   : > { %2825 = vmatprep.subr.bf16.mxu1 %v10785_v20 }
 0x304   : > { %2826 = vmatpush1.bf16.msra.mxu1 %v2425_v10 }
 0x305   : > { %2827 = vmatprep.subr.bf16.mxu1 %v10785_v20 }
 0x306   : > { %v6928_v58 = vpop.f32.mrf.mxu1 }
 0x307   : > { %v2235_v40 = vadd.f32 %v6928_v58, %v8608_v38 }
 0x308   : > { %2828 = vmatpush1.bf16.msra.mxu1 %v2424_v59  ;;  %v8640_v56 = vpop.f32.mrf.mxu1 }
 0x309   : > { %2829 = vmatprep.subr.bf16.mxu1 %v10785_v20  ;;  %v2323_v10 = vmax.f32 %v2235_v40, 0.0  ;;  %v2227_v13 = vadd.f32 %v8608_v38, %v8640_v56  ;;  %v7279_v40 = vld [vmem:[%s10722_s4 + $0x13c] ss:$12 sps:$4 sm:$0xff]  }
 0x30a   : > { %v6929_v28 = vpop.f32.mrf.mxu1 }
 0x30b   : > { %v2238_v8 = vadd.f32 %v6929_v28, %v8608_v38 }
 0x30c   : > { %2830 = vmatpush1.bf16.msra.mxu1 %v2423_v11  ;;  %v2229_v22 = vpop.f32.mrf.mxu1 }
 0x30d   : > { %2831 = vmatprep.subr.bf16.mxu1 %v10785_v20  ;;  %v2324_v51 = vmax.f32 %v2238_v8, 0.0  ;;  %v2230_v18 = vadd.f32 %v8608_v38, %v2229_v22  ;;  %v7275_v8 = vld [vmem:[%s10722_s4 + $0x124] ss:$12 sps:$4 sm:$0xff]  }
 0x30f   : > { %v2432_v24 = vpack.c.bf16 %v2324_v51, %v2323_v10  ;;  %v2322_v49 = vmax.f32 %v2230_v18, 0.0  ;;  %v7283_v51 = vld [vmem:[%s10722_s4 + $0x154] ss:$12 sps:$4 sm:$0xff]  }
 0x310   : > { %v7282_v18 = vld [vmem:[%s10722_s4 + $0x140] ss:$12 sps:$4 sm:$0xff]   ;;  %v7289_v10 = vld [vmem:[%s10722_s4 + $0x168] ss:$12 sps:$4 sm:$0xff]  }
 0x326   : > { %v6932_v31 = vpop.f32.mrf.mxu1 }
 0x327   : > { %v2251_v44 = vadd.f32 %v6932_v31, %v8608_v38  ;;  %v2321_v31 = vmax.f32 %v2227_v13, 0.0  ;;  %v7291_v13 = vld [vmem:[%s10722_s4 + $0x184] ss:$12 sps:$4 sm:$0xff]  }
 0x328   : > { %v2242_v0 = vpop.f32.mrf.mxu1 }
 0x329   : > { %v2327_v3 = vmax.f32 %v2251_v44, 0.0  ;;  %v2243_v21 = vadd.f32 %v8608_v38, %v2242_v0  ;;  %v2431_v56 = vpack.c.bf16 %v2322_v49, %v2321_v31  ;;  %v7265_v44 = vld [vmem:[%s10722_s4 + $0xd8] ss:$12 sps:$4 sm:$0xff]   ;;  %v7294_v49 = vld [vmem:[%s10722_s4 + $0x188] ss:$12 sps:$4 sm:$0xff]  }
 0x32a   : > { %v6933_v12 = vpop.f32.mrf.mxu1  ;;  %v7302_v31 = vld [vmem:[%s10722_s4 + $0x1b8] ss:$12 sps:$4 sm:$0xff]  }
 0x32b   : > { %v2254_v14 = vadd.f32 %v6933_v12, %v8608_v38  ;;  %v2325_v30 = vmax.f32 %v2243_v21, 0.0  ;;  %v7273_v21 = vld [vmem:[%s10722_s4 + $0x108] ss:$12 sps:$4 sm:$0xff]  }
 0x32c   : > { %v2245_v63 = vpop.f32.mrf.mxu1 }
 0x32d   : > { %v2328_v42 = vmax.f32 %v2254_v14, 0.0  ;;  %v2246_v47 = vadd.f32 %v8608_v38, %v2245_v63  ;;  %v7261_v14 = vld [vmem:[%s10722_s4 + $0xc0] ss:$12 sps:$4 sm:$0xff]  }
 0x32f   : > { %v2434_v45 = vpack.c.bf16 %v2328_v42, %v2327_v3  ;;  %v2326_v9 = vmax.f32 %v2246_v47, 0.0  ;;  %v7266_v42 = vld [vmem:[%s10722_s4 + $0xe0] ss:$12 sps:$4 sm:$0xff]   ;;  %v7269_v47 = vld [vmem:[%s10722_s4 + $0xf0] ss:$12 sps:$4 sm:$0xff]  }
 0x330   : > { %v7270_v3 = vld [vmem:[%s10722_s4 + $0xf8] ss:$12 sps:$4 sm:$0xff]  }
 0x331   : > { %v2433_v36 = vpack.c.bf16 %v2326_v9, %v2325_v30  ;;  %v7277_v9 = vld [vmem:[%s10722_s4 + $0x120] ss:$12 sps:$4 sm:$0xff]   ;;  %v7278_v30 = vld [vmem:[%s10722_s4 + $0x128] ss:$12 sps:$4 sm:$0xff]  }
 0x346   : > { %v6936_v52 = vpop.f32.mrf.mxu1 }
 0x347   : > { %v2267_v17 = vadd.f32 %v6936_v52, %v8608_v38  ;;  %v7227_v52 = vld [vmem:[%s10722_s4] ss:$12 sps:$4 sm:$0xff]  }
 0x348   : > { %v2258_v32 = vpop.f32.mrf.mxu1 }
 0x349   : > { %v2331_v46 = vmax.f32 %v2267_v17, 0.0  ;;  %v2259_v2 = vadd.f32 %v8608_v38, %v2258_v32  ;;  %v7250_v17 = vld [vmem:[%s10722_s4 + $0x80] ss:$12 sps:$4 sm:$0xff]  }
 0x34a   : > { %v6937_v19 = vpop.f32.mrf.mxu1 }
 0x34b   : > { %v2270_v27 = vadd.f32 %v6937_v19, %v8608_v38  ;;  %v2329_v5 = vmax.f32 %v2259_v2, 0.0  ;;  %v7230_v19 = vld [vmem:[%s10722_s4 + $0x8] ss:$12 sps:$4 sm:$0xff]   ;;  %v7258_v2 = vld [vmem:[%s10722_s4 + $0xb0] ss:$12 sps:$4 sm:$0xff]  }
 0x34c   : > { %v2261_v43 = vpop.f32.mrf.mxu1 }
 0x34d   : > { %v2332_v16 = vmax.f32 %v2270_v27, 0.0  ;;  %v2262_v61 = vadd.f32 %v8608_v38, %v2261_v43  ;;  %v7233_v43 = vld [vmem:[%s10722_s4 + $0x18] ss:$12 sps:$4 sm:$0xff]   ;;  %v7246_v27 = vld [vmem:[%s10722_s4 + $0x68] ss:$12 sps:$4 sm:$0xff]  }
 0x34f   : > { %v2436_v25 = vpack.c.bf16 %v2332_v16, %v2331_v46  ;;  %v2330_v23 = vmax.f32 %v2262_v61, 0.0  ;;  %v7255_v16 = vld [vmem:[%s10722_s4 + $0xac] ss:$12 sps:$4 sm:$0xff]   ;;  %v7259_v46 = vld [vmem:[%s10722_s4 + $0xc4] ss:$12 sps:$4 sm:$0xff]  }
 0x350   : > { %v7254_v61 = vld [vmem:[%s10722_s4 + $0x98] ss:$12 sps:$4 sm:$0xff]  }
 0x351   : > { %v2435_v15 = vpack.c.bf16 %v2330_v23, %v2329_v5  ;;  %v7262_v23 = vld [vmem:[%s10722_s4 + $0xc8] ss:$12 sps:$4 sm:$0xff]  }
 0x352   : > { %v7267_v5 = vld [vmem:[%s10722_s4 + $0xf4] ss:$12 sps:$4 sm:$0xff]  }
 0x362   : > { %v6940_v6 = vpop.f32.mrf.mxu1 }
 0x363   : > { %v2283_v62 = vadd.f32 %v6940_v6, %v8608_v38  ;;  %v7235_v6 = vld [vmem:[%s10722_s4 + $0x34] ss:$12 sps:$4 sm:$0xff]  }
 0x364   : > { %v2274_v26 = vpop.f32.mrf.mxu1 }
 0x365   : > { %v2335_v50 = vmax.f32 %v2283_v62, 0.0  ;;  %v2275_v57 = vadd.f32 %v8608_v38, %v2274_v26  ;;  %v7234_v26 = vld [vmem:[%s10722_s4 + $0x20] ss:$12 sps:$4 sm:$0xff]   ;;  %v7237_v62 = vld [vmem:[%s10722_s4 + $0x30] ss:$12 sps:$4 sm:$0xff]  }
 0x366   : > { %v6941_v1 = vpop.f32.mrf.mxu1 }
 0x367   : > { %v2286_v33 = vadd.f32 %v6941_v1, %v8608_v38  ;;  %v2333_v34 = vmax.f32 %v2275_v57, 0.0  ;;  %v7239_v1 = vld [vmem:[%s10722_s4 + $0x4c] ss:$12 sps:$4 sm:$0xff]   ;;  %v7242_v57 = vld [vmem:[%s10722_s4 + $0x50] ss:$12 sps:$4 sm:$0xff]  }
 0x368   : > { %v2277_v53 = vpop.f32.mrf.mxu1 }
 0x369   : > { %v2336_v54 = vmax.f32 %v2286_v33, 0.0  ;;  %v2278_v39 = vadd.f32 %v8608_v38, %v2277_v53  ;;  %v7238_v33 = vld [vmem:[%s10722_s4 + $0x38] ss:$12 sps:$4 sm:$0xff]   ;;  %v7241_v53 = vld [vmem:[%s10722_s4 + $0x48] ss:$12 sps:$4 sm:$0xff]  }
 0x36b   : > { %v2438_v4 = vpack.c.bf16 %v2336_v54, %v2335_v50  ;;  %v2334_v48 = vmax.f32 %v2278_v39, 0.0  ;;  %v7243_v50 = vld [vmem:[%s10722_s4 + $0x64] ss:$12 sps:$4 sm:$0xff]   ;;  %v7245_v54 = vld [vmem:[%s10722_s4 + $0x60] ss:$12 sps:$4 sm:$0xff]  }
 0x36c   : > { %v7247_v39 = vld [vmem:[%s10722_s4 + $0x7c] ss:$12 sps:$4 sm:$0xff]  }
 0x36d   : > { %2832 = vmatpush2.bf16.msra.mxu1 %v2438_v4  ;;  %v2437_v29 = vpack.c.bf16 %v2334_v48, %v2333_v34  ;;  %v7249_v4 = vld [vmem:[%s10722_s4 + $0x78] ss:$12 sps:$4 sm:$0xff]   ;;  %v7251_v48 = vld [vmem:[%s10722_s4 + $0x94] ss:$12 sps:$4 sm:$0xff]   ;;  %v7253_v34 = vld [vmem:[%s10722_s4 + $0x90] ss:$12 sps:$4 sm:$0xff]  }
 0x36e   : > { %2833 = vmatprep.subr.bf16.mxu1 %v10785_v20 }
 0x371   : > { %2834 = vmatpush2.bf16.msra.mxu1 %v2437_v29  ;;  %v7257_v29 = vld [vmem:[%s10722_s4 + $0xa8] ss:$12 sps:$4 sm:$0xff]  }
 0x372   : > { %2835 = vmatprep.subr.bf16.mxu1 %v10785_v20 }
 0x375   : > { %2836 = vmatpush2.bf16.msra.mxu1 %v2436_v25  ;;  %v7263_v25 = vld [vmem:[%s10722_s4 + $0xdc] ss:$12 sps:$4 sm:$0xff]  }
 0x376   : > { %2837 = vmatprep.subr.bf16.mxu1 %v10785_v20 }
 0x379   : > { %2838 = vmatpush2.bf16.msra.mxu1 %v2435_v15  ;;  %v7271_v15 = vld [vmem:[%s10722_s4 + $0x10c] ss:$12 sps:$4 sm:$0xff]  }
 0x37a   : > { %2839 = vmatprep.subr.bf16.mxu1 %v10785_v20 }
 0x37d   : > { %v6944_v7 = vpop.f32.mrf.mxu1  ;;  %2840 = vmatpush2.bf16.msra.mxu1 %v2434_v45  ;;  %v7274_v45 = vld [vmem:[%s10722_s4 + $0x110] ss:$12 sps:$4 sm:$0xff]  }
 0x37e   : > { %2841 = vmatprep.subr.bf16.mxu1 %v10785_v20  ;;  %v2299_v60 = vadd.f32 %v6944_v7, %v8608_v38  ;;  %v7281_v7 = vld [vmem:[%s10722_s4 + $0x138] ss:$12 sps:$4 sm:$0xff]  }
 0x37f   : > { %v2290_v37 = vpop.f32.mrf.mxu1 }
 0x380   : > { %v2339_v11 = vmax.f32 %v2299_v60, 0.0  ;;  %v2291_v58 = vadd.f32 %v8608_v38, %v2290_v37  ;;  %v7287_v37 = vld [vmem:[%s10722_s4 + $0x16c] ss:$12 sps:$4 sm:$0xff]  }
 0x381   : > { %v6945_v55 = vpop.f32.mrf.mxu1  ;;  %2842 = vmatpush2.bf16.msra.mxu1 %v2433_v36  ;;  %v7285_v36 = vld [vmem:[%s10722_s4 + $0x150] ss:$12 sps:$4 sm:$0xff]   ;;  %v7286_v60 = vld [vmem:[%s10722_s4 + $0x158] ss:$12 sps:$4 sm:$0xff]  }
 0x382   : > { %v2302_v59 = vadd.f32 %v6945_v55, %v8608_v38  ;;  %2843 = vmatprep.subr.bf16.mxu1 %v10785_v20  ;;  %v2337_v63 = vmax.f32 %v2291_v58, 0.0  ;;  %v7290_v55 = vld [vmem:[%s10722_s4 + $0x170] ss:$12 sps:$4 sm:$0xff]   ;;  %v7298_v58 = vld [vmem:[%s10722_s4 + $0x1a0] ss:$12 sps:$4 sm:$0xff]  }
 0x383   : > { %v2293_v35 = vpop.f32.mrf.mxu1 }
 0x384   : > { %v2340_v28 = vmax.f32 %v2302_v59, 0.0  ;;  %v2294_v22 = vadd.f32 %v8608_v38, %v2293_v35  ;;  %v7231_v38 = vld [vmem:[%s10722_s4 + $0x1c] ss:$12 sps:$4 sm:$0xff]   ;;  %v7293_v59 = vld [vmem:[%s10722_s4 + $0x180] ss:$12 sps:$4 sm:$0xff]  }
 0x385   : > { %2844 = vmatpush2.bf16.msra.mxu1 %v2432_v24  ;;  %v7295_v24 = vld [vmem:[%s10722_s4 + $0x19c] ss:$12 sps:$4 sm:$0xff]   ;;  %v7297_v35 = vld [vmem:[%s10722_s4 + $0x198] ss:$12 sps:$4 sm:$0xff]  }
 0x386   : > { %v2440_v0 = vpack.c.bf16 %v2340_v28, %v2339_v11  ;;  %v2338_v12 = vmax.f32 %v2294_v22, 0.0  ;;  %2845 = vmatprep.subr.bf16.mxu1 %v10785_v20  ;;  %v7299_v11 = vld [vmem:[%s10722_s4 + $0x1b4] ss:$12 sps:$4 sm:$0xff]   ;;  %v7301_v28 = vld [vmem:[%s10722_s4 + $0x1b0] ss:$12 sps:$4 sm:$0xff]  }
 0x387   : > { %v7305_v22 = vld [vmem:[%s10722_s4 + $0x1cc] ss:$12 sps:$4 sm:$0xff]  }
 0x388   : > { %6947 = vmatpush3.bf16.msra.mxu0 %v2440_v0  ;;  %v2439_v32 = vpack.c.bf16 %v2338_v12, %v2337_v63  ;;  %v2421_v0 = vld [vmem:[%s10722_s4 + $0x1e0] sm:$0xff]  ;;  %v7303_v12 = vld [vmem:[%s10722_s4 + $0x1c8] ss:$12 sps:$4 sm:$0xff]   ;;  %v7306_v63 = vld [vmem:[%s10722_s4 + $0x1d0] ss:$12 sps:$4 sm:$0xff]  }
 0x389   : > { %2846 = vmatpush2.bf16.msra.mxu1 %v2431_v56  ;;  %6948 = vmatprep.subr.bf16.mxu0 %v10743_v41  ;;  %v6441_v56 = vcombine.high %v2421_v0, %v2421_v0 }
 0x38c   : > { %6949 = vmatpush3.bf16.msra.mxu0 %v2439_v32  ;;  %2848 = vmatmul.mubr.bf16.vlgmr.msra.gmra.mxu1 %v7227_v52  ;;  %v6440_v52 = vcombine.low %v2421_v0, %v2421_v0 }
 0x38d   : > { %2855 = vmatprep.mubr.bf16.mxu1 %v7231_v38  ;;  %v7309_v38 = vld [vmem:[%s10722_s4 + $0x1e8] ss:$0 sps:$4 sm:$0xff]  }
 0x38f   : > { %6951 = vmatmul.mubr.msk.bf16.vlgmr.msra.gmra.mxu0 %vm2751_vm6, %v7230_v19 }
 0x390   : > { %6954 = vmatprep.mubr.msk.bf16.mxu0 %vm7439_vm15, %v10743_v41 }
 0x394   : > { %2856 = vmatmul.mubr.bf16.gmra.mxu1 %v7233_v43 }
 0x395   : > { %2863 = vmatprep.mubr.bf16.mxu1 %v7235_v6 }
 0x397   : > { %6955 = vmatmul.mubr.msk.bf16.gmra.mxu0 %vm2751_vm6, %v7234_v26 }
 0x398   : > { %6958 = vmatprep.mubr.msk.bf16.mxu0 %vm7439_vm15, %v10743_v41 }
 0x39c   : > { %2864 = vmatmul.mubr.bf16.gmra.mxu1 %v7237_v62 }
 0x39d   : > { %2871 = vmatprep.mubr.bf16.mxu1 %v7239_v1 }
 0x39f   : > { %6959 = vmatmul.mubr.msk.bf16.gmra.mxu0 %vm2751_vm6, %v7238_v33 }
 0x3a0   : > { %6962 = vmatprep.mubr.msk.bf16.mxu0 %vm7439_vm15, %v10743_v41 }
 0x3a4   : > { %2872 = vmatmul.mubr.bf16.gmra.mxu1 %v7241_v53 }
 0x3a5   : > { %2879 = vmatprep.mubr.bf16.mxu1 %v7243_v50 }
 0x3a7   : > { %6963 = vmatmul.mubr.msk.bf16.gmra.mxu0 %vm2751_vm6, %v7242_v57 }
 0x3a8   : > { %6966 = vmatprep.mubr.msk.bf16.mxu0 %vm7439_vm15, %v10743_v41 }
 0x3ac   : > { %2880 = vmatmul.mubr.bf16.gmra.mxu1 %v7245_v54 }
 0x3ad   : > { %2887 = vmatprep.mubr.bf16.mxu1 %v7247_v39 }
 0x3af   : > { %6967 = vmatmul.mubr.msk.bf16.gmra.mxu0 %vm2751_vm6, %v7246_v27 }
 0x3b0   : > { %6970 = vmatprep.mubr.msk.bf16.mxu0 %vm7439_vm15, %v10743_v41 }
 0x3b4   : > { %2888 = vmatmul.mubr.bf16.gmra.mxu1 %v7249_v4 }
 0x3b5   : > { %2895 = vmatprep.mubr.bf16.mxu1 %v7251_v48 }
 0x3b7   : > { %6971 = vmatmul.mubr.msk.bf16.gmra.mxu0 %vm2751_vm6, %v7250_v17 }
 0x3b8   : > { %6974 = vmatprep.mubr.msk.bf16.mxu0 %vm7439_vm15, %v10743_v41 }
 0x3bc   : > { %2896 = vmatmul.mubr.bf16.gmra.mxu1 %v7253_v34 }
 0x3bd   : > { %2903 = vmatprep.mubr.bf16.mxu1 %v7255_v16 }
 0x3bf   : > { %6975 = vmatmul.mubr.msk.bf16.gmra.mxu0 %vm2751_vm6, %v7254_v61 }
 0x3c0   : > { %6978 = vmatprep.mubr.msk.bf16.mxu0 %vm7439_vm15, %v10743_v41 }
 0x3c4   : > { %2904 = vmatmul.mubr.bf16.gmra.mxu1 %v7257_v29 }
 0x3c5   : > { %2911 = vmatprep.mubr.bf16.mxu1 %v7259_v46 }
 0x3c7   : > { %6979 = vmatmul.mubr.msk.bf16.gmra.mxu0 %vm2751_vm6, %v7258_v2 }
 0x3c8   : > { %6982 = vmatprep.mubr.msk.bf16.mxu0 %vm7439_vm15, %v10743_v41 }
 0x3cc   : > { %2912 = vmatmul.mubr.bf16.gmra.mxu1 %v7261_v14 }
 0x3cd   : > { %2919 = vmatprep.mubr.bf16.mxu1 %v7263_v25 }
 0x3cf   : > { %6983 = vmatmul.mubr.msk.bf16.gmra.mxu0 %vm2751_vm6, %v7262_v23 }
 0x3d0   : > { %6986 = vmatprep.mubr.msk.bf16.mxu0 %vm7439_vm15, %v10743_v41 }
 0x3d4   : > { %2920 = vmatmul.mubr.bf16.gmra.mxu1 %v7265_v44 }
 0x3d5   : > { %2927 = vmatprep.mubr.bf16.mxu1 %v7267_v5 }
 0x3d7   : > { %6987 = vmatmul.mubr.msk.bf16.gmra.mxu0 %vm2751_vm6, %v7266_v42 }
 0x3d8   : > { %6990 = vmatprep.mubr.msk.bf16.mxu0 %vm7439_vm15, %v10743_v41 }
 0x3dc   : > { %2928 = vmatmul.mubr.bf16.gmra.mxu1 %v7269_v47 }
 0x3dd   : > { %2935 = vmatprep.mubr.bf16.mxu1 %v7271_v15 }
 0x3df   : > { %6991 = vmatmul.mubr.msk.bf16.gmra.mxu0 %vm2751_vm6, %v7270_v3 }
 0x3e0   : > { %6994 = vmatprep.mubr.msk.bf16.mxu0 %vm7439_vm15, %v10743_v41 }
 0x3e4   : > { %2936 = vmatmul.mubr.bf16.gmra.mxu1 %v7273_v21 }
 0x3e5   : > { %2943 = vmatprep.mubr.bf16.mxu1 %v7275_v8 }
 0x3e7   : > { %6995 = vmatmul.mubr.msk.bf16.gmra.mxu0 %vm2751_vm6, %v7274_v45 }
 0x3e8   : > { %6998 = vmatprep.mubr.msk.bf16.mxu0 %vm7439_vm15, %v10743_v41 }
 0x3ec   : > { %2944 = vmatmul.mubr.bf16.gmra.mxu1 %v7277_v9 }
 0x3ed   : > { %2951 = vmatprep.mubr.bf16.mxu1 %v7279_v40 }
 0x3ef   : > { %6999 = vmatmul.mubr.msk.bf16.gmra.mxu0 %vm2751_vm6, %v7278_v30 }
 0x3f0   : > { %7002 = vmatprep.mubr.msk.bf16.mxu0 %vm7439_vm15, %v10743_v41 }
 0x3f4   : > { %2952 = vmatmul.mubr.bf16.gmra.mxu1 %v7281_v7 }
 0x3f5   : > { %2959 = vmatprep.mubr.bf16.mxu1 %v7283_v51 }
 0x3f7   : > { %7003 = vmatmul.mubr.msk.bf16.gmra.mxu0 %vm2751_vm6, %v7282_v18 }
 0x3f8   : > { %7006 = vmatprep.mubr.msk.bf16.mxu0 %vm7439_vm15, %v10743_v41 }
 0x3fc   : > { %2960 = vmatmul.mubr.bf16.gmra.mxu1 %v7285_v36 }
 0x3fd   : > { %2967 = vmatprep.mubr.bf16.mxu1 %v7287_v37 }
 0x3ff   : > { %7007 = vmatmul.mubr.msk.bf16.gmra.mxu0 %vm2751_vm6, %v7286_v60 }
 0x400   : > { %7010 = vmatprep.mubr.msk.bf16.mxu0 %vm7439_vm15, %v10743_v41 }
 0x404   : > { %2968 = vmatmul.mubr.bf16.gmra.mxu1 %v7289_v10 }
 0x405   : > { %2975 = vmatprep.mubr.bf16.mxu1 %v7291_v13 }
 0x407   : > { %7011 = vmatmul.mubr.msk.bf16.gmra.mxu0 %vm2751_vm6, %v7290_v55 }
 0x408   : > { %7014 = vmatprep.mubr.msk.bf16.mxu0 %vm7439_vm15, %v10743_v41 }
 0x40c   : > { %2976 = vmatmul.mubr.bf16.gmra.mxu1 %v7293_v59 }
 0x40d   : > { %2983 = vmatprep.mubr.bf16.mxu1 %v7295_v24 }
 0x40f   : > { %7015 = vmatmul.mubr.msk.bf16.gmra.mxu0 %vm2751_vm6, %v7294_v49 }
 0x410   : > { %7018 = vmatprep.mubr.msk.bf16.mxu0 %vm7439_vm15, %v10743_v41 }
 0x414   : > { %2984 = vmatmul.mubr.bf16.gmra.mxu1 %v7297_v35 }
 0x415   : > { %2991 = vmatprep.mubr.bf16.mxu1 %v7299_v11 }
 0x417   : > { %7019 = vmatmul.mubr.msk.bf16.gmra.mxu0 %vm2751_vm6, %v7298_v58 }
 0x418   : > { %7022 = vmatprep.mubr.msk.bf16.mxu0 %vm7439_vm15, %v10743_v41 }
 0x41c   : > { %2992 = vmatmul.mubr.bf16.gmra.mxu1 %v7301_v28 }
 0x41d   : > { %2999 = vmatprep.mubr.bf16.mxu1 %v7305_v22 }
 0x41f   : > { %7023 = vmatmul.mubr.msk.bf16.gmra.mxu0 %vm2751_vm6, %v7302_v31 }
 0x420   : > { %7026 = vmatprep.mubr.msk.bf16.mxu0 %vm7439_vm15, %v10743_v41 }
 0x424   : > { %3000 = vmatmul.mubr.bf16.gmra.mxu1 %v7303_v12 }
 0x425   : > { %3007 = vmatprep.mubr.bf16.mxu1 %v6441_v56 }
 0x427   : > { %7027 = vmatmul.mubr.msk.bf16.gmra.mxu0 %vm2751_vm6, %v7306_v63 }
 0x428   : > { %7030 = vmatprep.mubr.msk.bf16.mxu0 %vm7439_vm15, %v10743_v41 }
 0x42c   : > { %3008 = vmatmul.mubr.bf16.gmra.mxu1 %v6440_v52 }
 0x42f   : > { %7031 = vmatmul.mubr.msk.bf16.gmra.mxu0 %vm2751_vm6, %v7309_v38 }
 0x44c   : > { %v2849_v32 = vpop.f32.mrf.mxu1 }
 0x44e   : > { %v2851_v19 = vpop.f32.mrf.mxu1 }
 0x44f   : > { %v3049_v43 = vpop.f32.mrf.mxu0 }
 0x450   : > { %v2852_v6 = vpop.f32.mrf.mxu1  ;;  %v3050_v57 = vadd.f32 %v3049_v43, %v2849_v32 }
 0x451   : > { %v6952_v26 = vpop.f32.mrf.mxu0 }
 0x452   : > { %v2854_v62 = vpop.f32.mrf.mxu1 }
 0x453   : > { %v3052_v1 = vpop.f32.mrf.mxu0 }
 0x454   : > { %v3053_v33 = vadd.f32 %v3052_v1, %v2852_v6  ;;  %v2857_v53 = vpop.f32.mrf.mxu1 }
 0x455   : > { %v6953_v50 = vpop.f32.mrf.mxu0 }
 0x456   : > { %v2859_v54 = vpop.f32.mrf.mxu1  ;;  %v8915_v27 = vpack.c.bf16 %v3053_v33, %v3050_v57 }
 0x457   : > { %v3057_v39 = vpop.f32.mrf.mxu0 }
 0x458   : > { %10786 = vst [vmem:[#allocation3_spill] sm:$0xff] %v8915_v27  ;;  %v2860_v4 = vpop.f32.mrf.mxu1  ;;  %v3058_v16 = vadd.f32 %v3057_v39, %v2857_v53  ;;  %v3239_v46 = vshll.u32 %v8915_v27, 16  ;;  %v3439_v5 = vrot.slane %v8915_v27, 1  ;;  %v3237_v45 = vshrl.u32 %v8915_v27, 16 }
 0x459   : > { %v6956_v48 = vpop.f32.mrf.mxu0 }
 0x45a   : > { %v2862_v17 = vpop.f32.mrf.mxu1  ;;  %v3241_v47 = vrot.slane %v3239_v46, 1 }
 0x45b   : > { %v3060_v34 = vpop.f32.mrf.mxu0 }
 0x45c   : > { %v3061_v61 = vadd.f32 %v3060_v34, %v2860_v4  ;;  %v2865_v29 = vpop.f32.mrf.mxu1  ;;  %v3242_v18 = vor.u32 %v3241_v47, %v3237_v45 }
 0x45d   : > { %v6957_v2 = vpop.f32.mrf.mxu0 }
 0x45e   : > { %v8918_v14 = vpack.c.bf16 %v3061_v61, %v3058_v16  ;;  %v2867_v25 = vpop.f32.mrf.mxu1 }
 0x45f   : > { %v3065_v23 = vpop.f32.mrf.mxu0 }
 0x460   : > { %10787 = vst [vmem:[#allocation2_spill] sm:$0xff] %v8918_v14  ;;  %v2868_v44 = vpop.f32.mrf.mxu1  ;;  %v3440_v42 = vrot.slane %v8918_v14, 1  ;;  %v3244_v15 = vshll.u32 %v8918_v14, 16  ;;  %v3066_v30 = vadd.f32 %v3065_v23, %v2865_v29  ;;  %v3248_v55 = vshrl.u32 %v8918_v14, 16 }
 0x461   : > { %v6960_v3 = vpop.f32.mrf.mxu0  ;;  %v3669_v19 = vrot.slane %v8918_v14, 2 }
 0x462   : > { %v3441_v21 = vsel %vm1230_vm0, %v3439_v5, %v3440_v42  ;;  %v2870_v8 = vpop.f32.mrf.mxu1  ;;  %v3246_v9 = vrot.slane %v3244_v15, 1  ;;  %v3551_v56 = vrot.slane %v3248_v55, 1  ;;  %v3552_v63 = vrot.slane %v3244_v15, 2 }
 0x463   : > { %3476 = vrot.lane.b32.xlu0 %v3441_v21, %s7440_s23  ;;  %v3068_v40 = vpop.f32.mrf.mxu0 }
 0x464   : > { %v3069_v7 = vadd.f32 %v3068_v40, %v2868_v44  ;;  %v2873_v51 = vpop.f32.mrf.mxu1  ;;  %v3247_v60 = vsel %vm1026_vm1, %v3242_v18, %v3246_v9  ;;  %v3250_v43 = vor.u32 %v3248_v55, %v3246_v9  ;;  %v3553_v57 = vor.u32 %v3552_v63, %v3551_v56 }
 0x465   : > { %v6961_v36 = vpop.f32.mrf.mxu0 }
 0x466   : > { %v8926_v37 = vpack.c.bf16 %v3069_v7, %v3066_v30  ;;  %v2875_v10 = vpop.f32.mrf.mxu1 }
 0x467   : > { %3384 = vrot.lane.b32.xlu0 %v3247_v60, %s7441_s24  ;;  %v3073_v13 = vpop.f32.mrf.mxu0 }
 0x468   : > { %10788 = vst [vmem:[#allocation4_spill] sm:$0xff] %v8926_v37  ;;  %v2876_v59 = vpop.f32.mrf.mxu1  ;;  %v3442_v24 = vrot.slane %v8926_v37, 1  ;;  %v8933_v49 = vshll.u32 %v8926_v37, 16  ;;  %v8936_v11 = vshrl.u32 %v8926_v37, 16  ;;  %v3670_v28 = vrot.slane %v8926_v37, 2 }
 0x469   : > { %v6964_v35 = vpop.f32.mrf.mxu0  ;;  %v3074_v38 = vadd.f32 %v3073_v13, %v2873_v51 }
 0x46a   : > { %v3443_v58 = vsel %vm1230_vm0, %v3440_v42, %v3442_v24  ;;  %v3254_v22 = vrot.slane %v8933_v49, 1  ;;  %v2878_v31 = vpop.f32.mrf.mxu1  ;;  %v3555_v0 = vrot.slane %v8933_v49, 2  ;;  %v3554_v52 = vrot.slane %v8936_v11, 1 }
 0x46b   : > { %3515 = vrot.lane.b32.xlu0 %v3443_v58, %s7442_s25  ;;  %3478 = vrot.lane.b32.xlu1 %v3443_v58, %s7440_s23  ;;  %v3076_v12 = vpop.f32.mrf.mxu0  ;;  %v3671_v33 = vsel %vm1462_vm2, %v3669_v19, %v3670_v28  ;;  %v3781_v10 = vrot.slane %v8936_v11, 2  ;;  %v3782_v13 = vrot.slane %v8933_v49, 3 }
 0x46c   : > { %v3077_v32 = vadd.f32 %v3076_v12, %v2876_v59  ;;  %v2881_v6 = vpop.f32.mrf.mxu1  ;;  %v3556_v62 = vor.u32 %v3555_v0, %v3554_v52  ;;  %v3255_v53 = vsel %vm1026_vm1, %v3250_v43, %v3254_v22  ;;  %v3258_v59 = vor.u32 %v8936_v11, %v3254_v22 }
 0x46d   : > { %v6965_v26 = vpop.f32.mrf.mxu0  ;;  %v3783_v11 = vor.u32 %v3782_v13, %v3781_v10 }
 0x46e   : > { %v8946_v1 = vpack.c.bf16 %v3077_v32, %v3074_v38  ;;  %v2883_v50 = vpop.f32.mrf.mxu1  ;;  %v3557_v17 = vsel %vm1343_vm3, %v3553_v57, %v3556_v62 }
 0x46f   : > { %3706 = vrot.lane.b32.xlu0 %v3671_v33, %s7443_s26  ;;  %3386 = vrot.lane.b32.xlu1 %v3255_v53, %s7441_s24  ;;  %v3081_v54 = vpop.f32.mrf.mxu0 }
 0x470   : > { %10789 = vst [vmem:[#allocation5_spill] sm:$0xff] %v8946_v1  ;;  %v3444_v39 = vrot.slane %v8946_v1, 1  ;;  %v2884_v4 = vpop.f32.mrf.mxu1  ;;  %v8956_v48 = vshll.u32 %v8946_v1, 16  ;;  %v8960_v16 = vshrl.u32 %v8946_v1, 16  ;;  %v3082_v29 = vadd.f32 %v3081_v54, %v2881_v6 }
 0x471   : > { %v6968_v34 = vpop.f32.mrf.mxu0  ;;  %v3672_v46 = vrot.slane %v8946_v1, 2 }
 0x472   : > { %v3445_v61 = vsel %vm1230_vm0, %v3442_v24, %v3444_v39  ;;  %v3559_v2 = vrot.slane %v8956_v48, 2  ;;  %v2886_v25 = vpop.f32.mrf.mxu1  ;;  %v3558_v44 = vrot.slane %v8960_v16, 1  ;;  %v3784_v40 = vrot.slane %v8960_v16, 2 }
 0x473   : > { %3633 = vrot.lane.b32.xlu0 %v3557_v17, %s7444_s27  ;;  %3517 = vrot.lane.b32.xlu1 %v3445_v61, %s7442_s25  ;;  %v3084_v23 = vpop.f32.mrf.mxu0  ;;  %v3673_v15 = vsel %vm1462_vm2, %v3670_v28, %v3672_v46  ;;  %v3785_v30 = vrot.slane %v8956_v48, 3  ;;  %v3262_v18 = vrot.slane %v8956_v48, 1 }
 0x474   : > { %v3085_v5 = vadd.f32 %v3084_v23, %v2884_v4  ;;  %v2889_v42 = vpop.f32.mrf.mxu1  ;;  %v8971_v21 = vor.u32 %v3559_v2, %v3558_v44 }
 0x475   : > { %v6969_v47 = vpop.f32.mrf.mxu0  ;;  %v3786_v35 = vor.u32 %v3785_v30, %v3784_v40  ;;  %v3263_v31 = vsel %vm1026_vm1, %v3258_v59, %v3262_v18  ;;  %v3266_v50 = vor.u32 %v8960_v16, %v3262_v18 }
 0x476   : > { %v8969_v3 = vpack.c.bf16 %v3085_v5, %v3082_v29  ;;  %v2891_v8 = vpop.f32.mrf.mxu1  ;;  %v3561_v51 = vsel %vm1343_vm3, %v3556_v62, %v8971_v21 }
 0x477   : > { %3708 = vrot.lane.b32.xlu1 %v3673_v15, %s7443_s26  ;;  %3480 = vrot.lane.b32.xlu0 %v3445_v61, %s7440_s23  ;;  %v3089_v45 = vpop.f32.mrf.mxu0  ;;  %v3787_v52 = vsel %vm1575_vm5, %v3783_v11, %v3786_v35 }
 0x478   : > { %v2892_v9 = vpop.f32.mrf.mxu1  ;;  %v3446_v36 = vrot.slane %v8969_v3, 1  ;;  %v3674_v58 = vrot.slane %v8969_v3, 2  ;;  %v8994_v12 = vshll.u32 %v8969_v3, 16  ;;  %v8997_v56 = vshrl.u32 %v8969_v3, 16 }
 0x479   : > { %v6972_v7 = vpop.f32.mrf.mxu0  ;;  %v3090_v32 = vadd.f32 %v3089_v45, %v2889_v42 }
 0x47a   : > { %v2894_v60 = vpop.f32.mrf.mxu1  ;;  %v3447_v0 = vsel %vm1230_vm0, %v3444_v39, %v3446_v36  ;;  %v3675_v38 = vsel %vm1462_vm2, %v3672_v46, %v3674_v58  ;;  %v3270_v43 = vrot.slane %v8994_v12, 1  ;;  %v3788_v26 = vrot.slane %v8997_v56, 2 }
 0x47b   : > { %3745 = vrot.lane.b32.xlu0 %v3673_v15, %s7445_s28  ;;  %3635 = vrot.lane.b32.xlu1 %v3561_v51, %s7444_s27  ;;  %v3092_v55 = vpop.f32.mrf.mxu0  ;;  %v3789_v62 = vrot.slane %v8994_v12, 3  ;;  %v3562_v54 = vrot.slane %v8997_v56, 1  ;;  %v3563_v39 = vrot.slane %v8994_v12, 2 }
 0x47c   : > { %v2897_v24 = vpop.f32.mrf.mxu1  ;;  %v3093_v6 = vadd.f32 %v3092_v55, %v2892_v9  ;;  %v3271_v48 = vsel %vm1026_vm1, %v3266_v50, %v3270_v43 }
 0x47d   : > { %v6973_v28 = vpop.f32.mrf.mxu0  ;;  %v9020_v34 = vor.u32 %v3789_v62, %v3788_v26  ;;  %v3564_v46 = vor.u32 %v3563_v39, %v3562_v54 }
 0x47e   : > { %v2899_v49 = vpop.f32.mrf.mxu1  ;;  %v9018_v17 = vpack.c.bf16 %v3093_v6, %v3090_v32 }
 0x47f   : > { %3388 = vrot.lane.b32.xlu0 %v3263_v31, %s7441_s24  ;;  %3482 = vrot.lane.b32.xlu1 %v3447_v0, %s7440_s23  ;;  %v3097_v22 = vpop.f32.mrf.mxu0  ;;  %v3791_v25 = vsel %vm1575_vm5, %v3786_v35, %v9020_v34  ;;  %v3565_v8 = vsel %vm1343_vm3, %v8971_v21, %v3564_v46 }
 0x480   : > { %v2900_v63 = vpop.f32.mrf.mxu1  ;;  %v3448_v23 = vrot.slane %v9018_v17, 1  ;;  %v3276_v44 = vshll.u32 %v9018_v17, 16  ;;  %v3280_v5 = vshrl.u32 %v9018_v17, 16  ;;  %v3098_v45 = vadd.f32 %v3097_v22, %v2897_v24 }
 0x481   : > { %v6976_v19 = vpop.f32.mrf.mxu0  ;;  %v3676_v9 = vrot.slane %v9018_v17, 2 }
 0x482   : > { %v2902_v33 = vpop.f32.mrf.mxu1  ;;  %v3449_v30 = vsel %vm1230_vm0, %v3446_v36, %v3448_v23  ;;  %v3566_v51 = vrot.slane %v3280_v5, 1  ;;  %v3567_v18 = vrot.slane %v3276_v44, 2  ;;  %v3278_v31 = vrot.slane %v3276_v44, 1 }
 0x483   : > { %3861 = vrot.lane.b32.xlu0 %v3787_v52, %s7446_s29  ;;  %3747 = vrot.lane.b32.xlu1 %v3675_v38, %s7445_s28  ;;  %v3100_v53 = vpop.f32.mrf.mxu0  ;;  %v3677_v21 = vsel %vm1462_vm2, %v3674_v58, %v3676_v9  ;;  %v3792_v11 = vrot.slane %v3280_v5, 2  ;;  %v3793_v22 = vrot.slane %v3276_v44, 3  ;;  %v3274_v52 = vor.u32 %v8997_v56, %v3270_v43 }
 0x484   : > { %v9011_v57 = vpop.f32.mrf.mxu1  ;;  %v3101_v7 = vadd.f32 %v3100_v53, %v2900_v63  ;;  %v9050_v24 = vor.u32 %v3567_v18, %v3566_v51 }
 0x485   : > { %v6977_v4 = vpop.f32.mrf.mxu0  ;;  %v3279_v26 = vsel %vm1026_vm1, %v3274_v52, %v3278_v31  ;;  %v3794_v53 = vor.u32 %v3793_v22, %v3792_v11 }
 0x486   : > { %v2907_v61 = vpop.f32.mrf.mxu1  ;;  %v9048_v59 = vpack.c.bf16 %v3101_v7, %v3098_v45  ;;  %v3569_v58 = vsel %vm1343_vm3, %v3564_v46, %v9050_v24 }
 0x487   : > { %3519 = vrot.lane.b32.xlu0 %v3447_v0, %s7442_s25  ;;  %3390 = vrot.lane.b32.xlu1 %v3271_v48, %s7441_s24  ;;  %v9024_v16 = vpop.f32.mrf.mxu0 }
 0x488   : > { %v9026_v29 = vpop.f32.mrf.mxu1  ;;  %v3678_v12 = vrot.slane %v9048_v59, 2  ;;  %v9070_v56 = vshll.u32 %v9048_v59, 16  ;;  %v9073_v43 = vshrl.u32 %v9048_v59, 16 }
 0x489   : > { %v6980_v2 = vpop.f32.mrf.mxu0 }
 0x48a   : > { %v2910_v42 = vpop.f32.mrf.mxu1  ;;  %v3282_v2 = vor.u32 %v3280_v5, %v3278_v31  ;;  %v3797_v45 = vrot.slane %v9070_v56, 3  ;;  %v3679_v5 = vsel %vm1462_vm2, %v3676_v9, %v3678_v12  ;;  %v3571_v18 = vrot.slane %v9070_v56, 2 }
 0x48b   : > { %3710 = vrot.lane.b32.xlu0 %v3675_v38, %s7443_s26  ;;  %3863 = vrot.lane.b32.xlu1 %v3791_v25, %s7446_s29  ;;  %v9035_v47 = vpop.f32.mrf.mxu0  ;;  %v3450_v38 = vrot.slane %v9048_v59, 1 }
 0x48c   : > { %v2913_v15 = vpop.f32.mrf.mxu1  ;;  %v3109_v7 = vadd.f32 %v9035_v47, %v9026_v29 }
 0x48d   : > { %v6981_v40 = vpop.f32.mrf.mxu0  ;;  %v3451_v54 = vsel %vm1230_vm0, %v3448_v23, %v3450_v38  ;;  %v3795_v23 = vsel %vm1575_vm5, %v9020_v34, %v3794_v53 }
 0x48e   : > { %v2915_v60 = vpop.f32.mrf.mxu1 }
 0x48f   : > { %3637 = vrot.lane.b32.xlu0 %v3565_v8, %s7444_s27  ;;  %3521 = vrot.lane.b32.xlu1 %v3449_v30, %s7442_s25  ;;  %v3113_v10 = vpop.f32.mrf.mxu0  ;;  %v3796_v8 = vrot.slane %v9073_v43, 2 }
 0x490   : > { %v2916_v13 = vpop.f32.mrf.mxu1  ;;  %v3114_v36 = vadd.f32 %v3113_v10, %v2913_v15  ;;  %v3106_v15 = vadd.f32 %v9024_v16, %v9011_v57  ;;  %v3570_v16 = vrot.slane %v9073_v43, 1 }
 0x491   : > { %v6984_v55 = vpop.f32.mrf.mxu0  ;;  %v9108_v10 = vor.u32 %v3797_v45, %v3796_v8 }
 0x492   : > { %v2918_v35 = vpop.f32.mrf.mxu1  ;;  %v9113_v47 = vpack.c.bf16 %v3109_v7, %v3106_v15 }
 0x493   : > { %3712 = vrot.lane.b32.xlu1 %v3677_v21, %s7443_s26  ;;  %3484 = vrot.lane.b32.xlu0 %v3449_v30, %s7440_s23  ;;  %v3116_v28 = vpop.f32.mrf.mxu0  ;;  %v3286_v30 = vrot.slane %v9070_v56, 1  ;;  %v3799_v11 = vsel %vm1575_vm5, %v3794_v53, %v9108_v10 }
 0x494   : > { %v3117_v0 = vadd.f32 %v3116_v28, %v2916_v13  ;;  %v2921_v49 = vpop.f32.mrf.mxu1  ;;  %v9118_v28 = vor.u32 %v3571_v18, %v3570_v16  ;;  %v9132_v52 = vshll.u32 %v9113_v47, 16 }
 0x495   : > { %v6985_v63 = vpop.f32.mrf.mxu0  ;;  %v3287_v29 = vsel %vm1026_vm1, %v3282_v2, %v3286_v30 }
 0x496   : > { %v9060_v32 = vpack.c.bf16 %v3117_v0, %v3114_v36  ;;  %v2923_v19 = vpop.f32.mrf.mxu1  ;;  %v3573_v53 = vsel %vm1343_vm3, %v9050_v24, %v9118_v28  ;;  %v3575_v15 = vrot.slane %v9132_v52, 2 }
 0x497   : > { %3749 = vrot.lane.b32.xlu0 %v3677_v21, %s7445_s28  ;;  %3639 = vrot.lane.b32.xlu1 %v3569_v58, %s7444_s27  ;;  %v3121_v6 = vpop.f32.mrf.mxu0  ;;  %v3452_v58 = vrot.slane %v9113_v47, 1  ;;  %v9135_v19 = vshrl.u32 %v9113_v47, 16 }
 0x498   : > { %v2924_v62 = vpop.f32.mrf.mxu1  ;;  %v9066_v33 = vshll.u32 %v9060_v32, 16  ;;  %v3122_v39 = vadd.f32 %v3121_v6, %v2921_v49  ;;  %v9079_v48 = vshrl.u32 %v9060_v32, 16 }
 0x499   : > { %v6988_v50 = vpop.f32.mrf.mxu0  ;;  %v3453_v24 = vsel %vm1230_vm0, %v3450_v38, %v3452_v58 }
 0x49a   : > { %v2926_v4 = vpop.f32.mrf.mxu1  ;;  %v3302_v61 = vrot.slane %v9066_v33, 1  ;;  %v3680_v50 = vrot.slane %v9113_v47, 2 }
 0x49b   : > { %3392 = vrot.lane.b32.xlu0 %v3279_v26, %s7441_s24  ;;  %3486 = vrot.lane.b32.xlu1 %v3451_v54, %s7440_s23  ;;  %v3124_v46 = vpop.f32.mrf.mxu0 }
 0x49c   : > { %v3125_v25 = vadd.f32 %v3124_v46, %v2924_v62  ;;  %v2929_v44 = vpop.f32.mrf.mxu1  ;;  %v3306_v42 = vor.u32 %v9079_v48, %v3302_v61 }
 0x49d   : > { %v6989_v40 = vpop.f32.mrf.mxu0 }
 0x49e   : > { %v9099_v51 = vpack.c.bf16 %v3125_v25, %v3122_v39  ;;  %v2931_v34 = vpop.f32.mrf.mxu1 }
 0x49f   : > { %3865 = vrot.lane.b32.xlu0 %v3795_v23, %s7446_s29  ;;  %3751 = vrot.lane.b32.xlu1 %v3679_v5, %s7445_s28  ;;  %v3129_v57 = vpop.f32.mrf.mxu0  ;;  %v3574_v23 = vrot.slane %v9135_v19, 1 }
 0x4a0   : > { %v2932_v60 = vpop.f32.mrf.mxu1  ;;  %v9106_v9 = vshll.u32 %v9099_v51, 16  ;;  %v3130_v55 = vadd.f32 %v3129_v57, %v2929_v44  ;;  %v9128_v63 = vshrl.u32 %v9099_v51, 16  ;;  %v10746_v4 = vrot.slane %v9099_v51, 3 }
 0x4a1   : > { %v6992_v13 = vpop.f32.mrf.mxu0 }
 0x4a2   : > { %v2934_v21 = vpop.f32.mrf.mxu1  ;;  %v3310_v36 = vrot.slane %v9106_v9, 1  ;;  %v3582_v46 = vrot.slane %v9128_v63, 1  ;;  %v3583_v2 = vrot.slane %v9106_v9, 2  ;;  %v3681_v13 = vsel %vm1462_vm2, %v3678_v12, %v3680_v50 }
 0x4a3   : > { %3523 = vrot.lane.b32.xlu0 %v3451_v54, %s7442_s25  ;;  %3394 = vrot.lane.b32.xlu1 %v3287_v29, %s7441_s24  ;;  %v3132_v35 = vpop.f32.mrf.mxu0  ;;  %v9178_v29 = vor.u32 %v3575_v15, %v3574_v23 }
 0x4a4   : > { %v3133_v31 = vadd.f32 %v3132_v35, %v2932_v60  ;;  %v2937_v0 = vpop.f32.mrf.mxu1  ;;  %v9123_v49 = vsel %vm1026_vm1, %v3306_v42, %v3310_v36  ;;  %v9171_v16 = vor.u32 %v3583_v2, %v3582_v46  ;;  %v3290_v35 = vor.u32 %v9073_v43, %v3286_v30 }
 0x4a5   : > { %v6993_v22 = vpop.f32.mrf.mxu0 }
 0x4a6   : > { %v9137_v6 = vpack.c.bf16 %v3133_v31, %v3130_v55  ;;  %v2939_v26 = vpop.f32.mrf.mxu1  ;;  %v3294_v31 = vrot.slane %v9132_v52, 1  ;;  %v3454_v22 = vrot.slane %v9060_v32, 1 }
 0x4a7   : > { %3714 = vrot.lane.b32.xlu0 %v3679_v5, %s7443_s26  ;;  %3867 = vrot.lane.b32.xlu1 %v3799_v11, %s7446_s29  ;;  %v3137_v62 = vpop.f32.mrf.mxu0  ;;  %v3801_v26 = vrot.slane %v9132_v52, 3 }
 0x4a8   : > { %10790 = vst [vmem:[#allocation6_spill] sm:$0xff] %v9137_v6  ;;  %v2940_v54 = vpop.f32.mrf.mxu1  ;;  %v9146_v39 = vshll.u32 %v9137_v6, 16  ;;  %v9152_v44 = vshrl.u32 %v9137_v6, 16  ;;  %v10745_v42 = vrot.slane %v9137_v6, 3  ;;  %v3138_v8 = vadd.f32 %v3137_v62, %v2937_v0 }
 0x4a9   : > { %v6996_v25 = vpop.f32.mrf.mxu0  ;;  %v3800_v0 = vrot.slane %v9135_v19, 2  ;;  %v3686_v43 = vrot.slane %v9137_v6, 2 }
 0x4aa   : > { %v2942_v45 = vpop.f32.mrf.mxu1  ;;  %v3913_v5 = vsel %vm1692_vm4, %v10746_v4, %v10745_v42  ;;  %v3586_v7 = vrot.slane %v9152_v44, 1  ;;  %v3587_v38 = vrot.slane %v9146_v39, 2  ;;  %v3813_v46 = vrot.slane %v9146_v39, 3 }
 0x4ab   : > { %3641 = vrot.lane.b32.xlu0 %v3573_v53, %s7444_s27  ;;  %3525 = vrot.lane.b32.xlu1 %v3453_v24, %s7442_s25  ;;  %v3140_v40 = vpop.f32.mrf.mxu0  ;;  %v3577_v25 = vsel %vm1343_vm3, %v9118_v28, %v9178_v29 }
 0x4ac   : > { %v3141_v34 = vadd.f32 %v3140_v40, %v2940_v54  ;;  %v2945_v57 = vpop.f32.mrf.mxu1  ;;  %4316 = vmatprep.subr.bf16.mxu1 %v3913_v5  ;;  %v3588_v60 = vor.u32 %v3587_v38, %v3586_v7  ;;  %v3812_v54 = vrot.slane %v9152_v44, 2  ;;  %v3295_v7 = vsel %vm1026_vm1, %v3290_v35, %v3294_v31 }
 0x4ad   : > { %v6997_v18 = vpop.f32.mrf.mxu0  ;;  %v3802_v38 = vor.u32 %v3801_v26, %v3800_v0  ;;  %v3804_v35 = vrot.slane %v9079_v48, 2  ;;  %v3805_v0 = vrot.slane %v9066_v33, 3 }
 0x4ae   : > { %v9180_v55 = vpack.c.bf16 %v3141_v34, %v3138_v8  ;;  %v2947_v21 = vpop.f32.mrf.mxu1  ;;  %v9191_v12 = vsel %vm1343_vm3, %v9171_v16, %v3588_v60 }
 0x4af   : > { %3716 = vrot.lane.b32.xlu1 %v3681_v13, %s7443_s26  ;;  %3488 = vrot.lane.b32.xlu0 %v3453_v24, %s7440_s23  ;;  %v3145_v11 = vpop.f32.mrf.mxu0  ;;  %v3682_v21 = vrot.slane %v9060_v32, 2 }
 0x4b0   : > { %10791 = vst [vmem:[#allocation7_spill] sm:$0xff] %v9180_v55  ;;  %v2948_v62 = vpop.f32.mrf.mxu1  ;;  %v9196_v53 = vshll.u32 %v9180_v55, 16  ;;  %v9199_v56 = vshrl.u32 %v9180_v55, 16  ;;  %v10747_v2 = vrot.slane %v9180_v55, 2  ;;  %v3146_v24 = vadd.f32 %v3145_v11, %v2945_v57 }
 0x4b1   : > { %v7000_v30 = vpop.f32.mrf.mxu0  ;;  %v10804_v14 = vrot.slane %v9180_v55, 2 }
 0x4b2   : > { %v2950_v23 = vpop.f32.mrf.mxu1  ;;  %v3590_v15 = vrot.slane %v9199_v56, 1  ;;  %v3591_v8 = vrot.slane %v9196_v53, 2  ;;  %v9217_v40 = vsel %vm1462_vm2, %v3686_v43, %v10747_v2  ;;  %v3816_v28 = vrot.slane %v9199_v56, 2 }
 0x4b3   : > { %3753 = vrot.lane.b32.xlu0 %v3681_v13, %s7445_s28  ;;  %3643 = vrot.lane.b32.xlu1 %v3577_v25, %s7444_s27  ;;  %v3148_v45 = vpop.f32.mrf.mxu0  ;;  %v3817_v5 = vrot.slane %v9196_v53, 3  ;;  %v3455_v13 = vsel %vm1230_vm0, %v3452_v58, %v3454_v22  ;;  %v9234_v30 = vor.u32 %v3813_v46, %v3812_v54 }
 0x4b4   : > { %v3149_v34 = vadd.f32 %v3148_v45, %v2948_v62  ;;  %v9224_v57 = vpop.f32.mrf.mxu1  ;;  %v9226_v18 = vor.u32 %v3591_v8, %v3590_v15  ;;  %v3683_v45 = vsel %vm1462_vm2, %v3680_v50, %v3682_v21 }
 0x4b5   : > { %v7001_v11 = vpop.f32.mrf.mxu0  ;;  %v3818_v25 = vor.u32 %v3817_v5, %v3816_v28  ;;  %v9265_v28 = vor.u32 %v3805_v0, %v3804_v35  ;;  %v3684_v35 = vrot.slane %v9099_v51, 2 }
 0x4b6   : > { %v9238_v26 = vpack.c.bf16 %v3149_v34, %v3146_v24  ;;  %v2955_v62 = vpop.f32.mrf.mxu1  ;;  %v9242_v23 = vsel %vm1343_vm3, %v3588_v60, %v9226_v18  ;;  %v3803_v60 = vsel %vm1575_vm5, %v9108_v10, %v3802_v38 }
 0x4b7   : > { %3396 = vrot.lane.b32.xlu0 %v3295_v7, %s7441_s24  ;;  %3490 = vrot.lane.b32.xlu1 %v3455_v13, %s7440_s23  ;;  %v9246_v58 = vpop.f32.mrf.mxu0  ;;  %v9250_v54 = vsel %vm1575_vm5, %v9234_v30, %v3818_v25  ;;  %v3807_v50 = vsel %vm1575_vm5, %v3802_v38, %v9265_v28  ;;  %v3685_v41 = vsel %vm1462_vm2, %v3682_v21, %v3684_v35 }
 0x4b8   : > { %10792 = vst [vmem:[#allocation8_spill] sm:$0xff] %v9238_v26  ;;  %v9252_v46 = vpop.f32.mrf.mxu1  ;;  %v9255_v24 = vshll.u32 %v9238_v26, 16  ;;  %v9258_v8 = vshrl.u32 %v9238_v26, 16 }
 0x4b9   : > { %v7004_v15 = vpop.f32.mrf.mxu0 }
 0x4ba   : > { %v2958_v5 = vpop.f32.mrf.mxu1  ;;  %v3820_v34 = vrot.slane %v9258_v8, 2  ;;  %v3821_v11 = vrot.slane %v9255_v24, 3 }
 0x4bb   : > { %3869 = vrot.lane.b32.xlu0 %v3803_v60, %s7446_s29  ;;  %3755 = vrot.lane.b32.xlu1 %v3683_v45, %s7445_s28  ;;  %v9269_v7 = vpop.f32.mrf.mxu0 }
 0x4bc   : > { %v9273_v62 = vpop.f32.mrf.mxu1  ;;  %v9275_v15 = vor.u32 %v3821_v11, %v3820_v34  ;;  %v3579_v34 = vrot.slane %v9066_v33, 2  ;;  %v9318_v33 = vsel %vm1462_vm2, %v3684_v35, %v3686_v43 }
 0x4bd   : > { %v7005_v10 = vpop.f32.mrf.mxu0 }
 0x4be   : > { %v2963_v0 = vpop.f32.mrf.mxu1  ;;  %v9286_v5 = vsel %vm1575_vm5, %v3818_v25, %v9275_v15  ;;  %v3578_v10 = vrot.slane %v9079_v48, 1 }
 0x4bf   : > { %3527 = vrot.lane.b32.xlu0 %v3455_v13, %s7442_s25  ;;  %3871 = vrot.lane.b32.xlu1 %v3807_v50, %s7446_s29  ;;  %v9282_v60 = vpop.f32.mrf.mxu0  ;;  %v3298_v13 = vor.u32 %v9135_v19, %v3294_v31 }
 0x4c0   : > { %v9290_v11 = vpop.f32.mrf.mxu1  ;;  %v3580_v0 = vor.u32 %v3579_v34, %v3578_v10  ;;  %v3162_v2 = vadd.f32 %v9282_v60, %v9273_v62 }
 0x4c1   : > { %v7008_v38 = vpop.f32.mrf.mxu0 }
 0x4c2   : > { %v2966_v50 = vpop.f32.mrf.mxu1  ;;  %v3303_v38 = vsel %vm1026_vm1, %v3298_v13, %v3302_v61  ;;  %v3585_v52 = vsel %vm1343_vm3, %v3580_v0, %v9171_v16  ;;  %v3456_v61 = vrot.slane %v9099_v51, 1  ;;  %v3458_v16 = vrot.slane %v9137_v6, 1 }
 0x4c3   : > { %3718 = vrot.lane.b32.xlu0 %v3683_v45, %s7443_s26  ;;  %3720 = vrot.lane.b32.xlu1 %v3685_v41, %s7443_s26  ;;  %v9298_v25 = vpop.f32.mrf.mxu0  ;;  %v3809_v50 = vrot.slane %v9106_v9, 3 }
 0x4c4   : > { %v9300_v48 = vpop.f32.mrf.mxu1  ;;  %v9334_v35 = vsel %vm1230_vm0, %v3454_v22, %v3456_v61 }
 0x4c5   : > { %v7009_v42 = vpop.f32.mrf.mxu0 }
 0x4c6   : > { %v2971_v21 = vpop.f32.mrf.mxu1  ;;  %v3581_v42 = vsel %vm1343_vm3, %v9178_v29, %v3580_v0  ;;  %v3808_v29 = vrot.slane %v9128_v63, 2  ;;  %v9337_v0 = vsel %vm1230_vm0, %v3456_v61, %v3458_v16 }
 0x4c7   : > { %3398 = vrot.lane.b32.xlu0 %v3303_v38, %s7441_s24  ;;  %3647 = vrot.lane.b32.xlu1 %v3585_v52, %s7444_s27  ;;  %v9309_v19 = vpop.f32.mrf.mxu0  ;;  %v3314_v38 = vor.u32 %v9128_v63, %v3310_v36  ;;  %v3318_v52 = vrot.slane %v9146_v39, 1 }
 0x4c8   : > { %v9311_v31 = vpop.f32.mrf.mxu1 }
 0x4c9   : > { %v7012_v45 = vpop.f32.mrf.mxu0 }
 0x4ca   : > { %v2974_v10 = vpop.f32.mrf.mxu1 }
 0x4cb   : > { %3645 = vrot.lane.b32.xlu0 %v3581_v42, %s7444_s27  ;;  %3759 = vrot.lane.b32.xlu1 %v9318_v33, %s7445_s28  ;;  %v9325_v34 = vpop.f32.mrf.mxu0  ;;  %v3810_v42 = vor.u32 %v3809_v50, %v3808_v29  ;;  %v3319_v10 = vsel %vm1026_vm1, %v3314_v38, %v3318_v52  ;;  %v3462_v38 = vrot.slane %v9238_v26, 1 }
 0x4cc   : > { %v9327_v13 = vpop.f32.mrf.mxu1 }
 0x4cd   : > { %v7013_v43 = vpop.f32.mrf.mxu0  ;;  %v3815_v50 = vsel %vm1575_vm5, %v3810_v42, %v9234_v30 }
 0x4ce   : > { %v2979_v21 = vpop.f32.mrf.mxu1  ;;  %v3811_v43 = vsel %vm1575_vm5, %v9265_v28, %v3810_v42 }
 0x4cf   : > { %3529 = vrot.lane.b32.xlu0 %v9334_v35, %s7442_s25  ;;  %3494 = vrot.lane.b32.xlu1 %v9337_v0, %s7440_s23  ;;  %v9347_v45 = vpop.f32.mrf.mxu0  ;;  %v3460_v21 = vrot.slane %v9180_v55, 1 }
 0x4d0   : > { %v9349_v22 = vpop.f32.mrf.mxu1 }
 0x4d1   : > { %v7016_v61 = vpop.f32.mrf.mxu0 }
 0x4d2   : > { %v2982_v9 = vpop.f32.mrf.mxu1  ;;  %v3157_v61 = vadd.f32 %v9269_v7, %v9252_v46  ;;  %v3463_v46 = vsel %vm1230_vm0, %v3460_v21, %v3462_v38 }
 0x4d3   : > { %3757 = vrot.lane.b32.xlu0 %v3685_v41, %s7445_s28  ;;  %3402 = vrot.lane.b32.xlu1 %v3319_v10, %s7441_s24  ;;  %v9354_v36 = vpop.f32.mrf.mxu0  ;;  %v3154_v41 = vadd.f32 %v9246_v58, %v9224_v57  ;;  %v3326_v9 = vrot.slane %v9196_v53, 1  ;;  %v9380_v57 = vsel %vm1230_vm0, %v3458_v16, %v3460_v21  ;;  %v3322_v58 = vor.u32 %v9152_v44, %v3318_v52 }
 0x4d4   : > { %v9356_v63 = vpop.f32.mrf.mxu1 }
 0x4d5   : > { %v9358_v39 = vpop.permute.xlu0 %3476  ;;  %v7017_v29 = vpop.f32.mrf.mxu0  ;;  %v9384_v7 = vpack.c.bf16 %v3157_v61, %v3154_v41  ;;  %v3327_v52 = vsel %vm1026_vm1, %v3322_v58, %v3326_v9 }
 0x4d6   : > { %10793 = vst [vmem:[#allocation9_spill] sm:$0xff] %v9358_v39  ;;  %v2987_v10 = vpop.f32.mrf.mxu1 }
 0x4d7   : > { %3873 = vrot.lane.b32.xlu0 %v3811_v43, %s7446_s29  ;;  %3875 = vrot.lane.b32.xlu1 %v3815_v50, %s7446_s29  ;;  %v9372_v28 = vpop.f32.mrf.mxu0  ;;  %10795 = vst [vmem:[#allocation11_spill] sm:$0xff] %v9384_v7  ;;  %v3330_v43 = vor.u32 %v9199_v56, %v3326_v9  ;;  %v3334_v50 = vrot.slane %v9255_v24, 1  ;;  %v9401_v41 = vshll.u32 %v9384_v7, 16  ;;  %v9404_v61 = vshrl.u32 %v9384_v7, 16 }
 0x4d8   : > { %v9375_v29 = vpop.f32.mrf.mxu1  ;;  %v3165_v9 = vadd.f32 %v9298_v25, %v9290_v11  ;;  %v3692_v62 = vrot.slane %v9384_v7, 2 }
 0x4d9   : > { %v9377_v30 = vpop.permute.xlu0 %3384  ;;  %v7020_v42 = vpop.f32.mrf.mxu0  ;;  %v3335_v21 = vsel %vm1026_vm1, %v3330_v43, %v3334_v50  ;;  %v3598_v60 = vrot.slane %v9404_v61, 1  ;;  %v3599_v11 = vrot.slane %v9401_v41, 2 }
 0x4da   : > { %10794 = vst [vmem:[#allocation10_spill] sm:$0xff] %v9377_v30  ;;  %v2990_v10 = vpop.f32.mrf.mxu1 }
 0x4db   : > { %3496 = vrot.lane.b32.xlu0 %v9380_v57, %s7440_s23  ;;  %3498 = vrot.lane.b32.xlu1 %v3463_v46, %s7440_s23  ;;  %v9391_v53 = vpop.f32.mrf.mxu0 }
 0x4dc   : > { %v2993_v16 = vpop.f32.mrf.mxu1 }
 0x4dd   : > { %v9393_v4 = vpop.permute.xlu0 %3515  ;;  %v9395_v44 = vpop.permute.xlu1 %3478 }
 0x4de   : > { %10796 = vst [vmem:[#allocation12_spill] sm:$0xff] %v9393_v4  ;;  %10797 = vst [vmem:[#allocation13_spill] sm:$0xff] %v9395_v44  ;;  %v7021_v42 = vpop.f32.mrf.mxu0  ;;  %v2995_v10 = vpop.f32.mrf.mxu1  ;;  %v3690_v4 = vrot.slane %v9238_v26, 2  ;;  %v9427_v26 = vpack.c.bf16 %v3165_v9, %v3162_v2 }
 0x4df   : > { %3404 = vrot.lane.b32.xlu0 %v3327_v52, %s7441_s24  ;;  %3406 = vrot.lane.b32.xlu1 %v3335_v21, %s7441_s24  ;;  %v3594_v42 = vrot.slane %v9258_v8, 1  ;;  %v3595_v52 = vrot.slane %v9255_v24, 2  ;;  %v10800_v21 = vrot.slane %v9384_v7, 1 }
 0x4e0   : > { %v3193_v58 = vpop.f32.mrf.mxu0  ;;  %v2996_v43 = vpop.f32.mrf.mxu1  ;;  %10801 = vst [vmem:[#allocation16_spill] sm:$0xff] %v9427_v26  ;;  %v9448_v9 = vshll.u32 %v9427_v26, 16  ;;  %v10811_v37 = vrot.slane %v9427_v26, 2 }
 0x4e1   : > { %v9412_v56 = vpop.permute.xlu0 %3706  ;;  %v9414_v20 = vpop.permute.xlu1 %3386  ;;  %v3465_v10 = vsel %vm1230_vm0, %v3462_v38, %v10800_v21  ;;  %v3194_v39 = vadd.f32 %v3193_v58, %v2993_v16  ;;  %v3596_v21 = vor.u32 %v3595_v52, %v3594_v42  ;;  %v9451_v58 = vshrl.u32 %v9427_v26, 16 }
 0x4e2   : > { %10798 = vst [vmem:[#allocation14_spill] sm:$0xff] %v9412_v56  ;;  %10799 = vst [vmem:[#allocation15_spill] sm:$0xff] %v9414_v20  ;;  %v7024_v25 = vpop.f32.mrf.mxu0  ;;  %v2998_v56 = vpop.f32.mrf.mxu1  ;;  %v10810_v20 = vrot.slane %v9384_v7, 1  ;;  %v9493_v55 = vsel %vm1462_vm2, %v3692_v62, %v10811_v37 }
 0x4e3   : > { %3535 = vrot.lane.b32.xlu0 %v3463_v46, %s7442_s25  ;;  %3537 = vrot.lane.b32.xlu1 %v3465_v10, %s7442_s25  ;;  %v9436_v25 = vsel %vm1462_vm2, %v10804_v14, %v3690_v4  ;;  %v9439_v46 = vsel %vm1462_vm2, %v3690_v4, %v3692_v62  ;;  %v9441_v56 = vor.u32 %v3599_v11, %v3598_v60 }
 0x4e4   : > { %v3196_v24 = vpop.f32.mrf.mxu0  ;;  %v3001_v27 = vpop.f32.mrf.mxu1  ;;  %v3338_v14 = vor.u32 %v9258_v8, %v3334_v50  ;;  %v3597_v11 = vsel %vm1343_vm3, %v9226_v18, %v3596_v21  ;;  %v3825_v50 = vrot.slane %v9401_v41, 3  ;;  %v3828_v18 = vrot.slane %v9451_v58, 2 }
 0x4e5   : > { %v9429_v30 = vpop.permute.xlu0 %3633  ;;  %v9431_v38 = vpop.permute.xlu1 %3517  ;;  %v3197_v44 = vadd.f32 %v3196_v24, %v2996_v43  ;;  %v3342_v24 = vrot.slane %v9401_v41, 1 }
 0x4e6   : > { %10802 = vst [vmem:[#allocation17_spill] sm:$0xff] %v9429_v30  ;;  %10803 = vst [vmem:[#allocation18_spill] sm:$0xff] %v9431_v38  ;;  %v7025_v2 = vpop.f32.mrf.mxu0  ;;  %v3003_v16 = vpop.f32.mrf.mxu1  ;;  %v3601_v30 = vsel %vm1343_vm3, %v3596_v21, %v9441_v56  ;;  %v3829_v38 = vrot.slane %v9448_v9, 3 }
 0x4e7   : > { %3726 = vrot.lane.b32.xlu0 %v9436_v25, %s7443_s26  ;;  %3728 = vrot.lane.b32.xlu1 %v9439_v46, %s7443_s26  ;;  %v9454_v4 = vpack.c.bf16 %v3197_v44, %v3194_v39  ;;  %v3824_v2 = vrot.slane %v9404_v61, 2 }
 0x4e8   : > { %v3201_v43 = vpop.f32.mrf.mxu0  ;;  %v3004_v42 = vpop.f32.mrf.mxu1 }
 0x4e9   : > { %v9456_v52 = vpop.permute.xlu1 %3708  ;;  %v9458_v60 = vpop.permute.xlu0 %3480  ;;  %v3202_v16 = vadd.f32 %v3201_v43, %v3001_v27  ;;  %v9474_v27 = vshll.u32 %v9454_v4, 16  ;;  %v3618_v21 = vshrl.u32 %v9454_v4, 16 }
 0x4ea   : > { %10805 = vst [vmem:[#allocation19_spill] sm:$0xff] %v9456_v52  ;;  %10806 = vst [vmem:[#allocation20_spill] sm:$0xff] %v9458_v60  ;;  %v7028_v44 = vpop.f32.mrf.mxu0  ;;  %v3006_v52 = vpop.f32.mrf.mxu1 }
 0x4eb   : > { %3653 = vrot.lane.b32.xlu0 %v3597_v11, %s7444_s27  ;;  %3655 = vrot.lane.b32.xlu1 %v3601_v30, %s7444_s27  ;;  %v3343_v52 = vsel %vm1026_vm1, %v3338_v14, %v3342_v24  ;;  %v3346_v11 = vor.u32 %v9404_v61, %v3342_v24  ;;  %v10809_v44 = vrot.slane %v9427_v26, 1  ;;  %v9505_v24 = vor.u32 %v3829_v38, %v3828_v18 }
 0x4ec   : > { %v3204_v43 = vpop.f32.mrf.mxu0  ;;  %v3009_v8 = vpop.f32.mrf.mxu1  ;;  %v3621_v38 = vrot.slane %v9474_v27, 2 }
 0x4ed   : > { %v9477_v39 = vpop.permute.xlu0 %3745  ;;  %v9479_v41 = vpop.permute.xlu1 %3635  ;;  %v3205_v30 = vadd.f32 %v3204_v43, %v3004_v42  ;;  %v9488_v60 = vsel %vm1230_vm0, %v10810_v20, %v10809_v44  ;;  %v3173_v42 = vadd.f32 %v9325_v34, %v9311_v31  ;;  %v3620_v34 = vrot.slane %v3618_v21, 1 }
 0x4ee   : > { %10807 = vst [vmem:[#allocation21_spill] sm:$0xff] %v9477_v39  ;;  %10808 = vst [vmem:[#allocation22_spill] sm:$0xff] %v9479_v41  ;;  %v3170_v39 = vadd.f32 %v9309_v19, %v9300_v48  ;;  %v9497_v41 = vor.u32 %v3825_v50, %v3824_v2  ;;  %v7029_v14 = vpop.f32.mrf.mxu0  ;;  %v3011_v61 = vpop.f32.mrf.mxu1  ;;  %v3844_v48 = vrot.slane %v3618_v21, 2  ;;  %v3845_v19 = vrot.slane %v9474_v27, 3 }
 0x4ef   : > { %3500 = vrot.lane.b32.xlu0 %v3465_v10, %s7440_s23  ;;  %3502 = vrot.lane.b32.xlu1 %v9488_v60, %s7440_s23  ;;  %v3234_v37 = vpack.c.bf16 %v3205_v30, %v3202_v16 }
 0x4f0   : > { %v3209_v50 = vpop.f32.mrf.mxu0  ;;  %v3012_v10 = vpop.f32.mrf.mxu1  ;;  %v9537_v1 = vpack.c.bf16 %v3173_v42, %v3170_v39 }
 0x4f1   : > { %v9510_v43 = vpop.permute.xlu0 %3388  ;;  %v9512_v44 = vpop.permute.xlu1 %3482  ;;  %v3704_v14 = vrot.slane %v3234_v37, 2  ;;  %v3513_v61 = vrot.slane %v3234_v37, 1  ;;  %v3210_v20 = vadd.f32 %v3209_v50, %v3009_v8  ;;  %v3625_v31 = vshrl.u32 %v3234_v37, 16 }
 0x4f2   : > { %10812 = vst [vmem:[#allocation23_spill] sm:$0xff] %v9510_v43  ;;  %10813 = vst [vmem:[#allocation24_spill] sm:$0xff] %v9512_v44  ;;  %v3628_v16 = vshll.u32 %v3234_v37, 16  ;;  %v3930_v18 = vrot.slane %v3234_v37, 3  ;;  %v7032_v30 = vpop.f32.mrf.mxu0  ;;  %v3013_v62 = vpop.f32.mrf.mxu1  ;;  %v10814_v10 = vrot.slane %v9454_v4, 2  ;;  %v10816_v8 = vrot.slane %v9454_v4, 1 }
 0x4f3   : > { %3765 = vrot.lane.b32.xlu0 %v9439_v46, %s7445_s28  ;;  %3767 = vrot.lane.b32.xlu1 %v9493_v55, %s7445_s28  ;;  %v3627_v50 = vrot.slane %v3625_v31, 1  ;;  %v10764_v37 = vrot.slane %v9454_v4, 3  ;;  %v3235_v62 = vpack.c.bf16 %v3210_v20, %v3210_v20  ;;  %v3848_v7 = vrot.slane %v3625_v31, 2  ;;  %10820 = vst [vmem:[#allocation28_spill] sm:$0xff] %v9537_v1 }
 0x4f4   : > { %v9522_v2 = vsel %vm1462_vm2, %v10814_v10, %v3704_v14  ;;  %v9527_v21 = vsel %vm1230_vm0, %v10816_v8, %v3513_v61  ;;  %v3630_v30 = vrot.slane %v3628_v16, 2  ;;  %v3849_v46 = vrot.slane %v3628_v16, 3  ;;  %v3212_v43 = vpop.f32.mrf.mxu0 }
 0x4f5   : > { %10815 = vst [vmem:[#allocation25_spill] sm:$0xff] %v9522_v2  ;;  %v9530_v44 = vpop.permute.xlu0 %3861  ;;  %v9532_v6 = vpop.permute.xlu1 %3747  ;;  %v10819_v10 = vrot.slane %v9448_v9, 1  ;;  %v3602_v61 = vrot.slane %v9451_v58, 1  ;;  %v9543_v20 = vsel %vm1692_vm4, %v10764_v37, %v3930_v18  ;;  %v9545_v31 = vor.u32 %v3845_v19, %v3844_v48 }
 0x4f6   : > { %10817 = vst [vmem:[#allocation26_spill] sm:$0xff] %v9530_v44  ;;  %10818 = vst [vmem:[#allocation27_spill] sm:$0xff] %v9532_v6  ;;  %v3853_v43 = vshrl.u32 %v3235_v62, 16  ;;  %v3856_v16 = vshll.u32 %v3235_v62, 16  ;;  %v9547_v8 = vor.u32 %v3621_v38, %v3620_v34  ;;  %v7033_v44 = vpop.f32.mrf.mxu0  ;;  %v3631_v39 = vor.u32 %v3630_v30, %v3627_v50 }
 0x4f7   : > { %v3351_v2 = vsel %vm1026_vm1, %v3346_v11, %v10819_v10  ;;  %10821 = vst [vmem:[#allocation29_spill] sm:$0xff] %v9543_v20  ;;  %3408 = vrot.lane.b32.xlu0 %v3343_v52, %s7441_s24  ;;  %v3743_v11 = vrot.slane %v3235_v62, 2  ;;  %v3850_v42 = vor.u32 %v3849_v46, %v3848_v7  ;;  %v3932_v10 = vrot.slane %v3235_v62, 3 }
 0x4f8   : > { %3410 = vrot.lane.b32.xlu1 %v3351_v2, %s7441_s24  ;;  %v3831_v37 = vsel %vm1575_vm5, %v9497_v41, %v9505_v24  ;;  %v3603_v48 = vrot.slane %v9448_v9, 2  ;;  %v3855_v19 = vrot.slane %v3853_v43, 2  ;;  %v3858_v20 = vrot.slane %v3856_v16, 3 }
 0x4f9   : > { %v9555_v6 = vpop.permute.xlu0 %3519  ;;  %v9557_v34 = vpop.permute.xlu1 %3390  ;;  %v9561_v52 = vsel %vm1343_vm3, %v9547_v8, %v3631_v39  ;;  %v9564_v2 = vsel %vm1462_vm2, %v3704_v14, %v3743_v11  ;;  %v9568_v7 = vsel %vm1575_vm5, %v9545_v31, %v3850_v42  ;;  %v9571_v44 = vsel %vm1692_vm4, %v3930_v18, %v3932_v10 }
 0x4fa   : > { %10822 = vst [vmem:[#allocation30_spill] sm:$0xff] %v9568_v7  ;;  %10823 = vst [vmem:[#allocation31_spill] sm:$0xff] %v9571_v44  ;;  %v3468_v38 = vrot.slane %v9537_v1, 1  ;;  %v3356_v50 = vshll.u32 %v9537_v1, 16  ;;  %v3360_v62 = vshrl.u32 %v9537_v1, 16  ;;  %v3859_v30 = vor.u32 %v3858_v20, %v3855_v19 }
 0x4fb   : > { %3539 = vrot.lane.b32.xlu0 %v9488_v60, %s7442_s25  ;;  %v3178_v18 = vadd.f32 %v9347_v45, %v9327_v13  ;;  %v3604_v16 = vor.u32 %v3603_v48, %v3602_v61  ;;  %v3696_v39 = vrot.slane %v9537_v1, 2  ;;  %v10827_v20 = vrot.slane %v9427_v26, 1 }
 0x4fc   : > { %3883 = vrot.lane.b32.xlu1 %v3831_v37, %s7446_s29  ;;  %v9580_v14 = vsel %vm1575_vm5, %v3850_v42, %v3859_v30  ;;  %v3181_v60 = vadd.f32 %v9354_v36, %v9349_v22  ;;  %v3606_v37 = vrot.slane %v3360_v62, 1  ;;  %v3607_v42 = vrot.slane %v3356_v50, 2 }
 0x4fd   : > { %10824 = vst [vmem:[#allocation32_spill] sm:$0xff] %v9580_v14  ;;  %v9582_v46 = vpop.permute.xlu0 %3710  ;;  %v9584_v43 = vpop.permute.xlu1 %3863  ;;  %v3469_v11 = vsel %vm1230_vm0, %v10827_v20, %v3468_v38  ;;  %v3605_v45 = vsel %vm1343_vm3, %v9441_v56, %v3604_v16  ;;  %v10828_v61 = vrot.slane %v9427_v26, 2  ;;  %v3833_v44 = vrot.slane %v3356_v50, 3 }
 0x4fe   : > { %10825 = vst [vmem:[#allocation33_spill] sm:$0xff] %v9582_v46  ;;  %10826 = vst [vmem:[#allocation34_spill] sm:$0xff] %v9584_v43  ;;  %v9606_v19 = vpack.c.bf16 %v3181_v60, %v3178_v18  ;;  %v9608_v22 = vor.u32 %v3607_v42, %v3606_v37  ;;  %v10830_v18 = vrot.slane %v9448_v9, 1  ;;  %v3358_v60 = vrot.slane %v3356_v50, 1 }
 0x4ff   : > { %3730 = vrot.lane.b32.xlu0 %v9493_v55, %s7443_s26  ;;  %v3697_v48 = vsel %vm1462_vm2, %v10828_v61, %v3696_v39  ;;  %v3832_v61 = vrot.slane %v3360_v62, 2 }
 0x500   : > { %3541 = vrot.lane.b32.xlu1 %v3469_v11, %s7442_s25  ;;  %10829 = vst [vmem:[#allocation35_spill] sm:$0xff] %v9606_v19  ;;  %v3609_v30 = vsel %vm1343_vm3, %v3604_v16, %v9608_v22  ;;  %v3470_v56 = vrot.slane %v9606_v19, 1  ;;  %v3354_v20 = vor.u32 %v9451_v58, %v10830_v18  ;;  %v9631_v26 = vshll.u32 %v9606_v19, 16 }
 0x501   : > { %v9597_v10 = vpop.permute.xlu0 %3637  ;;  %v9599_v13 = vpop.permute.xlu1 %3521  ;;  %v3834_v18 = vor.u32 %v3833_v44, %v3832_v61  ;;  %v3362_v1 = vor.u32 %v3360_v62, %v3358_v60 }
 0x502   : > { %v3471_v16 = vsel %vm1230_vm0, %v3468_v38, %v3470_v56  ;;  %v3359_v9 = vsel %vm1026_vm1, %v3354_v20, %v3358_v60  ;;  %v3186_v38 = vadd.f32 %v9372_v28, %v9356_v63  ;;  %v3837_v20 = vrot.slane %v9631_v26, 3 }
 0x503   : > { %3657 = vrot.lane.b32.xlu0 %v3605_v45, %s7444_s27  ;;  %v3698_v45 = vrot.slane %v9606_v19, 2  ;;  %v3835_v63 = vsel %vm1575_vm5, %v9505_v24, %v3834_v18  ;;  %v3611_v61 = vrot.slane %v9631_v26, 2 }
 0x504   : > { %3732 = vrot.lane.b32.xlu1 %v3697_v48, %s7443_s26 }
 0x505   : > { %v9612_v55 = vpop.permute.xlu1 %3712  ;;  %v9614_v36 = vpop.permute.xlu0 %3484  ;;  %v3699_v50 = vsel %vm1462_vm2, %v3696_v39, %v3698_v45 }
 0x507   : > { %3504 = vrot.lane.b32.xlu0 %v3469_v11, %s7440_s23  ;;  %v9634_v11 = vshrl.u32 %v9606_v19, 16  ;;  %v10771_v19 = vrot.slane %v9631_v26, 1 }
 0x508   : > { %3659 = vrot.lane.b32.xlu1 %v3609_v30, %s7444_s27 }
 0x509   : > { %v9624_v37 = vpop.permute.xlu0 %3749  ;;  %v9626_v42 = vpop.permute.xlu1 %3639  ;;  %v3836_v7 = vrot.slane %v9634_v11, 2  ;;  %v3367_v28 = vsel %vm1026_vm1, %v3362_v1, %v10771_v19  ;;  %v3610_v60 = vrot.slane %v9634_v11, 1 }
 0x50a   : > { %10831 = vst [vmem:[#allocation36_spill] sm:$0xff] %v9624_v37 }
 0x50b   : > { %3769 = vrot.lane.b32.xlu0 %v3697_v48, %s7445_s28  ;;  %v3189_v48 = vadd.f32 %v9391_v53, %v9375_v29  ;;  %v3838_v53 = vor.u32 %v3837_v20, %v3836_v7  ;;  %v3612_v20 = vor.u32 %v3611_v61, %v3610_v60 }
 0x50c   : > { %3506 = vrot.lane.b32.xlu1 %v3471_v16, %s7440_s23 }
 0x50d   : > { %v9639_v58 = vpop.permute.xlu0 %3392  ;;  %v9641_v30 = vpop.permute.xlu1 %3486  ;;  %v9662_v29 = vpack.c.bf16 %v3189_v48, %v3186_v38  ;;  %v3839_v24 = vsel %vm1575_vm5, %v3834_v18, %v3838_v53  ;;  %v3613_v60 = vsel %vm1343_vm3, %v9608_v22, %v3612_v20 }
 0x50f   : > { %3412 = vrot.lane.b32.xlu0 %v3359_v9, %s7441_s24  ;;  %v10772_v9 = vrot.slane %v9662_v29, 1  ;;  %v9675_v1 = vshll.u32 %v9662_v29, 16  ;;  %v9678_v7 = vshrl.u32 %v9662_v29, 16 }
 0x510   : > { %3771 = vrot.lane.b32.xlu1 %v3699_v50, %s7445_s28 }
 0x511   : > { %v9653_v43 = vpop.permute.xlu0 %3865  ;;  %v9655_v39 = vpop.permute.xlu1 %3751  ;;  %v9689_v18 = vsel %vm1230_vm0, %v3470_v56, %v10772_v9  ;;  %v3615_v19 = vrot.slane %v9675_v1, 2  ;;  %v3840_v9 = vrot.slane %v9678_v7, 2  ;;  %v3841_v14 = vrot.slane %v9675_v1, 3 }
 0x512   : > { %10832 = vst [vmem:[#allocation37_spill] sm:$0xff] %v9653_v43 }
 0x513   : > { %3885 = vrot.lane.b32.xlu0 %v3835_v63, %s7446_s29  ;;  %v3700_v63 = vrot.slane %v9662_v29, 2  ;;  %v3842_v22 = vor.u32 %v3841_v14, %v3840_v9 }
 0x514   : > { %3414 = vrot.lane.b32.xlu1 %v3367_v28, %s7441_s24  ;;  %v3614_v28 = vrot.slane %v9678_v7, 1 }
 0x515   : > { %v9666_v44 = vpop.permute.xlu0 %3523  ;;  %v9668_v62 = vpop.permute.xlu1 %3394  ;;  %v3701_v56 = vsel %vm1462_vm2, %v3698_v45, %v3700_v63 }
 0x516   : > { %v9704_v61 = vor.u32 %v3615_v19, %v3614_v28  ;;  %v3843_v28 = vsel %vm1575_vm5, %v3838_v53, %v3842_v22 }
 0x517   : > { %3543 = vrot.lane.b32.xlu0 %v3471_v16, %s7442_s25 }
 0x518   : > { %3887 = vrot.lane.b32.xlu1 %v3839_v24, %s7446_s29  ;;  %v3617_v37 = vsel %vm1343_vm3, %v3612_v20, %v9704_v61  ;;  %v3847_v20 = vsel %vm1575_vm5, %v3842_v22, %v9545_v31 }
 0x519   : > { %v9682_v38 = vpop.permute.xlu0 %3714  ;;  %v9684_v48 = vpop.permute.xlu1 %3867 }
 0x51b   : > { %3734 = vrot.lane.b32.xlu0 %v3699_v50, %s7443_s26 }
 0x51c   : > { %3545 = vrot.lane.b32.xlu1 %v9689_v18, %s7442_s25 }
 0x51d   : > { %v9697_v16 = vpop.permute.xlu0 %3641  ;;  %v9699_v24 = vpop.permute.xlu1 %3525 }
 0x51f   : > { %3661 = vrot.lane.b32.xlu0 %v3613_v60, %s7444_s27  ;;  %v10833_v60 = vrot.slane %v9454_v4, 2 }
 0x520   : > { %3736 = vrot.lane.b32.xlu1 %v3701_v56, %s7443_s26 }
 0x521   : > { %v9710_v50 = vpop.permute.xlu1 %3716  ;;  %v9712_v43 = vpop.permute.xlu0 %3488  ;;  %v9726_v46 = vsel %vm1462_vm2, %v3700_v63, %v10833_v60 }
 0x523   : > { %3773 = vrot.lane.b32.xlu0 %v3701_v56, %s7445_s28 }
 0x524   : > { %3663 = vrot.lane.b32.xlu1 %v3617_v37, %s7444_s27  ;;  %v3827_v37 = vsel %vm1575_vm5, %v9275_v15, %v9497_v41 }
 0x525   : > { %v9718_v19 = vpop.permute.xlu0 %3753  ;;  %v9720_v45 = vpop.permute.xlu1 %3643 }
 0x527   : > { %3889 = vrot.lane.b32.xlu0 %v3843_v28, %s7446_s29 }
 0x528   : > { %3775 = vrot.lane.b32.xlu1 %v9726_v46, %s7445_s28 }
 0x529   : > { %v3397_v14 = vpop.permute.xlu0 %3396  ;;  %v3491_v9 = vpop.permute.xlu1 %3490 }
 0x52b   : > { %3881 = vrot.lane.b32.xlu0 %v3827_v37, %s7446_s29 }
 0x52c   : > { %3891 = vrot.lane.b32.xlu1 %v3847_v20, %s7446_s29 }
 0x52d   : > { %v9738_v53 = vpop.permute.xlu0 %3869  ;;  %v9740_v63 = vpop.permute.xlu1 %3755 }
 0x52f   : > { %3400 = vrot.lane.b32.xlu0 %v9123_v49, %s7441_s24 }
 0x530   : > { %3533 = vrot.lane.b32.xlu1 %v9380_v57, %s7442_s25 }
 0x531   : > { %v3528_v56 = vpop.permute.xlu0 %3527  ;;  %v9746_v28 = vpop.permute.xlu1 %3871 }
 0x533   : > { %3492 = vrot.lane.b32.xlu0 %v9334_v35, %s7440_s23  ;;  %v3374_v35 = vrot.slane %v9675_v1, 1 }
 0x534   : > { %3651 = vrot.lane.b32.xlu1 %v9242_v23, %s7444_s27  ;;  %v7312_v23 = vld [vmem:[%s10723_s5 + $0x4] ss:$12 sps:$4 sm:$0xff]  }
 0x535   : > { %v3719_v15 = vpop.permute.xlu0 %3718  ;;  %v3721_v41 = vpop.permute.xlu1 %3720  ;;  %4348 = vmatprep.mubr.bf16.mxu1 %v7312_v23  ;;  %v3378_v60 = vor.u32 %v9678_v7, %v3374_v35  ;;  %v10834_v7 = vrot.slane %v9631_v26, 1 }
 0x537   : > { %3531 = vrot.lane.b32.xlu0 %v9337_v0, %s7442_s25 }
 0x538   : > { %3724 = vrot.lane.b32.xlu1 %v9217_v40, %s7443_s26 }
 0x539   : > { %v3399_v49 = vpop.permute.xlu0 %3398  ;;  %v3648_v31 = vpop.permute.xlu1 %3647 }
 0x53a   : > { %v3968_v22 = vsel %vm3952_vm7, %v9113_v47, %v3399_v49 }
 0x53b   : > { %3649 = vrot.lane.b32.xlu0 %v9191_v12, %s7444_s27  ;;  %v3382_v12 = vrot.slane %v9474_v27, 1  ;;  %v3370_v27 = vor.u32 %v9634_v11, %v10834_v7 }
 0x53c   : > { %3763 = vrot.lane.b32.xlu1 %v9436_v25, %s7445_s28  ;;  %v4004_v25 = vsel %vm2751_vm6, %v3968_v22, %v3491_v9 }
 0x53d   : > { %v3646_v57 = vpop.permute.xlu0 %3645  ;;  %v3760_v0 = vpop.permute.xlu1 %3759  ;;  %v3383_v49 = vsel %vm1026_vm1, %v3378_v60, %v3382_v12  ;;  %v3375_v26 = vsel %vm1026_vm1, %v3370_v27, %v3374_v35 }
 0x53f   : > { %3761 = vrot.lane.b32.xlu0 %v9217_v40, %s7445_s28  ;;  %v3966_v40 = vsel %vm3952_vm7, %v9048_v59, %v3397_v14  ;;  %v3964_v14 = vsel %vm3952_vm7, %v9018_v17, %v9668_v62 }
 0x540   : > { %3879 = vrot.lane.b32.xlu1 %v9286_v5, %s7446_s29  ;;  %v4000_v62 = vsel %vm2751_vm6, %v3964_v14, %v9641_v30 }
 0x541   : > { %v3530_v1 = vpop.permute.xlu0 %3529  ;;  %v3495_v37 = vpop.permute.xlu1 %3494 }
 0x542   : > { %v4041_v20 = vsel %vm4025_vm8, %v4004_v25, %v3530_v1  ;;  %v10835_v1 = vrot.slane %v9454_v4, 1 }
 0x543   : > { %v4078_v23 = vsel %vm4062_vm9, %v4041_v20, %v3648_v31  ;;  %3418 = vrot.lane.b32.xlu0 %v3383_v49, %s7441_s24  ;;  %v4002_v31 = vsel %vm2751_vm6, %v3966_v40, %v9712_v43  ;;  %v4037_v49 = vsel %vm4025_vm8, %v4000_v62, %v9699_v24  ;;  %v3906_v40 = vrot.slane %v9113_v47, 3 }
 0x544   : > { %3722 = vrot.lane.b32.xlu1 %v9318_v33, %s7443_s26  ;;  %v4115_v11 = vsel %vm4099_vm10, %v4078_v23, %v3721_v41  ;;  %v4039_v35 = vsel %vm4025_vm8, %v4002_v31, %v3528_v56  ;;  %v10837_v56 = vrot.slane %v9099_v51, 3  ;;  %v4074_v30 = vsel %vm4062_vm9, %v4037_v49, %v9720_v45 }
 0x545   : > { %v3758_v5 = vpop.permute.xlu0 %3757  ;;  %v3403_v9 = vpop.permute.xlu1 %3402  ;;  %v4076_v41 = vsel %vm4062_vm9, %v4039_v35, %v3646_v57  ;;  %v4152_v43 = vsel %vm4136_vm11, %v4115_v11, %v3760_v0  ;;  %v3962_v0 = vsel %vm3952_vm7, %v8969_v3, %v9639_v58  ;;  %v4111_v47 = vsel %vm4099_vm10, %v4074_v30, %v9710_v50  ;;  %v10840_v50 = vld [vmem:[#allocation7_spill] sm:$0xff] }
 0x546   : > { %v3972_v22 = vsel %vm3952_vm7, %v9099_v51, %v3403_v9  ;;  %v4113_v7 = vsel %vm4099_vm10, %v4076_v41, %v3719_v15  ;;  %v3998_v24 = vsel %vm2751_vm6, %v3962_v0, %v9614_v36  ;;  %v10838_v15 = vld [vmem:[#allocation5_spill] sm:$0xff]  ;;  %v3904_v36 = vrot.slane %v9048_v59, 3  ;;  %v10841_v59 = vld [vmem:[#allocation24_spill] sm:$0xff]  ;;  %v10847_v0 = vld [vmem:[#allocation2_spill] sm:$0xff] }
 0x547   : > { %3416 = vrot.lane.b32.xlu0 %v3375_v26, %s7441_s24  ;;  %v9794_v33 = vsel %vm2751_vm6, %v3972_v22, %v3495_v37  ;;  %v10836_v37 = vrot.slane %v9662_v29, 1  ;;  %v4150_v51 = vsel %vm4136_vm11, %v4113_v7, %v3758_v5  ;;  %v3960_v45 = vsel %vm3952_vm7, %v10838_v15, %v9557_v34  ;;  %s10158_s24 = scalar_lea.vmem %s10732_s14, %s6607_s21 }
 0x548   : > { %3877 = vrot.lane.b32.xlu1 %v9250_v54, %s7446_s29  ;;  %v3908_v54 = vrot.slane %v9060_v32, 3  ;;  %v4035_v5 = vsel %vm4025_vm8, %v3998_v24, %v9666_v44  ;;  %v4148_v9 = vsel %vm4136_vm11, %v4111_v47, %v9740_v63  ;;  %v10839_v44 = vld [vmem:[#allocation6_spill] sm:$0xff]  ;;  %v3907_v14 = vsel %vm1692_vm4, %v3904_v36, %v3906_v40 }
 0x549   : > { %v3874_v60 = vpop.permute.xlu0 %3873  ;;  %v3876_v12 = vpop.permute.xlu1 %3875  ;;  %v3475_v20 = vsel %vm1230_vm0, %v10836_v37, %v10835_v1  ;;  %v4190_v34 = vsel %vm4173_vm12, %v4148_v9, %v9746_v28  ;;  %v3996_v35 = vsel %vm2751_vm6, %v3960_v45, %v10841_v59  ;;  %v10843_v28 = vld [vmem:[#allocation23_spill] sm:$0xff]  ;;  %v3902_v62 = vrot.slane %v9018_v17, 3  ;;  %v10853_v45 = vld [vmem:[#allocation22_spill] sm:$0xff]  ;;  %v10855_v9 = vld [vmem:[#allocation37_spill] sm:$0xff] }
 0x54a   : > { %v4196_v25 = vsel %vm4173_vm12, %v4152_v43, %v3876_v12  ;;  %v3911_v57 = vsel %vm1692_vm4, %v3908_v54, %v10837_v56  ;;  %v4193_v58 = vsel %vm4173_vm12, %v4150_v51, %v3874_v60  ;;  %v10844_v60 = vld [vmem:[#allocation4_spill] sm:$0xff]  ;;  %v4033_v12 = vsel %vm4025_vm8, %v3996_v35, %v9599_v13 }
 0x54b   : > { %4317 = vmatpush1.bf16.msra.mxu1 %v4196_v25  ;;  %3508 = vrot.lane.b32.xlu0 %v9689_v18, %s7440_s23  ;;  %v3909_v18 = vsel %vm1692_vm4, %v3906_v40, %v3908_v54  ;;  %v3958_v43 = vsel %vm3952_vm7, %v10844_v60, %v10843_v28  ;;  %v4070_v25 = vsel %vm4062_vm9, %v4033_v12, %v9626_v42  ;;  %v3900_v51 = vrot.slane %v8969_v3, 3  ;;  %v10850_v40 = vld [vmem:[#allocation3_spill] sm:$0xff]  ;;  %v10852_v3 = vld [vmem:[#allocation33_spill] sm:$0xff] }
 0x54c   : > { %3510 = vrot.lane.b32.xlu1 %v3475_v20, %s7440_s23  ;;  %4318 = vmatprep.subr.bf16.mxu1 %v3911_v57  ;;  %v10845_v57 = vld [vmem:[#allocation20_spill] sm:$0xff]  ;;  %v3623_v42 = vsel %vm1343_vm3, %v9704_v61, %v9547_v8  ;;  %v3905_v17 = vsel %vm1692_vm4, %v3902_v62, %v3904_v36  ;;  %v4107_v7 = vsel %vm4099_vm10, %v4070_v25, %v9612_v55  ;;  %vm4907_vm3 = vcmask 1042432  }
 0x54d   : > { %v3497_v27 = vpop.permute.xlu0 %3496  ;;  %v3499_v23 = vpop.permute.xlu1 %3498  ;;  %v4144_v8 = vsel %vm4136_vm11, %v4107_v7, %v9655_v39  ;;  %v3903_v55 = vsel %vm1692_vm4, %v3900_v51, %v3902_v62  ;;  %v10862_v62 = vld [vmem:[#allocation34_spill] sm:$0xff] }
 0x54f   : > { %4319 = vmatpush1.bf16.msra.mxu1 %v4193_v58  ;;  %3547 = vrot.lane.b32.xlu0 %v3475_v20, %s7442_s25  ;;  %v10851_v58 = vld [vmem:[#allocation18_spill] sm:$0xff] }
 0x550   : > { %3738 = vrot.lane.b32.xlu1 %v9726_v46, %s7443_s26  ;;  %4320 = vmatprep.subr.bf16.mxu1 %v3909_v18  ;;  %v4072_v46 = vsel %vm4062_vm9, %v4035_v5, %v9697_v16  ;;  %v10842_v16 = vld [vmem:[#allocation25_spill] sm:$0xff]  ;;  %v10854_v5 = vld [vmem:[#allocation36_spill] sm:$0xff] }
 0x551   : > { %v3405_v22 = vpop.permute.xlu0 %3404  ;;  %v3407_v26 = vpop.permute.xlu1 %3406  ;;  %v4109_v54 = vsel %vm4099_vm10, %v4072_v46, %v9682_v38 }
 0x552   : > { %v3974_v11 = vsel %vm3952_vm7, %v10839_v44, %v3405_v22  ;;  %v3976_v31 = vsel %vm3952_vm7, %v10840_v50, %v3407_v26  ;;  %v4146_v1 = vsel %vm4136_vm11, %v4109_v54, %v9718_v19  ;;  %v10846_v19 = vld [vmem:[#allocation15_spill] sm:$0xff] }
 0x553   : > { %4321 = vmatpush1.bf16.msra.mxu1 %v4190_v34  ;;  %v4010_v63 = vsel %vm2751_vm6, %v3974_v11, %v3497_v27  ;;  %v4012_v41 = vsel %vm2751_vm6, %v3976_v31, %v3499_v23  ;;  %3549 = vrot.lane.b32.xlu0 %v9527_v21, %s7442_s25  ;;  %v4187_v13 = vsel %vm4173_vm12, %v4146_v1, %v9738_v53  ;;  %v10856_v31 = vld [vmem:[#allocation9_spill] sm:$0xff]  ;;  %v10861_v54 = vld [vmem:[#allocation27_spill] sm:$0xff] }
 0x554   : > { %3740 = vrot.lane.b32.xlu1 %v10842_v16, %s7443_s26  ;;  %4322 = vmatprep.subr.bf16.mxu1 %v3907_v14  ;;  %v3994_v21 = vsel %vm2751_vm6, %v3958_v43, %v10845_v57  ;;  %v3956_v53 = vsel %vm3952_vm7, %v10847_v0, %v10846_v19  ;;  %v4184_v27 = vsel %vm4173_vm12, %v4144_v8, %v9684_v48  ;;  %v3898_v48 = vrot.slane %v10838_v15, 3  ;;  %v10857_v14 = vld [vmem:[#allocation32_spill] sm:$0xff]  ;;  %v10860_v43 = vld [vmem:[#allocation17_spill] sm:$0xff]  ;;  %v10864_v57 = vld [vmem:[#allocation14_spill] sm:$0xff] }
 0x555   : > { %v3536_v37 = vpop.permute.xlu0 %3535  ;;  %v3538_v20 = vpop.permute.xlu1 %3537  ;;  %v4031_v49 = vsel %vm4025_vm8, %v3994_v21, %v9555_v6  ;;  %v10848_v6 = vld [vmem:[#allocation13_spill] sm:$0xff]  ;;  %v10867_v8 = vrot.slane %v9454_v4, 3 }
 0x556   : > { %v4047_v56 = vsel %vm4025_vm8, %v4010_v63, %v3536_v37  ;;  %v4049_v38 = vsel %vm4025_vm8, %v4012_v41, %v3538_v20  ;;  %v3992_v23 = vsel %vm2751_vm6, %v3956_v53, %v10848_v6  ;;  %v3901_v11 = vsel %vm1692_vm4, %v3898_v48, %v3900_v51  ;;  %v10859_v41 = vld [vmem:[#allocation19_spill] sm:$0xff]  ;;  %v10866_v53 = vld [vmem:[#allocation26_spill] sm:$0xff] }
 0x557   : > { %4323 = vmatpush1.bf16.msra.mxu1 %v4187_v13  ;;  %3665 = vrot.lane.b32.xlu0 %v3623_v42, %s7444_s27  ;;  %v4029_v24 = vsel %vm4025_vm8, %v3992_v23, %v10851_v58  ;;  %v3897_v20 = vrot.slane %v10844_v60, 3  ;;  %v10865_v42 = vld [vmem:[#allocation21_spill] sm:$0xff]  ;;  %v3926_v60 = vrot.slane %v9662_v29, 3 }
 0x558   : > { %3667 = vrot.lane.b32.xlu1 %v9561_v52, %s7444_s27  ;;  %4324 = vmatprep.subr.bf16.mxu1 %v3905_v17  ;;  %v4068_v52 = vsel %vm4062_vm9, %v4031_v49, %v9597_v10  ;;  %v10849_v10 = vld [vmem:[#allocation10_spill] sm:$0xff] }
 0x559   : > { %v3727_v61 = vpop.permute.xlu0 %3726  ;;  %v3729_v30 = vpop.permute.xlu1 %3728  ;;  %v3954_v39 = vsel %vm3952_vm7, %v10850_v40, %v10849_v10  ;;  %v4105_v18 = vsel %vm4099_vm10, %v4068_v52, %v10852_v3 }
 0x55a   : > { %v4142_v47 = vsel %vm4136_vm11, %v4105_v18, %v10854_v5  ;;  %v3990_v15 = vsel %vm2751_vm6, %v3954_v39, %v10856_v31 }
 0x55b   : > { %4325 = vmatpush1.bf16.msra.mxu1 %v4184_v27  ;;  %3777 = vrot.lane.b32.xlu0 %v10842_v16, %s7445_s28  ;;  %v4181_v22 = vsel %vm4173_vm12, %v4142_v47, %v10855_v9  ;;  %v10858_v16 = vld [vmem:[#allocation12_spill] sm:$0xff] }
 0x55c   : > { %3779 = vrot.lane.b32.xlu1 %v9564_v2, %s7445_s28  ;;  %4326 = vmatprep.subr.bf16.mxu1 %v3903_v55  ;;  %v4066_v2 = vsel %vm4062_vm9, %v4029_v24, %v10853_v45  ;;  %v4027_v63 = vsel %vm4025_vm8, %v3990_v15, %v10858_v16 }
 0x55d   : > { %v3654_v36 = vpop.permute.xlu0 %3653  ;;  %v3656_v46 = vpop.permute.xlu1 %3655  ;;  %v4103_v28 = vsel %vm4099_vm10, %v4066_v2, %v10859_v41  ;;  %v4064_v12 = vsel %vm4062_vm9, %v4027_v63, %v10860_v43  ;;  %v10870_v43 = vld [vmem:[#allocation11_spill] sm:$0xff] }
 0x55e   : > { %v4084_v26 = vsel %vm4062_vm9, %v4047_v56, %v3654_v36  ;;  %v4086_v34 = vsel %vm4062_vm9, %v4049_v38, %v3656_v46  ;;  %v4140_v25 = vsel %vm4136_vm11, %v4103_v28, %v10861_v54  ;;  %v10863_v56 = vld [vmem:[#allocation30_spill] sm:$0xff]  ;;  %v3899_v38 = vsel %vm1692_vm4, %v3897_v20, %v3898_v48 }
 0x55f   : > { %4327 = vmatpush1.bf16.msra.mxu1 %v4181_v22  ;;  %v4121_v59 = vsel %vm4099_vm10, %v4084_v26, %v3727_v61  ;;  %v4123_v35 = vsel %vm4099_vm10, %v4086_v34, %v3729_v30  ;;  %v4178_v13 = vsel %vm4173_vm12, %v4140_v25, %v10862_v62  ;;  %v4101_v21 = vsel %vm4099_vm10, %v4064_v12, %v10864_v57  ;;  %v10868_v26 = vld [vmem:[#allocation28_spill] sm:$0xff] }
 0x560   : > { %3895 = vrot.lane.b32.xlu1 %v10857_v14, %s7446_s29  ;;  %4328 = vmatprep.subr.bf16.mxu1 %v3901_v11  ;;  %v4138_v17 = vsel %vm4136_vm11, %v4101_v21, %v10865_v42  ;;  %v3929_v61 = vsel %vm1692_vm4, %v3926_v60, %v10867_v8  ;;  %v10869_v14 = vld [vmem:[#allocation16_spill] sm:$0xff] }
 0x561   : > { %v9938_v1 = vpop.permute.xlu0 %3500  ;;  %v3503_v37 = vpop.permute.xlu1 %3502  ;;  %v4175_v49 = vsel %vm4173_vm12, %v4138_v17, %v10866_v53 }
 0x563   : > { %4329 = vmatpush1.bf16.msra.mxu1 %v4178_v13 }
 0x564   : > { %3893 = vrot.lane.b32.xlu1 %v10863_v56, %s7446_s29  ;;  %4330 = vmatprep.subr.bf16.mxu1 %v3899_v38  ;;  %v10871_v38 = vld [vmem:[#allocation35_spill] sm:$0xff]  ;;  %s6608_s29 = sshll.u32 %s10879_s19, 6 }
 0x565   : > { %v3766_v19 = vpop.permute.xlu0 %3765  ;;  %v3768_v0 = vpop.permute.xlu1 %3767  ;;  %v3924_v57 = vrot.slane %v10871_v38, 3  ;;  %s507_s21 = scalar_lea.vmem %s10733_s15, %s6608_s29 }
 0x566   : > { %v9954_v7 = vsel %vm4136_vm11, %v4121_v59, %v3766_v19  ;;  %v4160_v52 = vsel %vm4136_vm11, %v4123_v35, %v3768_v0  ;;  %v10872_v19 = vld [vmem:[#allocation8_spill] sm:$0xff] }
 0x567   : > { %4331 = vmatpush1.bf16.msra.mxu1 %v4175_v49  ;;  %v3927_v17 = vsel %vm1692_vm4, %v3924_v57, %v3926_v60 }
 0x568   : > { %4332 = vmatprep.subr.bf16.mxu1 %v3929_v61 }
 0x569   : > { %v3409_v30 = vpop.permute.xlu0 %3408 }
 0x56a   : > { %v3411_v51 = vpop.permute.xlu1 %3410  ;;  %v3978_v0 = vsel %vm3952_vm7, %v10872_v19, %v3409_v30 }
 0x56b   : > { %v3980_v12 = vsel %vm3952_vm7, %v10870_v43, %v3411_v51  ;;  %v4014_v60 = vsel %vm2751_vm6, %v3978_v0, %v9938_v1  ;;  %v7318_v0 = vld [vmem:[%s10723_s5 + $0x34] ss:$12 sps:$4 sm:$0xff]  }
 0x56c   : > { %v4016_v42 = vsel %vm2751_vm6, %v3980_v12, %v3503_v37 }
 0x56d   : > { %v3540_v27 = vpop.permute.xlu0 %3539 }
 0x56e   : > { %v3884_v6 = vpop.permute.xlu1 %3883 }
 0x56f   : > { %v9961_v23 = vsel %vm4173_vm12, %v4160_v52, %v3884_v6  ;;  %v3922_v6 = vrot.slane %v10868_v26, 3 }
 0x571   : > { %v9963_v55 = vpop.permute.xlu0 %3730  ;;  %v3925_v30 = vsel %vm1692_vm4, %v3922_v6, %v3924_v57  ;;  %v10874_v57 = vld [vmem:[#allocation31_spill] sm:$0xff] }
 0x572   : > { %v3542_v10 = vpop.permute.xlu1 %3541 }
 0x573   : > { %v4053_v53 = vsel %vm4025_vm8, %v4016_v42, %v3542_v10  ;;  %v4051_v10 = vsel %vm4025_vm8, %v4014_v60, %v3540_v27 }
 0x575   : > { %v3658_v40 = vpop.permute.xlu0 %3657 }
 0x576   : > { %v3733_v39 = vpop.permute.xlu1 %3732 }
 0x579   : > { %v3505_v58 = vpop.permute.xlu0 %3504 }
 0x57a   : > { %v3660_v24 = vpop.permute.xlu1 %3659 }
 0x57b   : > { %v4090_v52 = vsel %vm4062_vm9, %v4053_v53, %v3660_v24  ;;  %v4088_v24 = vsel %vm4062_vm9, %v4051_v10, %v3658_v40  ;;  %v3918_v40 = vrot.slane %v10870_v43, 3  ;;  %v10873_v43 = vrot.slane %v10839_v44, 3 }
 0x57d   : > { %v3770_v3 = vpop.permute.xlu0 %3769 }
 0x57e   : > { %v3507_v18 = vpop.permute.xlu1 %3506 }
 0x581   : > { %v3413_v4 = vpop.permute.xlu0 %3412 }
 0x582   : > { %v3772_v48 = vpop.permute.xlu1 %3771  ;;  %v3982_v59 = vsel %vm3952_vm7, %v10869_v14, %v3413_v4 }
 0x583   : > { %v4018_v28 = vsel %vm2751_vm6, %v3982_v59, %v3505_v58  ;;  %v4127_v58 = vsel %vm4099_vm10, %v4090_v52, %v3733_v39 }
 0x585   : > { %v3886_v45 = vpop.permute.xlu0 %3885 }
 0x586   : > { %v3415_v2 = vpop.permute.xlu1 %3414 }
 0x587   : > { %v3984_v34 = vsel %vm3952_vm7, %v10868_v26, %v3415_v2 }
 0x588   : > { %v4020_v15 = vsel %vm2751_vm6, %v3984_v34, %v3507_v18  ;;  %v4164_v18 = vsel %vm4136_vm11, %v4127_v58, %v3772_v48  ;;  %v3916_v34 = vrot.slane %v10872_v19, 3  ;;  %v7313_v19 = vld [vmem:[%s10723_s5 + $0x18] ss:$12 sps:$4 sm:$0xff]  }
 0x589   : > { %v3544_v5 = vpop.permute.xlu0 %3543 }
 0x58a   : > { %v3888_v47 = vpop.permute.xlu1 %3887  ;;  %v4055_v54 = vsel %vm4025_vm8, %v4018_v28, %v3544_v5  ;;  %v3920_v5 = vrot.slane %v10869_v14, 3 }
 0x58c   : > { %v3923_v1 = vsel %vm1692_vm4, %v3920_v5, %v3922_v6  ;;  %v7321_v6 = vld [vmem:[%s10723_s5 + $0x4c] ss:$12 sps:$4 sm:$0xff]  }
 0x58d   : > { %v3735_v36 = vpop.permute.xlu0 %3734 }
 0x58e   : > { %v3546_v46 = vpop.permute.xlu1 %3545 }
 0x58f   : > { %v4057_v35 = vsel %vm4025_vm8, %v4020_v15, %v3546_v46  ;;  %v4125_v46 = vsel %vm4099_vm10, %v4088_v24, %v9963_v55  ;;  %v3919_v55 = vsel %vm1692_vm4, %v3916_v34, %v3918_v40 }
 0x590   : > { %v4162_v27 = vsel %vm4136_vm11, %v4125_v46, %v3770_v3 }
 0x591   : > { %v3662_v9 = vpop.permute.xlu0 %3661  ;;  %v4211_v48 = vsel %vm4173_vm12, %v4162_v27, %v3886_v45  ;;  %v10875_v27 = vld [vmem:[#allocation29_spill] sm:$0xff] }
 0x592   : > { %v3737_v22 = vpop.permute.xlu1 %3736  ;;  %v4092_v20 = vsel %vm4062_vm9, %v4055_v54, %v3662_v9 }
 0x593   : > { %v4129_v49 = vsel %vm4099_vm10, %v4092_v20, %v3735_v36  ;;  %v4214_v36 = vsel %vm4173_vm12, %v4164_v18, %v3888_v47 }
 0x595   : > { %v3774_v11 = vpop.permute.xlu0 %3773 }
 0x596   : > { %v3664_v31 = vpop.permute.xlu1 %3663  ;;  %v4166_v8 = vsel %vm4136_vm11, %v4129_v49, %v3774_v11 }
 0x597   : > { %v4094_v16 = vsel %vm4062_vm9, %v4057_v35, %v3664_v31  ;;  %v3914_v31 = vrot.slane %v10840_v50, 3 }
 0x598   : > { %v4131_v25 = vsel %vm4099_vm10, %v4094_v16, %v3737_v22  ;;  %v3921_v22 = vsel %vm1692_vm4, %v3918_v40, %v3920_v5 }
 0x599   : > { %v3890_v63 = vpop.permute.xlu0 %3889  ;;  %v3917_v35 = vsel %vm1692_vm4, %v3914_v31, %v3916_v34  ;;  %v3915_v12 = vsel %vm1692_vm4, %v10873_v43, %v3914_v31  ;;  %v7325_v34 = vld [vmem:[%s10723_s5 + $0x50] ss:$12 sps:$4 sm:$0xff]   ;;  %v7329_v31 = vld [vmem:[%s10724_s6 + $0x20] sm:$0xff]  }
 0x59a   : > { %v3776_v41 = vpop.permute.xlu1 %3775  ;;  %v4217_v37 = vsel %vm4173_vm12, %v4166_v8, %v3890_v63 }
 0x59b   : > { %v4168_v62 = vsel %vm4136_vm11, %v4131_v25, %v3776_v41 }
 0x59d   : > { %v3882_v13 = vpop.permute.xlu0 %3881 }
 0x59e   : > { %v3892_v56 = vpop.permute.xlu1 %3891  ;;  %v4205_v45 = vsel %vm4173_vm12, %v9954_v7, %v3882_v13  ;;  %v7310_v13 = vld [vmem:[%s10723_s5] ss:$12 sps:$4 sm:$0xff]  }
 0x59f   : > { %v4220_v21 = vsel %vm4173_vm12, %v4168_v62, %v3892_v56  ;;  %v7315_v56 = vld [vmem:[%s10723_s5 + $0x1c] ss:$12 sps:$4 sm:$0xff]  }
 0x5a0   : > { %4333 = vmatpush2.bf16.msra.mxu1 %v4220_v21 }
 0x5a1   : > { %4334 = vmatprep.subr.bf16.mxu1 %v3927_v17  ;;  %v3401_v61 = vpop.permute.xlu0 %3400 }
 0x5a2   : > { %v3534_v51 = vpop.permute.xlu1 %3533  ;;  %v3970_v15 = vsel %vm3952_vm7, %v9060_v32, %v3401_v61  ;;  %v7316_v61 = vld [vmem:[%s10723_s5 + $0x30] ss:$12 sps:$4 sm:$0xff]  }
 0x5a3   : > { %v4045_v14 = vsel %vm4025_vm8, %v9794_v33, %v3534_v51 }
 0x5a4   : > { %4335 = vmatpush2.bf16.msra.mxu1 %v4217_v37 }
 0x5a5   : > { %4336 = vmatprep.subr.bf16.mxu1 %v3925_v30  ;;  %v3493_v4 = vpop.permute.xlu0 %3492 }
 0x5a6   : > { %v3652_v2 = vpop.permute.xlu1 %3651  ;;  %v4006_v59 = vsel %vm2751_vm6, %v3970_v15, %v3493_v4  ;;  %v7331_v15 = vld [vmem:[%s10724_s6 + $0x10] sm:$0xff]  }
 0x5a8   : > { %4337 = vmatpush2.bf16.msra.mxu1 %v4214_v36 }
 0x5a9   : > { %4338 = vmatprep.subr.bf16.mxu1 %v3923_v1  ;;  %v3532_v39 = vpop.permute.xlu0 %3531 }
 0x5aa   : > { %v3725_v9 = vpop.permute.xlu1 %3724  ;;  %v4043_v16 = vsel %vm4025_vm8, %v4006_v59, %v3532_v39  ;;  %v7333_v59 = vld [vmem:[%s10724_s6] sm:$0xff]  }
 0x5ac   : > { %4339 = vmatpush2.bf16.msra.mxu1 %v4211_v48  ;;  %v10876_v48 = vmov 0  }
 0x5ad   : > { %4340 = vmatprep.subr.bf16.mxu1 %v3921_v22  ;;  %v3650_v47 = vpop.permute.xlu0 %3649  ;;  %v7322_v22 = vld [vmem:[%s10723_s5 + $0x8] ss:$12 sps:$4 sm:$0xff]  }
 0x5ae   : > { %v3764_v26 = vpop.permute.xlu1 %3763  ;;  %v4080_v7 = vsel %vm4062_vm9, %v4043_v16, %v3650_v47  ;;  %v7323_v47 = vld [vmem:[%s10723_s5 + $0x20] ss:$12 sps:$4 sm:$0xff]  }
 0x5b0   : > { %4341 = vmatpush2.bf16.msra.mxu1 %v9961_v23  ;;  %v4082_v23 = vsel %vm4062_vm9, %v4045_v14, %v3652_v2  ;;  %v7332_v14 = vld [vmem:[%s10724_s6 + $0x8] sm:$0xff]  }
 0x5b1   : > { %4342 = vmatprep.subr.bf16.mxu1 %v3919_v55  ;;  %v3762_v3 = vpop.permute.xlu0 %3761  ;;  %v4119_v50 = vsel %vm4099_vm10, %v4082_v23, %v3725_v9  ;;  %v7326_v55 = vld [vmem:[%s10724_s6 + $0x38] sm:$0xff]   ;;  %v7334_v23 = vld [vmem:[%s10724_s6 + $0x40] sm:$0xff]  }
 0x5b2   : > { %v3880_v11 = vpop.permute.xlu1 %3879  ;;  %v4156_v63 = vsel %vm4136_vm11, %v4119_v50, %v3764_v26  ;;  %v7324_v26 = vld [vmem:[%s10723_s5 + $0x38] ss:$12 sps:$4 sm:$0xff]  }
 0x5b3   : > { %v4202_v33 = vsel %vm4173_vm12, %v4156_v63, %v3880_v11  ;;  %v7328_v11 = vld [vmem:[%s10724_s6 + $0x28] sm:$0xff]  }
 0x5b4   : > { %4343 = vmatpush2.bf16.msra.mxu1 %v4205_v45  ;;  %v7330_v45 = vld [vmem:[%s10724_s6 + $0x18] sm:$0xff]  }
 0x5b5   : > { %4344 = vmatprep.subr.bf16.mxu1 %v3917_v35  ;;  %v3419_v41 = vpop.permute.xlu0 %3418  ;;  %v10877_v35 = vmov 0.0  }
 0x5b6   : > { %v3723_v32 = vpop.permute.xlu1 %3722  ;;  %v3988_v8 = vsel %vm3952_vm7, %v9662_v29, %v3419_v41 }
 0x5b7   : > { %v4117_v28 = vsel %vm4099_vm10, %v4080_v7, %v3723_v32 }
 0x5b8   : > { %4345 = vmatpush2.bf16.msra.mxu1 %v4202_v33  ;;  %v4154_v54 = vsel %vm4136_vm11, %v4117_v28, %v3762_v3  ;;  %v7327_v3 = vld [vmem:[%s10724_s6 + $0x30] sm:$0xff]  }
 0x5b9   : > { %4346 = vmatprep.subr.bf16.mxu1 %v3915_v12  ;;  %v3417_v20 = vpop.permute.xlu0 %3416 }
 0x5ba   : > { %v3878_v25 = vpop.permute.xlu1 %3877  ;;  %v3986_v58 = vsel %vm3952_vm7, %v10871_v38, %v3417_v20  ;;  %v7319_v38 = vld [vmem:[%s10723_s5 + $0x48] ss:$12 sps:$4 sm:$0xff]  }
 0x5bb   : > { %v4199_v62 = vsel %vm4173_vm12, %v4154_v54, %v3878_v25 }
 0x5bc   : > { %4347 = vmatpush2.bf16.msra.mxu1 %v4199_v62 }
 0x5bd   : > { %4401 = vmatprep.subr.bf16.mxu1 %v10874_v57  ;;  %v3509_v21 = vpop.permute.xlu0 %3508 }
 0x5be   : > { %v3511_v44 = vpop.permute.xlu1 %3510  ;;  %v4022_v29 = vsel %vm2751_vm6, %v3986_v58, %v3509_v21 }
 0x5bf   : > { %4349 = vmatmul.mubr.bf16.vlgmr.msra.gmra.mxu1 %v7310_v13  ;;  %v4024_v51 = vsel %vm2751_vm6, %v3988_v8, %v3511_v44 }
 0x5c0   : > { %4358 = vmatprep.mubr.bf16.mxu1 %v7315_v56 }
 0x5c1   : > { %v3548_v17 = vpop.permute.xlu0 %3547 }
 0x5c2   : > { %v3739_v42 = vpop.permute.xlu1 %3738  ;;  %v4059_v24 = vsel %vm4025_vm8, %v4022_v29, %v3548_v17 }
 0x5c5   : > { %v3550_v49 = vpop.permute.xlu0 %3549 }
 0x5c6   : > { %v3741_v53 = vpop.permute.xlu1 %3740  ;;  %v4061_v37 = vsel %vm4025_vm8, %v4024_v51, %v3550_v49 }
 0x5c7   : > { %4359 = vmatmul.mubr.bf16.gmra.mxu1 %v7313_v19 }
 0x5c8   : > { %4368 = vmatprep.mubr.bf16.mxu1 %v7318_v0 }
 0x5c9   : > { %v3666_v60 = vpop.permute.xlu0 %3665 }
 0x5ca   : > { %v3668_v52 = vpop.permute.xlu1 %3667  ;;  %v4096_v4 = vsel %vm4062_vm9, %v4059_v24, %v3666_v60 }
 0x5cb   : > { %v4098_v30 = vsel %vm4062_vm9, %v4061_v37, %v3668_v52  ;;  %v4133_v46 = vsel %vm4099_vm10, %v4096_v4, %v3739_v42 }
 0x5cc   : > { %v4135_v18 = vsel %vm4099_vm10, %v4098_v30, %v3741_v53 }
 0x5cd   : > { %v3778_v36 = vpop.permute.xlu0 %3777 }
 0x5ce   : > { %v3780_v10 = vpop.permute.xlu1 %3779  ;;  %v4170_v39 = vsel %vm4136_vm11, %v4133_v46, %v3778_v36 }
 0x5cf   : > { %4369 = vmatmul.mubr.bf16.gmra.mxu1 %v7316_v61  ;;  %v4172_v2 = vsel %vm4136_vm11, %v4135_v18, %v3780_v10 }
 0x5d0   : > { %4378 = vmatprep.mubr.bf16.mxu1 %v7321_v6 }
 0x5d2   : > { %v3896_v5 = vpop.permute.xlu1 %3895 }
 0x5d3   : > { %v4226_v1 = vsel %vm4173_vm12, %v4172_v2, %v3896_v5 }
 0x5d4   : > { %4402 = vmatpush1.bf16.msra.mxu1 %v4226_v1 }
 0x5d5   : > { %4403 = vmatprep.subr.bf16.mxu1 %v10875_v27 }
 0x5d6   : > { %v3894_v9 = vpop.permute.xlu1 %3893 }
 0x5d7   : > { %v4223_v40 = vsel %vm4173_vm12, %v4170_v39, %v3894_v9  ;;  %4379 = vmatmul.mubr.bf16.gmra.mxu1 %v7319_v38 }
 0x5d8   : > { %4404 = vmatpush1.bf16.msra.mxu1 %v4223_v40  ;;  %4421 = vmatprep.mubr.bf16.mxu1 %v10876_v48 }
 0x5d9   : > { %4561 = vmatprep.subr.bf16.mxu1 %v10876_v48 }
 0x5df   : > { %6476 = vmatmul.mubr.msk.bf16.vlgmr.msra.gmra.mxu1 %vm2751_vm6, %v7322_v22 }
 0x5e0   : > { %4431 = vmatprep.mubr.bf16.mxu1 %v10876_v48  ;;  %4562 = vmatpush1.bf16.msra.mxu1 %v7326_v55 }
 0x5e1   : > { %4563 = vmatprep.subr.bf16.mxu1 %v10876_v48 }
 0x5e4   : > { %4564 = vmatpush1.bf16.msra.mxu1 %v7327_v3 }
 0x5e5   : > { %4565 = vmatprep.subr.bf16.mxu1 %v10876_v48 }
 0x5e7   : > { %6477 = vmatmul.mubr.msk.bf16.gmra.mxu1 %vm2751_vm6, %v7323_v47 }
 0x5e8   : > { %4441 = vmatprep.mubr.bf16.mxu1 %v10876_v48  ;;  %4566 = vmatpush1.bf16.msra.mxu1 %v7328_v11  ;;  %v7342_v11 = vld [vmem:[%s10728_s10 + $0x78] sm:$0xff]  }
 0x5e9   : > { %4567 = vmatprep.subr.bf16.mxu1 %v10876_v48  ;;  %6694 = vmatprep.subr.bf16.mxu0 %v7342_v11  ;;  %v7351_v11 = vld [vmem:[%s10728_s10 + $0x18] sm:$0xff]  }
 0x5ec   : > { %4568 = vmatpush1.bf16.msra.mxu1 %v7329_v31  ;;  %v7343_v31 = vld [vmem:[%s10728_s10 + $0x38] sm:$0xff]  }
 0x5ed   : > { %4569 = vmatprep.subr.bf16.mxu1 %v10876_v48  ;;  %6695 = vmatpush3.bf16.msra.mxu0 %v7343_v31  ;;  %v7376_v31 = vld [vmem:[%s10728_s10 + $0xd0] sm:$0xff]  }
 0x5ef   : > { %6478 = vmatmul.mubr.msk.bf16.gmra.mxu1 %vm2751_vm6, %v7324_v26 }
 0x5f0   : > { %4451 = vmatprep.mubr.bf16.mxu1 %v10876_v48  ;;  %4570 = vmatpush1.bf16.msra.mxu1 %v7330_v45  ;;  %v7344_v45 = vld [vmem:[%s10728_s10 + $0x70] sm:$0xff]  }
 0x5f1   : > { %4571 = vmatprep.subr.bf16.mxu1 %v10876_v48  ;;  %6696 = vmatprep.subr.bf16.mxu0 %v7344_v45  ;;  %v7352_v45 = vld [vmem:[%s10728_s10 + $0x50] sm:$0xff]  }
 0x5f4   : > { %4572 = vmatpush1.bf16.msra.mxu1 %v7331_v15  ;;  %v7345_v15 = vld [vmem:[%s10728_s10 + $0x30] sm:$0xff]  }
 0x5f5   : > { %4573 = vmatprep.subr.bf16.mxu1 %v10876_v48  ;;  %6697 = vmatpush3.bf16.msra.mxu0 %v7345_v15  ;;  %v7377_v15 = vld [vmem:[%s10728_s10 + $0x90] sm:$0xff]  }
 0x5f7   : > { %6479 = vmatmul.mubr.msk.bf16.gmra.mxu1 %vm2751_vm6, %v7325_v34 }
 0x5f8   : > { %4574 = vmatpush1.bf16.msra.mxu1 %v7332_v14  ;;  %v7346_v14 = vld [vmem:[%s10728_s10 + $0x68] sm:$0xff]  }
 0x5f9   : > { %4575 = vmatprep.subr.bf16.mxu1 %v10876_v48  ;;  %6698 = vmatprep.subr.bf16.mxu0 %v7346_v14  ;;  %v7353_v14 = vld [vmem:[%s10728_s10 + $0x10] sm:$0xff]  }
 0x5fc   : > { %4576 = vmatpush1.bf16.msra.mxu1 %v7333_v59  ;;  %v7347_v59 = vld [vmem:[%s10728_s10 + $0x28] sm:$0xff]  }
 0x5fd   : > { %4591 = vmatprep.subr.bf16.mxu1 %v10876_v48  ;;  %6699 = vmatpush3.bf16.msra.mxu0 %v7347_v59  ;;  %v7380_v59 = vld [vmem:[%s10728_s10 + $0xc8] sm:$0xff]  }
 0x600   : > { %4592 = vmatpush2.bf16.msra.mxu1 %v7334_v23  ;;  %v6480_v23 = vld [vmem:[%s10725_s7] ss:$0 sm:$0xff] }
 0x601   : > { %7034 = vmatprep.subr.bf16.mxu1 %v10877_v35 }
 0x67f   : > { %v4350_v16 = vpop.f32.mrf.mxu1 }
 0x681   : > { %v4352_v50 = vpop.f32.mrf.mxu1 }
 0x683   : > { %v4354_v7 = vpop.f32.mrf.mxu1 }
 0x685   : > { %v4356_v63 = vpop.f32.mrf.mxu1 }
 0x687   : > { %v4360_v32 = vpop.f32.mrf.mxu1 }
 0x689   : > { %v4362_v41 = vpop.f32.mrf.mxu1 }
 0x68b   : > { %v4364_v33 = vpop.f32.mrf.mxu1 }
 0x68d   : > { %v4366_v28 = vpop.f32.mrf.mxu1 }
 0x68f   : > { %v4370_v43 = vpop.f32.mrf.mxu1 }
 0x691   : > { %v4372_v12 = vpop.f32.mrf.mxu1 }
 0x693   : > { %v4374_v54 = vpop.f32.mrf.mxu1 }
 0x695   : > { %v4376_v25 = vpop.f32.mrf.mxu1 }
 0x697   : > { %v4380_v20 = vpop.f32.mrf.mxu1 }
 0x699   : > { %v4382_v62 = vpop.f32.mrf.mxu1 }
 0x69b   : > { %v4384_v13 = vpop.f32.mrf.mxu1 }
 0x69d   : > { %v4386_v56 = vpop.f32.mrf.mxu1 }
 0x69f   : > { %v4423_v57 = vpop.f32.mrf.mxu1 }
 0x6a0   : > { %v4424_v53 = vadd.f32 %v4423_v57, %v4350_v16 }
 0x6a1   : > { %v4425_v44 = vpop.f32.mrf.mxu1 }
 0x6a2   : > { %v4426_v19 = vadd.f32 %v4425_v44, %v4352_v50 }
 0x6a3   : > { %v4427_v21 = vpop.f32.mrf.mxu1 }
 0x6a4   : > { %v4428_v42 = vadd.f32 %v4427_v21, %v4354_v7 }
 0x6a5   : > { %v4429_v17 = vpop.f32.mrf.mxu1 }
 0x6a6   : > { %v4430_v0 = vadd.f32 %v4429_v17, %v4356_v63  ;;  %v4462_v8 = vpack.c.bf16 %v4428_v42, %v4424_v53 }
 0x6a7   : > { %v4433_v49 = vpop.f32.mrf.mxu1 }
 0x6a8   : > { %v4463_v52 = vpack.c.bf16 %v4430_v0, %v4426_v19  ;;  %v4434_v10 = vadd.f32 %v4433_v49, %v4360_v32 }
 0x6a9   : > { %v4435_v61 = vpop.f32.mrf.mxu1 }
 0x6aa   : > { %6490 = vmatprep.mubr.msk.bf16.mxu1 %vm3952_vm7, %v4463_v52  ;;  %v4436_v60 = vadd.f32 %v4435_v61, %v4362_v41 }
 0x6ab   : > { %v4437_v51 = vpop.f32.mrf.mxu1  ;;  %4594 = vmatmul.mubr.bf16.vlgmr.msra.gmra.mxu1 %v4462_v8 }
 0x6ac   : > { %v4438_v6 = vadd.f32 %v4437_v51, %v4364_v33 }
 0x6ad   : > { %v4439_v37 = vpop.f32.mrf.mxu1 }
 0x6ae   : > { %v4440_v30 = vadd.f32 %v4439_v37, %v4366_v28  ;;  %v4464_v24 = vpack.c.bf16 %v4438_v6, %v4434_v10 }
 0x6af   : > { %v4443_v58 = vpop.f32.mrf.mxu1 }
 0x6b0   : > { %v4465_v29 = vpack.c.bf16 %v4440_v30, %v4436_v60  ;;  %v4444_v38 = vadd.f32 %v4443_v58, %v4370_v43 }
 0x6b1   : > { %v4445_v18 = vpop.f32.mrf.mxu1 }
 0x6b2   : > { %6491 = vmatprep.mubr.msk.bf16.mxu1 %vm3952_vm7, %v4465_v29  ;;  %v4446_v36 = vadd.f32 %v4445_v18, %v4372_v12  ;;  %v7336_v18 = vld [vmem:[%s10726_s8 + $0x8] sm:$0xff]  }
 0x6b3   : > { %v4447_v4 = vpop.f32.mrf.mxu1  ;;  %4602 = vmatmul.mubr.bf16.gmra.mxu1 %v4464_v24  ;;  %v7335_v24 = vld [vmem:[%s10726_s8] sm:$0xff]  }
 0x6b4   : > { %v4448_v2 = vadd.f32 %v4447_v4, %v4374_v54  ;;  %v7337_v4 = vld [vmem:[%s10726_s8 + $0x10] sm:$0xff]  }
 0x6b5   : > { %v4449_v5 = vpop.f32.mrf.mxu1 }
 0x6b6   : > { %v4450_v1 = vadd.f32 %v4449_v5, %v4376_v25  ;;  %v4466_v39 = vpack.c.bf16 %v4448_v2, %v4444_v38  ;;  %v7338_v2 = vld [vmem:[%s10726_s8 + $0x18] sm:$0xff]   ;;  %v7339_v5 = vld [vmem:[%s10726_s8 + $0x20] sm:$0xff]  }
 0x6b7   : > { %v4453_v46 = vpop.f32.mrf.mxu1  ;;  %v7358_v38 = vld [vmem:[%s10728_s10 + $0xf8] sm:$0xff]  }
 0x6b8   : > { %v4467_v27 = vpack.c.bf16 %v4450_v1, %v4446_v36  ;;  %v4454_v34 = vadd.f32 %v4453_v46, %v4380_v20  ;;  %v7340_v36 = vld [vmem:[%s10726_s8 + $0x28] sm:$0xff]   ;;  %v7341_v1 = vld [vmem:[%s10726_s8 + $0x30] ss:$0 sps:$4 sm:$0xff]   ;;  %v7359_v46 = vld [vmem:[%s10728_s10 + $0xb8] sm:$0xff]  }
 0x6b9   : > { %v4455_v9 = vpop.f32.mrf.mxu1 }
 0x6ba   : > { %6492 = vmatprep.mubr.msk.bf16.mxu1 %vm3952_vm7, %v4467_v27  ;;  %v4456_v47 = vadd.f32 %v4455_v9, %v4382_v62  ;;  %v7360_v27 = vld [vmem:[%s10728_s10 + $0xf0] sm:$0xff]   ;;  %v7364_v9 = vld [vmem:[%s10728_s10 + $0xe8] sm:$0xff]  }
 0x6bb   : > { %v4457_v40 = vpop.f32.mrf.mxu1  ;;  %4610 = vmatmul.mubr.bf16.gmra.mxu1 %v4466_v39  ;;  %v7361_v39 = vld [vmem:[%s10728_s10 + $0xb0] sm:$0xff]  }
 0x6bc   : > { %v4458_v48 = vadd.f32 %v4457_v40, %v4384_v13  ;;  %v7365_v40 = vld [vmem:[%s10728_s10 + $0xa8] sm:$0xff]  }
 0x6bd   : > { %v4459_v22 = vpop.f32.mrf.mxu1 }
 0x6be   : > { %v4460_v26 = vadd.f32 %v4459_v22, %v4386_v56  ;;  %v4468_v3 = vpack.c.bf16 %v4458_v48, %v4454_v34  ;;  %v7368_v48 = vld [vmem:[%s10728_s10 + $0xe0] sm:$0xff]   ;;  %v7372_v34 = vld [vmem:[%s10728_s10 + $0xd8] sm:$0xff]  }
 0x6bf   : > { %v7348_v22 = vld [vmem:[%s10728_s10 + $0x60] sm:$0xff]  }
 0x6c0   : > { %v4469_v55 = vpack.c.bf16 %v4460_v26, %v4456_v47  ;;  %v7369_v47 = vld [vmem:[%s10728_s10 + $0xa0] sm:$0xff]   ;;  %6700 = vmatprep.subr.bf16.mxu0 %v7348_v22 }
 0x6c1   : > { %v7349_v26 = vld [vmem:[%s10728_s10 + $0x20] sm:$0xff]  }
 0x6c2   : > { %6493 = vmatprep.mubr.msk.bf16.mxu1 %vm3952_vm7, %v4469_v55  ;;  %6701 = vmatpush3.bf16.msra.mxu0 %v7349_v26  ;;  %v7373_v55 = vld [vmem:[%s10728_s10 + $0x98] sm:$0xff]  }
 0x6c3   : > { %4618 = vmatmul.mubr.bf16.gmra.mxu1 %v4468_v3  ;;  %v7350_v3 = vld [vmem:[%s10728_s10 + $0x58] sm:$0xff]  }
 0x6c4   : > { %7042 = vmatprep.mubr.msk.bf16.mxu1 %vm7439_vm15, %v10877_v35  ;;  %6702 = vmatprep.subr.bf16.mxu0 %v7350_v3  ;;  %v7398_v3 = vld [vmem:[%s10728_s10 + $0x1e0] sm:$0xff]  }
 0x6c6   : > { %6703 = vmatpush3.bf16.msra.mxu0 %v7351_v11 }
 0x6c7   : > { %6704 = vmatprep.subr.bf16.mxu0 %v7352_v45 }
 0x6ca   : > { %6705 = vmatpush3.bf16.msra.mxu0 %v7353_v14  ;;  %v7374_v14 = vld [vmem:[%s10728_s10 + $0x160] sm:$0xff]  }
 0x76b   : > { %v4595_v16 = vpop.f32.mrf.mxu1 }
 0x76c   : > { %v4596_v7 = vadd.f32 %v6480_v23, %v4595_v16  ;;  %v7354_v16 = vld [vmem:[%s10728_s10 + $0x48] sm:$0xff]  }
 0x76d   : > { %v4597_v50 = vpop.f32.mrf.mxu1  ;;  %6706 = vmatprep.subr.bf16.mxu0 %v7354_v16 }
 0x76e   : > { %v4626_v33 = vmax.f32 %v4596_v7, 0.0  ;;  %v7355_v50 = vld [vmem:[%s10728_s10 + $0x8] sm:$0xff]   ;;  %v7384_v7 = vld [vmem:[%s10728_s10 + $0xc0] sm:$0xff]  }
 0x76f   : > { %v4598_v63 = vpop.f32.mrf.mxu1  ;;  %6707 = vmatpush3.bf16.msra.mxu0 %v7355_v50 }
 0x770   : > { %v4599_v32 = vadd.f32 %v6480_v23, %v4598_v63  ;;  %v7356_v63 = vld [vmem:[%s10728_s10 + $0x40] sm:$0xff]  }
 0x771   : > { %v4600_v41 = vpop.f32.mrf.mxu1  ;;  %6708 = vmatprep.subr.bf16.mxu0 %v7356_v63 }
 0x772   : > { %v4627_v28 = vmax.f32 %v4599_v32, 0.0  ;;  %v7385_v32 = vld [vmem:[%s10728_s10 + $0x80] sm:$0xff]  }
 0x773   : > { %v4603_v43 = vpop.f32.mrf.mxu1  ;;  %v7357_v41 = vld [vmem:[%s10728_s10] sm:$0xff]  }
 0x774   : > { %v4634_v12 = vpack.c.bf16 %v4627_v28, %v4626_v33  ;;  %v4604_v25 = vadd.f32 %v6480_v23, %v4603_v43  ;;  %6709 = vmatpush3.bf16.msra.mxu0 %v7357_v41  ;;  %v7390_v33 = vld [vmem:[%s10728_s10 + $0x1f8] sm:$0xff]  }
 0x775   : > { %v4605_v54 = vpop.f32.mrf.mxu1  ;;  %v7362_v28 = vld [vmem:[%s10728_s10 + $0x178] sm:$0xff]  }
 0x776   : > { %6621 = vst [vmem:[%s10158_s24] sm:$0xff] %v4634_v12   ;;  %v4628_v56 = vmax.f32 %v4604_v25, 0.0  ;;  %6786 = vmatprep.subr.bf16.mxu0 %v7362_v28  ;;  %v7378_v28 = vld [vmem:[%s10728_s10 + $0x158] sm:$0xff]  }
 0x777   : > { %v4606_v20 = vpop.f32.mrf.mxu1 }
 0x778   : > { %v4607_v62 = vadd.f32 %v6480_v23, %v4606_v20 }
 0x779   : > { %v4608_v13 = vpop.f32.mrf.mxu1 }
 0x77a   : > { %v4629_v57 = vmax.f32 %v4607_v62, 0.0 }
 0x77b   : > { %v4611_v44 = vpop.f32.mrf.mxu1 }
 0x77c   : > { %v4635_v21 = vpack.c.bf16 %v4629_v57, %v4628_v56  ;;  %v4612_v17 = vadd.f32 %v6480_v23, %v4611_v44 }
 0x77d   : > { %v4613_v42 = vpop.f32.mrf.mxu1 }
 0x77e   : > { %6637 = vst [vmem:[%s10158_s24 + $0x8] sm:$0xff] %v4635_v21   ;;  %v4630_v49 = vmax.f32 %v4612_v17, 0.0 }
 0x77f   : > { %v4614_v19 = vpop.f32.mrf.mxu1 }
 0x780   : > { %v4615_v0 = vadd.f32 %v6480_v23, %v4614_v19 }
 0x781   : > { %v4616_v53 = vpop.f32.mrf.mxu1 }
 0x782   : > { %v4631_v52 = vmax.f32 %v4615_v0, 0.0 }
 0x783   : > { %v4619_v8 = vpop.f32.mrf.mxu1 }
 0x784   : > { %v4636_v61 = vpack.c.bf16 %v4631_v52, %v4630_v49  ;;  %v4620_v6 = vadd.f32 %v6480_v23, %v4619_v8 }
 0x785   : > { %v4621_v51 = vpop.f32.mrf.mxu1 }
 0x786   : > { %6638 = vst [vmem:[%s10158_s24 + $0x10] sm:$0xff] %v4636_v61   ;;  %v4632_v10 = vmax.f32 %v4620_v6, 0.0 }
 0x787   : > { %v4622_v37 = vpop.f32.mrf.mxu1 }
 0x788   : > { %v4623_v60 = vadd.f32 %v6480_v23, %v4622_v37  ;;  %v7381_v23 = vld [vmem:[%s10728_s10 + $0x88] sm:$0xff]  }
 0x789   : > { %v4624_v30 = vpop.f32.mrf.mxu1 }
 0x78a   : > { %v4633_v58 = vmax.f32 %v4623_v60, 0.0  ;;  %v7392_v30 = vld [vmem:[%s10728_s10 + $0x1f0] sm:$0xff]  }
 0x78c   : > { %v4637_v29 = vpack.c.bf16 %v4633_v58, %v4632_v10  ;;  %v7363_v58 = vld [vmem:[%s10728_s10 + $0x138] sm:$0xff]  }
 0x78e   : > { %6639 = vst [vmem:[%s10158_s24 + $0x18] sm:$0xff] %v4637_v29   ;;  %7035 = vmatpush3.bf16.msra.mxu1 %v4637_v29 }
 0x78f   : > { %7036 = vmatprep.subr.bf16.mxu1 %v10877_v35 }
 0x792   : > { %7037 = vmatpush3.bf16.msra.mxu1 %v4636_v61  ;;  %v7391_v61 = vld [vmem:[%s10728_s10 + $0x1b8] sm:$0xff]  }
 0x793   : > { %7038 = vmatprep.subr.bf16.mxu1 %v10877_v35 }
 0x796   : > { %7039 = vmatpush3.bf16.msra.mxu1 %v4635_v21 }
 0x797   : > { %7040 = vmatprep.subr.bf16.mxu1 %v10877_v35 }
 0x79a   : > { %7041 = vmatpush3.bf16.msra.mxu1 %v4634_v12 }
 0x79b   : > { %6740 = vmatprep.subr.bf16.mxu1 %v7358_v38 }
 0x79d   : > { %7043 = vmatmul.mubr.msk.bf16.vlgmr.msra.gmra.mxu1 %vm4062_vm9, %v7335_v24  ;;  %v7366_v24 = vld [vmem:[%s10728_s10 + $0x170] sm:$0xff]  }
 0x79e   : > { %7046 = vmatprep.mubr.msk.bf16.mxu1 %vm7439_vm15, %v10877_v35  ;;  %6741 = vmatpush3.bf16.msra.mxu1 %v7359_v46 }
 0x79f   : > { %6742 = vmatprep.subr.bf16.mxu1 %v7360_v27  ;;  %v7370_v27 = vld [vmem:[%s10728_s10 + $0x168] sm:$0xff]  }
 0x7a2   : > { %6743 = vmatpush3.bf16.msra.mxu1 %v7361_v39 }
 0x7a3   : > { %6744 = vmatprep.subr.bf16.mxu1 %v7364_v9 }
 0x7a5   : > { %7047 = vmatmul.mubr.msk.bf16.gmra.mxu1 %vm4062_vm9, %v7336_v18 }
 0x7a6   : > { %7050 = vmatprep.mubr.msk.bf16.mxu1 %vm7439_vm15, %v10877_v35  ;;  %6745 = vmatpush3.bf16.msra.mxu1 %v7365_v40 }
 0x7a7   : > { %6746 = vmatprep.subr.bf16.mxu1 %v7368_v48  ;;  %v7396_v48 = vld [vmem:[%s10728_s10 + $0x1a8] sm:$0xff]  }
 0x7aa   : > { %6747 = vmatpush3.bf16.msra.mxu1 %v7369_v47 }
 0x7ab   : > { %6748 = vmatprep.subr.bf16.mxu1 %v7372_v34 }
 0x7ad   : > { %7051 = vmatmul.mubr.msk.bf16.gmra.mxu1 %vm4062_vm9, %v7337_v4  ;;  %v7393_v4 = vld [vmem:[%s10728_s10 + $0x1b0] sm:$0xff]  }
 0x7ae   : > { %7054 = vmatprep.mubr.msk.bf16.mxu1 %vm7439_vm15, %v10877_v35  ;;  %6749 = vmatpush3.bf16.msra.mxu1 %v7373_v55 }
 0x7af   : > { %6750 = vmatprep.subr.bf16.mxu1 %v7376_v31  ;;  %v7371_v31 = vld [vmem:[%s10728_s10 + $0x128] sm:$0xff]  }
 0x7b2   : > { %6751 = vmatpush3.bf16.msra.mxu1 %v7377_v15 }
 0x7b3   : > { %6752 = vmatprep.subr.bf16.mxu1 %v7380_v59 }
 0x7b5   : > { %7055 = vmatmul.mubr.msk.bf16.gmra.mxu1 %vm4062_vm9, %v7338_v2 }
 0x7b6   : > { %7058 = vmatprep.mubr.msk.bf16.mxu1 %vm7439_vm15, %v10877_v35  ;;  %6753 = vmatpush3.bf16.msra.mxu1 %v7381_v23  ;;  %v7399_v23 = vld [vmem:[%s10728_s10 + $0x1a0] sm:$0xff]  }
 0x7b7   : > { %6754 = vmatprep.subr.bf16.mxu1 %v7384_v7  ;;  %v7401_v7 = vld [vmem:[%s10728_s10 + $0x1d8] sm:$0xff]  }
 0x7ba   : > { %6755 = vmatpush3.bf16.msra.mxu1 %v7385_v32  ;;  %v7375_v32 = vld [vmem:[%s10728_s10 + $0x120] sm:$0xff]  }
 0x7bb   : > { %6832 = vmatprep.subr.bf16.mxu1 %v7390_v33 }
 0x7bd   : > { %7059 = vmatmul.mubr.msk.bf16.gmra.mxu1 %vm4062_vm9, %v7339_v5  ;;  %v7395_v5 = vld [vmem:[%s10728_s10 + $0x1e8] sm:$0xff]  }
 0x7be   : > { %7062 = vmatprep.mubr.msk.bf16.mxu1 %vm7439_vm15, %v10877_v35 }
 0x7c5   : > { %7063 = vmatmul.mubr.msk.bf16.gmra.mxu1 %vm4062_vm9, %v7340_v36 }
 0x7c6   : > { %7066 = vmatprep.mubr.msk.bf16.mxu1 %vm7439_vm15, %v10877_v35 }
 0x7cd   : > { %7067 = vmatmul.mubr.msk.bf16.gmra.mxu1 %vm4062_vm9, %v7341_v1  ;;  %v7367_v1 = vld [vmem:[%s10728_s10 + $0x130] sm:$0xff]  }
 0x85d   : > { %v4775_v43 = vpop.f32.mrf.mxu1 }
 0x85f   : > { %v7044_v12 = vpop.f32.mrf.mxu1 }
 0x861   : > { %v4778_v54 = vpop.f32.mrf.mxu1 }
 0x862   : > { %v10291_v25 = vpack.c.bf16 %v4778_v54, %v4775_v43 }
 0x863   : > { %v7045_v20 = vpop.f32.mrf.mxu1 }
 0x864   : > { %v4839_v13 = vshll.u32 %v10291_v25, 16  ;;  %v4837_v17 = vshrl.u32 %v10291_v25, 16  ;;  %v4908_v19 = vrot.slane %v10291_v25, 5  ;;  %v4891_v49 = vrot.slane %v10291_v25, 1  ;;  %v7402_v20 = vld [vmem:[%s10728_s10 + $0x198] sm:$0xff]  }
 0x865   : > { %v4783_v62 = vpop.f32.mrf.mxu1 }
 0x866   : > { %v4841_v21 = vrot.slane %v4839_v13, 1 }
 0x867   : > { %v7048_v56 = vpop.f32.mrf.mxu1 }
 0x868   : > { %v4842_v51 = vor.u32 %v4841_v21, %v4837_v17 }
 0x869   : > { %v4786_v57 = vpop.f32.mrf.mxu1 }
 0x86a   : > { %v10294_v44 = vpack.c.bf16 %v4786_v57, %v4783_v62 }
 0x86b   : > { %v7049_v42 = vpop.f32.mrf.mxu1 }
 0x86c   : > { %v10301_v0 = vshll.u32 %v10294_v44, 16  ;;  %v4909_v53 = vrot.slane %v10294_v44, 5  ;;  %v4892_v52 = vrot.slane %v10294_v44, 1  ;;  %v10337_v38 = vshrl.u32 %v10294_v44, 16 }
 0x86d   : > { %v4791_v8 = vpop.f32.mrf.mxu1  ;;  %v5022_v45 = vrot.slane %v10294_v44, 3 }
 0x86e   : > { %v4846_v6 = vrot.slane %v10301_v0, 1  ;;  %v4910_v37 = vsel %vm4907_vm3, %v4908_v19, %v4909_v53  ;;  %v4893_v60 = vsel %vm1230_vm0, %v4891_v49, %v4892_v52  ;;  %v7404_v19 = vld [vmem:[%s10728_s10 + $0x1d0] sm:$0xff]   ;;  %v7379_v49 = vld [vmem:[%s10728_s10 + $0x118] sm:$0xff]  }
 0x86f   : > { %v7052_v10 = vpop.f32.mrf.mxu1  ;;  %5726 = vmatprep.mubr.bf16.mxu1 %v4910_v37 }
 0x870   : > { %v4847_v29 = vsel %vm1026_vm1, %v4842_v51, %v4846_v6  ;;  %5727 = vmatmul.mubr.bf16.vlgmr.msra.gmra.mxu1 %v4893_v60  ;;  %v4850_v47 = vor.u32 %v10337_v38, %v4846_v6  ;;  %v7405_v51 = vld [vmem:[%s10728_s10 + $0x190] sm:$0xff]   ;;  %v7407_v60 = vld [vmem:[%s10728_s10 + $0x1c8] sm:$0xff]  }
 0x871   : > { %v4794_v18 = vpop.f32.mrf.mxu1  ;;  %5653 = vmatprep.mubr.bf16.mxu0 %v4847_v29  ;;  %6833 = vmatpush3.bf16.msra.mxu1 %v7391_v61  ;;  %v7383_v10 = vld [vmem:[%s10728_s10 + $0x110] sm:$0xff]  }
 0x872   : > { %v10327_v2 = vpack.c.bf16 %v4794_v18, %v4791_v8  ;;  %5654 = vmatmul.mubr.bf16.vlgmr.msra.gmra.mxu0 %v10291_v25  ;;  %6834 = vmatprep.subr.bf16.mxu1 %v7392_v30  ;;  %v7382_v8 = vld [vmem:[%s10728_s10 + $0x150] sm:$0xff]  }
 0x873   : > { %v7053_v36 = vpop.f32.mrf.mxu1  ;;  %6787 = vmatpush3.bf16.msra.mxu0 %v7363_v58 }
 0x874   : > { %v10340_v46 = vshll.u32 %v10327_v2, 16  ;;  %6788 = vmatprep.subr.bf16.mxu0 %v7366_v24  ;;  %v4911_v39 = vrot.slane %v10327_v2, 5  ;;  %v4894_v9 = vrot.slane %v10327_v2, 1  ;;  %v5023_v22 = vrot.slane %v10327_v2, 3  ;;  %v7386_v24 = vld [vmem:[%s10728_s10 + $0x148] sm:$0xff]  }
 0x875   : > { %v4799_v40 = vpop.f32.mrf.mxu1  ;;  %6835 = vmatpush3.bf16.msra.mxu1 %v7393_v4  ;;  %v10382_v41 = vshrl.u32 %v10327_v2, 16  ;;  %v7408_v36 = vld [vmem:[%s10728_s10 + $0x188] sm:$0xff]  }
 0x876   : > { %v4854_v26 = vrot.slane %v10340_v46, 1  ;;  %v4912_v34 = vsel %vm4907_vm3, %v4909_v53, %v4911_v39  ;;  %v4895_v55 = vsel %vm1230_vm0, %v4892_v52, %v4894_v9  ;;  %6836 = vmatprep.subr.bf16.mxu1 %v7395_v5  ;;  %v10370_v16 = vsel %vm1692_vm4, %v5022_v45, %v5023_v22 }
 0x877   : > { %v7056_v11 = vpop.f32.mrf.mxu1  ;;  %6789 = vmatpush3.bf16.msra.mxu0 %v7367_v1  ;;  %5734 = vmatprep.mubr.bf16.mxu1 %v4912_v34  ;;  %v4993_v34 = vrot.slane %v10340_v46, 3  ;;  %v4989_v45 = vrot.slane %v10337_v38, 2 }
 0x878   : > { %v4855_v15 = vsel %vm1026_vm1, %v4850_v47, %v4854_v26  ;;  %6790 = vmatprep.subr.bf16.mxu0 %v7370_v27  ;;  %5735 = vmatmul.mubr.bf16.gmra.mxu1 %v4895_v55  ;;  %v4858_v56 = vor.u32 %v10382_v41, %v4854_v26  ;;  %v7387_v47 = vld [vmem:[%s10728_s10 + $0x108] sm:$0xff]   ;;  %v4992_v26 = vrot.slane %v10382_v41, 2 }
 0x879   : > { %v4802_v59 = vpop.f32.mrf.mxu1  ;;  %5661 = vmatprep.mubr.bf16.mxu0 %v4855_v15  ;;  %6837 = vmatpush3.bf16.msra.mxu1 %v7396_v48  ;;  %v7410_v48 = vld [vmem:[%s10728_s10 + $0x1c0] sm:$0xff]   ;;  %v4990_v15 = vrot.slane %v10301_v0, 3 }
 0x87a   : > { %v10372_v50 = vpack.c.bf16 %v4802_v59, %v4799_v40  ;;  %5662 = vmatmul.mubr.bf16.gmra.mxu0 %v10294_v44  ;;  %6838 = vmatprep.subr.bf16.mxu1 %v7398_v3  ;;  %v7388_v3 = vld [vmem:[%s10728_s10 + $0x140] sm:$0xff]  }
 0x87b   : > { %v7057_v63 = vpop.f32.mrf.mxu1  ;;  %6791 = vmatpush3.bf16.msra.mxu0 %v7371_v31  ;;  %v7411_v31 = vld [vmem:[%s10728_s10 + $0x180] sm:$0xff]  }
 0x87c   : > { %v10385_v33 = vshll.u32 %v10372_v50, 16  ;;  %6792 = vmatprep.subr.bf16.mxu0 %v7374_v14  ;;  %v4913_v43 = vrot.slane %v10372_v50, 5  ;;  %v4896_v12 = vrot.slane %v10372_v50, 1  ;;  %v5025_v62 = vrot.slane %v10372_v50, 3 }
 0x87d   : > { %v4807_v54 = vpop.f32.mrf.mxu1  ;;  %6839 = vmatpush3.bf16.msra.mxu1 %v7399_v23  ;;  %v10426_v58 = vshrl.u32 %v10372_v50, 16  ;;  %v7389_v23 = vld [vmem:[%s10728_s10 + $0x100] sm:$0xff]  }
 0x87e   : > { %v4862_v57 = vrot.slane %v10385_v33, 1  ;;  %v4914_v21 = vsel %vm4907_vm3, %v4911_v39, %v4913_v43  ;;  %v4897_v42 = vsel %vm1230_vm0, %v4894_v9, %v4896_v12  ;;  %6840 = vmatprep.subr.bf16.mxu1 %v7401_v7  ;;  %v10414_v6 = vsel %vm1692_vm4, %v5023_v22, %v5025_v62 }
 0x87f   : > { %v7060_v53 = vpop.f32.mrf.mxu1  ;;  %6793 = vmatpush3.bf16.msra.mxu0 %v7375_v32  ;;  %5742 = vmatprep.mubr.bf16.mxu1 %v4914_v21  ;;  %v4994_v7 = vor.u32 %v4993_v34, %v4992_v26  ;;  %v7397_v26 = vld [vmem:[%s10728_s10 + $0x230] sm:$0xff]   ;;  %v4976_v34 = vrot.slane %v10372_v50, 2 }
 0x880   : > { %v4863_v52 = vsel %vm1026_vm1, %v4858_v56, %v4862_v57  ;;  %6794 = vmatprep.subr.bf16.mxu0 %v7378_v28  ;;  %5743 = vmatmul.mubr.bf16.gmra.mxu1 %v4897_v42  ;;  %v4866_v27 = vor.u32 %v10426_v58, %v4862_v57  ;;  %v4956_v53 = vrot.slane %v10291_v25, 6 }
 0x881   : > { %v4810_v61 = vpop.f32.mrf.mxu1  ;;  %5669 = vmatprep.mubr.bf16.mxu0 %v4863_v52  ;;  %6841 = vmatpush3.bf16.msra.mxu1 %v7402_v20  ;;  %v4991_v20 = vor.u32 %v4990_v15, %v4989_v45 }
 0x882   : > { %v10416_v37 = vpack.c.bf16 %v4810_v61, %v4807_v54  ;;  %5670 = vmatmul.mubr.bf16.gmra.mxu0 %v10327_v2  ;;  %6842 = vmatprep.subr.bf16.mxu1 %v7404_v19  ;;  %v4957_v54 = vrot.slane %v10294_v44, 6  ;;  %v4996_v61 = vrot.slane %v10426_v58, 2 }
 0x883   : > { %v7061_v30 = vpop.f32.mrf.mxu1  ;;  %6795 = vmatpush3.bf16.msra.mxu0 %v7379_v49  ;;  %v4995_v49 = vsel %vm1575_vm5, %v4991_v20, %v4994_v7 }
 0x884   : > { %v10429_v29 = vshll.u32 %v10416_v37, 16  ;;  %6796 = vmatprep.subr.bf16.mxu0 %v7382_v8  ;;  %v4915_v18 = vrot.slane %v10416_v37, 5  ;;  %v4898_v4 = vrot.slane %v10416_v37, 1  ;;  %v5027_v1 = vrot.slane %v10416_v37, 3 }
 0x885   : > { %v4815_v5 = vpop.f32.mrf.mxu1  ;;  %6843 = vmatpush3.bf16.msra.mxu1 %v7405_v51  ;;  %v10471_v32 = vshrl.u32 %v10416_v37, 16  ;;  %v4997_v51 = vrot.slane %v10385_v33, 3  ;;  %v4928_v30 = vrot.slane %v10337_v38, 5  ;;  %v4978_v20 = vrot.slane %v10416_v37, 2 }
 0x886   : > { %v4870_v39 = vrot.slane %v10429_v29, 1  ;;  %v4916_v9 = vsel %vm4907_vm3, %v4913_v43, %v4915_v18  ;;  %v4899_v40 = vsel %vm1230_vm0, %v4896_v12, %v4898_v4  ;;  %6844 = vmatprep.subr.bf16.mxu1 %v7407_v60  ;;  %v10462_v14 = vsel %vm1692_vm4, %v5025_v62, %v5027_v1 }
 0x887   : > { %v7064_v22 = vpop.f32.mrf.mxu1  ;;  %6797 = vmatpush3.bf16.msra.mxu0 %v7383_v10  ;;  %5750 = vmatprep.mubr.bf16.mxu1 %v4916_v9  ;;  %v4929_v10 = vrot.slane %v10301_v0, 6  ;;  %v4973_v0 = vrot.slane %v10294_v44, 2  ;;  %v4932_v44 = vrot.slane %v10382_v41, 5 }
 0x888   : > { %v4871_v55 = vsel %vm1026_vm1, %v4866_v27, %v4870_v39  ;;  %6798 = vmatprep.subr.bf16.mxu0 %v7386_v24  ;;  %5751 = vmatmul.mubr.bf16.gmra.mxu1 %v4899_v40  ;;  %v4874_v57 = vor.u32 %v10471_v32, %v4870_v39  ;;  %v4998_v27 = vor.u32 %v4997_v51, %v4996_v61  ;;  %v4959_v39 = vrot.slane %v10327_v2, 6  ;;  %v7394_v40 = vld [vmem:[%s10728_s10 + $0x238] sm:$0xff]  }
 0x889   : > { %v4818_v11 = vpop.f32.mrf.mxu1  ;;  %5677 = vmatprep.mubr.bf16.mxu0 %v4871_v55  ;;  %6845 = vmatpush3.bf16.msra.mxu1 %v7408_v36  ;;  %v4974_v36 = vrot.slane %v10327_v2, 2  ;;  %v4930_v38 = vor.u32 %v4929_v10, %v4928_v30  ;;  %v4933_v2 = vrot.slane %v10340_v46, 6  ;;  %v4961_v46 = vrot.slane %v10372_v50, 6  ;;  %v7409_v30 = vld [vmem:[%s10728_s10 + $0x210] sm:$0xff]  }
 0x88a   : > { %v10464_v59 = vpack.c.bf16 %v4818_v11, %v4815_v5  ;;  %5678 = vmatmul.mubr.bf16.gmra.mxu0 %v10372_v50  ;;  %6846 = vmatprep.subr.bf16.mxu1 %v7410_v48  ;;  %v4926_v5 = vrot.slane %v4839_v13, 6  ;;  %v4999_v25 = vsel %vm1575_vm5, %v4994_v7, %v4998_v27  ;;  %v5000_v13 = vrot.slane %v10471_v32, 2  ;;  %v7400_v11 = vld [vmem:[%s10728_s10 + $0x228] sm:$0xff]  }
 0x88b   : > { %6799 = vmatpush3.bf16.msra.mxu0 %v7387_v47  ;;  %v7065_v63 = vpop.f32.mrf.mxu1  ;;  %v5001_v48 = vrot.slane %v10429_v29, 3  ;;  %v4960_v47 = vsel %vm4955_vm13, %v4957_v54, %v4959_v39  ;;  %v4934_v41 = vor.u32 %v4933_v2, %v4932_v44  ;;  %v4940_v61 = vrot.slane %v10471_v32, 5 }
 0x88c   : > { %v10474_v28 = vshll.u32 %v10464_v59, 16  ;;  %6800 = vmatprep.subr.bf16.mxu0 %v7388_v3  ;;  %v4917_v43 = vrot.slane %v10464_v59, 5  ;;  %v4900_v12 = vrot.slane %v10464_v59, 1  ;;  %v5029_v56 = vrot.slane %v10464_v59, 3 }
 0x88d   : > { %6847 = vmatpush3.bf16.msra.mxu1 %v7411_v31  ;;  %v10479_v62 = vpop.f32.mrf.mxu1  ;;  %v4944_v55 = vshrl.u32 %v10464_v59, 16  ;;  %v5002_v3 = vor.u32 %v5001_v48, %v5000_v13  ;;  %v4977_v31 = vsel %vm1462_vm2, %v4974_v36, %v4976_v34  ;;  %v4936_v63 = vrot.slane %v10426_v58, 5 }
 0x88e   : > { %v4878_v21 = vrot.slane %v10474_v28, 1  ;;  %v4918_v42 = vsel %vm4907_vm3, %v4915_v18, %v4917_v43  ;;  %v4901_v19 = vsel %vm1230_vm0, %v4898_v4, %v4900_v12  ;;  %v10495_v60 = vsel %vm1692_vm4, %v5027_v1, %v5029_v56 }
 0x88f   : > { %6801 = vmatpush3.bf16.msra.mxu0 %v7389_v23  ;;  %5758 = vmatprep.mubr.bf16.mxu1 %v4918_v42  ;;  %v7068_v52 = vpop.f32.mrf.mxu1  ;;  %v4958_v18 = vsel %vm4955_vm13, %v4956_v53, %v4957_v54  ;;  %v4925_v4 = vrot.slane %v4837_v17, 5  ;;  %vm4924_vm0 = vsmask.f32 2304  ;;  %v4975_v17 = vsel %vm1462_vm2, %v4973_v0, %v4974_v36  ;;  %v7403_v54 = vld [vmem:[%s10728_s10 + $0x220] sm:$0xff]   ;;  %v7406_v42 = vld [vmem:[%s10728_s10 + $0x218] sm:$0xff]  }
 0x890   : > { %v4879_v8 = vsel %vm1026_vm1, %v4874_v57, %v4878_v21  ;;  %7070 = vmatprep.subr.bf16.mxu0 %v10877_v35  ;;  %5759 = vmatmul.mubr.bf16.gmra.mxu1 %v4901_v19  ;;  %v5003_v45 = vsel %vm1575_vm5, %v4998_v27, %v5002_v3  ;;  %v10534_v15 = vpack.c.bf16 %v10479_v62, %v10479_v62  ;;  %v5004_v23 = vrot.slane %v4944_v55, 2  ;;  %v7413_v0 = vld [vmem:[%s10728_s10 + $0x200] sm:$0xff]  }
 0x891   : > { %5685 = vmatprep.mubr.bf16.mxu0 %v4879_v8  ;;  %5872 = vmatprep.mubr.bf16.mxu1 %v4995_v49  ;;  %v4826_v24 = vpop.f32.mrf.mxu1  ;;  %v4927_v9 = vor.u32 %v4926_v5, %v4925_v4  ;;  %v5005_v7 = vrot.slane %v10474_v28, 3  ;;  %v4935_v50 = vsel %vm4924_vm0, %v4930_v38, %v4934_v41  ;;  %v4937_v43 = vrot.slane %v10385_v33, 6 }
 0x892   : > { %5686 = vmatmul.mubr.bf16.gmra.mxu0 %v10416_v37  ;;  %v4962_v12 = vsel %vm4955_vm13, %v4959_v39, %v4961_v46  ;;  %v5009_v62 = vshrl.u32 %v10534_v15, 16  ;;  %v5012_v58 = vshll.u32 %v10534_v15, 16  ;;  %v4963_v21 = vrot.slane %v10416_v37, 6 }
 0x893   : > { %5799 = vmatprep.mubr.bf16.mxu0 %v4958_v18  ;;  %v7069_v1 = vpop.f32.mrf.mxu1  ;;  %v4931_v22 = vsel %vm4924_vm0, %v4927_v9, %v4930_v38  ;;  %v5006_v57 = vor.u32 %v5005_v7, %v5004_v23  ;;  %v4938_v33 = vor.u32 %v4937_v43, %v4936_v63  ;;  %v4979_v19 = vsel %vm1462_vm2, %v4976_v34, %v4978_v20  ;;  %v7414_v63 = vld [vmem:[%s10727_s9] sm:$0xff]  }
 0x894   : > { %v5011_v49 = vrot.slane %v5009_v62, 2  ;;  %v5014_v52 = vrot.slane %v5012_v58, 3  ;;  %v4941_v37 = vrot.slane %v10429_v29, 6  ;;  %v4964_v51 = vsel %vm4955_vm13, %v4961_v46, %v4963_v21  ;;  %v7412_v29 = vld [vmem:[%s10728_s10 + $0x208] sm:$0xff]  }
 0x895   : > { %v5007_v53 = vsel %vm1575_vm5, %v5002_v3, %v5006_v57  ;;  %v4939_v8 = vsel %vm4924_vm0, %v4934_v41, %v4938_v33  ;;  %v4980_v10 = vrot.slane %v10464_v59, 2  ;;  %v4965_v32 = vrot.slane %v10464_v59, 6 }
 0x896   : > { %v5015_v24 = vor.u32 %v5014_v52, %v5011_v49  ;;  %v4942_v18 = vor.u32 %v4941_v37, %v4940_v61  ;;  %v4946_v1 = vrot.slane %v4944_v55, 5  ;;  %v4947_v27 = vrot.slane %v10474_v28, 6 }
 0x897   : > { %v4981_v4 = vsel %vm1462_vm2, %v4978_v20, %v4980_v10  ;;  %v4966_v38 = vsel %vm4955_vm13, %v4963_v21, %v4965_v32  ;;  %v4982_v39 = vrot.slane %v10534_v15, 2 }
 0x898   : > { %5873 = vmatmul.mubr.bf16.vlgmr.msra.gmra.mxu1 %v4975_v17  ;;  %v5016_v5 = vsel %vm1575_vm5, %v5006_v57, %v5015_v24  ;;  %v4943_v36 = vsel %vm4924_vm0, %v4938_v33, %v4942_v18  ;;  %v4948_v9 = vor.u32 %v4947_v27, %v4946_v1 }
 0x899   : > { %5880 = vmatprep.mubr.bf16.mxu1 %v4999_v25 }
 0x89a   : > { %5800 = vmatmul.mubr.bf16.vlgmr.msra.gmra.mxu0 %v4931_v22  ;;  %v4949_v28 = vsel %vm4924_vm0, %v4942_v18, %v4948_v9 }
 0x89b   : > { %5807 = vmatprep.mubr.bf16.mxu0 %v4960_v47  ;;  %7071 = vmatpush3.bf16.msra.mxu0 %v7394_v40  ;;  %v4983_v40 = vsel %vm1462_vm2, %v4980_v10, %v4982_v39 }
 0x89c   : > { %7072 = vmatprep.subr.bf16.mxu0 %v10877_v35 }
 0x89f   : > { %7073 = vmatpush3.bf16.msra.mxu0 %v7397_v26 }
 0x8a0   : > { %7074 = vmatprep.subr.bf16.mxu0 %v10877_v35  ;;  %5881 = vmatmul.mubr.bf16.gmra.mxu1 %v4977_v31 }
 0x8a1   : > { %5888 = vmatprep.mubr.bf16.mxu1 %v5003_v45 }
 0x8a2   : > { %5808 = vmatmul.mubr.bf16.gmra.mxu0 %v4935_v50 }
 0x8a3   : > { %5815 = vmatprep.mubr.bf16.mxu0 %v4962_v12  ;;  %7075 = vmatpush3.bf16.msra.mxu0 %v7400_v11 }
 0x8a4   : > { %7076 = vmatprep.subr.bf16.mxu0 %v10877_v35 }
 0x8a7   : > { %7077 = vmatpush3.bf16.msra.mxu0 %v7403_v54 }
 0x8a8   : > { %7078 = vmatprep.subr.bf16.mxu0 %v10877_v35  ;;  %5889 = vmatmul.mubr.bf16.gmra.mxu1 %v4979_v19 }
 0x8a9   : > { %5896 = vmatprep.mubr.bf16.mxu1 %v5007_v53 }
 0x8aa   : > { %5816 = vmatmul.mubr.bf16.gmra.mxu0 %v4939_v8 }
 0x8ab   : > { %5823 = vmatprep.mubr.bf16.mxu0 %v4964_v51  ;;  %7079 = vmatpush3.bf16.msra.mxu0 %v7406_v42 }
 0x8ac   : > { %7080 = vmatprep.subr.bf16.mxu0 %v10877_v35 }
 0x8af   : > { %7081 = vmatpush3.bf16.msra.mxu0 %v7409_v30 }
 0x8b0   : > { %7082 = vmatprep.subr.bf16.mxu0 %v10877_v35  ;;  %5897 = vmatmul.mubr.bf16.gmra.mxu1 %v4981_v4 }
 0x8b1   : > { %5904 = vmatprep.mubr.bf16.mxu1 %v5016_v5 }
 0x8b2   : > { %5824 = vmatmul.mubr.bf16.gmra.mxu0 %v4943_v36 }
 0x8b3   : > { %5831 = vmatprep.mubr.bf16.mxu0 %v4966_v38  ;;  %7083 = vmatpush3.bf16.msra.mxu0 %v7412_v29 }
 0x8b4   : > { %7084 = vmatprep.subr.bf16.mxu0 %v10877_v35 }
 0x8b7   : > { %7085 = vmatpush3.bf16.msra.mxu0 %v7413_v0 }
 0x8b8   : > { %5905 = vmatmul.mubr.bf16.gmra.mxu1 %v4983_v40 }
 0x8b9   : > { %7116 = vmatprep.mubr.msk.bf16.mxu1 %vm4099_vm10, %v7414_v63 }
 0x8ba   : > { %5832 = vmatmul.mubr.bf16.gmra.mxu0 %v4949_v28 }
 0x8bb   : > { %7086 = vmatprep.mubr.msk.bf16.mxu0 %vm7439_vm15, %v10877_v35 }
 0x8c2   : > { %7087 = vmatmul.mubr.bf16.vlgmr.msra.gmra.mxu0 %v10370_v16  ;;  %v5031_v16 = vrot.slane %v10534_v15, 3 }
 0x8c3   : > { %7090 = vmatprep.mubr.msk.bf16.mxu0 %vm7439_vm15, %v10877_v35 }
 0x8c4   : > { %v5032_v17 = vsel %vm1692_vm4, %v5029_v56, %v5031_v16 }
 0x8ca   : > { %7091 = vmatmul.mubr.bf16.gmra.mxu0 %v10414_v6 }
 0x8cb   : > { %7094 = vmatprep.mubr.msk.bf16.mxu0 %vm7439_vm15, %v10877_v35 }
 0x8d2   : > { %7095 = vmatmul.mubr.bf16.gmra.mxu0 %v10462_v14  ;;  %v10602_v14 = vld [vmem:[%s10729_s11] ss:$0 sm:$0xff] }
 0x8d3   : > { %7098 = vmatprep.mubr.msk.bf16.mxu0 %vm7439_vm15, %v10877_v35 }
 0x8da   : > { %7099 = vmatmul.mubr.bf16.gmra.mxu0 %v10495_v60 }
 0x8db   : > { %7102 = vmatprep.mubr.msk.bf16.mxu0 %vm7439_vm15, %v10877_v35 }
 0x8e2   : > { %7103 = vmatmul.mubr.bf16.gmra.mxu0 %v5032_v17 }
 0x930   : > { %v6756_v6 = vpop.f32.mrf.mxu1 }
 0x932   : > { %v6710_v25 = vpop.f32.mrf.mxu0  ;;  %v6757_v13 = vpop.f32.mrf.mxu1 }
 0x933   : > { %v6758_v48 = vadd.f32 %v6757_v13, %v6756_v6 }
 0x934   : > { %v6711_v60 = vpop.f32.mrf.mxu0  ;;  %v6759_v22 = vpop.f32.mrf.mxu1 }
 0x935   : > { %v6712_v44 = vadd.f32 %v6711_v60, %v6710_v25 }
 0x936   : > { %v6713_v35 = vpop.f32.mrf.mxu0  ;;  %v6760_v2 = vpop.f32.mrf.mxu1 }
 0x937   : > { %v5656_v47 = vadd.f32 %v6712_v44, %v10602_v14  ;;  %v6761_v59 = vadd.f32 %v6760_v2, %v6759_v22 }
 0x938   : > { %v6714_v26 = vpop.f32.mrf.mxu0  ;;  %v6762_v56 = vpop.f32.mrf.mxu1 }
 0x939   : > { %v6715_v34 = vadd.f32 %v6714_v26, %v6713_v35  ;;  %v5729_v55 = vadd.f32 %v6758_v48, %v5656_v47 }
 0x93a   : > { %v6716_v3 = vpop.f32.mrf.mxu0  ;;  %v6763_v41 = vpop.f32.mrf.mxu1 }
 0x93b   : > { %v5659_v46 = vadd.f32 %v6715_v34, %v10602_v14  ;;  %v6764_v11 = vadd.f32 %v6763_v41, %v6762_v56 }
 0x93c   : > { %v6717_v31 = vpop.f32.mrf.mxu0  ;;  %v6765_v45 = vpop.f32.mrf.mxu1 }
 0x93d   : > { %v6718_v15 = vadd.f32 %v6717_v31, %v6716_v3  ;;  %v5732_v23 = vadd.f32 %v6761_v59, %v5659_v46 }
 0x93e   : > { %v6719_v7 = vpop.f32.mrf.mxu0  ;;  %v6766_v50 = vpop.f32.mrf.mxu1 }
 0x93f   : > { %v5664_v43 = vadd.f32 %v6718_v15, %v10602_v14  ;;  %v6767_v12 = vadd.f32 %v6766_v50, %v6765_v45 }
 0x940   : > { %v6720_v54 = vpop.f32.mrf.mxu0  ;;  %v6768_v20 = vpop.f32.mrf.mxu1 }
 0x941   : > { %v6721_v62 = vadd.f32 %v6720_v54, %v6719_v7  ;;  %v5737_v58 = vadd.f32 %v6764_v11, %v5664_v43 }
 0x942   : > { %v6722_v57 = vpop.f32.mrf.mxu0  ;;  %v6769_v33 = vpop.f32.mrf.mxu1 }
 0x943   : > { %v5667_v21 = vadd.f32 %v6721_v62, %v10602_v14  ;;  %v6770_v37 = vadd.f32 %v6769_v33, %v6768_v20 }
 0x944   : > { %v6723_v42 = vpop.f32.mrf.mxu0  ;;  %v10612_v19 = vpop.f32.mrf.mxu1 }
 0x945   : > { %v6724_v53 = vadd.f32 %v6723_v42, %v6722_v57  ;;  %v5740_v49 = vadd.f32 %v6767_v12, %v5667_v21 }
 0x946   : > { %v6725_v52 = vpop.f32.mrf.mxu0  ;;  %v10614_v8 = vpop.f32.mrf.mxu1 }
 0x947   : > { %v5672_v61 = vadd.f32 %v6724_v53, %v10602_v14 }
 0x948   : > { %v6726_v51 = vpop.f32.mrf.mxu0  ;;  %v10617_v30 = vpop.f32.mrf.mxu1 }
 0x949   : > { %v10619_v10 = vadd.f32 %v6726_v51, %v6725_v52  ;;  %v10621_v24 = vadd.f32 %v6770_v37, %v5672_v61 }
 0x94a   : > { %v6728_v18 = vpop.f32.mrf.mxu0  ;;  %v10623_v32 = vpop.f32.mrf.mxu1 }
 0x94c   : > { %v6729_v29 = vpop.f32.mrf.mxu0  ;;  %v10625_v4 = vpop.f32.mrf.mxu1 }
 0x94d   : > { %v10627_v5 = vadd.f32 %v6729_v29, %v6728_v18 }
 0x94e   : > { %v6731_v36 = vpop.f32.mrf.mxu0  ;;  %v10629_v1 = vpop.f32.mrf.mxu1 }
 0x950   : > { %v6732_v27 = vpop.f32.mrf.mxu0  ;;  %v10631_v38 = vpop.f32.mrf.mxu1 }
 0x951   : > { %v10633_v0 = vadd.f32 %v6732_v27, %v6731_v36 }
 0x952   : > { %v6734_v39 = vpop.f32.mrf.mxu0  ;;  %v10635_v9 = vpop.f32.mrf.mxu1 }
 0x954   : > { %v6735_v40 = vpop.f32.mrf.mxu0  ;;  %v10637_v28 = vpop.f32.mrf.mxu1 }
 0x955   : > { %v10639_v16 = vadd.f32 %v6735_v40, %v6734_v39 }
 0x956   : > { %v6737_v17 = vpop.f32.mrf.mxu0  ;;  %v10641_v6 = vpop.f32.mrf.mxu1 }
 0x958   : > { %v6738_v25 = vpop.f32.mrf.mxu0  ;;  %v6848_v13 = vpop.f32.mrf.mxu1 }
 0x959   : > { %v10643_v48 = vadd.f32 %v6738_v25, %v6737_v17 }
 0x95a   : > { %v6802_v60 = vpop.f32.mrf.mxu0  ;;  %v6849_v22 = vpop.f32.mrf.mxu1 }
 0x95b   : > { %v6850_v29 = vadd.f32 %v6849_v22, %v6848_v13 }
 0x95c   : > { %v6803_v44 = vpop.f32.mrf.mxu0  ;;  %v6851_v35 = vpop.f32.mrf.mxu1 }
 0x95d   : > { %v6804_v2 = vadd.f32 %v6803_v44, %v6802_v60 }
 0x95e   : > { %v6805_v47 = vpop.f32.mrf.mxu0  ;;  %v6852_v56 = vpop.f32.mrf.mxu1 }
 0x95f   : > { %v5802_v59 = vadd.f32 %v6804_v2, %v5729_v55  ;;  %v6853_v27 = vadd.f32 %v6852_v56, %v6851_v35 }
 0x960   : > { %v6806_v26 = vpop.f32.mrf.mxu0  ;;  %v6854_v11 = vpop.f32.mrf.mxu1 }
 0x961   : > { %v6807_v34 = vadd.f32 %v6806_v26, %v6805_v47  ;;  %v5875_v39 = vadd.f32 %v6850_v29, %v5802_v59 }
 0x962   : > { %v6808_v3 = vpop.f32.mrf.mxu0  ;;  %v6855_v50 = vpop.f32.mrf.mxu1 }
 0x963   : > { %v5805_v41 = vadd.f32 %v6807_v34, %v5732_v23 }
 0x964   : > { %v6809_v46 = vpop.f32.mrf.mxu0  ;;  %v6857_v20 = vpop.f32.mrf.mxu1 }
 0x965   : > { %v6810_v31 = vadd.f32 %v6809_v46, %v6808_v3  ;;  %v5878_v60 = vadd.f32 %v6853_v27, %v5805_v41  ;;  %v6856_v3 = vadd.f32 %v6855_v50, %v6854_v11  ;;  %v6773_v41 = vadd.f32 %v10614_v8, %v10612_v19 }
 0x966   : > { %v6811_v45 = vpop.f32.mrf.mxu0  ;;  %v6858_v55 = vpop.f32.mrf.mxu1  ;;  %v5683_v19 = vadd.f32 %v10633_v0, %v10602_v14  ;;  %v6776_v8 = vadd.f32 %v10623_v32, %v10617_v30  ;;  %v5688_v30 = vadd.f32 %v10639_v16, %v10602_v14  ;;  %v6785_v16 = vadd.f32 %v10641_v6, %v10637_v28 }
 0x967   : > { %v5810_v15 = vadd.f32 %v6810_v31, %v5737_v58  ;;  %v5675_v31 = vadd.f32 %v10619_v10, %v10602_v14  ;;  %v6859_v22 = vadd.f32 %v6858_v55, %v6857_v20  ;;  %v5680_v10 = vadd.f32 %v10627_v5, %v10602_v14 }
 0x968   : > { %v6812_v7 = vpop.f32.mrf.mxu0  ;;  %v6860_v42 = vpop.f32.mrf.mxu1  ;;  %v6779_v5 = vadd.f32 %v10629_v1, %v10625_v4  ;;  %v5691_v4 = vadd.f32 %v10643_v48, %v10602_v14  ;;  %v6782_v1 = vadd.f32 %v10635_v9, %v10631_v38 }
 0x969   : > { %v6813_v63 = vadd.f32 %v6812_v7, %v6811_v45  ;;  %v5883_v35 = vadd.f32 %v6856_v3, %v5810_v15  ;;  %v5748_v11 = vadd.f32 %v6773_v41, %v5675_v31 }
 0x96a   : > { %v6814_v43 = vpop.f32.mrf.mxu0  ;;  %v6861_v52 = vpop.f32.mrf.mxu1  ;;  %v5756_v0 = vadd.f32 %v6779_v5, %v5683_v19  ;;  %v5764_v38 = vadd.f32 %v6785_v16, %v5691_v4  ;;  %v7416_v19 = vld [vmem:[%s10727_s9 + $0x10] sm:$0xff]  }
 0x96b   : > { %v5813_v12 = vadd.f32 %v6813_v63, %v5740_v49  ;;  %v6862_v55 = vadd.f32 %v6861_v52, %v6860_v42 }
 0x96c   : > { %v6815_v54 = vpop.f32.mrf.mxu0  ;;  %v6863_v58 = vpop.f32.mrf.mxu1 }
 0x96d   : > { %v6816_v7 = vadd.f32 %v6815_v54, %v6814_v43 }
 0x96e   : > { %v6817_v62 = vpop.f32.mrf.mxu0  ;;  %v6864_v49 = vpop.f32.mrf.mxu1 }
 0x96f   : > { %v5818_v50 = vadd.f32 %v6816_v7, %v10621_v24  ;;  %v6865_v24 = vadd.f32 %v6864_v49, %v6863_v58 }
 0x970   : > { %v6818_v57 = vpop.f32.mrf.mxu0  ;;  %v6866_v17 = vpop.f32.mrf.mxu1 }
 0x971   : > { %v6819_v63 = vadd.f32 %v6818_v57, %v6817_v62 }
 0x972   : > { %v6820_v33 = vpop.f32.mrf.mxu0  ;;  %v6867_v26 = vpop.f32.mrf.mxu1 }
 0x973   : > { %v5821_v20 = vadd.f32 %v6819_v63, %v5748_v11  ;;  %v6868_v49 = vadd.f32 %v6867_v26, %v6866_v17  ;;  %v5761_v17 = vadd.f32 %v6782_v1, %v5688_v30 }
 0x974   : > { %v6821_v21 = vpop.f32.mrf.mxu0  ;;  %v6869_v56 = vpop.f32.mrf.mxu1 }
 0x975   : > { %v6822_v62 = vadd.f32 %v6821_v21, %v6820_v33 }
 0x976   : > { %v6823_v53 = vpop.f32.mrf.mxu0  ;;  %v6870_v54 = vpop.f32.mrf.mxu1 }
 0x977   : > { %v6871_v7 = vadd.f32 %v6870_v54, %v6869_v56 }
 0x978   : > { %v6824_v23 = vpop.f32.mrf.mxu0 }
 0x979   : > { %v6825_v42 = vadd.f32 %v6824_v23, %v6823_v53 }
 0x97a   : > { %v10645_v61 = vpop.f32.mrf.mxu0 }
 0x97b   : > { %v5829_v21 = vadd.f32 %v6825_v42, %v5756_v0  ;;  %v6597_v0 = vld [vmem:[%s10731_s13] ss:$0 sm:$0xff] }
 0x97c   : > { %v10647_v37 = vpop.f32.mrf.mxu0 }
 0x97d   : > { %v6828_v23 = vadd.f32 %v10647_v37, %v10645_v61  ;;  %v5902_v48 = vadd.f32 %v6871_v7, %v5829_v21 }
 0x97e   : > { %v10649_v51 = vpop.f32.mrf.mxu0 }
 0x97f   : > { %v5834_v9 = vadd.f32 %v6828_v23, %v5761_v17 }
 0x980   : > { %v10651_v18 = vpop.f32.mrf.mxu0 }
 0x981   : > { %v6831_v26 = vadd.f32 %v10651_v18, %v10649_v51 }
 0x982   : > { %v5947_v36 = vpop.f32.mrf.mxu0 }
 0x983   : > { %v5948_v25 = vadd.f32 %v5947_v36, %v5875_v39  ;;  %v5886_v36 = vadd.f32 %v6859_v22, %v5813_v12  ;;  %v5837_v37 = vadd.f32 %v6831_v26, %v5764_v38 }
 0x984   : > { %v7088_v40 = vpop.f32.mrf.mxu0 }
 0x985   : > { %v5986_v34 = vmax.f32 %v5948_v25, 0.0  ;;  %v5891_v25 = vadd.f32 %v6862_v55, %v5818_v50 }
 0x986   : > { %v5950_v44 = vpop.f32.mrf.mxu0 }
 0x987   : > { %v5951_v2 = vadd.f32 %v5950_v44, %v5878_v60  ;;  %v6872_v44 = vpop.f32.mrf.mxu1 }
 0x988   : > { %v7089_v47 = vpop.f32.mrf.mxu0 }
 0x989   : > { %v5987_v46 = vmax.f32 %v5951_v2, 0.0  ;;  %v5753_v2 = vadd.f32 %v6776_v8, %v5680_v10  ;;  %v5894_v47 = vadd.f32 %v6865_v24, %v5821_v20  ;;  %v6873_v33 = vpop.f32.mrf.mxu1  ;;  %v7417_v8 = vld [vmem:[%s10727_s9 + $0x18] sm:$0xff]  }
 0x98a   : > { %v5955_v45 = vpop.f32.mrf.mxu0 }
 0x98b   : > { %v10655_v13 = vpack.c.bf16 %v5987_v46, %v5986_v34  ;;  %v5956_v29 = vadd.f32 %v5955_v45, %v5883_v35  ;;  %v5826_v3 = vadd.f32 %v6822_v62, %v5753_v2 }
 0x98c   : > { %v7092_v59 = vpop.f32.mrf.mxu0 }
 0x98d   : > { %v5988_v15 = vmax.f32 %v5956_v29, 0.0  ;;  %v5899_v22 = vadd.f32 %v6868_v49, %v5826_v3  ;;  %v6875_v59 = vpop.f32.mrf.mxu1 }
 0x98e   : > { %v5958_v27 = vpop.f32.mrf.mxu0 }
 0x98f   : > { %v5959_v39 = vadd.f32 %v5958_v27, %v5886_v36  ;;  %v6876_v61 = vpop.f32.mrf.mxu1  ;;  %v6874_v36 = vadd.f32 %v6873_v33, %v6872_v44 }
 0x990   : > { %v7093_v43 = vpop.f32.mrf.mxu0  ;;  %v6877_v6 = vadd.f32 %v6876_v61, %v6875_v59 }
 0x991   : > { %v5989_v40 = vmax.f32 %v5959_v39, 0.0  ;;  %v5907_v50 = vadd.f32 %v6874_v36, %v5834_v9 }
 0x992   : > { %v5963_v12 = vpop.f32.mrf.mxu0  ;;  %v5910_v43 = vadd.f32 %v6877_v6, %v5837_v37 }
 0x993   : > { %v10666_v57 = vpack.c.bf16 %v5989_v40, %v5988_v15  ;;  %v5964_v52 = vadd.f32 %v5963_v12, %v5891_v25  ;;  %v7415_v40 = vld [vmem:[%s10727_s9 + $0x8] sm:$0xff]  }
 0x994   : > { %v7096_v60 = vpop.f32.mrf.mxu0  ;;  %v7418_v12 = vld [vmem:[%s10730_s12 + $0x8] sm:$0xff]  }
 0x995   : > { %v5990_v58 = vmax.f32 %v5964_v52, 0.0 }
 0x996   : > { %v5966_v34 = vpop.f32.mrf.mxu0 }
 0x997   : > { %v5967_v46 = vadd.f32 %v5966_v34, %v5894_v47 }
 0x998   : > { %v7097_v32 = vpop.f32.mrf.mxu0 }
 0x999   : > { %v5991_v31 = vmax.f32 %v5967_v46, 0.0 }
 0x99a   : > { %v5971_v53 = vpop.f32.mrf.mxu0 }
 0x99b   : > { %v6006_v45 = vpack.c.bf16 %v5991_v31, %v5990_v58  ;;  %v5972_v14 = vadd.f32 %v5971_v53, %v5899_v22 }
 0x99c   : > { %v7100_v35 = vpop.f32.mrf.mxu0 }
 0x99d   : > { %v5992_v56 = vmax.f32 %v5972_v14, 0.0 }
 0x99e   : > { %v5974_v41 = vpop.f32.mrf.mxu0 }
 0x99f   : > { %v5975_v63 = vadd.f32 %v5974_v41, %v5902_v48 }
 0x9a0   : > { %v7101_v29 = vpop.f32.mrf.mxu0 }
 0x9a1   : > { %v5993_v27 = vmax.f32 %v5975_v63, 0.0 }
 0x9a2   : > { %v5979_v11 = vpop.f32.mrf.mxu0 }
 0x9a3   : > { %v6007_v28 = vpack.c.bf16 %v5993_v27, %v5992_v56  ;;  %v5980_v10 = vadd.f32 %v5979_v11, %v5907_v50 }
 0x9a4   : > { %v7104_v39 = vpop.f32.mrf.mxu0 }
 0x9a5   : > { %v5994_v20 = vmax.f32 %v5980_v10, 0.0 }
 0x9a6   : > { %v5982_v51 = vpop.f32.mrf.mxu0 }
 0x9a7   : > { %v5983_v18 = vadd.f32 %v5982_v51, %v5910_v43 }
 0x9a8   : > { %v7105_v54 = vpop.f32.mrf.mxu0 }
 0x9a9   : > { %v5995_v15 = vmax.f32 %v5983_v18, 0.0 }
 0x9ab   : > { %v6008_v55 = vpack.c.bf16 %v5995_v15, %v5994_v20 }
 0x9ad   : > { %7106 = vmatprep.subr.bf16.mxu1 %v6008_v55 }
 0x9ae   : > { %7107 = vmatpush3.bf16.msra.mxu1 %v6008_v55 }
 0x9af   : > { %7108 = vmatprep.subr.bf16.mxu1 %v6007_v28 }
 0x9b2   : > { %7109 = vmatpush3.bf16.msra.mxu1 %v6007_v28 }
 0x9b3   : > { %7110 = vmatprep.subr.bf16.mxu1 %v6006_v45 }
 0x9b6   : > { %7111 = vmatpush3.bf16.msra.mxu1 %v6006_v45 }
 0x9b7   : > { %7112 = vmatprep.subr.bf16.mxu1 %v10666_v57 }
 0x9ba   : > { %7113 = vmatpush3.bf16.msra.mxu1 %v10666_v57 }
 0x9bb   : > { %7114 = vmatprep.subr.bf16.mxu1 %v10655_v13 }
 0x9be   : > { %7115 = vmatpush3.bf16.msra.mxu1 %v10655_v13  ;;  %v7419_v13 = vld [vmem:[%s10730_s12] sm:$0xff]  }
 0x9bf   : > { %7124 = vmatprep.subr.bf16.mxu1 %v7418_v12 }
 0x9c1   : > { %7117 = vmatmul.mubr.msk.bf16.vlgmr.msra.gmra.mxu1 %vm4099_vm10, %v7415_v40 }
 0x9c2   : > { %7120 = vmatprep.mubr.msk.bf16.mxu1 %vm4099_vm10, %v7416_v19  ;;  %7125 = vmatpush3.bf16.msra.mxu1 %v7418_v12 }
 0x9c3   : > { %7126 = vmatprep.subr.bf16.mxu1 %v7419_v13 }
 0x9c6   : > { %7127 = vmatpush3.bf16.msra.mxu1 %v7419_v13 }
 0x9c9   : > { %7121 = vmatmul.mubr.msk.bf16.gmra.mxu1 %vm4099_vm10, %v7417_v8 }
 0xa81   : > { %v7118_v62 = vpop.f32.mrf.mxu1 }
 0xa83   : > { %v6075_v57 = vpop.f32.mrf.mxu1 }
 0xa85   : > { %v7119_v24 = vpop.f32.mrf.mxu1 }
 0xa86   : > { %v6107_v60 = vpack.c.bf16 %v7119_v24, %v7118_v62 }
 0xa87   : > { %v6078_v25 = vpop.f32.mrf.mxu1 }
 0xa88   : > { %v6106_v5 = vpack.c.bf16 %v6078_v25, %v6075_v57 }
 0xa89   : > { %v7122_v44 = vpop.f32.mrf.mxu1 }
 0xa8a   : > { %7128 = vmatprep.mubr.msk.bf16.mxu1 %vm2751_vm6, %v6106_v5 }
 0xa8b   : > { %v6091_v2 = vpop.f32.mrf.mxu1  ;;  %7129 = vmatmul.mubr.msk.bf16.vlgmr.msra.gmra.mxu1 %vm2751_vm6, %v6107_v60 }
 0xa8d   : > { %v7123_v42 = vpop.f32.mrf.mxu1 }
 0xa8e   : > { %v6109_v34 = vpack.c.bf16 %v7123_v42, %v7122_v44 }
 0xa8f   : > { %v6094_v52 = vpop.f32.mrf.mxu1 }
 0xa90   : > { %v6108_v47 = vpack.c.bf16 %v6094_v52, %v6091_v2 }
 0xa92   : > { %7132 = vmatprep.mubr.msk.bf16.mxu1 %vm2751_vm6, %v6108_v47 }
 0xa93   : > { %7133 = vmatmul.mubr.msk.bf16.gmra.mxu1 %vm2751_vm6, %v6109_v34 }
 0xb4b   : > { %v7130_v3 = vpop.f32.mrf.mxu1 }
 0xb4c   : > { %v6188_v46 = vadd.f32 %v7130_v3, %v6597_v0 }
 0xb4d   : > { %v6179_v30 = vpop.f32.mrf.mxu1 }
 0xb4e   : > { %6212 = vst [vmem:[%s507_s21 + $0x10] sm:$0xff] %v6188_v46  ;;  %v6180_v32 = vadd.f32 %v6597_v0, %v6179_v30 }
 0xb4f   : > { %v7131_v33 = vpop.f32.mrf.mxu1 }
 0xb50   : > { %6210 = vst [vmem:[%s507_s21] sm:$0xff] %v6180_v32  ;;  %v6191_v21 = vadd.f32 %v7131_v33, %v6597_v0 }
 0xb51   : > { %v6182_v58 = vpop.f32.mrf.mxu1 }
 0xb52   : > { %6213 = vst [vmem:[%s507_s21 + $0x18] sm:$0xff] %v6191_v21  ;;  %v6183_v49 = vadd.f32 %v6597_v0, %v6182_v58 }
 0xb53   : > { %v7134_v31 = vpop.f32.mrf.mxu1 }
 0xb54   : > { %6211 = vst [vmem:[%s507_s21 + $0x8] sm:$0xff] %v6183_v49  ;;  %v6204_v4 = vadd.f32 %v7134_v31, %v6597_v0 }
 0xb55   : > { %v6195_v1 = vpop.f32.mrf.mxu1 }
 0xb56   : > { %6216 = vst [vmem:[%s507_s21 + $0x30] sm:$0xff] %v6204_v4  ;;  %v6196_v53 = vadd.f32 %v6597_v0, %v6195_v1 }
 0xb57   : > { %v7135_v23 = vpop.f32.mrf.mxu1 }
 0xb58   : > { %6214 = vst [vmem:[%s507_s21 + $0x20] sm:$0xff] %v6196_v53  ;;  %v6207_v45 = vadd.f32 %v7135_v23, %v6597_v0 }
 0xb59   : > { %v6198_v7 = vpop.f32.mrf.mxu1 }
 0xb5a   : > { %6217 = vst [vmem:[%s507_s21 + $0x38] sm:$0xff] %v6207_v45  ;;  %v6199_v22 = vadd.f32 %v6597_v0, %v6198_v7 }
 0xb5c   : > { %6215 = vst [vmem:[%s507_s21 + $0x28] sm:$0xff] %v6199_v22 }
 0xb5d PF: > { %s26_s18 = sadd.s32 1, %s7426_s18  }
 0xb5e   : > { %p23_p4 = scmp.ge.s32.totalorder %s26_s18, 4  }
 0xb60   :  { %25 = sbr.rel (!%p23_p4) target bundleno = 1 (0x1), region = 118 }

// kernel: generalized_rcnn_forward.3
= control target key start
LH: loop header
LB: loop body
LE: loop exit
PB: predicated region body
PF: predicated region fallthrough
CT: control target
= control target key end

     0   :  { %vm2642_vm0 = vmmov 0   ;;  %s3252_s0 = inlined_call_operand.vmem [shape: bf16[128,128], index: 0, kind: input, shape index: {}]   ;;  %s3253_s1 = inlined_call_operand.vmem [shape: bf16[256,128], index: 1, kind: input, shape index: {}]   ;;  %s3254_s2 = inlined_call_operand.vmem [shape: bf16[2048,128], index: 2, kind: input, shape index: {}]   ;;  %s3255_s4 = inlined_call_operand.vmem [shape: bf16[128,128], index: 4, kind: input, shape index: {}]   ;;  %s3256_s6 = inlined_call_operand.vmem [shape: bf16[128,128], index: 6, kind: input, shape index: {}]   ;;  %s3257_s3 = inlined_call_operand.vmem [shape: f32[1,128], index: 3, kind: input, shape index: {}]   ;;  %s3258_s5 = inlined_call_operand.vmem [shape: f32[1,128], index: 5, kind: input, shape index: {}]   ;;  %s3259_s7 = inlined_call_operand.vmem [shape: f32[1,128], index: 7, kind: input, shape index: {}]   ;;  %s3260_s8 = inlined_call_operand.vmem [shape: f32[16,128], index: 8, kind: output, shape index: {}]  }
   0x1   :  { %v2473_v0 = vld [vmem:[%s3252_s0 + $0x38] sm:$0xff]   ;;  %v2474_v1 = vld [vmem:[%s3252_s0 + $0x30] sm:$0xff]   ;;  %v2475_v2 = vld [vmem:[%s3252_s0 + $0x28] sm:$0xff]  }
   0x2   :  { %2383 = vmatprep.subr.bf16.mxu0 %v2473_v0  ;;  %v2476_v3 = vld [vmem:[%s3252_s0 + $0x20] sm:$0xff]   ;;  %v2477_v5 = vld [vmem:[%s3252_s0 + $0x18] sm:$0xff]   ;;  %v2478_v6 = vld [vmem:[%s3252_s0 + $0x10] sm:$0xff]  }
   0x3   :  { %2384 = vmatpush3.bf16.msra.mxu0 %v2473_v0  ;;  %v2481_v4 = vld [vmem:[%s3253_s1] sm:$0xff]   ;;  %v2479_v7 = vld [vmem:[%s3252_s0 + $0x8] sm:$0xff]   ;;  %v2497_v9 = vld [vmem:[%s3254_s2 + $0x78] sm:$0xff]  }
   0x4   :  { %2385 = vmatprep.subr.bf16.mxu0 %v2474_v1  ;;  %2399 = vmatprep.mubr.bf16.mxu0 %v2481_v4  ;;  %v2480_v8 = vld [vmem:[%s3252_s0] sm:$0xff]   ;;  %v2498_v10 = vld [vmem:[%s3254_s2 + $0x38] sm:$0xff]   ;;  %v2499_v11 = vld [vmem:[%s3254_s2 + $0x70] sm:$0xff]  }
   0x5   :  { %2189 = vmatprep.subr.bf16.mxu1 %v2497_v9  ;;  %v2500_v12 = vld [vmem:[%s3254_s2 + $0x30] sm:$0xff]   ;;  %v2501_v13 = vld [vmem:[%s3254_s2 + $0x68] sm:$0xff]   ;;  %v2503_v17 = vld [vmem:[%s3254_s2 + $0x60] sm:$0xff]  }
   0x6   :  { %2190 = vmatpush3.bf16.msra.mxu1 %v2498_v10  ;;  %v2482_v14 = vld [vmem:[%s3253_s1 + $0x8] sm:$0xff]   ;;  %v2483_v15 = vld [vmem:[%s3253_s1 + $0x10] sm:$0xff]   ;;  %v2504_v18 = vld [vmem:[%s3254_s2 + $0x20] sm:$0xff]  }
   0x7   :  { %2386 = vmatpush3.bf16.msra.mxu0 %v2474_v1  ;;  %2191 = vmatprep.subr.bf16.mxu1 %v2499_v11  ;;  %v2502_v16 = vld [vmem:[%s3254_s2 + $0x28] sm:$0xff]   ;;  %v2505_v19 = vld [vmem:[%s3254_s2 + $0x58] sm:$0xff]   ;;  %v2485_v21 = vld [vmem:[%s3253_s1 + $0x20] sm:$0xff]  }
   0x8   :  { %2387 = vmatprep.subr.bf16.mxu0 %v2475_v2  ;;  %v2484_v20 = vld [vmem:[%s3253_s1 + $0x18] sm:$0xff]   ;;  %v2507_v23 = vld [vmem:[%s3254_s2 + $0x50] sm:$0xff]   ;;  %v2486_v25 = vld [vmem:[%s3253_s1 + $0x28] sm:$0xff]  }
   0x9   :  { %v2506_v22 = vld [vmem:[%s3254_s2 + $0x18] sm:$0xff]   ;;  %v2508_v24 = vld [vmem:[%s3254_s2 + $0x10] sm:$0xff]   ;;  %v2489_v28 = vld [vmem:[%s3253_s1 + $0x40] sm:$0xff]  }
   0xa   :  { %2192 = vmatpush3.bf16.msra.mxu1 %v2500_v12  ;;  %v2487_v26 = vld [vmem:[%s3253_s1 + $0x30] sm:$0xff]   ;;  %v2488_v27 = vld [vmem:[%s3253_s1 + $0x38] sm:$0xff]   ;;  %v2490_v29 = vld [vmem:[%s3253_s1 + $0x48] sm:$0xff]  }
   0xb   :  { %2388 = vmatpush3.bf16.msra.mxu0 %v2475_v2  ;;  %2193 = vmatprep.subr.bf16.mxu1 %v2501_v13  ;;  %v2491_v30 = vld [vmem:[%s3253_s1 + $0x50] sm:$0xff]   ;;  %v2492_v31 = vld [vmem:[%s3253_s1 + $0x58] sm:$0xff]   ;;  %v2493_v32 = vld [vmem:[%s3253_s1 + $0x60] sm:$0xff]  }
   0xc   :  { %2389 = vmatprep.subr.bf16.mxu0 %v2476_v3  ;;  %v2494_v33 = vld [vmem:[%s3253_s1 + $0x68] sm:$0xff]   ;;  %v2495_v34 = vld [vmem:[%s3253_s1 + $0x70] sm:$0xff]   ;;  %v2496_v35 = vld [vmem:[%s3253_s1 + $0x78] sm:$0xff]  }
   0xd   :  { %v2509_v36 = vld [vmem:[%s3254_s2 + $0x48] sm:$0xff]   ;;  %v2511_v38 = vld [vmem:[%s3254_s2 + $0x40] sm:$0xff]   ;;  %v2515_v40 = vld [vmem:[%s3254_s2 + $0xf8] sm:$0xff]  }
   0xe   :  { %2194 = vmatpush3.bf16.msra.mxu1 %v2502_v16  ;;  %v2510_v37 = vld [vmem:[%s3254_s2 + $0x8] sm:$0xff]   ;;  %v2512_v39 = vld [vmem:[%s3254_s2] sm:$0xff]   ;;  %v2513_v41 = vld [vmem:[%s3254_s2 + $0x178] sm:$0xff]  }
   0xf   :  { %2390 = vmatpush3.bf16.msra.mxu0 %v2476_v3  ;;  %2195 = vmatprep.subr.bf16.mxu1 %v2503_v17  ;;  %v2514_v42 = vld [vmem:[%s3254_s2 + $0x138] sm:$0xff]   ;;  %v2519_v43 = vld [vmem:[%s3254_s2 + $0x170] sm:$0xff]   ;;  %v2523_v45 = vld [vmem:[%s3254_s2 + $0x168] sm:$0xff]  }
  0x10   :  { %2391 = vmatprep.subr.bf16.mxu0 %v2477_v5  ;;  %v2520_v44 = vld [vmem:[%s3254_s2 + $0x130] sm:$0xff]   ;;  %v2524_v46 = vld [vmem:[%s3254_s2 + $0x128] sm:$0xff]   ;;  %v2527_v47 = vld [vmem:[%s3254_s2 + $0x160] sm:$0xff]  }
  0x11   :  { %v2528_v48 = vld [vmem:[%s3254_s2 + $0x120] sm:$0xff]   ;;  %v2531_v49 = vld [vmem:[%s3254_s2 + $0x158] sm:$0xff]   ;;  %v2535_v51 = vld [vmem:[%s3254_s2 + $0x150] sm:$0xff]  }
  0x12   :  { %2196 = vmatpush3.bf16.msra.mxu1 %v2504_v18  ;;  %v2532_v50 = vld [vmem:[%s3254_s2 + $0x118] sm:$0xff]   ;;  %v2536_v52 = vld [vmem:[%s3254_s2 + $0x110] sm:$0xff]   ;;  %v2539_v53 = vld [vmem:[%s3254_s2 + $0x148] sm:$0xff]  }
  0x13   :  { %2392 = vmatpush3.bf16.msra.mxu0 %v2477_v5  ;;  %2197 = vmatprep.subr.bf16.mxu1 %v2505_v19  ;;  %v2540_v54 = vld [vmem:[%s3254_s2 + $0x108] sm:$0xff]   ;;  %v2543_v55 = vld [vmem:[%s3254_s2 + $0x140] sm:$0xff]   ;;  %v2547_v57 = vld [vmem:[%s3254_s2 + $0x278] sm:$0xff]  }
  0x14   :  { %2393 = vmatprep.subr.bf16.mxu0 %v2478_v6  ;;  %v2544_v56 = vld [vmem:[%s3254_s2 + $0x100] sm:$0xff]   ;;  %v2516_v63 = vld [vmem:[%s3254_s2 + $0xb8] sm:$0xff]   ;;  %v2517_v1 = vld [vmem:[%s3254_s2 + $0xf0] sm:$0xff]  }
  0x15   :  { %v2518_v3 = vld [vmem:[%s3254_s2 + $0xb0] sm:$0xff]   ;;  %v2521_v5 = vld [vmem:[%s3254_s2 + $0xe8] sm:$0xff]   ;;  %v2525_v10 = vld [vmem:[%s3254_s2 + $0xe0] sm:$0xff]  }
  0x16   :  { %2198 = vmatpush3.bf16.msra.mxu1 %v2506_v22  ;;  %v2526_v12 = vld [vmem:[%s3254_s2 + $0xa0] sm:$0xff]   ;;  %v2530_v17 = vld [vmem:[%s3254_s2 + $0x98] sm:$0xff]   ;;  %v2551_v22 = vld [vmem:[%s3254_s2 + $0x270] sm:$0xff]  }
  0x17   :  { %2394 = vmatpush3.bf16.msra.mxu0 %v2478_v6  ;;  %2199 = vmatprep.subr.bf16.mxu1 %v2507_v23  ;;  %v2548_v19 = vld [vmem:[%s3254_s2 + $0x238] sm:$0xff]  }
  0x18   :  { %2395 = vmatprep.subr.bf16.mxu0 %v2479_v7 }
  0x1a   :  { %2200 = vmatpush3.bf16.msra.mxu1 %v2508_v24  ;;  %v2534_v24 = vld [vmem:[%s3254_s2 + $0x90] sm:$0xff]  }
  0x1b   :  { %2396 = vmatpush3.bf16.msra.mxu0 %v2479_v7  ;;  %2201 = vmatprep.subr.bf16.mxu1 %v2509_v36  ;;  %v2542_v36 = vld [vmem:[%s3254_s2 + $0x80] sm:$0xff]  }
  0x1c   :  { %2397 = vmatprep.subr.bf16.mxu0 %v2480_v8 }
  0x1e   :  { %2202 = vmatpush3.bf16.msra.mxu1 %v2510_v37  ;;  %v2560_v37 = vld [vmem:[%s3254_s2 + $0x220] sm:$0xff]  }
  0x1f   :  { %2398 = vmatpush3.bf16.msra.mxu0 %v2480_v8  ;;  %2203 = vmatprep.subr.bf16.mxu1 %v2511_v38  ;;  %v2522_v8 = vld [vmem:[%s3254_s2 + $0xa8] sm:$0xff]  }
  0x20   :  { %2233 = vmatprep.subr.bf16.mxu0 %v2513_v41 }
  0x22   :  { %2400 = vmatmul.mubr.bf16.vlgmr.msra.gmra.mxu0 %v2482_v14  ;;  %2204 = vmatpush3.bf16.msra.mxu1 %v2512_v39  ;;  %v2529_v14 = vld [vmem:[%s3254_s2 + $0xd8] sm:$0xff]  }
  0x23   :  { %2403 = vmatprep.mubr.bf16.mxu0 %v2483_v15  ;;  %2211 = vmatprep.subr.bf16.mxu1 %v2515_v40  ;;  %v2545_v39 = vld [vmem:[%s3254_s2 + $0x1f8] sm:$0xff]  }
  0x24   :  { %2234 = vmatpush3.bf16.msra.mxu0 %v2514_v42  ;;  %v2563_v40 = vld [vmem:[%s3254_s2 + $0x258] sm:$0xff]  }
  0x25   :  { %2235 = vmatprep.subr.bf16.mxu0 %v2519_v43  ;;  %v2546_v43 = vld [vmem:[%s3254_s2 + $0x1b8] sm:$0xff]  }
  0x28   :  { %2236 = vmatpush3.bf16.msra.mxu0 %v2520_v44  ;;  %v2564_v44 = vld [vmem:[%s3254_s2 + $0x218] sm:$0xff]  }
  0x29   :  { %2237 = vmatprep.subr.bf16.mxu0 %v2523_v45 }
  0x2a   :  { %2404 = vmatmul.mubr.bf16.gmra.mxu0 %v2484_v20  ;;  %v2533_v20 = vld [vmem:[%s3254_s2 + $0xd0] sm:$0xff]  }
  0x2b   :  { %2407 = vmatprep.mubr.bf16.mxu0 %v2485_v21 }
  0x2c   :  { %2238 = vmatpush3.bf16.msra.mxu0 %v2524_v46 }
  0x2d   :  { %2239 = vmatprep.subr.bf16.mxu0 %v2527_v47  ;;  %v2549_v47 = vld [vmem:[%s3254_s2 + $0x1f0] sm:$0xff]  }
  0x30   :  { %2240 = vmatpush3.bf16.msra.mxu0 %v2528_v48  ;;  %v2567_v48 = vld [vmem:[%s3254_s2 + $0x250] sm:$0xff]  }
  0x31   :  { %2241 = vmatprep.subr.bf16.mxu0 %v2531_v49 }
  0x32   :  { %2408 = vmatmul.mubr.bf16.gmra.mxu0 %v2486_v25  ;;  %v2552_v25 = vld [vmem:[%s3254_s2 + $0x230] sm:$0xff]  }
  0x33   :  { %2411 = vmatprep.mubr.bf16.mxu0 %v2487_v26 }
  0x34   :  { %2242 = vmatpush3.bf16.msra.mxu0 %v2532_v50 }
  0x35   :  { %2243 = vmatprep.subr.bf16.mxu0 %v2535_v51  ;;  %v2550_v51 = vld [vmem:[%s3254_s2 + $0x1b0] sm:$0xff]  }
  0x38   :  { %2244 = vmatpush3.bf16.msra.mxu0 %v2536_v52  ;;  %v2568_v52 = vld [vmem:[%s3254_s2 + $0x210] sm:$0xff]  }
  0x39   :  { %2245 = vmatprep.subr.bf16.mxu0 %v2539_v53 }
  0x3a   :  { %2412 = vmatmul.mubr.bf16.gmra.mxu0 %v2488_v27  ;;  %v2537_v27 = vld [vmem:[%s3254_s2 + $0xc8] sm:$0xff]  }
  0x3b   :  { %2415 = vmatprep.mubr.bf16.mxu0 %v2489_v28  ;;  %v2555_v28 = vld [vmem:[%s3254_s2 + $0x268] sm:$0xff]  }
  0x3c   :  { %2246 = vmatpush3.bf16.msra.mxu0 %v2540_v54  ;;  %v2553_v54 = vld [vmem:[%s3254_s2 + $0x1e8] sm:$0xff]  }
  0x3d   :  { %2247 = vmatprep.subr.bf16.mxu0 %v2543_v55  ;;  %v2571_v55 = vld [vmem:[%s3254_s2 + $0x248] sm:$0xff]  }
  0x40   :  { %2248 = vmatpush3.bf16.msra.mxu0 %v2544_v56 }
  0x41   :  { %2277 = vmatprep.subr.bf16.mxu0 %v2547_v57  ;;  %v2554_v57 = vld [vmem:[%s3254_s2 + $0x1a8] sm:$0xff]  }
  0x42   :  { %2416 = vmatmul.mubr.bf16.gmra.mxu0 %v2490_v29 }
  0x43   :  { %2419 = vmatprep.mubr.bf16.mxu0 %v2491_v30  ;;  %v2538_v30 = vld [vmem:[%s3254_s2 + $0x88] sm:$0xff]  }
  0x4a   :  { %2420 = vmatmul.mubr.bf16.gmra.mxu0 %v2492_v31  ;;  %v2556_v31 = vld [vmem:[%s3254_s2 + $0x228] sm:$0xff]  }
  0x4b   :  { %2423 = vmatprep.mubr.bf16.mxu0 %v2493_v32 }
  0x52   :  { %2424 = vmatmul.mubr.bf16.gmra.mxu0 %v2494_v33  ;;  %v2541_v33 = vld [vmem:[%s3254_s2 + $0xc0] sm:$0xff]  }
  0x53   :  { %2427 = vmatprep.mubr.bf16.mxu0 %v2495_v34  ;;  %v2559_v34 = vld [vmem:[%s3254_s2 + $0x260] sm:$0xff]  }
  0x5a   :  { %2428 = vmatmul.mubr.bf16.gmra.mxu0 %v2496_v35 }
  0xe2   :  { %v2401_v58 = vpop.f32.mrf.mxu0 }
  0xe4   :  { %v256_v59 = vpop.f32.mrf.mxu0 }
  0xe6   :  { %v2402_v60 = vpop.f32.mrf.mxu0 }
  0xe7   :  { %v384_v61 = vpack.c.bf16 %v2402_v60, %v2401_v58  ;;  %v2572_v58 = vld [vmem:[%s3254_s2 + $0x208] sm:$0xff]   ;;  %v2557_v60 = vld [vmem:[%s3254_s2 + $0x1e0] sm:$0xff]  }
  0xe8   :  { %v259_v62 = vpop.f32.mrf.mxu0 }
  0xe9   :  { %v383_v0 = vpack.c.bf16 %v259_v62, %v256_v59  ;;  %1462 = vmatprep.mubr.bf16.mxu1 %v384_v61  ;;  %v2575_v61 = vld [vmem:[%s3254_s2 + $0x240] sm:$0xff]  }
  0xea   :  { %v2405_v2 = vpop.f32.mrf.mxu0 }
  0xeb   :  { %1463 = vmatmul.mubr.bf16.vlgmr.msra.gmra.mxu1 %v383_v0  ;;  %v2576_v0 = vld [vmem:[%s3254_s2 + $0x200] sm:$0xff]  }
  0xec   :  { %2212 = vmatpush3.bf16.msra.mxu1 %v2516_v63  ;;  %v2871_v4 = vpop.f32.mrf.mxu0  ;;  %v2558_v63 = vld [vmem:[%s3254_s2 + $0x1a0] sm:$0xff]  }
  0xed   :  { %2213 = vmatprep.subr.bf16.mxu1 %v2517_v1 }
  0xee   :  { %v2406_v6 = vpop.f32.mrf.mxu0 }
  0xef   :  { %v386_v7 = vpack.c.bf16 %v2406_v6, %v2405_v2  ;;  %v2561_v2 = vld [vmem:[%s3254_s2 + $0x1d8] sm:$0xff]  }
  0xf0   :  { %2214 = vmatpush3.bf16.msra.mxu1 %v2518_v3  ;;  %v2879_v9 = vpop.f32.mrf.mxu0  ;;  %v2579_v3 = vld [vmem:[%s3254_s2 + $0x378] sm:$0xff]  }
  0xf1   :  { %2215 = vmatprep.subr.bf16.mxu1 %v2521_v5  ;;  %1503 = vmatprep.mubr.bf16.mxu1 %v386_v7  ;;  %v385_v46 = vpack.c.bf16 %v2879_v9, %v2871_v4  ;;  %v2562_v6 = vld [vmem:[%s3254_s2 + $0x198] sm:$0xff]   ;;  %v2583_v9 = vld [vmem:[%s3254_s2 + $0x370] sm:$0xff]  }
  0xf2   :  { %v2409_v11 = vpop.f32.mrf.mxu0  ;;  %v2580_v7 = vld [vmem:[%s3254_s2 + $0x338] sm:$0xff]  }
  0xf4   :  { %2216 = vmatpush3.bf16.msra.mxu1 %v2522_v8  ;;  %v288_v13 = vpop.f32.mrf.mxu0  ;;  %v2565_v8 = vld [vmem:[%s3254_s2 + $0x1d0] sm:$0xff]  }
  0xf5   :  { %2217 = vmatprep.subr.bf16.mxu1 %v2525_v10 }
  0xf6   :  { %v2410_v15 = vpop.f32.mrf.mxu0 }
  0xf7   :  { %v388_v16 = vpack.c.bf16 %v2410_v15, %v2409_v11  ;;  %v2566_v11 = vld [vmem:[%s3254_s2 + $0x190] sm:$0xff]   ;;  %v2570_v15 = vld [vmem:[%s3254_s2 + $0x188] sm:$0xff]  }
  0xf8   :  { %2218 = vmatpush3.bf16.msra.mxu1 %v2526_v12  ;;  %v291_v18 = vpop.f32.mrf.mxu0  ;;  %v2584_v12 = vld [vmem:[%s3254_s2 + $0x330] sm:$0xff]  }
  0xf9   :  { %2219 = vmatprep.subr.bf16.mxu1 %v2529_v14  ;;  %v387_v21 = vpack.c.bf16 %v291_v18, %v288_v13  ;;  %1544 = vmatprep.mubr.bf16.mxu0 %v388_v16  ;;  %v2569_v13 = vld [vmem:[%s3254_s2 + $0x1c8] sm:$0xff]   ;;  %v2591_v18 = vld [vmem:[%s3254_s2 + $0x360] sm:$0xff]  }
  0xfa   :  { %v2413_v23 = vpop.f32.mrf.mxu0  ;;  %v2587_v14 = vld [vmem:[%s3254_s2 + $0x368] sm:$0xff]  }
  0xfb   :  { %1545 = vmatmul.mubr.bf16.vlgmr.msra.gmra.mxu0 %v387_v21  ;;  %v2588_v16 = vld [vmem:[%s3254_s2 + $0x328] sm:$0xff]   ;;  %v2577_v21 = vld [vmem:[%s3254_s2 + $0x2f8] sm:$0xff]  }
  0xfc   :  { %2220 = vmatpush3.bf16.msra.mxu1 %v2530_v17  ;;  %2278 = vmatpush3.bf16.msra.mxu0 %v2548_v19  ;;  %v2908_v26 = vpop.f32.mrf.mxu0  ;;  %v2573_v17 = vld [vmem:[%s3254_s2 + $0x1c0] sm:$0xff]  }
  0xfd   :  { %2221 = vmatprep.subr.bf16.mxu1 %v2533_v20  ;;  %2279 = vmatprep.subr.bf16.mxu0 %v2551_v22  ;;  %v2574_v19 = vld [vmem:[%s3254_s2 + $0x180] sm:$0xff]   ;;  %v2595_v22 = vld [vmem:[%s3254_s2 + $0x358] sm:$0xff]  }
  0xfe   :  { %v2414_v29 = vpop.f32.mrf.mxu0  ;;  %v2592_v20 = vld [vmem:[%s3254_s2 + $0x320] sm:$0xff]  }
  0xff   :  { %v390_v49 = vpack.c.bf16 %v2414_v29, %v2413_v23  ;;  %v2578_v23 = vld [vmem:[%s3254_s2 + $0x2b8] sm:$0xff]  }
 0x100   :  { %2222 = vmatpush3.bf16.msra.mxu1 %v2534_v24  ;;  %2280 = vmatpush3.bf16.msra.mxu0 %v2552_v25  ;;  %v2922_v32 = vpop.f32.mrf.mxu0  ;;  %v2596_v24 = vld [vmem:[%s3254_s2 + $0x318] sm:$0xff]  }
 0x101   :  { %2223 = vmatprep.subr.bf16.mxu1 %v2537_v27  ;;  %2281 = vmatprep.subr.bf16.mxu0 %v2555_v28  ;;  %v389_v25 = vpack.c.bf16 %v2922_v32, %v2908_v26  ;;  %v2581_v27 = vld [vmem:[%s3254_s2 + $0x2f0] sm:$0xff]   ;;  %v2603_v32 = vld [vmem:[%s3254_s2 + $0x348] sm:$0xff]  }
 0x102   :  { %v2417_v35 = vpop.f32.mrf.mxu0  ;;  %v2599_v28 = vld [vmem:[%s3254_s2 + $0x350] sm:$0xff]  }
 0x103   :  { %v2600_v26 = vld [vmem:[%s3254_s2 + $0x310] sm:$0xff]  }
 0x104   :  { %2224 = vmatpush3.bf16.msra.mxu1 %v2538_v30  ;;  %2282 = vmatpush3.bf16.msra.mxu0 %v2556_v31  ;;  %v320_v38 = vpop.f32.mrf.mxu0  ;;  %v2582_v30 = vld [vmem:[%s3254_s2 + $0x2b0] sm:$0xff]   ;;  %v2585_v31 = vld [vmem:[%s3254_s2 + $0x2e8] sm:$0xff]  }
 0x105   :  { %2225 = vmatprep.subr.bf16.mxu1 %v2541_v33  ;;  %2283 = vmatprep.subr.bf16.mxu0 %v2559_v34  ;;  %v2586_v33 = vld [vmem:[%s3254_s2 + $0x2a8] sm:$0xff]  }
 0x106   :  { %v2418_v41 = vpop.f32.mrf.mxu0  ;;  %v2604_v34 = vld [vmem:[%s3254_s2 + $0x308] sm:$0xff]  }
 0x107   :  { %v392_v42 = vpack.c.bf16 %v2418_v41, %v2417_v35  ;;  %v2589_v35 = vld [vmem:[%s3254_s2 + $0x2e0] sm:$0xff]  }
 0x108   :  { %2226 = vmatpush3.bf16.msra.mxu1 %v2542_v36  ;;  %2284 = vmatpush3.bf16.msra.mxu0 %v2560_v37  ;;  %v323_v45 = vpop.f32.mrf.mxu0  ;;  %v2607_v36 = vld [vmem:[%s3254_s2 + $0x340] sm:$0xff]  }
 0x109   :  { %2255 = vmatprep.subr.bf16.mxu1 %v2545_v39  ;;  %2285 = vmatprep.subr.bf16.mxu0 %v2563_v40  ;;  %v391_v4 = vpack.c.bf16 %v323_v45, %v320_v38  ;;  %v2590_v37 = vld [vmem:[%s3254_s2 + $0x2a0] sm:$0xff]   ;;  %v2593_v40 = vld [vmem:[%s3254_s2 + $0x2d8] sm:$0xff]   ;;  %v2601_v45 = vld [vmem:[%s3254_s2 + $0x2c8] sm:$0xff]  }
 0x10a   :  { %1626 = vmatprep.mubr.bf16.mxu0 %v392_v42  ;;  %v2956_v50 = vpop.f32.mrf.mxu0  ;;  %v2608_v39 = vld [vmem:[%s3254_s2 + $0x300] sm:$0xff]   ;;  %v2594_v42 = vld [vmem:[%s3254_s2 + $0x298] sm:$0xff]  }
 0x10b   :  { %1504 = vmatmul.mubr.bf16.vlgmr.msra.gmra.mxu1 %v385_v46 }
 0x10c   :  { %2256 = vmatpush3.bf16.msra.mxu1 %v2546_v43  ;;  %2286 = vmatpush3.bf16.msra.mxu0 %v2564_v44  ;;  %v2964_v53 = vpop.f32.mrf.mxu0  ;;  %v2597_v43 = vld [vmem:[%s3254_s2 + $0x2d0] sm:$0xff]  }
 0x10d   :  { %2257 = vmatprep.subr.bf16.mxu1 %v2549_v47  ;;  %2287 = vmatprep.subr.bf16.mxu0 %v2567_v48  ;;  %v2598_v44 = vld [vmem:[%s3254_s2 + $0x290] sm:$0xff]   ;;  %v2602_v47 = vld [vmem:[%s3254_s2 + $0x288] sm:$0xff]   ;;  %v2605_v48 = vld [vmem:[%s3254_s2 + $0x2c0] sm:$0xff]  }
 0x10e   :  { %1585 = vmatprep.mubr.bf16.mxu1 %v390_v49  ;;  %v2972_v56 = vpop.f32.mrf.mxu0 }
 0x10f   :  { %v394_v29 = vpack.c.bf16 %v2972_v56, %v2956_v50  ;;  %v2606_v50 = vld [vmem:[%s3254_s2 + $0x280] sm:$0xff]  }
 0x110   :  { %2258 = vmatpush3.bf16.msra.mxu1 %v2550_v51  ;;  %2288 = vmatpush3.bf16.msra.mxu0 %v2568_v52  ;;  %v2980_v59 = vpop.f32.mrf.mxu0  ;;  %v2609_v51 = vld [vmem:[%s3254_s2 + $0x3f8] sm:$0xff]  }
 0x111   :  { %2259 = vmatprep.subr.bf16.mxu1 %v2553_v54  ;;  %2289 = vmatprep.subr.bf16.mxu0 %v2571_v55  ;;  %v2610_v54 = vld [vmem:[%s3254_s2 + $0x3b8] sm:$0xff]   ;;  %v393_v56 = vpack.c.bf16 %v2980_v59, %v2964_v53  ;;  %v2614_v53 = vld [vmem:[%s3254_s2 + $0x3a8] sm:$0xff]   ;;  %v2615_v59 = vld [vmem:[%s3254_s2 + $0x3e0] sm:$0xff]  }
 0x112   :  { %v2425_v62 = vpop.f32.mrf.mxu0 }
 0x114   :  { %2260 = vmatpush3.bf16.msra.mxu1 %v2554_v57  ;;  %2290 = vmatpush3.bf16.msra.mxu0 %v2572_v58  ;;  %v2994_v1 = vpop.f32.mrf.mxu0  ;;  %v2611_v57 = vld [vmem:[%s3254_s2 + $0x3f0] sm:$0xff]  }
 0x115   :  { %2261 = vmatprep.subr.bf16.mxu1 %v2557_v60  ;;  %2291 = vmatprep.subr.bf16.mxu0 %v2575_v61  ;;  %v2612_v58 = vld [vmem:[%s3254_s2 + $0x3b0] sm:$0xff]   ;;  %v2613_v60 = vld [vmem:[%s3254_s2 + $0x3e8] sm:$0xff]   ;;  %v2616_v61 = vld [vmem:[%s3254_s2 + $0x3a0] sm:$0xff]  }
 0x116   :  { %v2426_v5 = vpop.f32.mrf.mxu0 }
 0x117   :  { %v396_v10 = vpack.c.bf16 %v2426_v5, %v2425_v62  ;;  %v2617_v62 = vld [vmem:[%s3254_s2 + $0x3d8] sm:$0xff]   ;;  %v2624_v5 = vld [vmem:[%s3254_s2 + $0x380] sm:$0xff]  }
 0x118   :  { %2262 = vmatpush3.bf16.msra.mxu1 %v2558_v63  ;;  %2292 = vmatpush3.bf16.msra.mxu0 %v2576_v0  ;;  %v355_v38 = vpop.f32.mrf.mxu0  ;;  %v2618_v63 = vld [vmem:[%s3254_s2 + $0x398] sm:$0xff]   ;;  %v2619_v0 = vld [vmem:[%s3254_s2 + $0x3d0] sm:$0xff]  }
 0x119   :  { %2263 = vmatprep.subr.bf16.mxu1 %v2561_v2  ;;  %2321 = vmatprep.subr.bf16.mxu0 %v2579_v3  ;;  %v395_v41 = vpack.c.bf16 %v355_v38, %v2994_v1  ;;  %v2620_v1 = vld [vmem:[%s3254_s2 + $0x390] sm:$0xff]   ;;  %v2621_v2 = vld [vmem:[%s3254_s2 + $0x3c8] sm:$0xff]  }
 0x11a   :  { %v2429_v46 = vpop.f32.mrf.mxu0  ;;  %v2622_v3 = vld [vmem:[%s3254_s2 + $0x388] sm:$0xff]  }
 0x11b   :  { %1627 = vmatmul.mubr.bf16.vlgmr.msra.gmra.mxu0 %v391_v4  ;;  %v2623_v4 = vld [vmem:[%s3254_s2 + $0x3c0] sm:$0xff]  }
 0x11c   :  { %2264 = vmatpush3.bf16.msra.mxu1 %v2562_v6  ;;  %2322 = vmatpush3.bf16.msra.mxu0 %v2580_v7  ;;  %v368_v49 = vpop.f32.mrf.mxu0 }
 0x11d   :  { %2265 = vmatprep.subr.bf16.mxu1 %v2565_v8  ;;  %2323 = vmatprep.subr.bf16.mxu0 %v2583_v9  ;;  %v2641_v8 = vmov 0.0   ;;  %v2625_v9 = vld [vmem:[%s3255_s4 + $0x38] sm:$0xff]  }
 0x11e   :  { %1708 = vmatprep.mubr.bf16.mxu0 %v396_v10  ;;  %v2430_v52 = vpop.f32.mrf.mxu0  ;;  %v2626_v10 = vld [vmem:[%s3255_s4 + $0x30] sm:$0xff]  }
 0x11f   :  { %v398_v55 = vpack.c.bf16 %v2430_v52, %v2429_v46 }
 0x120   :  { %2266 = vmatpush3.bf16.msra.mxu1 %v2566_v11  ;;  %2324 = vmatpush3.bf16.msra.mxu0 %v2584_v12  ;;  %v371_v6 = vpop.f32.mrf.mxu0  ;;  %v2627_v11 = vld [vmem:[%s3255_s4 + $0x28] sm:$0xff]   ;;  %v2628_v12 = vld [vmem:[%s3255_s4 + $0x20] sm:$0xff]  }
 0x121   :  { %2267 = vmatprep.subr.bf16.mxu1 %v2569_v13  ;;  %2325 = vmatprep.subr.bf16.mxu0 %v2587_v14  ;;  %v397_v7 = vpack.c.bf16 %v371_v6, %v368_v49  ;;  %v2629_v13 = vld [vmem:[%s3255_s4 + $0x18] sm:$0xff]   ;;  %v2630_v14 = vld [vmem:[%s3255_s4 + $0x10] sm:$0xff]  }
 0x124   :  { %2268 = vmatpush3.bf16.msra.mxu1 %v2570_v15  ;;  %2326 = vmatpush3.bf16.msra.mxu0 %v2588_v16  ;;  %v2631_v15 = vld [vmem:[%s3255_s4 + $0x8] sm:$0xff]   ;;  %v2632_v16 = vld [vmem:[%s3255_s4] sm:$0xff]  }
 0x125   :  { %2269 = vmatprep.subr.bf16.mxu1 %v2573_v17  ;;  %2327 = vmatprep.subr.bf16.mxu0 %v2591_v18  ;;  %v2633_v17 = vld [vmem:[%s3256_s6 + $0x38] sm:$0xff]   ;;  %v2634_v18 = vld [vmem:[%s3256_s6 + $0x30] sm:$0xff]  }
 0x128   :  { %2270 = vmatpush3.bf16.msra.mxu1 %v2574_v19  ;;  %2328 = vmatpush3.bf16.msra.mxu0 %v2592_v20  ;;  %v2635_v19 = vld [vmem:[%s3256_s6 + $0x28] sm:$0xff]   ;;  %v2636_v20 = vld [vmem:[%s3256_s6 + $0x20] sm:$0xff]  }
 0x129   :  { %2299 = vmatprep.subr.bf16.mxu1 %v2577_v21  ;;  %2329 = vmatprep.subr.bf16.mxu0 %v2595_v22  ;;  %v2637_v21 = vld [vmem:[%s3256_s6 + $0x18] sm:$0xff]  }
 0x12b   :  { %1586 = vmatmul.mubr.bf16.vlgmr.msra.gmra.mxu1 %v389_v25 }
 0x12c   :  { %2300 = vmatpush3.bf16.msra.mxu1 %v2578_v23  ;;  %2330 = vmatpush3.bf16.msra.mxu0 %v2596_v24 }
 0x12d   :  { %2301 = vmatprep.subr.bf16.mxu1 %v2581_v27  ;;  %2331 = vmatprep.subr.bf16.mxu0 %v2599_v28 }
 0x12e   :  { %1667 = vmatprep.mubr.bf16.mxu1 %v394_v29 }
 0x130   :  { %2302 = vmatpush3.bf16.msra.mxu1 %v2582_v30  ;;  %2332 = vmatpush3.bf16.msra.mxu0 %v2600_v26 }
 0x131   :  { %2303 = vmatprep.subr.bf16.mxu1 %v2585_v31  ;;  %2333 = vmatprep.subr.bf16.mxu0 %v2603_v32 }
 0x134   :  { %2304 = vmatpush3.bf16.msra.mxu1 %v2586_v33  ;;  %2334 = vmatpush3.bf16.msra.mxu0 %v2604_v34 }
 0x135   :  { %2305 = vmatprep.subr.bf16.mxu1 %v2589_v35  ;;  %2335 = vmatprep.subr.bf16.mxu0 %v2607_v36 }
 0x138   :  { %2306 = vmatpush3.bf16.msra.mxu1 %v2590_v37  ;;  %2336 = vmatpush3.bf16.msra.mxu0 %v2608_v39 }
 0x139   :  { %2307 = vmatprep.subr.bf16.mxu1 %v2593_v40  ;;  %2431 = vmatprep.subr.bf16.mxu0 %v2641_v8 }
 0x13b   :  { %1709 = vmatmul.mubr.bf16.vlgmr.msra.gmra.mxu0 %v395_v41 }
 0x13c   :  { %2308 = vmatpush3.bf16.msra.mxu1 %v2594_v42  ;;  %2432 = vmatpush3.bf16.msra.mxu0 %v2625_v9  ;;  %v2018_v42 = vld [vmem:[%s3257_s3] ss:$0 sm:$0xff] }
 0x13d   :  { %2309 = vmatprep.subr.bf16.mxu1 %v2597_v43  ;;  %2433 = vmatprep.subr.bf16.mxu0 %v2641_v8 }
 0x13e   :  { %2447 = vmatprep.mubr.msk.bf16.mxu0 %vm2642_vm0, %v2641_v8 }
 0x140   :  { %2310 = vmatpush3.bf16.msra.mxu1 %v2598_v44  ;;  %2434 = vmatpush3.bf16.msra.mxu0 %v2626_v10 }
 0x141   :  { %2311 = vmatprep.subr.bf16.mxu1 %v2601_v45  ;;  %2435 = vmatprep.subr.bf16.mxu0 %v2641_v8 }
 0x144   :  { %2312 = vmatpush3.bf16.msra.mxu1 %v2602_v47  ;;  %2436 = vmatpush3.bf16.msra.mxu0 %v2627_v11 }
 0x145   :  { %2313 = vmatprep.subr.bf16.mxu1 %v2605_v48  ;;  %2437 = vmatprep.subr.bf16.mxu0 %v2641_v8 }
 0x148   :  { %2314 = vmatpush3.bf16.msra.mxu1 %v2606_v50  ;;  %2438 = vmatpush3.bf16.msra.mxu0 %v2628_v12 }
 0x149   :  { %2343 = vmatprep.subr.bf16.mxu1 %v2609_v51  ;;  %2439 = vmatprep.subr.bf16.mxu0 %v2641_v8 }
 0x14b   :  { %1668 = vmatmul.mubr.bf16.vlgmr.msra.gmra.mxu1 %v393_v56 }
 0x14c   :  { %2344 = vmatpush3.bf16.msra.mxu1 %v2610_v54  ;;  %1749 = vmatprep.mubr.bf16.mxu1 %v398_v55 }
 0x14d   :  { %2345 = vmatprep.subr.bf16.mxu1 %v2611_v57  ;;  %2440 = vmatpush3.bf16.msra.mxu0 %v2629_v13 }
 0x14e   :  { %2441 = vmatprep.subr.bf16.mxu0 %v2641_v8 }
 0x150   :  { %2346 = vmatpush3.bf16.msra.mxu1 %v2612_v58 }
 0x151   :  { %2347 = vmatprep.subr.bf16.mxu1 %v2613_v60  ;;  %2442 = vmatpush3.bf16.msra.mxu0 %v2630_v14 }
 0x152   :  { %2443 = vmatprep.subr.bf16.mxu0 %v2641_v8 }
 0x154   :  { %2348 = vmatpush3.bf16.msra.mxu1 %v2614_v53 }
 0x155   :  { %2349 = vmatprep.subr.bf16.mxu1 %v2615_v59  ;;  %2444 = vmatpush3.bf16.msra.mxu0 %v2631_v15 }
 0x156   :  { %2445 = vmatprep.subr.bf16.mxu0 %v2641_v8 }
 0x158   :  { %2350 = vmatpush3.bf16.msra.mxu1 %v2616_v61 }
 0x159   :  { %2351 = vmatprep.subr.bf16.mxu1 %v2617_v62  ;;  %2446 = vmatpush3.bf16.msra.mxu0 %v2632_v16 }
 0x15c   :  { %2352 = vmatpush3.bf16.msra.mxu1 %v2618_v63 }
 0x15d   :  { %2353 = vmatprep.subr.bf16.mxu1 %v2619_v0 }
 0x160   :  { %2354 = vmatpush3.bf16.msra.mxu1 %v2620_v1 }
 0x161   :  { %2355 = vmatprep.subr.bf16.mxu1 %v2621_v2 }
 0x164   :  { %2356 = vmatpush3.bf16.msra.mxu1 %v2622_v3 }
 0x165   :  { %2357 = vmatprep.subr.bf16.mxu1 %v2623_v4 }
 0x168   :  { %2358 = vmatpush3.bf16.msra.mxu1 %v2624_v5 }
 0x169   :  { %2451 = vmatprep.subr.bf16.mxu1 %v2641_v8 }
 0x16b   :  { %1750 = vmatmul.mubr.bf16.vlgmr.msra.gmra.mxu1 %v397_v7 }
 0x16c   :  { %2467 = vmatprep.mubr.msk.bf16.mxu1 %vm2642_vm0, %v2641_v8  ;;  %2452 = vmatpush3.bf16.msra.mxu1 %v2633_v17 }
 0x16d   :  { %2453 = vmatprep.subr.bf16.mxu1 %v2641_v8 }
 0x170   :  { %2454 = vmatpush3.bf16.msra.mxu1 %v2634_v18 }
 0x171   :  { %2455 = vmatprep.subr.bf16.mxu1 %v2641_v8 }
 0x174   :  { %2456 = vmatpush3.bf16.msra.mxu1 %v2635_v19 }
 0x175   :  { %2457 = vmatprep.subr.bf16.mxu1 %v2641_v8 }
 0x178   :  { %2458 = vmatpush3.bf16.msra.mxu1 %v2636_v20 }
 0x179   :  { %2459 = vmatprep.subr.bf16.mxu1 %v2641_v8 }
 0x17c   :  { %2460 = vmatpush3.bf16.msra.mxu1 %v2637_v21 }
 0x17d   :  { %2461 = vmatprep.subr.bf16.mxu1 %v2641_v8 }
 0x1ab   :  { %v2205_v22 = vpop.f32.mrf.mxu1 }
 0x1ad   :  { %v2206_v23 = vpop.f32.mrf.mxu1 }
 0x1ae   :  { %v2207_v41 = vadd.f32 %v2206_v23, %v2205_v22 }
 0x1af   :  { %v2208_v24 = vpop.f32.mrf.mxu1 }
 0x1b0   :  { %v1465_v47 = vadd.f32 %v2207_v41, %v2018_v42 }
 0x1b1   :  { %v2209_v25 = vpop.f32.mrf.mxu1 }
 0x1b2   :  { %v2210_v44 = vadd.f32 %v2209_v25, %v2208_v24 }
 0x1b4   :  { %v1468_v51 = vadd.f32 %v2210_v44, %v2018_v42 }
 0x1bb   :  { %v2249_v29 = vpop.f32.mrf.mxu0 }
 0x1bd   :  { %v2250_v26 = vpop.f32.mrf.mxu0 }
 0x1be   :  { %v2251_v54 = vadd.f32 %v2250_v26, %v2249_v29  ;;  %v2639_v29 = vld [vmem:[%s3256_s6 + $0x8] sm:$0xff]   ;;  %v2147_v26 = vld [vmem:[%s3258_s5] ss:$0 sm:$0xff] }
 0x1bf   :  { %v2252_v32 = vpop.f32.mrf.mxu0 }
 0x1c1   :  { %v2253_v34 = vpop.f32.mrf.mxu0 }
 0x1c2   :  { %v2254_v56 = vadd.f32 %v2253_v34, %v2252_v32 }
 0x1cb   :  { %v2227_v27 = vpop.f32.mrf.mxu1 }
 0x1cd   :  { %v2228_v28 = vpop.f32.mrf.mxu1 }
 0x1ce   :  { %v2229_v45 = vadd.f32 %v2228_v28, %v2227_v27  ;;  %v2638_v28 = vld [vmem:[%s3256_s6 + $0x10] sm:$0xff]  }
 0x1cf   :  { %v2230_v30 = vpop.f32.mrf.mxu1  ;;  %2462 = vmatpush3.bf16.msra.mxu1 %v2638_v28 }
 0x1d0   :  { %v1506_v52 = vadd.f32 %v2229_v45, %v1465_v47  ;;  %2463 = vmatprep.subr.bf16.mxu1 %v2641_v8 }
 0x1d1   :  { %v2231_v31 = vpop.f32.mrf.mxu1 }
 0x1d2   :  { %v2232_v48 = vadd.f32 %v2231_v31, %v2230_v30  ;;  %v1547_v53 = vadd.f32 %v2251_v54, %v1506_v52  ;;  %v2640_v30 = vld [vmem:[%s3256_s6] sm:$0xff]  }
 0x1d3   :  { %2464 = vmatpush3.bf16.msra.mxu1 %v2639_v29 }
 0x1d4   :  { %v1509_v55 = vadd.f32 %v2232_v48, %v1468_v51  ;;  %2465 = vmatprep.subr.bf16.mxu1 %v2641_v8  ;;  %v2156_v8 = vld [vmem:[%s3259_s7] ss:$0 sm:$0xff] }
 0x1d6   :  { %v1550_v61 = vadd.f32 %v2254_v56, %v1509_v55 }
 0x1d7   :  { %2466 = vmatpush3.bf16.msra.mxu1 %v2640_v30 }
 0x1db   :  { %v2293_v36 = vpop.f32.mrf.mxu0 }
 0x1dd   :  { %v2294_v38 = vpop.f32.mrf.mxu0 }
 0x1de   :  { %v2295_v63 = vadd.f32 %v2294_v38, %v2293_v36 }
 0x1df   :  { %v2296_v40 = vpop.f32.mrf.mxu0 }
 0x1e1   :  { %v2297_v46 = vpop.f32.mrf.mxu0 }
 0x1e2   :  { %v2298_v3 = vadd.f32 %v2297_v46, %v2296_v40 }
 0x1eb   :  { %v2271_v33 = vpop.f32.mrf.mxu1 }
 0x1ed   :  { %v2272_v35 = vpop.f32.mrf.mxu1 }
 0x1ee   :  { %v2273_v57 = vadd.f32 %v2272_v35, %v2271_v33 }
 0x1ef   :  { %v2274_v37 = vpop.f32.mrf.mxu1 }
 0x1f0   :  { %v1588_v62 = vadd.f32 %v2273_v57, %v1547_v53 }
 0x1f1   :  { %v2275_v39 = vpop.f32.mrf.mxu1 }
 0x1f2   :  { %v2276_v59 = vadd.f32 %v2275_v39, %v2274_v37  ;;  %v1629_v5 = vadd.f32 %v2295_v63, %v1588_v62 }
 0x1f4   :  { %v1591_v2 = vadd.f32 %v2276_v59, %v1550_v61 }
 0x1f6   :  { %v1632_v10 = vadd.f32 %v2298_v3, %v1591_v2 }
 0x1fb   :  { %v2337_v50 = vpop.f32.mrf.mxu0 }
 0x1fd   :  { %v2338_v60 = vpop.f32.mrf.mxu0 }
 0x1fe   :  { %v2339_v12 = vadd.f32 %v2338_v60, %v2337_v50 }
 0x1ff   :  { %v2340_v1 = vpop.f32.mrf.mxu0 }
 0x201   :  { %v2341_v7 = vpop.f32.mrf.mxu0 }
 0x202   :  { %v2342_v15 = vadd.f32 %v2341_v7, %v2340_v1 }
 0x20b   :  { %v2315_v43 = vpop.f32.mrf.mxu1 }
 0x20d   :  { %v2316_v49 = vpop.f32.mrf.mxu1 }
 0x20e   :  { %v2317_v4 = vadd.f32 %v2316_v49, %v2315_v43 }
 0x20f   :  { %v2318_v58 = vpop.f32.mrf.mxu1 }
 0x210   :  { %v1670_v11 = vadd.f32 %v2317_v4, %v1629_v5 }
 0x211   :  { %v2319_v0 = vpop.f32.mrf.mxu1 }
 0x212   :  { %v2320_v6 = vadd.f32 %v2319_v0, %v2318_v58  ;;  %v1711_v18 = vadd.f32 %v2339_v12, %v1670_v11 }
 0x214   :  { %v1673_v14 = vadd.f32 %v2320_v6, %v1632_v10 }
 0x216   :  { %v1714_v20 = vadd.f32 %v2342_v15, %v1673_v14 }
 0x22b   :  { %v2359_v9 = vpop.f32.mrf.mxu1 }
 0x22d   :  { %v2360_v13 = vpop.f32.mrf.mxu1 }
 0x22e   :  { %v2361_v16 = vadd.f32 %v2360_v13, %v2359_v9 }
 0x22f   :  { %v2362_v17 = vpop.f32.mrf.mxu1 }
 0x230   :  { %v1752_v21 = vadd.f32 %v2361_v16, %v1711_v18 }
 0x231   :  { %v2363_v19 = vpop.f32.mrf.mxu1 }
 0x232   :  { %v2364_v22 = vadd.f32 %v2363_v19, %v2362_v17  ;;  %v1758_v24 = vmax.f32 %v1752_v21, 0.0 }
 0x234   :  { %v1755_v23 = vadd.f32 %v2364_v22, %v1714_v20 }
 0x236   :  { %v1759_v25 = vmax.f32 %v1755_v23, 0.0 }
 0x238   :  { %v1760_v27 = vpack.c.bf16 %v1759_v25, %v1758_v24 }
 0x23a   :  { %2448 = vmatmul.mubr.bf16.vlgmr.msra.gmra.mxu0 %v1760_v27 }
 0x2fa   :  { %v1866_v31 = vpop.f32.mrf.mxu0 }
 0x2fb   :  { %v1867_v33 = vadd.f32 %v2147_v26, %v1866_v31 }
 0x2fc   :  { %v2449_v32 = vpop.f32.mrf.mxu0 }
 0x2fd   :  { %v1873_v37 = vmax.f32 %v1867_v33, 0.0 }
 0x2fe   :  { %v1869_v34 = vpop.f32.mrf.mxu0 }
 0x2ff   :  { %v1870_v35 = vadd.f32 %v2147_v26, %v1869_v34 }
 0x300   :  { %v2450_v36 = vpop.f32.mrf.mxu0 }
 0x301   :  { %v1874_v38 = vmax.f32 %v1870_v35, 0.0 }
 0x303   :  { %v1875_v39 = vpack.c.bf16 %v1874_v38, %v1873_v37 }
 0x305   :  { %2468 = vmatmul.mubr.bf16.vlgmr.msra.gmra.mxu1 %v1875_v39 }
 0x3c5   :  { %v1981_v40 = vpop.f32.mrf.mxu1 }
 0x3c6   :  { %v1982_v41 = vadd.f32 %v2156_v8, %v1981_v40 }
 0x3c7   :  { %v2469_v42 = vpop.f32.mrf.mxu1 }
 0x3c8   :  { %1988 = vst [vmem:[%s3260_s8] sm:$0xff] %v1982_v41 }
 0x3c9   :  { %v1984_v43 = vpop.f32.mrf.mxu1 }
 0x3ca   :  { %v1985_v44 = vadd.f32 %v2156_v8, %v1984_v43 }
 0x3cb   :  { %v2470_v45 = vpop.f32.mrf.mxu1 }
 0x3cc   :  { %1989 = vst [vmem:[%s3260_s8 + $0x8] sm:$0xff] %v1985_v44 }

</bundles_post_ra>
